<compile_context>
chip_gen: v5e
topology: v5e:2x2
jax: 0.10.0
libtpu: 0.0.40
codegen_flags: <defaults>
</compile_context>

<pallas_src>
import math

import jax
import jax.numpy as jnp
from jax import lax
from jax.experimental import pallas as pl
from jax.experimental.pallas import tpu as pltpu

# ----------------------- hyper-parameters (small but consistent) -----------------------
B = 2
H = 8
W = 8
C = 4                           # hidden_dim / d_model
D_STATE = 16
EXPAND = 2
D_INNER = EXPAND * C            # 8
D_CONV = 3
DT_RANK = math.ceil(C / 16)     # 1
K = 4                           # 4 scan directions
L = H * W                       # 64
N_TOK = B * L                   # 128 tokens (lane axis in token-major stages)
G = K * B                       # 8 independent scan slabs
KBD = K * B * D_INNER           # 64   lanes (k,b,d)
GN = G * D_STATE                # 128  lanes (k,b,n)
NS = D_STATE // 2               # 8    sublanes per scan step (n % 8)
LANES = 2 * KBD                 # 128  scan lanes (n//8, k, b, d)
PN = L * NS                     # 512  rows of the scan precompute scratch
BD = B * D_INNER                # 16

f32 = jnp.float32


def _sigmoid(v):
    # EUP form (tanh), exact: sigmoid(x) = 0.5*(1+tanh(x/2)); avoids a VPU divide.
    return 0.5 * (jnp.tanh(0.5 * v) + 1.0)


def _silu(v):
    return v * _sigmoid(v)


# ================================ the single fused kernel ===============================
def _vss_fused_kernel(x_ref, ln1g_ref, ln1b_ref, win_ref, convmw_ref, convb_ref,
                      mbuild_ref, wdelta_ref, dtb_ref, wb_ref, wc_ref,
                      abig_ref, seln_ref, spread_ref, rep_ref, sum8_ref, dfull_ref,
                      mmerge_ref, lng_ref, lnb_ref, wout_ref,
                      o_ref,
                      dA_s, dBu_s, cfull_s, hist_s):
    # ---------------- stage 1: ln_1 + in_proj (token-major: 128 tokens on lanes) --------
    x = x_ref[...]                                               # (C, 128)
    mu = jnp.mean(x, axis=0, keepdims=True)
    var = jnp.mean((x - mu) ** 2, axis=0, keepdims=True)
    xn = (x - mu) * lax.rsqrt(var + 1e-6) * ln1g_ref[...] + ln1b_ref[...]   # eps = 1e-6
    xz = jnp.dot(win_ref[...], xn, preferred_element_type=f32)   # (2*D_INNER, 128)
    xp = xz[0:D_INNER, :]                                        # (8, 128)
    z = xz[D_INNER:2 * D_INNER, :]                               # (8, 128)

    # ---------------- stage 2: depthwise 3x3 conv + SiLU via lane shifts ----------------
    # one full-(8,128)-tile fma per tap: lane rotation + fused (boundary-mask x weight).
    acc = jnp.zeros((D_INNER, N_TOK), f32)
    for t in range(D_CONV * D_CONV):
        oh = t // D_CONV - 1
        ow = t % D_CONV - 1
        dlt = oh * W + ow
        sh = xp if dlt == 0 else jnp.roll(xp, -dlt, axis=1)      # lane rotation
        acc = acc + sh * convmw_ref[t * D_INNER:(t + 1) * D_INNER, :]
    xc = _silu(acc + convb_ref[...])                             # (8, 128)

    # ------- layout crossing: token-major -> sequence-major (padded square transpose) ---
    xpad = jnp.concatenate([xc, jnp.zeros((N_TOK - D_INNER, N_TOK), f32)], axis=0)
    xT = jnp.transpose(xpad)                                     # (128,128): rows (b,l)
    xs0 = jnp.concatenate([xT[0:L, 0:D_INNER], xT[L:2 * L, 0:D_INNER]], axis=1)  # (64,16)

    # ---------------- stage 3: 4 scan directions with ONE fused permutation matmul ------
    x123 = jnp.dot(mbuild_ref[...], xs0, preferred_element_type=f32)         # (192, 16)
    xs = jnp.concatenate([xs0, x123[0:L, :], x123[L:2 * L, :], x123[2 * L:3 * L, :]],
                         axis=1)                                 # (64, 64) lanes (k,b,d)

    # ---------------- stage 4: x_proj / dt_proj (block-diagonal weights) ----------------
    dpre = jnp.dot(xs, wdelta_ref[...], preferred_element_type=f32) + dtb_ref[...]
    # stable softplus (delta_softplus=True)
    delta = jnp.maximum(dpre, 0.0) + jnp.log(1.0 + jnp.exp(-jnp.abs(dpre)))  # (64, 64)
    du = delta * xs                                              # delta * u
    bsc = jnp.dot(xs, wb_ref[...], preferred_element_type=f32)   # (64, 128) lanes (k,b,n)
    csc = jnp.dot(xs, wc_ref[...], preferred_element_type=f32)   # (64, 128)

    # ---------------- stage 5: lane-dense scan precompute (rows (l, n%8), 128 lanes) ----
    # all replication/selection matrices are hoisted wrapper constants (no iota builds).
    rep = rep_ref[...]                                           # (512, 64) row-replicate
    seln = seln_ref[...]                                         # (512, 128) pick n%8==row
    spr = spread_ref[...]                                        # (128, 128) spread over d
    delta2 = jnp.concatenate([delta, delta], axis=1)             # (64, 128) two n-halves
    du2 = jnp.concatenate([du, du], axis=1)
    dA_s[...] = jnp.exp(jnp.dot(rep, delta2, preferred_element_type=f32) * abig_ref[...])
    b_rep = jnp.dot(jnp.dot(rep, bsc, preferred_element_type=f32) * seln, spr,
                    preferred_element_type=f32)
    dBu_s[...] = b_rep * jnp.dot(rep, du2, preferred_element_type=f32)
    cfull_s[...] = jnp.dot(jnp.dot(rep, csc, preferred_element_type=f32) * seln, spr,
                           preferred_element_type=f32)

    # ---------------- stage 6: selective scan; state = exactly one full (8,128) vreg ----
    h = jnp.zeros((NS, LANES), f32)
    for l in range(L):                                           # fully unrolled
        lo = l * NS
        h = dA_s[lo:lo + NS, :] * h + dBu_s[lo:lo + NS, :]
        hist_s[lo:lo + NS, :] = h

    # ---------------- stage 7: C-contraction (hoisted constant), D*u, fused merge -------
    ycon = cfull_s[...] * hist_s[...]                            # (512, 128)
    y128 = jnp.dot(sum8_ref[...], ycon, preferred_element_type=f32)          # (64, 128)
    y_all = y128[:, 0:KBD] + y128[:, KBD:2 * KBD] + dfull_ref[...] * xs      # (64, 64)
    y123 = jnp.concatenate([y_all[:, BD:2 * BD], y_all[:, 2 * BD:3 * BD],
                            y_all[:, 3 * BD:4 * BD]], axis=0)                # (192, 16)
    y_comb = y_all[:, 0:BD] + jnp.dot(mmerge_ref[...], y123,
                                      preferred_element_type=f32)            # (64, 16)

    # ------- layout crossing back to token-major (padded square transpose) --------------
    ypad = jnp.concatenate([y_comb, jnp.zeros((L, N_TOK - BD), f32)], axis=1)
    ypad = jnp.concatenate([ypad, jnp.zeros((N_TOK - L, N_TOK), f32)], axis=0)
    yT = jnp.transpose(ypad)                                     # (128, 128)
    y_t = jnp.concatenate([yT[0:D_INNER, 0:L], yT[D_INNER:2 * D_INNER, 0:L]],
                          axis=1)                                # (8, 128) token-major

    # ---------------- stage 8: out_norm + SiLU(z) gate + out_proj + residual ------------
    mu2 = jnp.mean(y_t, axis=0, keepdims=True)
    var2 = jnp.mean((y_t - mu2) ** 2, axis=0, keepdims=True)
    yn = (y_t - mu2) * lax.rsqrt(var2 + 1e-5) * lng_ref[...] + lnb_ref[...]  # eps = 1e-5
    gated = yn * _silu(z)                                        # dual_att == identity
    o_ref[...] = x + jnp.dot(wout_ref[...], gated, preferred_element_type=f32)  # (4,128)


# ====================== one-time parameter / constant precompute ========================
def precompute_constants(p):
    c = {}
    # stage 1
    c["ln1_g"] = p["ln1_g"].reshape(C, 1)
    c["ln1_b"] = p["ln1_b"].reshape(C, 1)
    c["w_in_t"] = jnp.transpose(p["w_in"])                              # (16, 4)

    # stage 2: fused (boundary mask x per-channel weight) per tap, token-major
    tok = jnp.arange(N_TOK)
    hh = (tok % L) // W
    ww = tok % W
    mw = []
    for t in range(D_CONV * D_CONV):
        oh = t // D_CONV - 1
        ow = t % D_CONV - 1
        valid = ((hh + oh >= 0) & (hh + oh < H) &
                 (ww + ow >= 0) & (ww + ow < W)).astype(f32)            # (128,)
        w_t = p["conv_w"][t // D_CONV, t % D_CONV, :]                   # (D_INNER,)
        mw.append(w_t[:, None] * valid[None, :])                        # (8, 128)
    c["conv_mw"] = jnp.concatenate(mw, axis=0)                          # (72, 128)
    c["conv_b"] = p["conv_b"].reshape(D_INNER, 1)

    # direction permutations (rows act on the 64-long sequence axis)
    li = jnp.arange(L)
    src_t = (li % H) * W + li // H
    m_t = (li[None, :] == src_t[:, None]).astype(f32)                   # HW <-> WH
    m_r = (li[:, None] + li[None, :] == L - 1).astype(f32)              # reversal
    m_rt = m_r @ m_t                                                    # builds dir 3
    m_tr = m_t @ m_r                                                    # merges dir 3
    c["m_build"] = jnp.concatenate([m_t, m_r, m_rt], axis=0)            # (192, 64)
    c["m_merge"] = jnp.concatenate([m_t, m_r, m_tr], axis=1)            # (64, 192)

    # block-diagonal projection weights; lane order (k, b, d) / (k, b, n)
    wdt = p["x_proj_w"][:, :DT_RANK, :]
    wB = p["x_proj_w"][:, DT_RANK:DT_RANK + D_STATE, :]
    wC = p["x_proj_w"][:, DT_RANK + D_STATE:, :]
    w_delta = jnp.einsum("krd,ker->kde", wdt, p["dt_w"])                # dt_proj folded
    eye_k = jnp.eye(K, dtype=f32)
    eye_b = jnp.eye(B, dtype=f32)
    c["w_delta_big"] = jnp.einsum("kde,kp,bq->kbdpqe", w_delta, eye_k, eye_b
                                  ).reshape(KBD, KBD)
    c["w_b_big"] = jnp.einsum("knd,kp,bq->kbdpqn", wB, eye_k, eye_b).reshape(KBD, GN)
    c["w_c_big"] = jnp.einsum("knd,kp,bq->kbdpqn", wC, eye_k, eye_b).reshape(KBD, GN)
    c["dtb_full"] = jnp.broadcast_to(p["dt_b"][:, None, :], (K, B, D_INNER)).reshape(1, KBD)
    c["dfull"] = jnp.broadcast_to(p["Ds"][:, None, :], (K, B, D_INNER)).reshape(1, KBD)

    # A in the scan layout: row (l, n%8), lane (n//8, k, b, d)
    A = -jnp.exp(p["A_logs"])                                           # (K, D_INNER, N)
    a_tile = jnp.transpose(A.reshape(K, D_INNER, 2, NS), (3, 2, 0, 1))  # (ns, nl, k, d)
    a_tile = jnp.broadcast_to(a_tile[:, :, :, None, :],
                              (NS, 2, K, B, D_INNER)).reshape(NS, LANES)
    c["a_big"] = jnp.broadcast_to(a_tile[None], (L, NS, LANES)).reshape(PN, LANES)

    # n-selection mask (n % 8 == row's ns) on the (k,b,n) lane layout
    seln8 = (jnp.arange(D_STATE)[None, :] % NS == jnp.arange(NS)[:, None]).astype(f32)
    c["seln_big"] = jnp.tile(jnp.tile(seln8, (1, G)), (L, 1))           # (512, 128)

    # spread (k,b,n) lanes -> (n//8,k,b,d) lanes (replicate over d)
    lin = jnp.arange(GN)
    lout = jnp.arange(LANES)
    g_in = lin // D_STATE
    n_in = lin % D_STATE
    g_out = (lout % KBD) // D_INNER
    nl_out = lout // KBD
    c["spread"] = ((g_in[:, None] == g_out[None, :]) &
                   ((n_in[:, None] // NS) == nl_out[None, :])).astype(f32)  # (128, 128)

    # row replication l -> (l, ns) and its transpose (sum over ns)
    rows = jnp.arange(PN)
    c["rep"] = (rows[:, None] // NS == li[None, :]).astype(f32)          # (512, 64)
    c["sum8"] = jnp.transpose(c["rep"])                                  # (64, 512)

    # stage 8
    c["lnout_g"] = p["lnout_g"].reshape(D_INNER, 1)
    c["lnout_b"] = p["lnout_b"].reshape(D_INNER, 1)
    c["w_out_t"] = jnp.transpose(p["w_out"])                             # (4, 8)
    return c


# ======================================= wrapper ========================================
def vss_block_forward(x, c):
    x_t = jnp.transpose(x.reshape(N_TOK, C))                             # (C, 128)
    n_in = 21
    out_t = pl.pallas_call(
        _vss_fused_kernel,
        out_shape=jax.ShapeDtypeStruct((C, N_TOK), f32),
        in_specs=[pl.BlockSpec(memory_space=pltpu.MemorySpace.VMEM)] * n_in,
        out_specs=pl.BlockSpec(memory_space=pltpu.MemorySpace.VMEM),
        scratch_shapes=[pltpu.VMEM((PN, LANES), f32)] * 4,   # dA, dBu, C-rep, h-history
        compiler_params=pltpu.CompilerParams(vmem_limit_bytes=32 * 1024 * 1024),
    )(x_t, c["ln1_g"], c["ln1_b"], c["w_in_t"], c["conv_mw"], c["conv_b"],
      c["m_build"], c["w_delta_big"], c["dtb_full"], c["w_b_big"], c["w_c_big"],
      c["a_big"], c["seln_big"], c["spread"], c["rep"], c["sum8"], c["dfull"],
      c["m_merge"], c["lnout_g"], c["lnout_b"], c["w_out_t"])
    return jnp.transpose(out_t).reshape(B, H, W, C)


# ================================== parameter init ======================================
def init_params(key):
    ks = jax.random.split(key, 7)
    p = {}
    p["ln1_g"] = jnp.ones((C,), f32)
    p["ln1_b"] = jnp.zeros((C,), f32)
    lim_in = 1.0 / math.sqrt(C)
    p["w_in"] = jax.random.uniform(ks[0], (C, 2 * D_INNER), f32, -lim_in, lim_in)
    lim_conv = 1.0 / math.sqrt(D_CONV * D_CONV)                   # depthwise: in/groups = 1
    p["conv_w"] = jax.random.uniform(ks[1], (D_CONV, D_CONV, D_INNER), f32, -lim_conv, lim_conv)
    p["conv_b"] = jax.random.uniform(ks[2], (D_INNER,), f32, -lim_conv, lim_conv)
    lim_xp = 1.0 / math.sqrt(D_INNER)
    p["x_proj_w"] = jax.random.uniform(ks[3], (K, DT_RANK + 2 * D_STATE, D_INNER), f32,
                                       -lim_xp, lim_xp)
    dt_std = DT_RANK ** -0.5
    p["dt_w"] = jax.random.uniform(ks[4], (K, D_INNER, DT_RANK), f32, -dt_std, dt_std)
    dt = jnp.exp(jax.random.uniform(ks[5], (K, D_INNER), f32) *
                 (math.log(0.1) - math.log(0.001)) + math.log(0.001))
    dt = jnp.maximum(dt, 1e-4)
    p["dt_b"] = dt + jnp.log(-jnp.expm1(-dt))                     # inverse-softplus init
    a_row = jnp.log(jnp.arange(1, D_STATE + 1, dtype=f32))
    p["A_logs"] = jnp.tile(a_row[None, None, :], (K, D_INNER, 1))  # (K, D, N)
    p["Ds"] = jnp.ones((K, D_INNER), f32)
    p["lnout_g"] = jnp.ones((D_INNER,), f32)
    p["lnout_b"] = jnp.zeros((D_INNER,), f32)
    lim_out = 1.0 / math.sqrt(D_INNER)
    p["w_out"] = jax.random.uniform(ks[6], (D_INNER, C), f32, -lim_out, lim_out)
    return p


# ============================ pure-JAX reference (for checking) =========================
def reference_forward(x, p):
    mu = x.mean(-1, keepdims=True)
    var = ((x - mu) ** 2).mean(-1, keepdims=True)
    xn = (x - mu) / jnp.sqrt(var + 1e-6) * p["ln1_g"] + p["ln1_b"]
    xz = xn @ p["w_in"]
    xp, z = xz[..., :D_INNER], xz[..., D_INNER:]

    x_nchw = jnp.transpose(xp, (0, 3, 1, 2))
    w_oihw = jnp.transpose(p["conv_w"], (2, 0, 1))[:, None]       # (D, 1, 3, 3)
    conv = lax.conv_general_dilated(
        x_nchw, w_oihw, (1, 1), "SAME", feature_group_count=D_INNER,
        dimension_numbers=("NCHW", "OIHW", "NCHW")) + p["conv_b"][None, :, None, None]
    xc = conv * jax.nn.sigmoid(conv)

    x_hw = xc.reshape(B, D_INNER, L)
    x_wh = jnp.transpose(xc, (0, 1, 3, 2)).reshape(B, D_INNER, L)
    x_hwwh = jnp.stack([x_hw, x_wh], axis=1)
    xs = jnp.concatenate([x_hwwh, jnp.flip(x_hwwh, axis=-1)], axis=1)   # (B, K, D, L)

    x_dbl = jnp.einsum("bkdl,kcd->bkcl", xs, p["x_proj_w"])
    dts = x_dbl[:, :, :DT_RANK]
    Bs = x_dbl[:, :, DT_RANK:DT_RANK + D_STATE]
    Cs = x_dbl[:, :, DT_RANK + D_STATE:]
    dts = jnp.einsum("bkrl,kdr->bkdl", dts, p["dt_w"])

    u = xs.reshape(B, K * D_INNER, L)
    delta = dts.reshape(B, K * D_INNER, L)
    delta = jax.nn.softplus(delta + p["dt_b"].reshape(-1)[None, :, None])
    A = -jnp.exp(p["A_logs"].reshape(K * D_INNER, D_STATE))
    Ds = p["Ds"].reshape(-1)
    Bs_full = jnp.repeat(Bs, D_INNER, axis=1)                     # (B, K*D, N, L)
    Cs_full = jnp.repeat(Cs, D_INNER, axis=1)

    def step(h, inp):
        u_l, d_l, b_l, c_l = inp
        dA = jnp.exp(d_l[..., None] * A[None])
        h = dA * h + (d_l * u_l)[..., None] * b_l
        y_l = (h * c_l).sum(-1) + Ds[None] * u_l
        return h, y_l

    inp = (jnp.moveaxis(u, -1, 0), jnp.moveaxis(delta, -1, 0),
           jnp.moveaxis(Bs_full, -1, 0), jnp.moveaxis(Cs_full, -1, 0))
    h0 = jnp.zeros((B, K * D_INNER, D_STATE), f32)
    _, ys = lax.scan(step, h0, inp)
    out_y = jnp.moveaxis(ys, 0, -1).reshape(B, K, D_INNER, L)

    inv_y = jnp.flip(out_y[:, 2:4], axis=-1)
    wh_y = jnp.transpose(out_y[:, 1].reshape(B, D_INNER, W, H),
                         (0, 1, 3, 2)).reshape(B, D_INNER, L)
    invwh_y = jnp.transpose(inv_y[:, 1].reshape(B, D_INNER, W, H),
                            (0, 1, 3, 2)).reshape(B, D_INNER, L)
    y = out_y[:, 0] + inv_y[:, 0] + wh_y + invwh_y
    y = jnp.transpose(y, (0, 2, 1)).reshape(B, H, W, D_INNER)

    mu = y.mean(-1, keepdims=True)
    var = ((y - mu) ** 2).mean(-1, keepdims=True)
    yn = (y - mu) / jnp.sqrt(var + 1e-5) * p["lnout_g"] + p["lnout_b"]
    out = (yn * (z * jax.nn.sigmoid(z))) @ p["w_out"]
    return x + out


if __name__ == "__main__":
    key = jax.random.PRNGKey(0)
    pkey, xkey = jax.random.split(key)
    params = init_params(pkey)
    x = jax.random.normal(xkey, (B, H, W, C), dtype=f32)

    # parameter-only plumbing done once, outside the jitted forward (review item 12)
    consts = precompute_constants(params)

    fwd = jax.jit(vss_block_forward)
    out = jax.block_until_ready(fwd(x, consts))

    ref = jax.block_until_ready(reference_forward(x, params))

    err = float(jnp.max(jnp.abs(out - ref)))
    assert out.shape == (B, H, W, C)
    assert jnp.all(jnp.isfinite(out))
    assert err < 2e-3, f"mismatch vs pure-JAX reference: {err}"
    print("KERNEL_OK")
</pallas_src>

<mosaic_0001>
module attributes {stable_mosaic.version = 11 : i64} {
  func.func @_vss_fused_kernel(%arg0: memref<4x128xf32, #tpu.memory_space<vmem>>, %arg1: memref<4x1xf32, #tpu.memory_space<vmem>>, %arg2: memref<4x1xf32, #tpu.memory_space<vmem>>, %arg3: memref<16x4xf32, #tpu.memory_space<vmem>>, %arg4: memref<72x128xf32, #tpu.memory_space<vmem>>, %arg5: memref<8x1xf32, #tpu.memory_space<vmem>>, %arg6: memref<192x64xf32, #tpu.memory_space<vmem>>, %arg7: memref<64x64xf32, #tpu.memory_space<vmem>>, %arg8: memref<1x64xf32, #tpu.memory_space<vmem>>, %arg9: memref<64x128xf32, #tpu.memory_space<vmem>>, %arg10: memref<64x128xf32, #tpu.memory_space<vmem>>, %arg11: memref<512x128xf32, #tpu.memory_space<vmem>>, %arg12: memref<512x128xf32, #tpu.memory_space<vmem>>, %arg13: memref<128x128xf32, #tpu.memory_space<vmem>>, %arg14: memref<512x64xf32, #tpu.memory_space<vmem>>, %arg15: memref<64x512xf32, #tpu.memory_space<vmem>>, %arg16: memref<1x64xf32, #tpu.memory_space<vmem>>, %arg17: memref<64x192xf32, #tpu.memory_space<vmem>>, %arg18: memref<8x1xf32, #tpu.memory_space<vmem>>, %arg19: memref<8x1xf32, #tpu.memory_space<vmem>>, %arg20: memref<4x8xf32, #tpu.memory_space<vmem>>, %arg21: memref<4x128xf32, #tpu.memory_space<vmem>>, %arg22: memref<512x128xf32, #tpu.memory_space<vmem>>, %arg23: memref<512x128xf32, #tpu.memory_space<vmem>>, %arg24: memref<512x128xf32, #tpu.memory_space<vmem>>, %arg25: memref<512x128xf32, #tpu.memory_space<vmem>>) attributes {dimension_semantics = [], scalar_prefetch = 0 : i64, scratch_operands = 4 : i64, tpu.core_type = #tpu.core_type<tc>} {
    %c0 = arith.constant 0 : index
    %c0_0 = arith.constant 0 : index
    %0 = vector.load %arg0[%c0, %c0_0] : memref<4x128xf32, #tpu.memory_space<vmem>>, vector<4x128xf32>
    %cst = arith.constant dense<0.000000e+00> : vector<128xf32>
    %1 = vector.multi_reduction <add>, %0, %cst [0] : vector<4x128xf32> to vector<128xf32>
    %2 = vector.shape_cast %1 : vector<128xf32> to vector<1x128xf32>
    %cst_1 = arith.constant 4.000000e+00 : f32
    %3 = vector.broadcast %cst_1 : f32 to vector<1x128xf32>
    %4 = arith.divf %2, %3 : vector<1x128xf32>
    %5 = vector.broadcast %4 : vector<1x128xf32> to vector<4x128xf32>
    %6 = arith.subf %0, %5 : vector<4x128xf32>
    %7 = arith.mulf %6, %6 : vector<4x128xf32>
    %cst_2 = arith.constant dense<0.000000e+00> : vector<128xf32>
    %8 = vector.multi_reduction <add>, %7, %cst_2 [0] : vector<4x128xf32> to vector<128xf32>
    %9 = vector.shape_cast %8 : vector<128xf32> to vector<1x128xf32>
    %cst_3 = arith.constant 4.000000e+00 : f32
    %10 = vector.broadcast %cst_3 : f32 to vector<1x128xf32>
    %11 = arith.divf %9, %10 : vector<1x128xf32>
    %12 = vector.broadcast %4 : vector<1x128xf32> to vector<4x128xf32>
    %13 = arith.subf %0, %12 : vector<4x128xf32>
    %cst_4 = arith.constant 9.99999997E-7 : f32
    %14 = vector.broadcast %cst_4 : f32 to vector<1x128xf32>
    %15 = arith.addf %11, %14 : vector<1x128xf32>
    %16 = math.rsqrt %15 : vector<1x128xf32>
    %17 = vector.broadcast %16 : vector<1x128xf32> to vector<4x128xf32>
    %18 = arith.mulf %13, %17 : vector<4x128xf32>
    %c0_5 = arith.constant 0 : index
    %c0_6 = arith.constant 0 : index
    %19 = vector.load %arg1[%c0_5, %c0_6] : memref<4x1xf32, #tpu.memory_space<vmem>>, vector<4x1xf32>
    %20 = vector.broadcast %19 : vector<4x1xf32> to vector<4x128xf32>
    %21 = arith.mulf %18, %20 : vector<4x128xf32>
    %c0_7 = arith.constant 0 : index
    %c0_8 = arith.constant 0 : index
    %22 = vector.load %arg2[%c0_7, %c0_8] : memref<4x1xf32, #tpu.memory_space<vmem>>, vector<4x1xf32>
    %23 = vector.broadcast %22 : vector<4x1xf32> to vector<4x128xf32>
    %24 = arith.addf %21, %23 : vector<4x128xf32>
    %c0_9 = arith.constant 0 : index
    %c0_10 = arith.constant 0 : index
    %25 = vector.load %arg3[%c0_9, %c0_10] : memref<16x4xf32, #tpu.memory_space<vmem>>, vector<16x4xf32>
    %cst_11 = arith.constant dense<0.000000e+00> : vector<16x128xf32>
    %26 = tpu.matmul %25, %24, %cst_11 {dimension_numbers = #tpu.dot_dimension_numbers<[1], [0], [0], [1], [0, 0, 1, 1], [], []>} : vector<16x4xf32>, vector<4x128xf32>, vector<16x128xf32> -> vector<16x128xf32>
    %27 = vector.extract_strided_slice %26 {offsets = [0, 0], sizes = [8, 128], strides = [1, 1]} : vector<16x128xf32> to vector<8x128xf32>
    %28 = vector.extract_strided_slice %26 {offsets = [8, 0], sizes = [8, 128], strides = [1, 1]} : vector<16x128xf32> to vector<8x128xf32>
    %cst_12 = arith.constant 0.000000e+00 : f32
    %29 = vector.broadcast %cst_12 : f32 to vector<8x128xf32>
    %30 = vector.extract_strided_slice %27 {offsets = [0, 119], sizes = [8, 9], strides = [1, 1]} : vector<8x128xf32> to vector<8x9xf32>
    %31 = vector.extract_strided_slice %27 {offsets = [0, 0], sizes = [8, 119], strides = [1, 1]} : vector<8x128xf32> to vector<8x119xf32>
    %32 = tpu.concatenate %30, %31 in 1 : vector<8x9xf32>, vector<8x119xf32> -> vector<8x128xf32>
    %c0_13 = arith.constant 0 : index
    %c0_14 = arith.constant 0 : index
    %33 = vector.load %arg4[%c0_13, %c0_14] : memref<72x128xf32, #tpu.memory_space<vmem>>, vector<8x128xf32>
    %34 = arith.mulf %32, %33 : vector<8x128xf32>
    %35 = arith.addf %29, %34 : vector<8x128xf32>
    %36 = vector.extract_strided_slice %27 {offsets = [0, 120], sizes = [8, 8], strides = [1, 1]} : vector<8x128xf32> to vector<8x8xf32>
    %37 = vector.extract_strided_slice %27 {offsets = [0, 0], sizes = [8, 120], strides = [1, 1]} : vector<8x128xf32> to vector<8x120xf32>
    %38 = tpu.concatenate %36, %37 in 1 : vector<8x8xf32>, vector<8x120xf32> -> vector<8x128xf32>
    %c8 = arith.constant 8 : index
    %c0_15 = arith.constant 0 : index
    %39 = vector.load %arg4[%c8, %c0_15] : memref<72x128xf32, #tpu.memory_space<vmem>>, vector<8x128xf32>
    %40 = arith.mulf %38, %39 : vector<8x128xf32>
    %41 = arith.addf %35, %40 : vector<8x128xf32>
    %42 = vector.extract_strided_slice %27 {offsets = [0, 121], sizes = [8, 7], strides = [1, 1]} : vector<8x128xf32> to vector<8x7xf32>
    %43 = vector.extract_strided_slice %27 {offsets = [0, 0], sizes = [8, 121], strides = [1, 1]} : vector<8x128xf32> to vector<8x121xf32>
    %44 = tpu.concatenate %42, %43 in 1 : vector<8x7xf32>, vector<8x121xf32> -> vector<8x128xf32>
    %c16 = arith.constant 16 : index
    %c0_16 = arith.constant 0 : index
    %45 = vector.load %arg4[%c16, %c0_16] : memref<72x128xf32, #tpu.memory_space<vmem>>, vector<8x128xf32>
    %46 = arith.mulf %44, %45 : vector<8x128xf32>
    %47 = arith.addf %41, %46 : vector<8x128xf32>
    %48 = vector.extract_strided_slice %27 {offsets = [0, 127], sizes = [8, 1], strides = [1, 1]} : vector<8x128xf32> to vector<8x1xf32>
    %49 = vector.extract_strided_slice %27 {offsets = [0, 0], sizes = [8, 127], strides = [1, 1]} : vector<8x128xf32> to vector<8x127xf32>
    %50 = tpu.concatenate %48, %49 in 1 : vector<8x1xf32>, vector<8x127xf32> -> vector<8x128xf32>
    %c24 = arith.constant 24 : index
    %c0_17 = arith.constant 0 : index
    %51 = vector.load %arg4[%c24, %c0_17] : memref<72x128xf32, #tpu.memory_space<vmem>>, vector<8x128xf32>
    %52 = arith.mulf %50, %51 : vector<8x128xf32>
    %53 = arith.addf %47, %52 : vector<8x128xf32>
    %c32 = arith.constant 32 : index
    %c0_18 = arith.constant 0 : index
    %54 = vector.load %arg4[%c32, %c0_18] : memref<72x128xf32, #tpu.memory_space<vmem>>, vector<8x128xf32>
    %55 = arith.mulf %27, %54 : vector<8x128xf32>
    %56 = arith.addf %53, %55 : vector<8x128xf32>
    %57 = vector.extract_strided_slice %27 {offsets = [0, 1], sizes = [8, 127], strides = [1, 1]} : vector<8x128xf32> to vector<8x127xf32>
    %58 = vector.extract_strided_slice %27 {offsets = [0, 0], sizes = [8, 1], strides = [1, 1]} : vector<8x128xf32> to vector<8x1xf32>
    %59 = tpu.concatenate %57, %58 in 1 : vector<8x127xf32>, vector<8x1xf32> -> vector<8x128xf32>
    %c40 = arith.constant 40 : index
    %c0_19 = arith.constant 0 : index
    %60 = vector.load %arg4[%c40, %c0_19] : memref<72x128xf32, #tpu.memory_space<vmem>>, vector<8x128xf32>
    %61 = arith.mulf %59, %60 : vector<8x128xf32>
    %62 = arith.addf %56, %61 : vector<8x128xf32>
    %63 = vector.extract_strided_slice %27 {offsets = [0, 7], sizes = [8, 121], strides = [1, 1]} : vector<8x128xf32> to vector<8x121xf32>
    %64 = vector.extract_strided_slice %27 {offsets = [0, 0], sizes = [8, 7], strides = [1, 1]} : vector<8x128xf32> to vector<8x7xf32>
    %65 = tpu.concatenate %63, %64 in 1 : vector<8x121xf32>, vector<8x7xf32> -> vector<8x128xf32>
    %c48 = arith.constant 48 : index
    %c0_20 = arith.constant 0 : index
    %66 = vector.load %arg4[%c48, %c0_20] : memref<72x128xf32, #tpu.memory_space<vmem>>, vector<8x128xf32>
    %67 = arith.mulf %65, %66 : vector<8x128xf32>
    %68 = arith.addf %62, %67 : vector<8x128xf32>
    %69 = vector.extract_strided_slice %27 {offsets = [0, 8], sizes = [8, 120], strides = [1, 1]} : vector<8x128xf32> to vector<8x120xf32>
    %70 = vector.extract_strided_slice %27 {offsets = [0, 0], sizes = [8, 8], strides = [1, 1]} : vector<8x128xf32> to vector<8x8xf32>
    %71 = tpu.concatenate %69, %70 in 1 : vector<8x120xf32>, vector<8x8xf32> -> vector<8x128xf32>
    %c56 = arith.constant 56 : index
    %c0_21 = arith.constant 0 : index
    %72 = vector.load %arg4[%c56, %c0_21] : memref<72x128xf32, #tpu.memory_space<vmem>>, vector<8x128xf32>
    %73 = arith.mulf %71, %72 : vector<8x128xf32>
    %74 = arith.addf %68, %73 : vector<8x128xf32>
    %75 = vector.extract_strided_slice %27 {offsets = [0, 9], sizes = [8, 119], strides = [1, 1]} : vector<8x128xf32> to vector<8x119xf32>
    %76 = vector.extract_strided_slice %27 {offsets = [0, 0], sizes = [8, 9], strides = [1, 1]} : vector<8x128xf32> to vector<8x9xf32>
    %77 = tpu.concatenate %75, %76 in 1 : vector<8x119xf32>, vector<8x9xf32> -> vector<8x128xf32>
    %c64 = arith.constant 64 : index
    %c0_22 = arith.constant 0 : index
    %78 = vector.load %arg4[%c64, %c0_22] : memref<72x128xf32, #tpu.memory_space<vmem>>, vector<8x128xf32>
    %79 = arith.mulf %77, %78 : vector<8x128xf32>
    %80 = arith.addf %74, %79 : vector<8x128xf32>
    %c0_23 = arith.constant 0 : index
    %c0_24 = arith.constant 0 : index
    %81 = vector.load %arg5[%c0_23, %c0_24] : memref<8x1xf32, #tpu.memory_space<vmem>>, vector<8x1xf32>
    %82 = vector.broadcast %81 : vector<8x1xf32> to vector<8x128xf32>
    %83 = arith.addf %80, %82 : vector<8x128xf32>
    %cst_25 = arith.constant 5.000000e-01 : f32
    %84 = vector.broadcast %cst_25 : f32 to vector<8x128xf32>
    %85 = arith.mulf %84, %83 : vector<8x128xf32>
    %86 = math.tanh %85 : vector<8x128xf32>
    %cst_26 = arith.constant 1.000000e+00 : f32
    %87 = vector.broadcast %cst_26 : f32 to vector<8x128xf32>
    %88 = arith.addf %86, %87 : vector<8x128xf32>
    %cst_27 = arith.constant 5.000000e-01 : f32
    %89 = vector.broadcast %cst_27 : f32 to vector<8x128xf32>
    %90 = arith.mulf %89, %88 : vector<8x128xf32>
    %91 = arith.mulf %83, %90 : vector<8x128xf32>
    %cst_28 = arith.constant 0.000000e+00 : f32
    %92 = vector.broadcast %cst_28 : f32 to vector<120x128xf32>
    %93 = tpu.concatenate %91, %92 in 0 : vector<8x128xf32>, vector<120x128xf32> -> vector<128x128xf32>
    %94 = tpu.transpose %93, [1, 0] : vector<128x128xf32> -> vector<128x128xf32>
    %95 = vector.extract_strided_slice %94 {offsets = [0, 0], sizes = [64, 8], strides = [1, 1]} : vector<128x128xf32> to vector<64x8xf32>
    %96 = vector.extract_strided_slice %94 {offsets = [64, 0], sizes = [64, 8], strides = [1, 1]} : vector<128x128xf32> to vector<64x8xf32>
    %97 = tpu.concatenate %95, %96 in 1 : vector<64x8xf32>, vector<64x8xf32> -> vector<64x16xf32>
    %c0_29 = arith.constant 0 : index
    %c0_30 = arith.constant 0 : index
    %98 = vector.load %arg6[%c0_29, %c0_30] : memref<192x64xf32, #tpu.memory_space<vmem>>, vector<192x64xf32>
    %cst_31 = arith.constant dense<0.000000e+00> : vector<192x16xf32>
    %99 = tpu.matmul %98, %97, %cst_31 {dimension_numbers = #tpu.dot_dimension_numbers<[1], [0], [0], [1], [0, 0, 1, 1], [], []>} : vector<192x64xf32>, vector<64x16xf32>, vector<192x16xf32> -> vector<192x16xf32>
    %100 = vector.extract_strided_slice %99 {offsets = [0, 0], sizes = [64, 16], strides = [1, 1]} : vector<192x16xf32> to vector<64x16xf32>
    %101 = vector.extract_strided_slice %99 {offsets = [64, 0], sizes = [64, 16], strides = [1, 1]} : vector<192x16xf32> to vector<64x16xf32>
    %102 = vector.extract_strided_slice %99 {offsets = [128, 0], sizes = [64, 16], strides = [1, 1]} : vector<192x16xf32> to vector<64x16xf32>
    %103 = tpu.concatenate %97, %100, %101, %102 in 1 : vector<64x16xf32>, vector<64x16xf32>, vector<64x16xf32>, vector<64x16xf32> -> vector<64x64xf32>
    %c0_32 = arith.constant 0 : index
    %c0_33 = arith.constant 0 : index
    %104 = vector.load %arg7[%c0_32, %c0_33] : memref<64x64xf32, #tpu.memory_space<vmem>>, vector<64x64xf32>
    %cst_34 = arith.constant dense<0.000000e+00> : vector<64x64xf32>
    %105 = tpu.matmul %103, %104, %cst_34 {dimension_numbers = #tpu.dot_dimension_numbers<[1], [0], [0], [1], [0, 0, 1, 1], [], []>} : vector<64x64xf32>, vector<64x64xf32>, vector<64x64xf32> -> vector<64x64xf32>
    %c0_35 = arith.constant 0 : index
    %c0_36 = arith.constant 0 : index
    %106 = vector.load %arg8[%c0_35, %c0_36] : memref<1x64xf32, #tpu.memory_space<vmem>>, vector<1x64xf32>
    %107 = vector.broadcast %106 : vector<1x64xf32> to vector<64x64xf32>
    %108 = arith.addf %105, %107 : vector<64x64xf32>
    %cst_37 = arith.constant 0.000000e+00 : f32
    %109 = vector.broadcast %cst_37 : f32 to vector<64x64xf32>
    %110 = arith.maximumf %108, %109 : vector<64x64xf32>
    %111 = math.absf %108 : vector<64x64xf32>
    %cst_38 = arith.constant 0.000000e+00 : f32
    %112 = vector.broadcast %cst_38 : f32 to vector<64x64xf32>
    %113 = arith.subf %112, %111 : vector<64x64xf32>
    %114 = math.exp %113 : vector<64x64xf32>
    %cst_39 = arith.constant 1.000000e+00 : f32
    %115 = vector.broadcast %cst_39 : f32 to vector<64x64xf32>
    %116 = arith.addf %115, %114 : vector<64x64xf32>
    %117 = math.log %116 : vector<64x64xf32>
    %118 = arith.addf %110, %117 : vector<64x64xf32>
    %119 = arith.mulf %118, %103 : vector<64x64xf32>
    %c0_40 = arith.constant 0 : index
    %c0_41 = arith.constant 0 : index
    %120 = vector.load %arg9[%c0_40, %c0_41] : memref<64x128xf32, #tpu.memory_space<vmem>>, vector<64x128xf32>
    %cst_42 = arith.constant dense<0.000000e+00> : vector<64x128xf32>
    %121 = tpu.matmul %103, %120, %cst_42 {dimension_numbers = #tpu.dot_dimension_numbers<[1], [0], [0], [1], [0, 0, 1, 1], [], []>} : vector<64x64xf32>, vector<64x128xf32>, vector<64x128xf32> -> vector<64x128xf32>
    %c0_43 = arith.constant 0 : index
    %c0_44 = arith.constant 0 : index
    %122 = vector.load %arg10[%c0_43, %c0_44] : memref<64x128xf32, #tpu.memory_space<vmem>>, vector<64x128xf32>
    %cst_45 = arith.constant dense<0.000000e+00> : vector<64x128xf32>
    %123 = tpu.matmul %103, %122, %cst_45 {dimension_numbers = #tpu.dot_dimension_numbers<[1], [0], [0], [1], [0, 0, 1, 1], [], []>} : vector<64x64xf32>, vector<64x128xf32>, vector<64x128xf32> -> vector<64x128xf32>
    %c0_46 = arith.constant 0 : index
    %c0_47 = arith.constant 0 : index
    %124 = vector.load %arg14[%c0_46, %c0_47] : memref<512x64xf32, #tpu.memory_space<vmem>>, vector<512x64xf32>
    %c0_48 = arith.constant 0 : index
    %c0_49 = arith.constant 0 : index
    %125 = vector.load %arg12[%c0_48, %c0_49] : memref<512x128xf32, #tpu.memory_space<vmem>>, vector<512x128xf32>
    %c0_50 = arith.constant 0 : index
    %c0_51 = arith.constant 0 : index
    %126 = vector.load %arg13[%c0_50, %c0_51] : memref<128x128xf32, #tpu.memory_space<vmem>>, vector<128x128xf32>
    %127 = tpu.concatenate %118, %118 in 1 : vector<64x64xf32>, vector<64x64xf32> -> vector<64x128xf32>
    %128 = tpu.concatenate %119, %119 in 1 : vector<64x64xf32>, vector<64x64xf32> -> vector<64x128xf32>
    %cst_52 = arith.constant dense<0.000000e+00> : vector<512x128xf32>
    %129 = tpu.matmul %124, %127, %cst_52 {dimension_numbers = #tpu.dot_dimension_numbers<[1], [0], [0], [1], [0, 0, 1, 1], [], []>} : vector<512x64xf32>, vector<64x128xf32>, vector<512x128xf32> -> vector<512x128xf32>
    %c0_53 = arith.constant 0 : index
    %c0_54 = arith.constant 0 : index
    %130 = vector.load %arg11[%c0_53, %c0_54] : memref<512x128xf32, #tpu.memory_space<vmem>>, vector<512x128xf32>
    %131 = arith.mulf %129, %130 : vector<512x128xf32>
    %132 = math.exp %131 : vector<512x128xf32>
    %c0_55 = arith.constant 0 : index
    %c0_56 = arith.constant 0 : index
    %133 = vector.load %arg22[%c0_55, %c0_56] : memref<512x128xf32, #tpu.memory_space<vmem>>, vector<512x128xf32>
    tpu.vector_store %arg22[%c0_55, %c0_56], %132 {strides = array<i32>} : memref<512x128xf32, #tpu.memory_space<vmem>>, vector<512x128xf32>,
    %cst_57 = arith.constant dense<0.000000e+00> : vector<512x128xf32>
    %134 = tpu.matmul %124, %121, %cst_57 {dimension_numbers = #tpu.dot_dimension_numbers<[1], [0], [0], [1], [0, 0, 1, 1], [], []>} : vector<512x64xf32>, vector<64x128xf32>, vector<512x128xf32> -> vector<512x128xf32>
    %135 = arith.mulf %134, %125 : vector<512x128xf32>
    %cst_58 = arith.constant dense<0.000000e+00> : vector<512x128xf32>
    %136 = tpu.matmul %135, %126, %cst_58 {dimension_numbers = #tpu.dot_dimension_numbers<[1], [0], [0], [1], [0, 0, 1, 1], [], []>} : vector<512x128xf32>, vector<128x128xf32>, vector<512x128xf32> -> vector<512x128xf32>
    %cst_59 = arith.constant dense<0.000000e+00> : vector<512x128xf32>
    %137 = tpu.matmul %124, %128, %cst_59 {dimension_numbers = #tpu.dot_dimension_numbers<[1], [0], [0], [1], [0, 0, 1, 1], [], []>} : vector<512x64xf32>, vector<64x128xf32>, vector<512x128xf32> -> vector<512x128xf32>
    %138 = arith.mulf %136, %137 : vector<512x128xf32>
    %c0_60 = arith.constant 0 : index
    %c0_61 = arith.constant 0 : index
    %139 = vector.load %arg23[%c0_60, %c0_61] : memref<512x128xf32, #tpu.memory_space<vmem>>, vector<512x128xf32>
    tpu.vector_store %arg23[%c0_60, %c0_61], %138 {strides = array<i32>} : memref<512x128xf32, #tpu.memory_space<vmem>>, vector<512x128xf32>,
    %cst_62 = arith.constant dense<0.000000e+00> : vector<512x128xf32>
    %140 = tpu.matmul %124, %123, %cst_62 {dimension_numbers = #tpu.dot_dimension_numbers<[1], [0], [0], [1], [0, 0, 1, 1], [], []>} : vector<512x64xf32>, vector<64x128xf32>, vector<512x128xf32> -> vector<512x128xf32>
    %141 = arith.mulf %140, %125 : vector<512x128xf32>
    %cst_63 = arith.constant dense<0.000000e+00> : vector<512x128xf32>
    %142 = tpu.matmul %141, %126, %cst_63 {dimension_numbers = #tpu.dot_dimension_numbers<[1], [0], [0], [1], [0, 0, 1, 1], [], []>} : vector<512x128xf32>, vector<128x128xf32>, vector<512x128xf32> -> vector<512x128xf32>
    %c0_64 = arith.constant 0 : index
    %c0_65 = arith.constant 0 : index
    %143 = vector.load %arg24[%c0_64, %c0_65] : memref<512x128xf32, #tpu.memory_space<vmem>>, vector<512x128xf32>
    tpu.vector_store %arg24[%c0_64, %c0_65], %142 {strides = array<i32>} : memref<512x128xf32, #tpu.memory_space<vmem>>, vector<512x128xf32>,
    %cst_66 = arith.constant 0.000000e+00 : f32
    %144 = vector.broadcast %cst_66 : f32 to vector<8x128xf32>
    %c0_67 = arith.constant 0 : index
    %c0_68 = arith.constant 0 : index
    %145 = vector.load %arg22[%c0_67, %c0_68] : memref<512x128xf32, #tpu.memory_space<vmem>>, vector<8x128xf32>
    %146 = arith.mulf %145, %144 : vector<8x128xf32>
    %c0_69 = arith.constant 0 : index
    %c0_70 = arith.constant 0 : index
    %147 = vector.load %arg23[%c0_69, %c0_70] : memref<512x128xf32, #tpu.memory_space<vmem>>, vector<8x128xf32>
    %148 = arith.addf %146, %147 : vector<8x128xf32>
    %c0_71 = arith.constant 0 : index
    %c0_72 = arith.constant 0 : index
    %149 = vector.load %arg25[%c0_71, %c0_72] : memref<512x128xf32, #tpu.memory_space<vmem>>, vector<8x128xf32>
    tpu.vector_store %arg25[%c0_71, %c0_72], %148 {strides = array<i32>} : memref<512x128xf32, #tpu.memory_space<vmem>>, vector<8x128xf32>,
    %c8_73 = arith.constant 8 : index
    %c0_74 = arith.constant 0 : index
    %150 = vector.load %arg22[%c8_73, %c0_74] : memref<512x128xf32, #tpu.memory_space<vmem>>, vector<8x128xf32>
    %151 = arith.mulf %150, %148 : vector<8x128xf32>
    %c8_75 = arith.constant 8 : index
    %c0_76 = arith.constant 0 : index
    %152 = vector.load %arg23[%c8_75, %c0_76] : memref<512x128xf32, #tpu.memory_space<vmem>>, vector<8x128xf32>
    %153 = arith.addf %151, %152 : vector<8x128xf32>
    %c8_77 = arith.constant 8 : index
    %c0_78 = arith.constant 0 : index
    %154 = vector.load %arg25[%c8_77, %c0_78] : memref<512x128xf32, #tpu.memory_space<vmem>>, vector<8x128xf32>
    tpu.vector_store %arg25[%c8_77, %c0_78], %153 {strides = array<i32>} : memref<512x128xf32, #tpu.memory_space<vmem>>, vector<8x128xf32>,
    %c16_79 = arith.constant 16 : index
    %c0_80 = arith.constant 0 : index
    %155 = vector.load %arg22[%c16_79, %c0_80] : memref<512x128xf32, #tpu.memory_space<vmem>>, vector<8x128xf32>
    %156 = arith.mulf %155, %153 : vector<8x128xf32>
    %c16_81 = arith.constant 16 : index
    %c0_82 = arith.constant 0 : index
    %157 = vector.load %arg23[%c16_81, %c0_82] : memref<512x128xf32, #tpu.memory_space<vmem>>, vector<8x128xf32>
    %158 = arith.addf %156, %157 : vector<8x128xf32>
    %c16_83 = arith.constant 16 : index
    %c0_84 = arith.constant 0 : index
    %159 = vector.load %arg25[%c16_83, %c0_84] : memref<512x128xf32, #tpu.memory_space<vmem>>, vector<8x128xf32>
    tpu.vector_store %arg25[%c16_83, %c0_84], %158 {strides = array<i32>} : memref<512x128xf32, #tpu.memory_space<vmem>>, vector<8x128xf32>,
    %c24_85 = arith.constant 24 : index
    %c0_86 = arith.constant 0 : index
    %160 = vector.load %arg22[%c24_85, %c0_86] : memref<512x128xf32, #tpu.memory_space<vmem>>, vector<8x128xf32>
    %161 = arith.mulf %160, %158 : vector<8x128xf32>
    %c24_87 = arith.constant 24 : index
    %c0_88 = arith.constant 0 : index
    %162 = vector.load %arg23[%c24_87, %c0_88] : memref<512x128xf32, #tpu.memory_space<vmem>>, vector<8x128xf32>
    %163 = arith.addf %161, %162 : vector<8x128xf32>
    %c24_89 = arith.constant 24 : index
    %c0_90 = arith.constant 0 : index
    %164 = vector.load %arg25[%c24_89, %c0_90] : memref<512x128xf32, #tpu.memory_space<vmem>>, vector<8x128xf32>
    tpu.vector_store %arg25[%c24_89, %c0_90], %163 {strides = array<i32>} : memref<512x128xf32, #tpu.memory_space<vmem>>, vector<8x128xf32>,
    %c32_91 = arith.constant 32 : index
    %c0_92 = arith.constant 0 : index
    %165 = vector.load %arg22[%c32_91, %c0_92] : memref<512x128xf32, #tpu.memory_space<vmem>>, vector<8x128xf32>
    %166 = arith.mulf %165, %163 : vector<8x128xf32>
    %c32_93 = arith.constant 32 : index
    %c0_94 = arith.constant 0 : index
    %167 = vector.load %arg23[%c32_93, %c0_94] : memref<512x128xf32, #tpu.memory_space<vmem>>, vector<8x128xf32>
    %168 = arith.addf %166, %167 : vector<8x128xf32>
    %c32_95 = arith.constant 32 : index
    %c0_96 = arith.constant 0 : index
    %169 = vector.load %arg25[%c32_95, %c0_96] : memref<512x128xf32, #tpu.memory_space<vmem>>, vector<8x128xf32>
    tpu.vector_store %arg25[%c32_95, %c0_96], %168 {strides = array<i32>} : memref<512x128xf32, #tpu.memory_space<vmem>>, vector<8x128xf32>,
    %c40_97 = arith.constant 40 : index
    %c0_98 = arith.constant 0 : index
    %170 = vector.load %arg22[%c40_97, %c0_98] : memref<512x128xf32, #tpu.memory_space<vmem>>, vector<8x128xf32>
    %171 = arith.mulf %170, %168 : vector<8x128xf32>
    %c40_99 = arith.constant 40 : index
    %c0_100 = arith.constant 0 : index
    %172 = vector.load %arg23[%c40_99, %c0_100] : memref<512x128xf32, #tpu.memory_space<vmem>>, vector<8x128xf32>
    %173 = arith.addf %171, %172 : vector<8x128xf32>
    %c40_101 = arith.constant 40 : index
    %c0_102 = arith.constant 0 : index
    %174 = vector.load %arg25[%c40_101, %c0_102] : memref<512x128xf32, #tpu.memory_space<vmem>>, vector<8x128xf32>
    tpu.vector_store %arg25[%c40_101, %c0_102], %173 {strides = array<i32>} : memref<512x128xf32, #tpu.memory_space<vmem>>, vector<8x128xf32>,
    %c48_103 = arith.constant 48 : index
    %c0_104 = arith.constant 0 : index
    %175 = vector.load %arg22[%c48_103, %c0_104] : memref<512x128xf32, #tpu.memory_space<vmem>>, vector<8x128xf32>
    %176 = arith.mulf %175, %173 : vector<8x128xf32>
    %c48_105 = arith.constant 48 : index
    %c0_106 = arith.constant 0 : index
    %177 = vector.load %arg23[%c48_105, %c0_106] : memref<512x128xf32, #tpu.memory_space<vmem>>, vector<8x128xf32>
    %178 = arith.addf %176, %177 : vector<8x128xf32>
    %c48_107 = arith.constant 48 : index
    %c0_108 = arith.constant 0 : index
    %179 = vector.load %arg25[%c48_107, %c0_108] : memref<512x128xf32, #tpu.memory_space<vmem>>, vector<8x128xf32>
    tpu.vector_store %arg25[%c48_107, %c0_108], %178 {strides = array<i32>} : memref<512x128xf32, #tpu.memory_space<vmem>>, vector<8x128xf32>,
    %c56_109 = arith.constant 56 : index
    %c0_110 = arith.constant 0 : index
    %180 = vector.load %arg22[%c56_109, %c0_110] : memref<512x128xf32, #tpu.memory_space<vmem>>, vector<8x128xf32>
    %181 = arith.mulf %180, %178 : vector<8x128xf32>
    %c56_111 = arith.constant 56 : index
    %c0_112 = arith.constant 0 : index
    %182 = vector.load %arg23[%c56_111, %c0_112] : memref<512x128xf32, #tpu.memory_space<vmem>>, vector<8x128xf32>
    %183 = arith.addf %181, %182 : vector<8x128xf32>
    %c56_113 = arith.constant 56 : index
    %c0_114 = arith.constant 0 : index
    %184 = vector.load %arg25[%c56_113, %c0_114] : memref<512x128xf32, #tpu.memory_space<vmem>>, vector<8x128xf32>
    tpu.vector_store %arg25[%c56_113, %c0_114], %183 {strides = array<i32>} : memref<512x128xf32, #tpu.memory_space<vmem>>, vector<8x128xf32>,
    %c64_115 = arith.constant 64 : index
    %c0_116 = arith.constant 0 : index
    %185 = vector.load %arg22[%c64_115, %c0_116] : memref<512x128xf32, #tpu.memory_space<vmem>>, vector<8x128xf32>
    %186 = arith.mulf %185, %183 : vector<8x128xf32>
    %c64_117 = arith.constant 64 : index
    %c0_118 = arith.constant 0 : index
    %187 = vector.load %arg23[%c64_117, %c0_118] : memref<512x128xf32, #tpu.memory_space<vmem>>, vector<8x128xf32>
    %188 = arith.addf %186, %187 : vector<8x128xf32>
    %c64_119 = arith.constant 64 : index
    %c0_120 = arith.constant 0 : index
    %189 = vector.load %arg25[%c64_119, %c0_120] : memref<512x128xf32, #tpu.memory_space<vmem>>, vector<8x128xf32>
    tpu.vector_store %arg25[%c64_119, %c0_120], %188 {strides = array<i32>} : memref<512x128xf32, #tpu.memory_space<vmem>>, vector<8x128xf32>,
    %c72 = arith.constant 72 : index
    %c0_121 = arith.constant 0 : index
    %190 = vector.load %arg22[%c72, %c0_121] : memref<512x128xf32, #tpu.memory_space<vmem>>, vector<8x128xf32>
    %191 = arith.mulf %190, %188 : vector<8x128xf32>
    %c72_122 = arith.constant 72 : index
    %c0_123 = arith.constant 0 : index
    %192 = vector.load %arg23[%c72_122, %c0_123] : memref<512x128xf32, #tpu.memory_space<vmem>>, vector<8x128xf32>
    %193 = arith.addf %191, %192 : vector<8x128xf32>
    %c72_124 = arith.constant 72 : index
    %c0_125 = arith.constant 0 : index
    %194 = vector.load %arg25[%c72_124, %c0_125] : memref<512x128xf32, #tpu.memory_space<vmem>>, vector<8x128xf32>
    tpu.vector_store %arg25[%c72_124, %c0_125], %193 {strides = array<i32>} : memref<512x128xf32, #tpu.memory_space<vmem>>, vector<8x128xf32>,
    %c80 = arith.constant 80 : index
    %c0_126 = arith.constant 0 : index
    %195 = vector.load %arg22[%c80, %c0_126] : memref<512x128xf32, #tpu.memory_space<vmem>>, vector<8x128xf32>
    %196 = arith.mulf %195, %193 : vector<8x128xf32>
    %c80_127 = arith.constant 80 : index
    %c0_128 = arith.constant 0 : index
    %197 = vector.load %arg23[%c80_127, %c0_128] : memref<512x128xf32, #tpu.memory_space<vmem>>, vector<8x128xf32>
    %198 = arith.addf %196, %197 : vector<8x128xf32>
    %c80_129 = arith.constant 80 : index
    %c0_130 = arith.constant 0 : index
    %199 = vector.load %arg25[%c80_129, %c0_130] : memref<512x128xf32, #tpu.memory_space<vmem>>, vector<8x128xf32>
    tpu.vector_store %arg25[%c80_129, %c0_130], %198 {strides = array<i32>} : memref<512x128xf32, #tpu.memory_space<vmem>>, vector<8x128xf32>,
    %c88 = arith.constant 88 : index
    %c0_131 = arith.constant 0 : index
    %200 = vector.load %arg22[%c88, %c0_131] : memref<512x128xf32, #tpu.memory_space<vmem>>, vector<8x128xf32>
    %201 = arith.mulf %200, %198 : vector<8x128xf32>
    %c88_132 = arith.constant 88 : index
    %c0_133 = arith.constant 0 : index
    %202 = vector.load %arg23[%c88_132, %c0_133] : memref<512x128xf32, #tpu.memory_space<vmem>>, vector<8x128xf32>
    %203 = arith.addf %201, %202 : vector<8x128xf32>
    %c88_134 = arith.constant 88 : index
    %c0_135 = arith.constant 0 : index
    %204 = vector.load %arg25[%c88_134, %c0_135] : memref<512x128xf32, #tpu.memory_space<vmem>>, vector<8x128xf32>
    tpu.vector_store %arg25[%c88_134, %c0_135], %203 {strides = array<i32>} : memref<512x128xf32, #tpu.memory_space<vmem>>, vector<8x128xf32>,
    %c96 = arith.constant 96 : index
    %c0_136 = arith.constant 0 : index
    %205 = vector.load %arg22[%c96, %c0_136] : memref<512x128xf32, #tpu.memory_space<vmem>>, vector<8x128xf32>
    %206 = arith.mulf %205, %203 : vector<8x128xf32>
    %c96_137 = arith.constant 96 : index
    %c0_138 = arith.constant 0 : index
    %207 = vector.load %arg23[%c96_137, %c0_138] : memref<512x128xf32, #tpu.memory_space<vmem>>, vector<8x128xf32>
    %208 = arith.addf %206, %207 : vector<8x128xf32>
    %c96_139 = arith.constant 96 : index
    %c0_140 = arith.constant 0 : index
    %209 = vector.load %arg25[%c96_139, %c0_140] : memref<512x128xf32, #tpu.memory_space<vmem>>, vector<8x128xf32>
    tpu.vector_store %arg25[%c96_139, %c0_140], %208 {strides = array<i32>} : memref<512x128xf32, #tpu.memory_space<vmem>>, vector<8x128xf32>,
    %c104 = arith.constant 104 : index
    %c0_141 = arith.constant 0 : index
    %210 = vector.load %arg22[%c104, %c0_141] : memref<512x128xf32, #tpu.memory_space<vmem>>, vector<8x128xf32>
    %211 = arith.mulf %210, %208 : vector<8x128xf32>
    %c104_142 = arith.constant 104 : index
    %c0_143 = arith.constant 0 : index
    %212 = vector.load %arg23[%c104_142, %c0_143] : memref<512x128xf32, #tpu.memory_space<vmem>>, vector<8x128xf32>
    %213 = arith.addf %211, %212 : vector<8x128xf32>
    %c104_144 = arith.constant 104 : index
    %c0_145 = arith.constant 0 : index
    %214 = vector.load %arg25[%c104_144, %c0_145] : memref<512x128xf32, #tpu.memory_space<vmem>>, vector<8x128xf32>
    tpu.vector_store %arg25[%c104_144, %c0_145], %213 {strides = array<i32>} : memref<512x128xf32, #tpu.memory_space<vmem>>, vector<8x128xf32>,
    %c112 = arith.constant 112 : index
    %c0_146 = arith.constant 0 : index
    %215 = vector.load %arg22[%c112, %c0_146] : memref<512x128xf32, #tpu.memory_space<vmem>>, vector<8x128xf32>
    %216 = arith.mulf %215, %213 : vector<8x128xf32>
    %c112_147 = arith.constant 112 : index
    %c0_148 = arith.constant 0 : index
    %217 = vector.load %arg23[%c112_147, %c0_148] : memref<512x128xf32, #tpu.memory_space<vmem>>, vector<8x128xf32>
    %218 = arith.addf %216, %217 : vector<8x128xf32>
    %c112_149 = arith.constant 112 : index
    %c0_150 = arith.constant 0 : index
    %219 = vector.load %arg25[%c112_149, %c0_150] : memref<512x128xf32, #tpu.memory_space<vmem>>, vector<8x128xf32>
    tpu.vector_store %arg25[%c112_149, %c0_150], %218 {strides = array<i32>} : memref<512x128xf32, #tpu.memory_space<vmem>>, vector<8x128xf32>,
    %c120 = arith.constant 120 : index
    %c0_151 = arith.constant 0 : index
    %220 = vector.load %arg22[%c120, %c0_151] : memref<512x128xf32, #tpu.memory_space<vmem>>, vector<8x128xf32>
    %221 = arith.mulf %220, %218 : vector<8x128xf32>
    %c120_152 = arith.constant 120 : index
    %c0_153 = arith.constant 0 : index
    %222 = vector.load %arg23[%c120_152, %c0_153] : memref<512x128xf32, #tpu.memory_space<vmem>>, vector<8x128xf32>
    %223 = arith.addf %221, %222 : vector<8x128xf32>
    %c120_154 = arith.constant 120 : index
    %c0_155 = arith.constant 0 : index
    %224 = vector.load %arg25[%c120_154, %c0_155] : memref<512x128xf32, #tpu.memory_space<vmem>>, vector<8x128xf32>
    tpu.vector_store %arg25[%c120_154, %c0_155], %223 {strides = array<i32>} : memref<512x128xf32, #tpu.memory_space<vmem>>, vector<8x128xf32>,
    %c128 = arith.constant 128 : index
    %c0_156 = arith.constant 0 : index
    %225 = vector.load %arg22[%c128, %c0_156] : memref<512x128xf32, #tpu.memory_space<vmem>>, vector<8x128xf32>
    %226 = arith.mulf %225, %223 : vector<8x128xf32>
    %c128_157 = arith.constant 128 : index
    %c0_158 = arith.constant 0 : index
    %227 = vector.load %arg23[%c128_157, %c0_158] : memref<512x128xf32, #tpu.memory_space<vmem>>, vector<8x128xf32>
    %228 = arith.addf %226, %227 : vector<8x128xf32>
    %c128_159 = arith.constant 128 : index
    %c0_160 = arith.constant 0 : index
    %229 = vector.load %arg25[%c128_159, %c0_160] : memref<512x128xf32, #tpu.memory_space<vmem>>, vector<8x128xf32>
    tpu.vector_store %arg25[%c128_159, %c0_160], %228 {strides = array<i32>} : memref<512x128xf32, #tpu.memory_space<vmem>>, vector<8x128xf32>,
    %c136 = arith.constant 136 : index
    %c0_161 = arith.constant 0 : index
    %230 = vector.load %arg22[%c136, %c0_161] : memref<512x128xf32, #tpu.memory_space<vmem>>, vector<8x128xf32>
    %231 = arith.mulf %230, %228 : vector<8x128xf32>
    %c136_162 = arith.constant 136 : index
    %c0_163 = arith.constant 0 : index
    %232 = vector.load %arg23[%c136_162, %c0_163] : memref<512x128xf32, #tpu.memory_space<vmem>>, vector<8x128xf32>
    %233 = arith.addf %231, %232 : vector<8x128xf32>
    %c136_164 = arith.constant 136 : index
    %c0_165 = arith.constant 0 : index
    %234 = vector.load %arg25[%c136_164, %c0_165] : memref<512x128xf32, #tpu.memory_space<vmem>>, vector<8x128xf32>
    tpu.vector_store %arg25[%c136_164, %c0_165], %233 {strides = array<i32>} : memref<512x128xf32, #tpu.memory_space<vmem>>, vector<8x128xf32>,
    %c144 = arith.constant 144 : index
    %c0_166 = arith.constant 0 : index
    %235 = vector.load %arg22[%c144, %c0_166] : memref<512x128xf32, #tpu.memory_space<vmem>>, vector<8x128xf32>
    %236 = arith.mulf %235, %233 : vector<8x128xf32>
    %c144_167 = arith.constant 144 : index
    %c0_168 = arith.constant 0 : index
    %237 = vector.load %arg23[%c144_167, %c0_168] : memref<512x128xf32, #tpu.memory_space<vmem>>, vector<8x128xf32>
    %238 = arith.addf %236, %237 : vector<8x128xf32>
    %c144_169 = arith.constant 144 : index
    %c0_170 = arith.constant 0 : index
    %239 = vector.load %arg25[%c144_169, %c0_170] : memref<512x128xf32, #tpu.memory_space<vmem>>, vector<8x128xf32>
    tpu.vector_store %arg25[%c144_169, %c0_170], %238 {strides = array<i32>} : memref<512x128xf32, #tpu.memory_space<vmem>>, vector<8x128xf32>,
    %c152 = arith.constant 152 : index
    %c0_171 = arith.constant 0 : index
    %240 = vector.load %arg22[%c152, %c0_171] : memref<512x128xf32, #tpu.memory_space<vmem>>, vector<8x128xf32>
    %241 = arith.mulf %240, %238 : vector<8x128xf32>
    %c152_172 = arith.constant 152 : index
    %c0_173 = arith.constant 0 : index
    %242 = vector.load %arg23[%c152_172, %c0_173] : memref<512x128xf32, #tpu.memory_space<vmem>>, vector<8x128xf32>
    %243 = arith.addf %241, %242 : vector<8x128xf32>
    %c152_174 = arith.constant 152 : index
    %c0_175 = arith.constant 0 : index
    %244 = vector.load %arg25[%c152_174, %c0_175] : memref<512x128xf32, #tpu.memory_space<vmem>>, vector<8x128xf32>
    tpu.vector_store %arg25[%c152_174, %c0_175], %243 {strides = array<i32>} : memref<512x128xf32, #tpu.memory_space<vmem>>, vector<8x128xf32>,
    %c160 = arith.constant 160 : index
    %c0_176 = arith.constant 0 : index
    %245 = vector.load %arg22[%c160, %c0_176] : memref<512x128xf32, #tpu.memory_space<vmem>>, vector<8x128xf32>
    %246 = arith.mulf %245, %243 : vector<8x128xf32>
    %c160_177 = arith.constant 160 : index
    %c0_178 = arith.constant 0 : index
    %247 = vector.load %arg23[%c160_177, %c0_178] : memref<512x128xf32, #tpu.memory_space<vmem>>, vector<8x128xf32>
    %248 = arith.addf %246, %247 : vector<8x128xf32>
    %c160_179 = arith.constant 160 : index
    %c0_180 = arith.constant 0 : index
    %249 = vector.load %arg25[%c160_179, %c0_180] : memref<512x128xf32, #tpu.memory_space<vmem>>, vector<8x128xf32>
    tpu.vector_store %arg25[%c160_179, %c0_180], %248 {strides = array<i32>} : memref<512x128xf32, #tpu.memory_space<vmem>>, vector<8x128xf32>,
    %c168 = arith.constant 168 : index
    %c0_181 = arith.constant 0 : index
    %250 = vector.load %arg22[%c168, %c0_181] : memref<512x128xf32, #tpu.memory_space<vmem>>, vector<8x128xf32>
    %251 = arith.mulf %250, %248 : vector<8x128xf32>
    %c168_182 = arith.constant 168 : index
    %c0_183 = arith.constant 0 : index
    %252 = vector.load %arg23[%c168_182, %c0_183] : memref<512x128xf32, #tpu.memory_space<vmem>>, vector<8x128xf32>
    %253 = arith.addf %251, %252 : vector<8x128xf32>
    %c168_184 = arith.constant 168 : index
    %c0_185 = arith.constant 0 : index
    %254 = vector.load %arg25[%c168_184, %c0_185] : memref<512x128xf32, #tpu.memory_space<vmem>>, vector<8x128xf32>
    tpu.vector_store %arg25[%c168_184, %c0_185], %253 {strides = array<i32>} : memref<512x128xf32, #tpu.memory_space<vmem>>, vector<8x128xf32>,
    %c176 = arith.constant 176 : index
    %c0_186 = arith.constant 0 : index
    %255 = vector.load %arg22[%c176, %c0_186] : memref<512x128xf32, #tpu.memory_space<vmem>>, vector<8x128xf32>
    %256 = arith.mulf %255, %253 : vector<8x128xf32>
    %c176_187 = arith.constant 176 : index
    %c0_188 = arith.constant 0 : index
    %257 = vector.load %arg23[%c176_187, %c0_188] : memref<512x128xf32, #tpu.memory_space<vmem>>, vector<8x128xf32>
    %258 = arith.addf %256, %257 : vector<8x128xf32>
    %c176_189 = arith.constant 176 : index
    %c0_190 = arith.constant 0 : index
    %259 = vector.load %arg25[%c176_189, %c0_190] : memref<512x128xf32, #tpu.memory_space<vmem>>, vector<8x128xf32>
    tpu.vector_store %arg25[%c176_189, %c0_190], %258 {strides = array<i32>} : memref<512x128xf32, #tpu.memory_space<vmem>>, vector<8x128xf32>,
    %c184 = arith.constant 184 : index
    %c0_191 = arith.constant 0 : index
    %260 = vector.load %arg22[%c184, %c0_191] : memref<512x128xf32, #tpu.memory_space<vmem>>, vector<8x128xf32>
    %261 = arith.mulf %260, %258 : vector<8x128xf32>
    %c184_192 = arith.constant 184 : index
    %c0_193 = arith.constant 0 : index
    %262 = vector.load %arg23[%c184_192, %c0_193] : memref<512x128xf32, #tpu.memory_space<vmem>>, vector<8x128xf32>
    %263 = arith.addf %261, %262 : vector<8x128xf32>
    %c184_194 = arith.constant 184 : index
    %c0_195 = arith.constant 0 : index
    %264 = vector.load %arg25[%c184_194, %c0_195] : memref<512x128xf32, #tpu.memory_space<vmem>>, vector<8x128xf32>
    tpu.vector_store %arg25[%c184_194, %c0_195], %263 {strides = array<i32>} : memref<512x128xf32, #tpu.memory_space<vmem>>, vector<8x128xf32>,
    %c192 = arith.constant 192 : index
    %c0_196 = arith.constant 0 : index
    %265 = vector.load %arg22[%c192, %c0_196] : memref<512x128xf32, #tpu.memory_space<vmem>>, vector<8x128xf32>
    %266 = arith.mulf %265, %263 : vector<8x128xf32>
    %c192_197 = arith.constant 192 : index
    %c0_198 = arith.constant 0 : index
    %267 = vector.load %arg23[%c192_197, %c0_198] : memref<512x128xf32, #tpu.memory_space<vmem>>, vector<8x128xf32>
    %268 = arith.addf %266, %267 : vector<8x128xf32>
    %c192_199 = arith.constant 192 : index
    %c0_200 = arith.constant 0 : index
    %269 = vector.load %arg25[%c192_199, %c0_200] : memref<512x128xf32, #tpu.memory_space<vmem>>, vector<8x128xf32>
    tpu.vector_store %arg25[%c192_199, %c0_200], %268 {strides = array<i32>} : memref<512x128xf32, #tpu.memory_space<vmem>>, vector<8x128xf32>,
    %c200 = arith.constant 200 : index
    %c0_201 = arith.constant 0 : index
    %270 = vector.load %arg22[%c200, %c0_201] : memref<512x128xf32, #tpu.memory_space<vmem>>, vector<8x128xf32>
    %271 = arith.mulf %270, %268 : vector<8x128xf32>
    %c200_202 = arith.constant 200 : index
    %c0_203 = arith.constant 0 : index
    %272 = vector.load %arg23[%c200_202, %c0_203] : memref<512x128xf32, #tpu.memory_space<vmem>>, vector<8x128xf32>
    %273 = arith.addf %271, %272 : vector<8x128xf32>
    %c200_204 = arith.constant 200 : index
    %c0_205 = arith.constant 0 : index
    %274 = vector.load %arg25[%c200_204, %c0_205] : memref<512x128xf32, #tpu.memory_space<vmem>>, vector<8x128xf32>
    tpu.vector_store %arg25[%c200_204, %c0_205], %273 {strides = array<i32>} : memref<512x128xf32, #tpu.memory_space<vmem>>, vector<8x128xf32>,
    %c208 = arith.constant 208 : index
    %c0_206 = arith.constant 0 : index
    %275 = vector.load %arg22[%c208, %c0_206] : memref<512x128xf32, #tpu.memory_space<vmem>>, vector<8x128xf32>
    %276 = arith.mulf %275, %273 : vector<8x128xf32>
    %c208_207 = arith.constant 208 : index
    %c0_208 = arith.constant 0 : index
    %277 = vector.load %arg23[%c208_207, %c0_208] : memref<512x128xf32, #tpu.memory_space<vmem>>, vector<8x128xf32>
    %278 = arith.addf %276, %277 : vector<8x128xf32>
    %c208_209 = arith.constant 208 : index
    %c0_210 = arith.constant 0 : index
    %279 = vector.load %arg25[%c208_209, %c0_210] : memref<512x128xf32, #tpu.memory_space<vmem>>, vector<8x128xf32>
    tpu.vector_store %arg25[%c208_209, %c0_210], %278 {strides = array<i32>} : memref<512x128xf32, #tpu.memory_space<vmem>>, vector<8x128xf32>,
    %c216 = arith.constant 216 : index
    %c0_211 = arith.constant 0 : index
    %280 = vector.load %arg22[%c216, %c0_211] : memref<512x128xf32, #tpu.memory_space<vmem>>, vector<8x128xf32>
    %281 = arith.mulf %280, %278 : vector<8x128xf32>
    %c216_212 = arith.constant 216 : index
    %c0_213 = arith.constant 0 : index
    %282 = vector.load %arg23[%c216_212, %c0_213] : memref<512x128xf32, #tpu.memory_space<vmem>>, vector<8x128xf32>
    %283 = arith.addf %281, %282 : vector<8x128xf32>
    %c216_214 = arith.constant 216 : index
    %c0_215 = arith.constant 0 : index
    %284 = vector.load %arg25[%c216_214, %c0_215] : memref<512x128xf32, #tpu.memory_space<vmem>>, vector<8x128xf32>
    tpu.vector_store %arg25[%c216_214, %c0_215], %283 {strides = array<i32>} : memref<512x128xf32, #tpu.memory_space<vmem>>, vector<8x128xf32>,
    %c224 = arith.constant 224 : index
    %c0_216 = arith.constant 0 : index
    %285 = vector.load %arg22[%c224, %c0_216] : memref<512x128xf32, #tpu.memory_space<vmem>>, vector<8x128xf32>
    %286 = arith.mulf %285, %283 : vector<8x128xf32>
    %c224_217 = arith.constant 224 : index
    %c0_218 = arith.constant 0 : index
    %287 = vector.load %arg23[%c224_217, %c0_218] : memref<512x128xf32, #tpu.memory_space<vmem>>, vector<8x128xf32>
    %288 = arith.addf %286, %287 : vector<8x128xf32>
    %c224_219 = arith.constant 224 : index
    %c0_220 = arith.constant 0 : index
    %289 = vector.load %arg25[%c224_219, %c0_220] : memref<512x128xf32, #tpu.memory_space<vmem>>, vector<8x128xf32>
    tpu.vector_store %arg25[%c224_219, %c0_220], %288 {strides = array<i32>} : memref<512x128xf32, #tpu.memory_space<vmem>>, vector<8x128xf32>,
    %c232 = arith.constant 232 : index
    %c0_221 = arith.constant 0 : index
    %290 = vector.load %arg22[%c232, %c0_221] : memref<512x128xf32, #tpu.memory_space<vmem>>, vector<8x128xf32>
    %291 = arith.mulf %290, %288 : vector<8x128xf32>
    %c232_222 = arith.constant 232 : index
    %c0_223 = arith.constant 0 : index
    %292 = vector.load %arg23[%c232_222, %c0_223] : memref<512x128xf32, #tpu.memory_space<vmem>>, vector<8x128xf32>
    %293 = arith.addf %291, %292 : vector<8x128xf32>
    %c232_224 = arith.constant 232 : index
    %c0_225 = arith.constant 0 : index
    %294 = vector.load %arg25[%c232_224, %c0_225] : memref<512x128xf32, #tpu.memory_space<vmem>>, vector<8x128xf32>
    tpu.vector_store %arg25[%c232_224, %c0_225], %293 {strides = array<i32>} : memref<512x128xf32, #tpu.memory_space<vmem>>, vector<8x128xf32>,
    %c240 = arith.constant 240 : index
    %c0_226 = arith.constant 0 : index
    %295 = vector.load %arg22[%c240, %c0_226] : memref<512x128xf32, #tpu.memory_space<vmem>>, vector<8x128xf32>
    %296 = arith.mulf %295, %293 : vector<8x128xf32>
    %c240_227 = arith.constant 240 : index
    %c0_228 = arith.constant 0 : index
    %297 = vector.load %arg23[%c240_227, %c0_228] : memref<512x128xf32, #tpu.memory_space<vmem>>, vector<8x128xf32>
    %298 = arith.addf %296, %297 : vector<8x128xf32>
    %c240_229 = arith.constant 240 : index
    %c0_230 = arith.constant 0 : index
    %299 = vector.load %arg25[%c240_229, %c0_230] : memref<512x128xf32, #tpu.memory_space<vmem>>, vector<8x128xf32>
    tpu.vector_store %arg25[%c240_229, %c0_230], %298 {strides = array<i32>} : memref<512x128xf32, #tpu.memory_space<vmem>>, vector<8x128xf32>,
    %c248 = arith.constant 248 : index
    %c0_231 = arith.constant 0 : index
    %300 = vector.load %arg22[%c248, %c0_231] : memref<512x128xf32, #tpu.memory_space<vmem>>, vector<8x128xf32>
    %301 = arith.mulf %300, %298 : vector<8x128xf32>
    %c248_232 = arith.constant 248 : index
    %c0_233 = arith.constant 0 : index
    %302 = vector.load %arg23[%c248_232, %c0_233] : memref<512x128xf32, #tpu.memory_space<vmem>>, vector<8x128xf32>
    %303 = arith.addf %301, %302 : vector<8x128xf32>
    %c248_234 = arith.constant 248 : index
    %c0_235 = arith.constant 0 : index
    %304 = vector.load %arg25[%c248_234, %c0_235] : memref<512x128xf32, #tpu.memory_space<vmem>>, vector<8x128xf32>
    tpu.vector_store %arg25[%c248_234, %c0_235], %303 {strides = array<i32>} : memref<512x128xf32, #tpu.memory_space<vmem>>, vector<8x128xf32>,
    %c256 = arith.constant 256 : index
    %c0_236 = arith.constant 0 : index
    %305 = vector.load %arg22[%c256, %c0_236] : memref<512x128xf32, #tpu.memory_space<vmem>>, vector<8x128xf32>
    %306 = arith.mulf %305, %303 : vector<8x128xf32>
    %c256_237 = arith.constant 256 : index
    %c0_238 = arith.constant 0 : index
    %307 = vector.load %arg23[%c256_237, %c0_238] : memref<512x128xf32, #tpu.memory_space<vmem>>, vector<8x128xf32>
    %308 = arith.addf %306, %307 : vector<8x128xf32>
    %c256_239 = arith.constant 256 : index
    %c0_240 = arith.constant 0 : index
    %309 = vector.load %arg25[%c256_239, %c0_240] : memref<512x128xf32, #tpu.memory_space<vmem>>, vector<8x128xf32>
    tpu.vector_store %arg25[%c256_239, %c0_240], %308 {strides = array<i32>} : memref<512x128xf32, #tpu.memory_space<vmem>>, vector<8x128xf32>,
    %c264 = arith.constant 264 : index
    %c0_241 = arith.constant 0 : index
    %310 = vector.load %arg22[%c264, %c0_241] : memref<512x128xf32, #tpu.memory_space<vmem>>, vector<8x128xf32>
    %311 = arith.mulf %310, %308 : vector<8x128xf32>
    %c264_242 = arith.constant 264 : index
    %c0_243 = arith.constant 0 : index
    %312 = vector.load %arg23[%c264_242, %c0_243] : memref<512x128xf32, #tpu.memory_space<vmem>>, vector<8x128xf32>
    %313 = arith.addf %311, %312 : vector<8x128xf32>
    %c264_244 = arith.constant 264 : index
    %c0_245 = arith.constant 0 : index
    %314 = vector.load %arg25[%c264_244, %c0_245] : memref<512x128xf32, #tpu.memory_space<vmem>>, vector<8x128xf32>
    tpu.vector_store %arg25[%c264_244, %c0_245], %313 {strides = array<i32>} : memref<512x128xf32, #tpu.memory_space<vmem>>, vector<8x128xf32>,
    %c272 = arith.constant 272 : index
    %c0_246 = arith.constant 0 : index
    %315 = vector.load %arg22[%c272, %c0_246] : memref<512x128xf32, #tpu.memory_space<vmem>>, vector<8x128xf32>
    %316 = arith.mulf %315, %313 : vector<8x128xf32>
    %c272_247 = arith.constant 272 : index
    %c0_248 = arith.constant 0 : index
    %317 = vector.load %arg23[%c272_247, %c0_248] : memref<512x128xf32, #tpu.memory_space<vmem>>, vector<8x128xf32>
    %318 = arith.addf %316, %317 : vector<8x128xf32>
    %c272_249 = arith.constant 272 : index
    %c0_250 = arith.constant 0 : index
    %319 = vector.load %arg25[%c272_249, %c0_250] : memref<512x128xf32, #tpu.memory_space<vmem>>, vector<8x128xf32>
    tpu.vector_store %arg25[%c272_249, %c0_250], %318 {strides = array<i32>} : memref<512x128xf32, #tpu.memory_space<vmem>>, vector<8x128xf32>,
    %c280 = arith.constant 280 : index
    %c0_251 = arith.constant 0 : index
    %320 = vector.load %arg22[%c280, %c0_251] : memref<512x128xf32, #tpu.memory_space<vmem>>, vector<8x128xf32>
    %321 = arith.mulf %320, %318 : vector<8x128xf32>
    %c280_252 = arith.constant 280 : index
    %c0_253 = arith.constant 0 : index
    %322 = vector.load %arg23[%c280_252, %c0_253] : memref<512x128xf32, #tpu.memory_space<vmem>>, vector<8x128xf32>
    %323 = arith.addf %321, %322 : vector<8x128xf32>
    %c280_254 = arith.constant 280 : index
    %c0_255 = arith.constant 0 : index
    %324 = vector.load %arg25[%c280_254, %c0_255] : memref<512x128xf32, #tpu.memory_space<vmem>>, vector<8x128xf32>
    tpu.vector_store %arg25[%c280_254, %c0_255], %323 {strides = array<i32>} : memref<512x128xf32, #tpu.memory_space<vmem>>, vector<8x128xf32>,
    %c288 = arith.constant 288 : index
    %c0_256 = arith.constant 0 : index
    %325 = vector.load %arg22[%c288, %c0_256] : memref<512x128xf32, #tpu.memory_space<vmem>>, vector<8x128xf32>
    %326 = arith.mulf %325, %323 : vector<8x128xf32>
    %c288_257 = arith.constant 288 : index
    %c0_258 = arith.constant 0 : index
    %327 = vector.load %arg23[%c288_257, %c0_258] : memref<512x128xf32, #tpu.memory_space<vmem>>, vector<8x128xf32>
    %328 = arith.addf %326, %327 : vector<8x128xf32>
    %c288_259 = arith.constant 288 : index
    %c0_260 = arith.constant 0 : index
    %329 = vector.load %arg25[%c288_259, %c0_260] : memref<512x128xf32, #tpu.memory_space<vmem>>, vector<8x128xf32>
    tpu.vector_store %arg25[%c288_259, %c0_260], %328 {strides = array<i32>} : memref<512x128xf32, #tpu.memory_space<vmem>>, vector<8x128xf32>,
    %c296 = arith.constant 296 : index
    %c0_261 = arith.constant 0 : index
    %330 = vector.load %arg22[%c296, %c0_261] : memref<512x128xf32, #tpu.memory_space<vmem>>, vector<8x128xf32>
    %331 = arith.mulf %330, %328 : vector<8x128xf32>
    %c296_262 = arith.constant 296 : index
    %c0_263 = arith.constant 0 : index
    %332 = vector.load %arg23[%c296_262, %c0_263] : memref<512x128xf32, #tpu.memory_space<vmem>>, vector<8x128xf32>
    %333 = arith.addf %331, %332 : vector<8x128xf32>
    %c296_264 = arith.constant 296 : index
    %c0_265 = arith.constant 0 : index
    %334 = vector.load %arg25[%c296_264, %c0_265] : memref<512x128xf32, #tpu.memory_space<vmem>>, vector<8x128xf32>
    tpu.vector_store %arg25[%c296_264, %c0_265], %333 {strides = array<i32>} : memref<512x128xf32, #tpu.memory_space<vmem>>, vector<8x128xf32>,
    %c304 = arith.constant 304 : index
    %c0_266 = arith.constant 0 : index
    %335 = vector.load %arg22[%c304, %c0_266] : memref<512x128xf32, #tpu.memory_space<vmem>>, vector<8x128xf32>
    %336 = arith.mulf %335, %333 : vector<8x128xf32>
    %c304_267 = arith.constant 304 : index
    %c0_268 = arith.constant 0 : index
    %337 = vector.load %arg23[%c304_267, %c0_268] : memref<512x128xf32, #tpu.memory_space<vmem>>, vector<8x128xf32>
    %338 = arith.addf %336, %337 : vector<8x128xf32>
    %c304_269 = arith.constant 304 : index
    %c0_270 = arith.constant 0 : index
    %339 = vector.load %arg25[%c304_269, %c0_270] : memref<512x128xf32, #tpu.memory_space<vmem>>, vector<8x128xf32>
    tpu.vector_store %arg25[%c304_269, %c0_270], %338 {strides = array<i32>} : memref<512x128xf32, #tpu.memory_space<vmem>>, vector<8x128xf32>,
    %c312 = arith.constant 312 : index
    %c0_271 = arith.constant 0 : index
    %340 = vector.load %arg22[%c312, %c0_271] : memref<512x128xf32, #tpu.memory_space<vmem>>, vector<8x128xf32>
    %341 = arith.mulf %340, %338 : vector<8x128xf32>
    %c312_272 = arith.constant 312 : index
    %c0_273 = arith.constant 0 : index
    %342 = vector.load %arg23[%c312_272, %c0_273] : memref<512x128xf32, #tpu.memory_space<vmem>>, vector<8x128xf32>
    %343 = arith.addf %341, %342 : vector<8x128xf32>
    %c312_274 = arith.constant 312 : index
    %c0_275 = arith.constant 0 : index
    %344 = vector.load %arg25[%c312_274, %c0_275] : memref<512x128xf32, #tpu.memory_space<vmem>>, vector<8x128xf32>
    tpu.vector_store %arg25[%c312_274, %c0_275], %343 {strides = array<i32>} : memref<512x128xf32, #tpu.memory_space<vmem>>, vector<8x128xf32>,
    %c320 = arith.constant 320 : index
    %c0_276 = arith.constant 0 : index
    %345 = vector.load %arg22[%c320, %c0_276] : memref<512x128xf32, #tpu.memory_space<vmem>>, vector<8x128xf32>
    %346 = arith.mulf %345, %343 : vector<8x128xf32>
    %c320_277 = arith.constant 320 : index
    %c0_278 = arith.constant 0 : index
    %347 = vector.load %arg23[%c320_277, %c0_278] : memref<512x128xf32, #tpu.memory_space<vmem>>, vector<8x128xf32>
    %348 = arith.addf %346, %347 : vector<8x128xf32>
    %c320_279 = arith.constant 320 : index
    %c0_280 = arith.constant 0 : index
    %349 = vector.load %arg25[%c320_279, %c0_280] : memref<512x128xf32, #tpu.memory_space<vmem>>, vector<8x128xf32>
    tpu.vector_store %arg25[%c320_279, %c0_280], %348 {strides = array<i32>} : memref<512x128xf32, #tpu.memory_space<vmem>>, vector<8x128xf32>,
    %c328 = arith.constant 328 : index
    %c0_281 = arith.constant 0 : index
    %350 = vector.load %arg22[%c328, %c0_281] : memref<512x128xf32, #tpu.memory_space<vmem>>, vector<8x128xf32>
    %351 = arith.mulf %350, %348 : vector<8x128xf32>
    %c328_282 = arith.constant 328 : index
    %c0_283 = arith.constant 0 : index
    %352 = vector.load %arg23[%c328_282, %c0_283] : memref<512x128xf32, #tpu.memory_space<vmem>>, vector<8x128xf32>
    %353 = arith.addf %351, %352 : vector<8x128xf32>
    %c328_284 = arith.constant 328 : index
    %c0_285 = arith.constant 0 : index
    %354 = vector.load %arg25[%c328_284, %c0_285] : memref<512x128xf32, #tpu.memory_space<vmem>>, vector<8x128xf32>
    tpu.vector_store %arg25[%c328_284, %c0_285], %353 {strides = array<i32>} : memref<512x128xf32, #tpu.memory_space<vmem>>, vector<8x128xf32>,
    %c336 = arith.constant 336 : index
    %c0_286 = arith.constant 0 : index
    %355 = vector.load %arg22[%c336, %c0_286] : memref<512x128xf32, #tpu.memory_space<vmem>>, vector<8x128xf32>
    %356 = arith.mulf %355, %353 : vector<8x128xf32>
    %c336_287 = arith.constant 336 : index
    %c0_288 = arith.constant 0 : index
    %357 = vector.load %arg23[%c336_287, %c0_288] : memref<512x128xf32, #tpu.memory_space<vmem>>, vector<8x128xf32>
    %358 = arith.addf %356, %357 : vector<8x128xf32>
    %c336_289 = arith.constant 336 : index
    %c0_290 = arith.constant 0 : index
    %359 = vector.load %arg25[%c336_289, %c0_290] : memref<512x128xf32, #tpu.memory_space<vmem>>, vector<8x128xf32>
    tpu.vector_store %arg25[%c336_289, %c0_290], %358 {strides = array<i32>} : memref<512x128xf32, #tpu.memory_space<vmem>>, vector<8x128xf32>,
    %c344 = arith.constant 344 : index
    %c0_291 = arith.constant 0 : index
    %360 = vector.load %arg22[%c344, %c0_291] : memref<512x128xf32, #tpu.memory_space<vmem>>, vector<8x128xf32>
    %361 = arith.mulf %360, %358 : vector<8x128xf32>
    %c344_292 = arith.constant 344 : index
    %c0_293 = arith.constant 0 : index
    %362 = vector.load %arg23[%c344_292, %c0_293] : memref<512x128xf32, #tpu.memory_space<vmem>>, vector<8x128xf32>
    %363 = arith.addf %361, %362 : vector<8x128xf32>
    %c344_294 = arith.constant 344 : index
    %c0_295 = arith.constant 0 : index
    %364 = vector.load %arg25[%c344_294, %c0_295] : memref<512x128xf32, #tpu.memory_space<vmem>>, vector<8x128xf32>
    tpu.vector_store %arg25[%c344_294, %c0_295], %363 {strides = array<i32>} : memref<512x128xf32, #tpu.memory_space<vmem>>, vector<8x128xf32>,
    %c352 = arith.constant 352 : index
    %c0_296 = arith.constant 0 : index
    %365 = vector.load %arg22[%c352, %c0_296] : memref<512x128xf32, #tpu.memory_space<vmem>>, vector<8x128xf32>
    %366 = arith.mulf %365, %363 : vector<8x128xf32>
    %c352_297 = arith.constant 352 : index
    %c0_298 = arith.constant 0 : index
    %367 = vector.load %arg23[%c352_297, %c0_298] : memref<512x128xf32, #tpu.memory_space<vmem>>, vector<8x128xf32>
    %368 = arith.addf %366, %367 : vector<8x128xf32>
    %c352_299 = arith.constant 352 : index
    %c0_300 = arith.constant 0 : index
    %369 = vector.load %arg25[%c352_299, %c0_300] : memref<512x128xf32, #tpu.memory_space<vmem>>, vector<8x128xf32>
    tpu.vector_store %arg25[%c352_299, %c0_300], %368 {strides = array<i32>} : memref<512x128xf32, #tpu.memory_space<vmem>>, vector<8x128xf32>,
    %c360 = arith.constant 360 : index
    %c0_301 = arith.constant 0 : index
    %370 = vector.load %arg22[%c360, %c0_301] : memref<512x128xf32, #tpu.memory_space<vmem>>, vector<8x128xf32>
    %371 = arith.mulf %370, %368 : vector<8x128xf32>
    %c360_302 = arith.constant 360 : index
    %c0_303 = arith.constant 0 : index
    %372 = vector.load %arg23[%c360_302, %c0_303] : memref<512x128xf32, #tpu.memory_space<vmem>>, vector<8x128xf32>
    %373 = arith.addf %371, %372 : vector<8x128xf32>
    %c360_304 = arith.constant 360 : index
    %c0_305 = arith.constant 0 : index
    %374 = vector.load %arg25[%c360_304, %c0_305] : memref<512x128xf32, #tpu.memory_space<vmem>>, vector<8x128xf32>
    tpu.vector_store %arg25[%c360_304, %c0_305], %373 {strides = array<i32>} : memref<512x128xf32, #tpu.memory_space<vmem>>, vector<8x128xf32>,
    %c368 = arith.constant 368 : index
    %c0_306 = arith.constant 0 : index
    %375 = vector.load %arg22[%c368, %c0_306] : memref<512x128xf32, #tpu.memory_space<vmem>>, vector<8x128xf32>
    %376 = arith.mulf %375, %373 : vector<8x128xf32>
    %c368_307 = arith.constant 368 : index
    %c0_308 = arith.constant 0 : index
    %377 = vector.load %arg23[%c368_307, %c0_308] : memref<512x128xf32, #tpu.memory_space<vmem>>, vector<8x128xf32>
    %378 = arith.addf %376, %377 : vector<8x128xf32>
    %c368_309 = arith.constant 368 : index
    %c0_310 = arith.constant 0 : index
    %379 = vector.load %arg25[%c368_309, %c0_310] : memref<512x128xf32, #tpu.memory_space<vmem>>, vector<8x128xf32>
    tpu.vector_store %arg25[%c368_309, %c0_310], %378 {strides = array<i32>} : memref<512x128xf32, #tpu.memory_space<vmem>>, vector<8x128xf32>,
    %c376 = arith.constant 376 : index
    %c0_311 = arith.constant 0 : index
    %380 = vector.load %arg22[%c376, %c0_311] : memref<512x128xf32, #tpu.memory_space<vmem>>, vector<8x128xf32>
    %381 = arith.mulf %380, %378 : vector<8x128xf32>
    %c376_312 = arith.constant 376 : index
    %c0_313 = arith.constant 0 : index
    %382 = vector.load %arg23[%c376_312, %c0_313] : memref<512x128xf32, #tpu.memory_space<vmem>>, vector<8x128xf32>
    %383 = arith.addf %381, %382 : vector<8x128xf32>
    %c376_314 = arith.constant 376 : index
    %c0_315 = arith.constant 0 : index
    %384 = vector.load %arg25[%c376_314, %c0_315] : memref<512x128xf32, #tpu.memory_space<vmem>>, vector<8x128xf32>
    tpu.vector_store %arg25[%c376_314, %c0_315], %383 {strides = array<i32>} : memref<512x128xf32, #tpu.memory_space<vmem>>, vector<8x128xf32>,
    %c384 = arith.constant 384 : index
    %c0_316 = arith.constant 0 : index
    %385 = vector.load %arg22[%c384, %c0_316] : memref<512x128xf32, #tpu.memory_space<vmem>>, vector<8x128xf32>
    %386 = arith.mulf %385, %383 : vector<8x128xf32>
    %c384_317 = arith.constant 384 : index
    %c0_318 = arith.constant 0 : index
    %387 = vector.load %arg23[%c384_317, %c0_318] : memref<512x128xf32, #tpu.memory_space<vmem>>, vector<8x128xf32>
    %388 = arith.addf %386, %387 : vector<8x128xf32>
    %c384_319 = arith.constant 384 : index
    %c0_320 = arith.constant 0 : index
    %389 = vector.load %arg25[%c384_319, %c0_320] : memref<512x128xf32, #tpu.memory_space<vmem>>, vector<8x128xf32>
    tpu.vector_store %arg25[%c384_319, %c0_320], %388 {strides = array<i32>} : memref<512x128xf32, #tpu.memory_space<vmem>>, vector<8x128xf32>,
    %c392 = arith.constant 392 : index
    %c0_321 = arith.constant 0 : index
    %390 = vector.load %arg22[%c392, %c0_321] : memref<512x128xf32, #tpu.memory_space<vmem>>, vector<8x128xf32>
    %391 = arith.mulf %390, %388 : vector<8x128xf32>
    %c392_322 = arith.constant 392 : index
    %c0_323 = arith.constant 0 : index
    %392 = vector.load %arg23[%c392_322, %c0_323] : memref<512x128xf32, #tpu.memory_space<vmem>>, vector<8x128xf32>
    %393 = arith.addf %391, %392 : vector<8x128xf32>
    %c392_324 = arith.constant 392 : index
    %c0_325 = arith.constant 0 : index
    %394 = vector.load %arg25[%c392_324, %c0_325] : memref<512x128xf32, #tpu.memory_space<vmem>>, vector<8x128xf32>
    tpu.vector_store %arg25[%c392_324, %c0_325], %393 {strides = array<i32>} : memref<512x128xf32, #tpu.memory_space<vmem>>, vector<8x128xf32>,
    %c400 = arith.constant 400 : index
    %c0_326 = arith.constant 0 : index
    %395 = vector.load %arg22[%c400, %c0_326] : memref<512x128xf32, #tpu.memory_space<vmem>>, vector<8x128xf32>
    %396 = arith.mulf %395, %393 : vector<8x128xf32>
    %c400_327 = arith.constant 400 : index
    %c0_328 = arith.constant 0 : index
    %397 = vector.load %arg23[%c400_327, %c0_328] : memref<512x128xf32, #tpu.memory_space<vmem>>, vector<8x128xf32>
    %398 = arith.addf %396, %397 : vector<8x128xf32>
    %c400_329 = arith.constant 400 : index
    %c0_330 = arith.constant 0 : index
    %399 = vector.load %arg25[%c400_329, %c0_330] : memref<512x128xf32, #tpu.memory_space<vmem>>, vector<8x128xf32>
    tpu.vector_store %arg25[%c400_329, %c0_330], %398 {strides = array<i32>} : memref<512x128xf32, #tpu.memory_space<vmem>>, vector<8x128xf32>,
    %c408 = arith.constant 408 : index
    %c0_331 = arith.constant 0 : index
    %400 = vector.load %arg22[%c408, %c0_331] : memref<512x128xf32, #tpu.memory_space<vmem>>, vector<8x128xf32>
    %401 = arith.mulf %400, %398 : vector<8x128xf32>
    %c408_332 = arith.constant 408 : index
    %c0_333 = arith.constant 0 : index
    %402 = vector.load %arg23[%c408_332, %c0_333] : memref<512x128xf32, #tpu.memory_space<vmem>>, vector<8x128xf32>
    %403 = arith.addf %401, %402 : vector<8x128xf32>
    %c408_334 = arith.constant 408 : index
    %c0_335 = arith.constant 0 : index
    %404 = vector.load %arg25[%c408_334, %c0_335] : memref<512x128xf32, #tpu.memory_space<vmem>>, vector<8x128xf32>
    tpu.vector_store %arg25[%c408_334, %c0_335], %403 {strides = array<i32>} : memref<512x128xf32, #tpu.memory_space<vmem>>, vector<8x128xf32>,
    %c416 = arith.constant 416 : index
    %c0_336 = arith.constant 0 : index
    %405 = vector.load %arg22[%c416, %c0_336] : memref<512x128xf32, #tpu.memory_space<vmem>>, vector<8x128xf32>
    %406 = arith.mulf %405, %403 : vector<8x128xf32>
    %c416_337 = arith.constant 416 : index
    %c0_338 = arith.constant 0 : index
    %407 = vector.load %arg23[%c416_337, %c0_338] : memref<512x128xf32, #tpu.memory_space<vmem>>, vector<8x128xf32>
    %408 = arith.addf %406, %407 : vector<8x128xf32>
    %c416_339 = arith.constant 416 : index
    %c0_340 = arith.constant 0 : index
    %409 = vector.load %arg25[%c416_339, %c0_340] : memref<512x128xf32, #tpu.memory_space<vmem>>, vector<8x128xf32>
    tpu.vector_store %arg25[%c416_339, %c0_340], %408 {strides = array<i32>} : memref<512x128xf32, #tpu.memory_space<vmem>>, vector<8x128xf32>,
    %c424 = arith.constant 424 : index
    %c0_341 = arith.constant 0 : index
    %410 = vector.load %arg22[%c424, %c0_341] : memref<512x128xf32, #tpu.memory_space<vmem>>, vector<8x128xf32>
    %411 = arith.mulf %410, %408 : vector<8x128xf32>
    %c424_342 = arith.constant 424 : index
    %c0_343 = arith.constant 0 : index
    %412 = vector.load %arg23[%c424_342, %c0_343] : memref<512x128xf32, #tpu.memory_space<vmem>>, vector<8x128xf32>
    %413 = arith.addf %411, %412 : vector<8x128xf32>
    %c424_344 = arith.constant 424 : index
    %c0_345 = arith.constant 0 : index
    %414 = vector.load %arg25[%c424_344, %c0_345] : memref<512x128xf32, #tpu.memory_space<vmem>>, vector<8x128xf32>
    tpu.vector_store %arg25[%c424_344, %c0_345], %413 {strides = array<i32>} : memref<512x128xf32, #tpu.memory_space<vmem>>, vector<8x128xf32>,
    %c432 = arith.constant 432 : index
    %c0_346 = arith.constant 0 : index
    %415 = vector.load %arg22[%c432, %c0_346] : memref<512x128xf32, #tpu.memory_space<vmem>>, vector<8x128xf32>
    %416 = arith.mulf %415, %413 : vector<8x128xf32>
    %c432_347 = arith.constant 432 : index
    %c0_348 = arith.constant 0 : index
    %417 = vector.load %arg23[%c432_347, %c0_348] : memref<512x128xf32, #tpu.memory_space<vmem>>, vector<8x128xf32>
    %418 = arith.addf %416, %417 : vector<8x128xf32>
    %c432_349 = arith.constant 432 : index
    %c0_350 = arith.constant 0 : index
    %419 = vector.load %arg25[%c432_349, %c0_350] : memref<512x128xf32, #tpu.memory_space<vmem>>, vector<8x128xf32>
    tpu.vector_store %arg25[%c432_349, %c0_350], %418 {strides = array<i32>} : memref<512x128xf32, #tpu.memory_space<vmem>>, vector<8x128xf32>,
    %c440 = arith.constant 440 : index
    %c0_351 = arith.constant 0 : index
    %420 = vector.load %arg22[%c440, %c0_351] : memref<512x128xf32, #tpu.memory_space<vmem>>, vector<8x128xf32>
    %421 = arith.mulf %420, %418 : vector<8x128xf32>
    %c440_352 = arith.constant 440 : index
    %c0_353 = arith.constant 0 : index
    %422 = vector.load %arg23[%c440_352, %c0_353] : memref<512x128xf32, #tpu.memory_space<vmem>>, vector<8x128xf32>
    %423 = arith.addf %421, %422 : vector<8x128xf32>
    %c440_354 = arith.constant 440 : index
    %c0_355 = arith.constant 0 : index
    %424 = vector.load %arg25[%c440_354, %c0_355] : memref<512x128xf32, #tpu.memory_space<vmem>>, vector<8x128xf32>
    tpu.vector_store %arg25[%c440_354, %c0_355], %423 {strides = array<i32>} : memref<512x128xf32, #tpu.memory_space<vmem>>, vector<8x128xf32>,
    %c448 = arith.constant 448 : index
    %c0_356 = arith.constant 0 : index
    %425 = vector.load %arg22[%c448, %c0_356] : memref<512x128xf32, #tpu.memory_space<vmem>>, vector<8x128xf32>
    %426 = arith.mulf %425, %423 : vector<8x128xf32>
    %c448_357 = arith.constant 448 : index
    %c0_358 = arith.constant 0 : index
    %427 = vector.load %arg23[%c448_357, %c0_358] : memref<512x128xf32, #tpu.memory_space<vmem>>, vector<8x128xf32>
    %428 = arith.addf %426, %427 : vector<8x128xf32>
    %c448_359 = arith.constant 448 : index
    %c0_360 = arith.constant 0 : index
    %429 = vector.load %arg25[%c448_359, %c0_360] : memref<512x128xf32, #tpu.memory_space<vmem>>, vector<8x128xf32>
    tpu.vector_store %arg25[%c448_359, %c0_360], %428 {strides = array<i32>} : memref<512x128xf32, #tpu.memory_space<vmem>>, vector<8x128xf32>,
    %c456 = arith.constant 456 : index
    %c0_361 = arith.constant 0 : index
    %430 = vector.load %arg22[%c456, %c0_361] : memref<512x128xf32, #tpu.memory_space<vmem>>, vector<8x128xf32>
    %431 = arith.mulf %430, %428 : vector<8x128xf32>
    %c456_362 = arith.constant 456 : index
    %c0_363 = arith.constant 0 : index
    %432 = vector.load %arg23[%c456_362, %c0_363] : memref<512x128xf32, #tpu.memory_space<vmem>>, vector<8x128xf32>
    %433 = arith.addf %431, %432 : vector<8x128xf32>
    %c456_364 = arith.constant 456 : index
    %c0_365 = arith.constant 0 : index
    %434 = vector.load %arg25[%c456_364, %c0_365] : memref<512x128xf32, #tpu.memory_space<vmem>>, vector<8x128xf32>
    tpu.vector_store %arg25[%c456_364, %c0_365], %433 {strides = array<i32>} : memref<512x128xf32, #tpu.memory_space<vmem>>, vector<8x128xf32>,
    %c464 = arith.constant 464 : index
    %c0_366 = arith.constant 0 : index
    %435 = vector.load %arg22[%c464, %c0_366] : memref<512x128xf32, #tpu.memory_space<vmem>>, vector<8x128xf32>
    %436 = arith.mulf %435, %433 : vector<8x128xf32>
    %c464_367 = arith.constant 464 : index
    %c0_368 = arith.constant 0 : index
    %437 = vector.load %arg23[%c464_367, %c0_368] : memref<512x128xf32, #tpu.memory_space<vmem>>, vector<8x128xf32>
    %438 = arith.addf %436, %437 : vector<8x128xf32>
    %c464_369 = arith.constant 464 : index
    %c0_370 = arith.constant 0 : index
    %439 = vector.load %arg25[%c464_369, %c0_370] : memref<512x128xf32, #tpu.memory_space<vmem>>, vector<8x128xf32>
    tpu.vector_store %arg25[%c464_369, %c0_370], %438 {strides = array<i32>} : memref<512x128xf32, #tpu.memory_space<vmem>>, vector<8x128xf32>,
    %c472 = arith.constant 472 : index
    %c0_371 = arith.constant 0 : index
    %440 = vector.load %arg22[%c472, %c0_371] : memref<512x128xf32, #tpu.memory_space<vmem>>, vector<8x128xf32>
    %441 = arith.mulf %440, %438 : vector<8x128xf32>
    %c472_372 = arith.constant 472 : index
    %c0_373 = arith.constant 0 : index
    %442 = vector.load %arg23[%c472_372, %c0_373] : memref<512x128xf32, #tpu.memory_space<vmem>>, vector<8x128xf32>
    %443 = arith.addf %441, %442 : vector<8x128xf32>
    %c472_374 = arith.constant 472 : index
    %c0_375 = arith.constant 0 : index
    %444 = vector.load %arg25[%c472_374, %c0_375] : memref<512x128xf32, #tpu.memory_space<vmem>>, vector<8x128xf32>
    tpu.vector_store %arg25[%c472_374, %c0_375], %443 {strides = array<i32>} : memref<512x128xf32, #tpu.memory_space<vmem>>, vector<8x128xf32>,
    %c480 = arith.constant 480 : index
    %c0_376 = arith.constant 0 : index
    %445 = vector.load %arg22[%c480, %c0_376] : memref<512x128xf32, #tpu.memory_space<vmem>>, vector<8x128xf32>
    %446 = arith.mulf %445, %443 : vector<8x128xf32>
    %c480_377 = arith.constant 480 : index
    %c0_378 = arith.constant 0 : index
    %447 = vector.load %arg23[%c480_377, %c0_378] : memref<512x128xf32, #tpu.memory_space<vmem>>, vector<8x128xf32>
    %448 = arith.addf %446, %447 : vector<8x128xf32>
    %c480_379 = arith.constant 480 : index
    %c0_380 = arith.constant 0 : index
    %449 = vector.load %arg25[%c480_379, %c0_380] : memref<512x128xf32, #tpu.memory_space<vmem>>, vector<8x128xf32>
    tpu.vector_store %arg25[%c480_379, %c0_380], %448 {strides = array<i32>} : memref<512x128xf32, #tpu.memory_space<vmem>>, vector<8x128xf32>,
    %c488 = arith.constant 488 : index
    %c0_381 = arith.constant 0 : index
    %450 = vector.load %arg22[%c488, %c0_381] : memref<512x128xf32, #tpu.memory_space<vmem>>, vector<8x128xf32>
    %451 = arith.mulf %450, %448 : vector<8x128xf32>
    %c488_382 = arith.constant 488 : index
    %c0_383 = arith.constant 0 : index
    %452 = vector.load %arg23[%c488_382, %c0_383] : memref<512x128xf32, #tpu.memory_space<vmem>>, vector<8x128xf32>
    %453 = arith.addf %451, %452 : vector<8x128xf32>
    %c488_384 = arith.constant 488 : index
    %c0_385 = arith.constant 0 : index
    %454 = vector.load %arg25[%c488_384, %c0_385] : memref<512x128xf32, #tpu.memory_space<vmem>>, vector<8x128xf32>
    tpu.vector_store %arg25[%c488_384, %c0_385], %453 {strides = array<i32>} : memref<512x128xf32, #tpu.memory_space<vmem>>, vector<8x128xf32>,
    %c496 = arith.constant 496 : index
    %c0_386 = arith.constant 0 : index
    %455 = vector.load %arg22[%c496, %c0_386] : memref<512x128xf32, #tpu.memory_space<vmem>>, vector<8x128xf32>
    %456 = arith.mulf %455, %453 : vector<8x128xf32>
    %c496_387 = arith.constant 496 : index
    %c0_388 = arith.constant 0 : index
    %457 = vector.load %arg23[%c496_387, %c0_388] : memref<512x128xf32, #tpu.memory_space<vmem>>, vector<8x128xf32>
    %458 = arith.addf %456, %457 : vector<8x128xf32>
    %c496_389 = arith.constant 496 : index
    %c0_390 = arith.constant 0 : index
    %459 = vector.load %arg25[%c496_389, %c0_390] : memref<512x128xf32, #tpu.memory_space<vmem>>, vector<8x128xf32>
    tpu.vector_store %arg25[%c496_389, %c0_390], %458 {strides = array<i32>} : memref<512x128xf32, #tpu.memory_space<vmem>>, vector<8x128xf32>,
    %c504 = arith.constant 504 : index
    %c0_391 = arith.constant 0 : index
    %460 = vector.load %arg22[%c504, %c0_391] : memref<512x128xf32, #tpu.memory_space<vmem>>, vector<8x128xf32>
    %461 = arith.mulf %460, %458 : vector<8x128xf32>
    %c504_392 = arith.constant 504 : index
    %c0_393 = arith.constant 0 : index
    %462 = vector.load %arg23[%c504_392, %c0_393] : memref<512x128xf32, #tpu.memory_space<vmem>>, vector<8x128xf32>
    %463 = arith.addf %461, %462 : vector<8x128xf32>
    %c504_394 = arith.constant 504 : index
    %c0_395 = arith.constant 0 : index
    %464 = vector.load %arg25[%c504_394, %c0_395] : memref<512x128xf32, #tpu.memory_space<vmem>>, vector<8x128xf32>
    tpu.vector_store %arg25[%c504_394, %c0_395], %463 {strides = array<i32>} : memref<512x128xf32, #tpu.memory_space<vmem>>, vector<8x128xf32>,
    %c0_396 = arith.constant 0 : index
    %c0_397 = arith.constant 0 : index
    %465 = vector.load %arg24[%c0_396, %c0_397] : memref<512x128xf32, #tpu.memory_space<vmem>>, vector<512x128xf32>
    %c0_398 = arith.constant 0 : index
    %c0_399 = arith.constant 0 : index
    %466 = vector.load %arg25[%c0_398, %c0_399] : memref<512x128xf32, #tpu.memory_space<vmem>>, vector<512x128xf32>
    %467 = arith.mulf %465, %466 : vector<512x128xf32>
    %c0_400 = arith.constant 0 : index
    %c0_401 = arith.constant 0 : index
    %468 = vector.load %arg15[%c0_400, %c0_401] : memref<64x512xf32, #tpu.memory_space<vmem>>, vector<64x512xf32>
    %cst_402 = arith.constant dense<0.000000e+00> : vector<64x128xf32>
    %469 = tpu.matmul %468, %467, %cst_402 {dimension_numbers = #tpu.dot_dimension_numbers<[1], [0], [0], [1], [0, 0, 1, 1], [], []>} : vector<64x512xf32>, vector<512x128xf32>, vector<64x128xf32> -> vector<64x128xf32>
    %470 = vector.extract_strided_slice %469 {offsets = [0, 0], sizes = [64, 64], strides = [1, 1]} : vector<64x128xf32> to vector<64x64xf32>
    %471 = vector.extract_strided_slice %469 {offsets = [0, 64], sizes = [64, 64], strides = [1, 1]} : vector<64x128xf32> to vector<64x64xf32>
    %472 = arith.addf %470, %471 : vector<64x64xf32>
    %c0_403 = arith.constant 0 : index
    %c0_404 = arith.constant 0 : index
    %473 = vector.load %arg16[%c0_403, %c0_404] : memref<1x64xf32, #tpu.memory_space<vmem>>, vector<1x64xf32>
    %474 = vector.broadcast %473 : vector<1x64xf32> to vector<64x64xf32>
    %475 = arith.mulf %474, %103 : vector<64x64xf32>
    %476 = arith.addf %472, %475 : vector<64x64xf32>
    %477 = vector.extract_strided_slice %476 {offsets = [0, 16], sizes = [64, 16], strides = [1, 1]} : vector<64x64xf32> to vector<64x16xf32>
    %478 = vector.extract_strided_slice %476 {offsets = [0, 32], sizes = [64, 16], strides = [1, 1]} : vector<64x64xf32> to vector<64x16xf32>
    %479 = vector.extract_strided_slice %476 {offsets = [0, 48], sizes = [64, 16], strides = [1, 1]} : vector<64x64xf32> to vector<64x16xf32>
    %480 = tpu.concatenate %477, %478, %479 in 0 : vector<64x16xf32>, vector<64x16xf32>, vector<64x16xf32> -> vector<192x16xf32>
    %481 = vector.extract_strided_slice %476 {offsets = [0, 0], sizes = [64, 16], strides = [1, 1]} : vector<64x64xf32> to vector<64x16xf32>
    %c0_405 = arith.constant 0 : index
    %c0_406 = arith.constant 0 : index
    %482 = vector.load %arg17[%c0_405, %c0_406] : memref<64x192xf32, #tpu.memory_space<vmem>>, vector<64x192xf32>
    %cst_407 = arith.constant dense<0.000000e+00> : vector<64x16xf32>
    %483 = tpu.matmul %482, %480, %cst_407 {dimension_numbers = #tpu.dot_dimension_numbers<[1], [0], [0], [1], [0, 0, 1, 1], [], []>} : vector<64x192xf32>, vector<192x16xf32>, vector<64x16xf32> -> vector<64x16xf32>
    %484 = arith.addf %481, %483 : vector<64x16xf32>
    %cst_408 = arith.constant 0.000000e+00 : f32
    %485 = vector.broadcast %cst_408 : f32 to vector<64x112xf32>
    %486 = tpu.concatenate %484, %485 in 1 : vector<64x16xf32>, vector<64x112xf32> -> vector<64x128xf32>
    %cst_409 = arith.constant 0.000000e+00 : f32
    %487 = vector.broadcast %cst_409 : f32 to vector<64x128xf32>
    %488 = tpu.concatenate %486, %487 in 0 : vector<64x128xf32>, vector<64x128xf32> -> vector<128x128xf32>
    %489 = tpu.transpose %488, [1, 0] : vector<128x128xf32> -> vector<128x128xf32>
    %490 = vector.extract_strided_slice %489 {offsets = [0, 0], sizes = [8, 64], strides = [1, 1]} : vector<128x128xf32> to vector<8x64xf32>
    %491 = vector.extract_strided_slice %489 {offsets = [8, 0], sizes = [8, 64], strides = [1, 1]} : vector<128x128xf32> to vector<8x64xf32>
    %492 = tpu.concatenate %490, %491 in 1 : vector<8x64xf32>, vector<8x64xf32> -> vector<8x128xf32>
    %cst_410 = arith.constant dense<0.000000e+00> : vector<128xf32>
    %493 = vector.multi_reduction <add>, %492, %cst_410 [0] : vector<8x128xf32> to vector<128xf32>
    %494 = vector.shape_cast %493 : vector<128xf32> to vector<1x128xf32>
    %cst_411 = arith.constant 8.000000e+00 : f32
    %495 = vector.broadcast %cst_411 : f32 to vector<1x128xf32>
    %496 = arith.divf %494, %495 : vector<1x128xf32>
    %497 = vector.broadcast %496 : vector<1x128xf32> to vector<8x128xf32>
    %498 = arith.subf %492, %497 : vector<8x128xf32>
    %499 = arith.mulf %498, %498 : vector<8x128xf32>
    %cst_412 = arith.constant dense<0.000000e+00> : vector<128xf32>
    %500 = vector.multi_reduction <add>, %499, %cst_412 [0] : vector<8x128xf32> to vector<128xf32>
    %501 = vector.shape_cast %500 : vector<128xf32> to vector<1x128xf32>
    %cst_413 = arith.constant 8.000000e+00 : f32
    %502 = vector.broadcast %cst_413 : f32 to vector<1x128xf32>
    %503 = arith.divf %501, %502 : vector<1x128xf32>
    %504 = vector.broadcast %496 : vector<1x128xf32> to vector<8x128xf32>
    %505 = arith.subf %492, %504 : vector<8x128xf32>
    %cst_414 = arith.constant 9.99999974E-6 : f32
    %506 = vector.broadcast %cst_414 : f32 to vector<1x128xf32>
    %507 = arith.addf %503, %506 : vector<1x128xf32>
    %508 = math.rsqrt %507 : vector<1x128xf32>
    %509 = vector.broadcast %508 : vector<1x128xf32> to vector<8x128xf32>
    %510 = arith.mulf %505, %509 : vector<8x128xf32>
    %c0_415 = arith.constant 0 : index
    %c0_416 = arith.constant 0 : index
    %511 = vector.load %arg18[%c0_415, %c0_416] : memref<8x1xf32, #tpu.memory_space<vmem>>, vector<8x1xf32>
    %512 = vector.broadcast %511 : vector<8x1xf32> to vector<8x128xf32>
    %513 = arith.mulf %510, %512 : vector<8x128xf32>
    %c0_417 = arith.constant 0 : index
    %c0_418 = arith.constant 0 : index
    %514 = vector.load %arg19[%c0_417, %c0_418] : memref<8x1xf32, #tpu.memory_space<vmem>>, vector<8x1xf32>
    %515 = vector.broadcast %514 : vector<8x1xf32> to vector<8x128xf32>
    %516 = arith.addf %513, %515 : vector<8x128xf32>
    %cst_419 = arith.constant 5.000000e-01 : f32
    %517 = vector.broadcast %cst_419 : f32 to vector<8x128xf32>
    %518 = arith.mulf %517, %28 : vector<8x128xf32>
    %519 = math.tanh %518 : vector<8x128xf32>
    %cst_420 = arith.constant 1.000000e+00 : f32
    %520 = vector.broadcast %cst_420 : f32 to vector<8x128xf32>
    %521 = arith.addf %519, %520 : vector<8x128xf32>
    %cst_421 = arith.constant 5.000000e-01 : f32
    %522 = vector.broadcast %cst_421 : f32 to vector<8x128xf32>
    %523 = arith.mulf %522, %521 : vector<8x128xf32>
    %524 = arith.mulf %28, %523 : vector<8x128xf32>
    %525 = arith.mulf %516, %524 : vector<8x128xf32>
    %c0_422 = arith.constant 0 : index
    %c0_423 = arith.constant 0 : index
    %526 = vector.load %arg20[%c0_422, %c0_423] : memref<4x8xf32, #tpu.memory_space<vmem>>, vector<4x8xf32>
    %cst_424 = arith.constant dense<0.000000e+00> : vector<4x128xf32>
    %527 = tpu.matmul %526, %525, %cst_424 {dimension_numbers = #tpu.dot_dimension_numbers<[1], [0], [0], [1], [0, 0, 1, 1], [], []>} : vector<4x8xf32>, vector<8x128xf32>, vector<4x128xf32> -> vector<4x128xf32>
    %528 = arith.addf %0, %527 : vector<4x128xf32>
    %c0_425 = arith.constant 0 : index
    %c0_426 = arith.constant 0 : index
    %529 = vector.load %arg21[%c0_425, %c0_426] : memref<4x128xf32, #tpu.memory_space<vmem>>, vector<4x128xf32>
    tpu.vector_store %arg21[%c0_425, %c0_426], %528 {strides = array<i32>} : memref<4x128xf32, #tpu.memory_space<vmem>>, vector<4x128xf32>,
    return
  }
}

</mosaic_0001>

<bundles_post_ra>
// kernel: vss_block_forward.1
= control target key start
LH: loop header
LB: loop body
LE: loop exit
PB: predicated region body
PF: predicated region fallthrough
CT: control target
= control target key end

     0   :  { %s8160_s0 = inlined_call_operand.vmem [shape: f32[4,128], index: 0, kind: input, shape index: {}]   ;;  %s8161_s1 = inlined_call_operand.vmem [shape: f32[4,1], index: 1, kind: input, shape index: {}]   ;;  %s8162_s2 = inlined_call_operand.vmem [shape: f32[4,1], index: 2, kind: input, shape index: {}]   ;;  %s8163_s3 = inlined_call_operand.vmem [shape: f32[16,4], index: 3, kind: input, shape index: {}]   ;;  %s8164_s4 = inlined_call_operand.hbm [shape: f32[72,128], index: 4, kind: input, shape index: {}]   ;;  %s8165_s5 = inlined_call_operand.vmem [shape: f32[8,1], index: 5, kind: input, shape index: {}]   ;;  %s8166_s6 = inlined_call_operand.vmem [shape: f32[192,64], index: 6, kind: input, shape index: {}]   ;;  %s8167_s7 = inlined_call_operand.hbm [shape: f32[64,64], index: 7, kind: input, shape index: {}]   ;;  %s8168_s8 = inlined_call_operand.vmem [shape: f32[1,64], index: 8, kind: input, shape index: {}]   ;;  %s8169_s9 = inlined_call_operand.hbm [shape: f32[64,128], index: 9, kind: input, shape index: {}]   ;;  %s8170_s10 = inlined_call_operand.hbm [shape: f32[64,128], index: 10, kind: input, shape index: {}]   ;;  %s8171_s11 = inlined_call_operand.vmem [shape: f32[512,128], index: 11, kind: input, shape index: {}]   ;;  %s8172_s12 = inlined_call_operand.hbm [shape: f32[512,128], index: 12, kind: input, shape index: {}]   ;;  %s8173_s13 = inlined_call_operand.vmem [shape: f32[128,128], index: 13, kind: input, shape index: {}]   ;;  %s8174_s14 = inlined_call_operand.vmem [shape: f32[512,64], index: 14, kind: input, shape index: {}]   ;;  %s8175_s15 = inlined_call_operand.vmem [shape: f32[64,512], index: 15, kind: input, shape index: {}]   ;;  %s8176_s16 = inlined_call_operand.vmem [shape: f32[1,64], index: 16, kind: input, shape index: {}]   ;;  %s8177_s17 = inlined_call_operand.hbm [shape: f32[64,192], index: 17, kind: input, shape index: {}]   ;;  %s8178_s18 = inlined_call_operand.vmem [shape: f32[8,1], index: 18, kind: input, shape index: {}]   ;;  %s8179_s19 = inlined_call_operand.vmem [shape: f32[8,1], index: 19, kind: input, shape index: {}]   ;;  %s8180_s20 = inlined_call_operand.vmem [shape: f32[4,8], index: 20, kind: input, shape index: {}]   ;;  %s8181_s21 = inlined_call_operand.vmem [shape: f32[4,128], index: 21, kind: output, shape index: {}]  }
   0x1   :  { %8232 = sst [smem:[#allocation66_spill]] %s8160_s0 }
   0x2   :  { %8233 = sst [smem:[#allocation67_spill]] %s8161_s1 }
   0x3   :  { %8234 = sst [smem:[#allocation68_spill]] %s8162_s2 }
   0x4   :  { %8235 = sst [smem:[#allocation69_spill]] %s8163_s3 }
   0x5   :  { %8236 = sst [smem:[#allocation70_spill]] %s8164_s4 }
   0x6   :  { %8237 = sst [smem:[#allocation71_spill]] %s8165_s5 }
   0x7   :  { %26 = vsyncpa [#allocation7], 0 }
   0x8   :  { %27 = vsyncpa [#allocation9], 0 }
   0x9   :  { %28 = vsyncpa [#allocation12], 0 }
   0xa   :  { %29 = vsyncpa [#allocation15], 0  ;;  %s59_s26 = sshll.u32 %s8167_s7, 4  ;;  %s5321_s27 = smov [#allocation8]   ;;  %s60_s26 = int_to_ptr.hbm [resolvable:$true] %s59_s26 }
   0xb   :  { %s61_s3 = sshll.u32 %s5321_s27, 4  ;;  %s87_s0 = sshll.u32 %s8170_s10, 4  ;;  %s62_s3 = int_to_ptr.vmem [resolvable:$true] %s61_s3  ;;  %s88_s0 = int_to_ptr.hbm [resolvable:$true] %s87_s0 }
   0xc   :  { %s5322_s4 = smov 128   ;;  %s5323_s30 = smov 8  }
   0xd   :  { %67 = dma.hbm_to_vmem [thread:$0]  %s60_s26, 1024, %s62_s3, [#allocation9], %s5322_s4, %s5322_s4, %s5323_s30  }
   0xe   :  { %s5324_s5 = smov [#allocation11]   ;;  %s8238_s7 = sld [smem:[#allocation70_spill]] }
   0xf   :  { %s89_s22 = sshll.u32 %s5324_s5, 4  ;;  %s74_s25 = sshll.u32 %s8169_s9, 4  ;;  %s90_s22 = int_to_ptr.vmem [resolvable:$true] %s89_s22  ;;  %s75_s25 = int_to_ptr.hbm [resolvable:$true] %s74_s25 }
  0x10   :  { %95 = dma.hbm_to_vmem [thread:$0]  %s88_s0, 1024, %s90_s22, [#allocation12], %s5322_s4, %s5322_s4, %s5323_s30  }
  0x11   :  { %s5325_s27 = smov [#allocation6]   ;;  %s5326_s26 = smov [#allocation10]  }
  0x12   :  { %s44_s28 = sshll.u32 %s5325_s27, 4  ;;  %s76_s3 = sshll.u32 %s5326_s26, 4  ;;  %s45_s28 = int_to_ptr.vmem [resolvable:$true] %s44_s28  ;;  %s77_s3 = int_to_ptr.vmem [resolvable:$true] %s76_s3 }
  0x13   :  { %s102_s23 = sshll.u32 %s8172_s12, 4  ;;  %s123_s22 = sshll.u32 %s8177_s17, 4  ;;  %s103_s23 = int_to_ptr.hbm [resolvable:$true] %s102_s23  ;;  %s124_s22 = int_to_ptr.hbm [resolvable:$true] %s123_s22 }
  0x14   :  { %s42_s24 = sshll.u32 %s8238_s7, 4  ;;  %s5327_s1 = smov [#allocation13]   ;;  %s43_s24 = int_to_ptr.hbm [resolvable:$true] %s42_s24 }
  0x15   :  { %50 = dma.hbm_to_vmem [thread:$0]  %s43_s24, 1152, %s45_s28, [#allocation7], %s5322_s4, %s5322_s4, %s5323_s30  }
  0x16   :  { %82 = dma.hbm_to_vmem [thread:$0]  %s75_s25, 1024, %s77_s3, [#allocation9], %s5322_s4, %s5322_s4, %s5323_s30  }
  0x17   :  { %s104_s7 = sshll.u32 %s5327_s1, 4  ;;  %s5328_s24 = smov [#allocation14]   ;;  %s105_s7 = int_to_ptr.vmem [resolvable:$true] %s104_s7 }
  0x18   :  { %110 = dma.hbm_to_vmem [thread:$0]  %s103_s23, 8192, %s105_s7, [#allocation12], %s5322_s4, %s5322_s4, %s5323_s30  }
  0x19   :  { %s125_s12 = sshll.u32 %s5328_s24, 4  ;;  %s5329_s10 = smov 256   ;;  %s126_s12 = int_to_ptr.vmem [resolvable:$true] %s125_s12 }
  0x1a   :  { %s5330_s2 = smov 16  }
  0x1b   :  { %131 = dma.hbm_to_vmem [thread:$0]  %s124_s22, 2048, %s126_s12, [#allocation15], %s5329_s10, %s5329_s10, %s5330_s2  }
  0x1c   :  { %5313 = dma.done.wait [#allocation7], 1152  }
  0x1d   :  { %5314 = vsyncadd [#allocation7], 4294966144 }
  0x1e   :  { %5315 = dma.done.wait [#allocation9], 2048  }
  0x1f   :  { %5316 = vsyncadd [#allocation9], 4294965248 }
  0x20   :  { %5317 = dma.done.wait [#allocation12], 9216  }
  0x21   :  { %5318 = vsyncadd [#allocation12], 4294958080 }
  0x22   :  { %5319 = dma.done.wait [#allocation15], 2048  }
  0x23   :  { %5320 = vsyncadd [#allocation15], 4294965248  ;;  %v5331_v0 = vmov 0   ;;  %s8239_s25 = sld [smem:[#allocation67_spill]]  ;;  %v5332_v3 = vmov 4.0   ;;  %vm163_vm0 = vcmask 1043456  }
  0x24   :  { %4747 = vset.pattern.permute.xlu0 %v5331_v0  ;;  %4748 = vset.pattern.permute.xlu1 %v5331_v0  ;;  %s8240_s26 = sld [smem:[#allocation68_spill]]  ;;  %4872 = vrcp.f32 %v5332_v3  ;;  %vm217_vm5 = vcmask 31744   ;;  %s5333_s22 = smov 127   ;;  %v254_v47 = vld [vmem:[#allocation6] sm:$0xff]  ;;  %v261_v48 = vld [vmem:[#allocation6 + $0x8] sm:$0xff]  ;;  %v267_v49 = vld [vmem:[#allocation6 + $0x10] sm:$0xff] }
  0x25   :  { %s8241_s5 = sld [smem:[#allocation66_spill]]  ;;  %s5334_s1 = smov 7   ;;  %v273_v54 = vld [vmem:[#allocation6 + $0x18] sm:$0xff]  ;;  %v276_v58 = vld [vmem:[#allocation6 + $0x20] sm:$0xff]  ;;  %v282_v61 = vld [vmem:[#allocation6 + $0x28] sm:$0xff]  ;;  %vm260_vm6 = vcmask 64512  }
  0x26   :  { %s8242_s0 = sld [smem:[#allocation69_spill]]  ;;  %s5335_s7 = smov 9   ;;  %vm411_vm7 = vcmask 523264   ;;  %vm669_vm8 = vcmask 130048   ;;  %vm678_vm9 = vcmask 261120   ;;  %vm687_vm10 = vcmask 392192  }
  0x27   :  { %s5336_s24 = smov 119   ;;  %s5337_s12 = smov 1  }
  0x28   :  { %s5338_s10 = smov 120   ;;  %s5339_s17 = smov 121  }
  0x29   :  { %v201_v1 = vld [vmem:[%s8239_s25] sm:$0xf]  ;;  %s8243_s27 = sld [smem:[#allocation71_spill]]  ;;  %s5340_s4 = smov 32  }
  0x2a   :  { %204 = vperm.xlu0 %4747, %v201_v1   ;;  %v208_v2 = vld [vmem:[%s8240_s26] sm:$0xf]  ;;  %v4873_v4 = vpop.eup %4872  ;;  %v288_v1 = vld [vmem:[#allocation6 + $0x30] sm:$0xff] }
  0x2b   :  { %v172_v5 = vmul.f32 4.0, %v4873_v4  ;;  %v162_v7 = vld [vmem:[%s8241_s5] sm:$0xf]  ;;  %vm176_vm1 = vweird.f32 %v4873_v4 }
  0x2c   :  { %v164_v8 = vsel %vm163_vm0, %v162_v7, 0.0  ;;  %v215_v42 = vld [vmem:[%s8242_s0] sm:$0xff] }
  0x2d   :  { %v173_v6 = vsub.f32 1.0, %v172_v5  ;;  %v165_v9 = vrot.slane %v164_v8, 4  ;;  %v294_v5 = vld [vmem:[#allocation6 + $0x38] sm:$0xff] }
  0x2f   :  { %v174_v10 = vmul.f32 %v4873_v4, %v173_v6  ;;  %v166_v11 = vadd.f32 %v165_v9, %v164_v8  ;;  %v303_v44 = vld [vmem:[%s8243_s27] sm:$0xff] }
  0x30   :  { %v300_v9 = vld [vmem:[#allocation6 + $0x40] sm:$0xff] }
  0x31   :  { %v167_v12 = vrot.slane %v166_v11, 2  ;;  %v175_v13 = vadd.f32 %v4873_v4, %v174_v10 }
  0x32   :  { %211 = vperm.xlu0 %4747, %v208_v2  }
  0x33   :  { %v168_v14 = vadd.f32 %v167_v12, %v166_v11  ;;  %v177_v16 = vsel %vm176_vm1, %v4873_v4, %v175_v13 }
  0x35   :  { %v169_v15 = vrot.slane %v168_v14, 1 }
  0x37   :  { %v170_v17 = vadd.f32 %v169_v15, %v168_v14 }
  0x39   :  { %v178_v18 = vmul.f32 %v177_v16, %v170_v17 }
  0x3b   :  { %v179_v19 = vsub.f32 %v162_v7, %v178_v18 }
  0x3d   :  { %v180_v20 = vmul.f32 %v179_v19, %v179_v19 }
  0x3f   :  { %v181_v21 = vsel %vm163_vm0, %v180_v20, 0.0 }
  0x40   :  { %v182_v22 = vrot.slane %v181_v21, 4 }
  0x42   :  { %v183_v23 = vadd.f32 %v182_v22, %v181_v21 }
  0x44   :  { %v184_v24 = vrot.slane %v183_v23, 2 }
  0x46   :  { %v185_v25 = vadd.f32 %v184_v24, %v183_v23 }
  0x48   :  { %v186_v26 = vrot.slane %v185_v25, 1 }
  0x4a   :  { %v187_v27 = vadd.f32 %v186_v26, %v185_v25 }
  0x4c   :  { %v188_v28 = vmul.f32 %v187_v27, %v177_v16 }
  0x4e   :  { %v189_v29 = vadd.f32 1e-06, %v188_v28 }
  0x50   :  { %4874 = vrsqrt.f32 %v189_v29  ;;  %vm196_vm2 = vweird.f32 %v189_v29 }
  0x56   :  { %v4875_v30 = vpop.eup %4874 }
  0x57   :  { %v191_v31 = vmul.f32 %v4875_v30, %v189_v29  ;;  %vm197_vm3 = vweird.f32 %v4875_v30 }
  0x58   :  { %vm198_vm4 = vmor %vm196_vm2, %vm197_vm3 }
  0x59   :  { %v192_v32 = vmul.f32 %v4875_v30, %v191_v31 }
  0x5b   :  { %v193_v33 = vmul.f32 0.5, %v192_v32 }
  0x5d   :  { %v194_v34 = vsub.f32 1.5, %v193_v33 }
  0x5f   :  { %v195_v35 = vmul.f32 %v4875_v30, %v194_v34 }
  0x61   :  { %v199_v37 = vsel %vm198_vm4, %v4875_v30, %v195_v35 }
  0x62   :  { %v200_v38 = vmul.f32 %v199_v37, %v179_v19 }
  0x9c   :  { %v205_v36 = vpop.permute.xlu0 %204 }
  0x9d   :  { %v207_v39 = vmul.f32 %v205_v36, %v200_v38 }
  0xa4   :  { %v212_v40 = vpop.permute.xlu0 %211 }
  0xa5   :  { %v214_v41 = vadd.f32 %v212_v40, %v207_v39 }
  0xa7   :  { %4389 = vmatpush.msk.msra.mxu0 %vm163_vm0, %v214_v41 }
  0xa8   :  { %4390 = vmatmul.msk.f32.vlgmr.msra.gmra.mxu0 %vm217_vm5, %v215_v42 }
 0x125   :  { %v244_v43 = vpop.f32.mrf.mxu0 }
 0x126   :  { %279 = vrot.lane.b32.xlu0 %v244_v43, %s5333_s22  ;;  %264 = vrot.lane.b32.xlu2 %v244_v43, %s5334_s1  ;;  %v277_v63 = vmul.f32 %v276_v58, %v244_v43  ;;  %v391_v58 = vld [vmem:[%s8166_s6 + $0x20] sm:$0xff] }
 0x127   :  { %251 = vrot.lane.b32.xlu1 %v244_v43, %s5335_s7 }
 0x12e   :  { %297 = vrot.lane.b32.xlu0 %v244_v43, %s5336_s24  ;;  %270 = vrot.lane.b32.xlu2 %v244_v43, %s5337_s12 }
 0x12f   :  { %257 = vrot.lane.b32.xlu1 %v244_v43, %s5323_s30 }
 0x136   :  { %291 = vrot.lane.b32.xlu2 %v244_v43, %s5338_s10 }
 0x137   :  { %285 = vrot.lane.b32.xlu1 %v244_v43, %s5339_s17 }
 0x13f   :  { %306 = vperm.xlu1 %4748, %v303_v44  }
 0x180   :  { %v265_v45 = vpop.permute.xlu2 %264 }
 0x181   :  { %v268_v56 = vmul.f32 %v267_v49, %v265_v45 }
 0x188   :  { %v271_v50 = vpop.permute.xlu2 %270 }
 0x189   :  { %v274_v59 = vmul.f32 %v273_v54, %v271_v50 }
 0x190   :  { %v292_v6 = vpop.permute.xlu2 %291 }
 0x191   :  { %v295_v11 = vmul.f32 %v294_v5, %v292_v6  ;;  %v401_v5 = vld [vmem:[%s8166_s6 + $0x70] sm:$0xff]  ;;  %v402_v6 = vld [vmem:[%s8166_s6 + $0x78] sm:$0xff] }
 0x198   :  { %v280_v55 = vpop.permute.xlu0 %279 }
 0x199   :  { %v252_v46 = vpop.permute.xlu1 %251  ;;  %v283_v3 = vmul.f32 %v282_v61, %v280_v55  ;;  %v388_v55 = vld [vmem:[%s8166_s6 + $0x8] sm:$0xff]  ;;  %v394_v61 = vld [vmem:[%s8166_s6 + $0x38] sm:$0xff] }
 0x19a   :  { %v255_v52 = vmul.f32 %v254_v47, %v252_v46 }
 0x1a0   :  { %v298_v10 = vpop.permute.xlu0 %297 }
 0x1a1   :  { %v258_v51 = vpop.permute.xlu1 %257  ;;  %v301_v13 = vmul.f32 %v300_v9, %v298_v10  ;;  %v404_v10 = vld [vmem:[%s8166_s6 + $0x88] sm:$0xff] }
 0x1a2   :  { %v262_v53 = vmul.f32 %v261_v48, %v258_v51 }
 0x1a4   :  { %v263_v57 = vadd.f32 %v262_v53, %v255_v52  ;;  %v387_v53 = vld [vmem:[%s8166_s6] sm:$0xff] }
 0x1a6   :  { %v269_v60 = vadd.f32 %v268_v56, %v263_v57  ;;  %v389_v56 = vld [vmem:[%s8166_s6 + $0x10] sm:$0xff]  ;;  %v390_v57 = vld [vmem:[%s8166_s6 + $0x18] sm:$0xff] }
 0x1a8   :  { %v275_v62 = vadd.f32 %v274_v59, %v269_v60  ;;  %v392_v59 = vld [vmem:[%s8166_s6 + $0x28] sm:$0xff]  ;;  %v393_v60 = vld [vmem:[%s8166_s6 + $0x30] sm:$0xff] }
 0x1a9   :  { %v286_v2 = vpop.permute.xlu1 %285 }
 0x1aa   :  { %v278_v4 = vadd.f32 %v277_v63, %v275_v62  ;;  %v289_v8 = vmul.f32 %v288_v1, %v286_v2  ;;  %v395_v62 = vld [vmem:[%s8166_s6 + $0x40] sm:$0xff]  ;;  %v396_v63 = vld [vmem:[%s8166_s6 + $0x48] sm:$0xff]  ;;  %v397_v1 = vld [vmem:[%s8166_s6 + $0x50] sm:$0xff] }
 0x1ab   :  { %v398_v2 = vld [vmem:[%s8166_s6 + $0x58] sm:$0xff] }
 0x1ac   :  { %v284_v7 = vadd.f32 %v283_v3, %v278_v4  ;;  %v399_v3 = vld [vmem:[%s8166_s6 + $0x60] sm:$0xff]  ;;  %v400_v4 = vld [vmem:[%s8166_s6 + $0x68] sm:$0xff] }
 0x1ae   :  { %v290_v12 = vadd.f32 %v289_v8, %v284_v7  ;;  %v403_v8 = vld [vmem:[%s8166_s6 + $0x80] sm:$0xff] }
 0x1b0   :  { %v296_v14 = vadd.f32 %v295_v11, %v290_v12  ;;  %v405_v12 = vld [vmem:[%s8166_s6 + $0x90] sm:$0xff] }
 0x1b1   :  { %v307_v15 = vpop.permute.xlu1 %306 }
 0x1b2   :  { %v302_v16 = vadd.f32 %v301_v13, %v296_v14  ;;  %v406_v14 = vld [vmem:[%s8166_s6 + $0x98] sm:$0xff] }
 0x1b4   :  { %v309_v17 = vadd.f32 %v307_v15, %v302_v16  ;;  %v407_v16 = vld [vmem:[%s8166_s6 + $0xa0] sm:$0xff] }
 0x1b6   :  { %v310_v18 = vmul.f32 0.5, %v309_v17 }
 0x1b8   :  { %4876 = vtanh.f32 %v310_v18  ;;  %v408_v18 = vld [vmem:[%s8166_s6 + $0xa8] sm:$0xff] }
 0x1be   :  { %v4877_v19 = vpop.eup %4876 }
 0x1bf   :  { %v312_v20 = vadd.f32 1.0, %v4877_v19 }
 0x1c1   :  { %v313_v21 = vmul.f32 0.5, %v312_v20  ;;  %v409_v20 = vld [vmem:[%s8166_s6 + $0xb0] sm:$0xff] }
 0x1c3   :  { %v314_v22 = vmul.f32 %v313_v21, %v309_v17 }
 0x1c5   :  { %315 = vxpose.xlu2.b32.start.end [1/1] (short) %v314_v22, 128  ;;  %v410_v22 = vld [vmem:[%s8166_s6 + $0xb8] sm:$0xff]  ;;  %s5341_s6 = smov 48  }
 0x227   :  { %4869 = vset.pattern.permute.xlu2 %v5331_v0 }
 0x25e   :  { %v331_v23 = vpop.trf.xlu2 }
 0x266   :  { %v332_v24 = vpop.trf.xlu2 }
 0x26e   :  { %v333_v25 = vpop.trf.xlu2 }
 0x276   :  { %v334_v26 = vpop.trf.xlu2 }
 0x27e   :  { %v335_v27 = vpop.trf.xlu2 }
 0x286   :  { %v336_v28 = vpop.trf.xlu2 }
 0x28e   :  { %v337_v29 = vpop.trf.xlu2 }
 0x296   :  { %v338_v30 = vpop.trf.xlu2 }
 0x29e   :  { %v339_v31 = vpop.trf.xlu2 }
 0x2a6   :  { %v340_v32 = vpop.trf.xlu2 }
 0x2ae   :  { %v341_v33 = vpop.trf.xlu2 }
 0x2b6   :  { %v342_v34 = vpop.trf.xlu2 }
 0x2be   :  { %v343_v35 = vpop.trf.xlu2 }
 0x2bf   :  { %363 = vrot.lane.b32.xlu1 %v343_v35, %s5323_s30 }
 0x2c6   :  { %v344_v36 = vpop.trf.xlu2 }
 0x2c7   :  { %365 = vrot.lane.b32.xlu0 %v344_v36, %s5323_s30 }
 0x2ce   :  { %v345_v37 = vpop.trf.xlu2 }
 0x2cf   :  { %367 = vrot.lane.b32.xlu1 %v345_v37, %s5323_s30 }
 0x2d6   :  { %v346_v0 = vpop.trf.xlu2 }
 0x2d7   :  { %359 = vrot.lane.b32.xlu1 %v341_v33, %s5323_s30  ;;  %369 = vrot.lane.b32.xlu0 %v346_v0, %s5323_s30  ;;  %v703_v0 = vld [vmem:[#allocation8 + $0x38] sm:$0xff] }
 0x2d8   :  { %740 = vmatpush.msra.mxu2 %v703_v0 }
 0x2df   :  { %355 = vrot.lane.b32.xlu1 %v339_v31, %s5323_s30  ;;  %361 = vrot.lane.b32.xlu0 %v342_v34, %s5323_s30 }
 0x2e7   :  { %357 = vrot.lane.b32.xlu0 %v340_v32, %s5323_s30 }
 0x331   :  { %v364_v38 = vpop.permute.xlu1 %363 }
 0x332   :  { %v5534_v46 = vsel %vm260_vm6, %v335_v27, %v364_v38  ;;  %v860_v38 = vld [vmem:[#allocation10 + $0x38] sm:$0xff] }
 0x333   :  { %869 = vmatpush.msra.mxu3 %v860_v38 }
 0x339   :  { %v366_v39 = vpop.permute.xlu0 %365 }
 0x33a   :  { %v5530_v44 = vsel %vm260_vm6, %v336_v28, %v366_v39  ;;  %v909_v39 = vld [vmem:[#allocation11 + $0x38] sm:$0xff] }
 0x33b   :  { %918 = vmatpush.msrb.mxu0 %v909_v39 }
 0x341   :  { %v368_v40 = vpop.permute.xlu1 %367 }
 0x342   :  { %v5526_v43 = vsel %vm260_vm6, %v337_v29, %v368_v40  ;;  %v702_v40 = vld [vmem:[#allocation8 + $0x30] sm:$0xff] }
 0x343   :  { %741 = vmatpush.msra.mxu2 %v702_v40 }
 0x349   :  { %v370_v41 = vpop.permute.xlu0 %369  ;;  %v360_v45 = vpop.permute.xlu1 %359 }
 0x34a   :  { %v5522_v42 = vsel %vm260_vm6, %v338_v30, %v370_v41  ;;  %v5542_v49 = vsel %vm260_vm6, %v333_v25, %v360_v45  ;;  %v859_v41 = vld [vmem:[#allocation10 + $0x30] sm:$0xff] }
 0x34b   :  { %492 = vmatpush.msra.mxu1 %v5522_v42  ;;  %v908_v45 = vld [vmem:[#allocation11 + $0x30] sm:$0xff]  ;;  %870 = vmatpush.msra.mxu3 %v859_v41 }
 0x34c   :  { %919 = vmatpush.msrb.mxu0 %v908_v45 }
 0x34d   :  { %493 = vmatpush.msra.mxu1 %v5526_v43 }
 0x34f   :  { %494 = vmatpush.msra.mxu1 %v5530_v44 }
 0x351   :  { %495 = vmatpush.msra.mxu1 %v5534_v46  ;;  %v362_v47 = vpop.permute.xlu0 %361  ;;  %v356_v50 = vpop.permute.xlu1 %355 }
 0x352   :  { %v5538_v48 = vsel %vm260_vm6, %v334_v26, %v362_v47  ;;  %v5553_v54 = vsel %vm260_vm6, %v331_v23, %v356_v50  ;;  %v701_v47 = vld [vmem:[#allocation8 + $0x28] sm:$0xff] }
 0x353   :  { %496 = vmatpush.msra.mxu1 %v5538_v48  ;;  %v858_v50 = vld [vmem:[#allocation10 + $0x28] sm:$0xff]  ;;  %742 = vmatpush.msra.mxu2 %v701_v47 }
 0x354   :  { %871 = vmatpush.msra.mxu3 %v858_v50 }
 0x355   :  { %497 = vmatpush.msra.mxu1 %v5542_v49 }
 0x359   :  { %v358_v51 = vpop.permute.xlu0 %357 }
 0x35a   :  { %v5546_v52 = vsel %vm260_vm6, %v332_v24, %v358_v51  ;;  %v907_v51 = vld [vmem:[#allocation11 + $0x28] sm:$0xff] }
 0x35b   :  { %498 = vmatpush.msra.mxu1 %v5546_v52  ;;  %920 = vmatpush.msrb.mxu0 %v907_v51 }
 0x35d   :  { %499 = vmatpush.msra.mxu1 %v5553_v54 }
 0x35e   :  { %4392 = vmatmul.msk.f32.vlgmr.msra.gmra.mxu1 %vm411_vm7, %v387_v53  ;;  %v700_v53 = vld [vmem:[#allocation8 + $0x20] sm:$0xff] }
 0x35f   :  { %743 = vmatpush.msra.mxu2 %v700_v53 }
 0x366   :  { %4393 = vmatmul.msk.f32.gmra.mxu1 %vm411_vm7, %v388_v55 }
 0x36e   :  { %4394 = vmatmul.msk.f32.gmra.mxu1 %vm411_vm7, %v389_v56  ;;  %v857_v56 = vld [vmem:[#allocation10 + $0x20] sm:$0xff] }
 0x36f   :  { %872 = vmatpush.msra.mxu3 %v857_v56 }
 0x376   :  { %4395 = vmatmul.msk.f32.gmra.mxu1 %vm411_vm7, %v390_v57  ;;  %v216_v57 = vld [vmem:[%s8242_s0 + $0x8] sm:$0xff] }
 0x377   :  { %4391 = vmatmul.msk.f32.gmra.mxu0 %vm217_vm5, %v216_v57 }
 0x37e   :  { %4396 = vmatmul.msk.f32.gmra.mxu1 %vm411_vm7, %v391_v58  ;;  %v906_v58 = vld [vmem:[#allocation11 + $0x20] sm:$0xff] }
 0x37f   :  { %921 = vmatpush.msrb.mxu0 %v906_v58 }
 0x386   :  { %4397 = vmatmul.msk.f32.gmra.mxu1 %vm411_vm7, %v392_v59  ;;  %v699_v59 = vld [vmem:[#allocation8 + $0x18] sm:$0xff] }
 0x387   :  { %744 = vmatpush.msra.mxu2 %v699_v59 }
 0x38e   :  { %4398 = vmatmul.msk.f32.gmra.mxu1 %vm411_vm7, %v393_v60  ;;  %v856_v60 = vld [vmem:[#allocation10 + $0x18] sm:$0xff] }
 0x38f   :  { %873 = vmatpush.msra.mxu3 %v856_v60 }
 0x396   :  { %4399 = vmatmul.msk.f32.gmra.mxu1 %vm411_vm7, %v394_v61  ;;  %v905_v61 = vld [vmem:[#allocation11 + $0x18] sm:$0xff] }
 0x397   :  { %922 = vmatpush.msrb.mxu0 %v905_v61 }
 0x39e   :  { %4400 = vmatmul.msk.f32.gmra.mxu1 %vm411_vm7, %v395_v62  ;;  %v698_v62 = vld [vmem:[#allocation8 + $0x10] sm:$0xff] }
 0x39f   :  { %745 = vmatpush.msra.mxu2 %v698_v62 }
 0x3a6   :  { %4401 = vmatmul.msk.f32.gmra.mxu1 %vm411_vm7, %v396_v63  ;;  %v855_v63 = vld [vmem:[#allocation10 + $0x10] sm:$0xff] }
 0x3a7   :  { %874 = vmatpush.msra.mxu3 %v855_v63  ;;  %v4870_v63 = vld [vmem:[%s8168_s8] ss:$0 sm:$0xff]  ;;  %s5342_s8 = smov 64  }
 0x3ae   :  { %4402 = vmatmul.msk.f32.gmra.mxu1 %vm411_vm7, %v397_v1  ;;  %v904_v1 = vld [vmem:[#allocation11 + $0x10] sm:$0xff] }
 0x3af   :  { %923 = vmatpush.msrb.mxu0 %v904_v1 }
 0x3b6   :  { %4403 = vmatmul.msk.f32.gmra.mxu1 %vm411_vm7, %v398_v2  ;;  %v697_v2 = vld [vmem:[#allocation8 + $0x8] sm:$0xff] }
 0x3b7   :  { %746 = vmatpush.msra.mxu2 %v697_v2 }
 0x3be   :  { %4404 = vmatmul.msk.f32.gmra.mxu1 %vm411_vm7, %v399_v3  ;;  %v854_v3 = vld [vmem:[#allocation10 + $0x8] sm:$0xff] }
 0x3bf   :  { %875 = vmatpush.msra.mxu3 %v854_v3 }
 0x3c6   :  { %4405 = vmatmul.msk.f32.gmra.mxu1 %vm411_vm7, %v400_v4  ;;  %v903_v4 = vld [vmem:[#allocation11 + $0x8] sm:$0xff] }
 0x3c7   :  { %924 = vmatpush.msrb.mxu0 %v903_v4 }
 0x3ce   :  { %4406 = vmatmul.msk.f32.gmra.mxu1 %vm411_vm7, %v401_v5 }
 0x3d6   :  { %4407 = vmatmul.msk.f32.gmra.mxu1 %vm411_vm7, %v402_v6  ;;  %v696_v6 = vld [vmem:[#allocation8] sm:$0xff] }
 0x3d7   :  { %747 = vmatpush.msra.mxu2 %v696_v6 }
 0x3db   :  { %v501_v7 = vpop.f32.mrf.mxu1 }
 0x3dc   :  { %581 = vrot.lane.b32.xlu2 %v501_v7, %s5330_s2  ;;  %v853_v7 = vld [vmem:[#allocation10] sm:$0xff] }
 0x3dd   :  { %876 = vmatpush.msra.mxu3 %v853_v7 }
 0x3de   :  { %4408 = vmatmul.msk.f32.gmra.mxu1 %vm411_vm7, %v403_v8  ;;  %v902_v8 = vld [vmem:[#allocation11] sm:$0xff] }
 0x3df   :  { %925 = vmatpush.msrb.mxu0 %v902_v8 }
 0x3e3   :  { %v504_v9 = vpop.f32.mrf.mxu1 }
 0x3e4   :  { %583 = vrot.lane.b32.xlu0 %v504_v9, %s5330_s2 }
 0x3e6   :  { %4409 = vmatmul.msk.f32.gmra.mxu1 %vm411_vm7, %v404_v10 }
 0x3eb   :  { %v507_v11 = vpop.f32.mrf.mxu1 }
 0x3ec   :  { %585 = vrot.lane.b32.xlu1 %v507_v11, %s5330_s2 }
 0x3ee   :  { %4410 = vmatmul.msk.f32.gmra.mxu1 %vm411_vm7, %v405_v12 }
 0x3f3   :  { %v510_v13 = vpop.f32.mrf.mxu1 }
 0x3f4   :  { %587 = vrot.lane.b32.xlu0 %v510_v13, %s5330_s2 }
 0x3f6   :  { %4411 = vmatmul.msk.f32.gmra.mxu1 %vm411_vm7, %v406_v14 }
 0x3fb   :  { %v513_v15 = vpop.f32.mrf.mxu1 }
 0x3fe   :  { %4412 = vmatmul.msk.f32.gmra.mxu1 %vm411_vm7, %v407_v16 }
 0x403   :  { %v516_v17 = vpop.f32.mrf.mxu1 }
 0x406   :  { %4413 = vmatmul.msk.f32.gmra.mxu1 %vm411_vm7, %v408_v18 }
 0x40b   :  { %v519_v19 = vpop.f32.mrf.mxu1 }
 0x40e   :  { %4414 = vmatmul.msk.f32.gmra.mxu1 %vm411_vm7, %v409_v20 }
 0x413   :  { %v522_v21 = vpop.f32.mrf.mxu1 }
 0x416   :  { %4415 = vmatmul.msk.f32.gmra.mxu1 %vm411_vm7, %v410_v22 }
 0x41b   :  { %v525_v23 = vpop.f32.mrf.mxu1 }
 0x41c   :  { %613 = vrot.lane.b32.xlu0 %v525_v23, %s5340_s4 }
 0x423   :  { %v528_v24 = vpop.f32.mrf.mxu1 }
 0x424   :  { %615 = vrot.lane.b32.xlu1 %v528_v24, %s5340_s4 }
 0x42b   :  { %v531_v25 = vpop.f32.mrf.mxu1 }
 0x42c   :  { %617 = vrot.lane.b32.xlu0 %v531_v25, %s5340_s4 }
 0x433   :  { %v534_v26 = vpop.f32.mrf.mxu1 }
 0x434   :  { %619 = vrot.lane.b32.xlu1 %v534_v26, %s5340_s4 }
 0x43b   :  { %v537_v27 = vpop.f32.mrf.mxu1 }
 0x43c   :  { %621 = vrot.lane.b32.xlu0 %v537_v27, %s5340_s4 }
 0x443   :  { %v540_v28 = vpop.f32.mrf.mxu1 }
 0x44b   :  { %v543_v29 = vpop.f32.mrf.mxu1 }
 0x453   :  { %v546_v30 = vpop.f32.mrf.mxu1 }
 0x456   :  { %v584_v5 = vpop.permute.xlu0 %583 }
 0x45b   :  { %v549_v31 = vpop.f32.mrf.mxu1 }
 0x45c   :  { %645 = vrot.lane.b32.xlu1 %v549_v31, %s5341_s6 }
 0x45e   :  { %v586_v9 = vpop.permute.xlu1 %585 }
 0x45f   :  { %v672_v25 = vsel %vm669_vm8, %v5542_v49, %v586_v9 }
 0x463   :  { %v552_v32 = vpop.f32.mrf.mxu1 }
 0x464   :  { %589 = vrot.lane.b32.xlu1 %v513_v15, %s5330_s2  ;;  %647 = vrot.lane.b32.xlu0 %v552_v32, %s5341_s6  ;;  %v582_v15 = vpop.permute.xlu2 %581 }
 0x465   :  { %v670_v16 = vsel %vm669_vm8, %v5553_v54, %v582_v15 }
 0x466   :  { %v588_v10 = vpop.permute.xlu0 %587 }
 0x46b   :  { %v555_v33 = vpop.f32.mrf.mxu1 }
 0x46c   :  { %591 = vrot.lane.b32.xlu0 %v516_v17, %s5330_s2  ;;  %649 = vrot.lane.b32.xlu1 %v555_v33, %s5341_s6 }
 0x473   :  { %v558_v34 = vpop.f32.mrf.mxu1 }
 0x474   :  { %623 = vrot.lane.b32.xlu1 %v540_v28, %s5340_s4  ;;  %651 = vrot.lane.b32.xlu0 %v558_v34, %s5341_s6 }
 0x47b   :  { %v561_v35 = vpop.f32.mrf.mxu1 }
 0x47c   :  { %625 = vrot.lane.b32.xlu0 %v543_v29, %s5340_s4  ;;  %653 = vrot.lane.b32.xlu1 %v561_v35, %s5341_s6  ;;  %v673_v29 = vsel %vm669_vm8, %v5538_v48, %v588_v10 }
 0x483   :  { %v564_v36 = vpop.f32.mrf.mxu1 }
 0x484   :  { %593 = vrot.lane.b32.xlu1 %v519_v19, %s5330_s2  ;;  %655 = vrot.lane.b32.xlu0 %v564_v36, %s5341_s6 }
 0x48b   :  { %v567_v37 = vpop.f32.mrf.mxu1 }
 0x48c   :  { %595 = vrot.lane.b32.xlu0 %v522_v21, %s5330_s2  ;;  %657 = vrot.lane.b32.xlu1 %v567_v37, %s5341_s6  ;;  %v671_v21 = vsel %vm669_vm8, %v5546_v52, %v584_v5 }
 0x48e   :  { %v614_v11 = vpop.permute.xlu0 %613 }
 0x48f   :  { %v679_v17 = vsel %vm678_vm9, %v670_v16, %v614_v11 }
 0x493   :  { %v570_v55 = vpop.f32.mrf.mxu1 }
 0x494   :  { %627 = vrot.lane.b32.xlu1 %v546_v30, %s5340_s4  ;;  %659 = vrot.lane.b32.xlu0 %v570_v55, %s5341_s6  ;;  %s5343_s4 = smov 112  }
 0x496   :  { %v616_v12 = vpop.permute.xlu1 %615 }
 0x497   :  { %v680_v54 = vsel %vm678_vm9, %v671_v21, %v616_v12 }
 0x49e   :  { %v618_v13 = vpop.permute.xlu0 %617 }
 0x49f   :  { %v681_v52 = vsel %vm678_vm9, %v672_v25, %v618_v13 }
 0x4a6   :  { %v620_v14 = vpop.permute.xlu1 %619 }
 0x4a7   :  { %v682_v49 = vsel %vm678_vm9, %v673_v29, %v620_v14 }
 0x4ae   :  { %v622_v18 = vpop.permute.xlu0 %621 }
 0x4ce   :  { %v646_v19 = vpop.permute.xlu1 %645 }
 0x4cf   :  { %v5681_v20 = vsel %vm687_vm10, %v679_v17, %v646_v19 }
 0x4d0   :  { %8244 = vst [vmem:[#allocation20_spill] sm:$0xff] %v5681_v20  ;;  %4416 = vmatmul.msk.f32.vlgmr.msra.gmra.mxu2 %vm411_vm7, %v5681_v20  ;;  %4424 = vmatmul.msk.f32.vlgmr.msra.gmra.mxu3 %vm411_vm7, %v5681_v20 }
 0x4d1   :  { %4432 = vmatmul.msk.f32.vlgmr.msrb.gmra.mxu0 %vm411_vm7, %v5681_v20 }
 0x4d6   :  { %v590_v22 = vpop.permute.xlu1 %589  ;;  %v648_v23 = vpop.permute.xlu0 %647 }
 0x4d7   :  { %v5693_v24 = vsel %vm687_vm10, %v680_v54, %v648_v23  ;;  %v674_v33 = vsel %vm669_vm8, %v5534_v46, %v590_v22 }
 0x4d8   :  { %8245 = vst [vmem:[#allocation21_spill] sm:$0xff] %v5693_v24  ;;  %4417 = vmatmul.msk.f32.gmra.mxu2 %vm411_vm7, %v5693_v24  ;;  %4425 = vmatmul.msk.f32.gmra.mxu3 %vm411_vm7, %v5693_v24  ;;  %v683_v34 = vsel %vm678_vm9, %v674_v33, %v622_v18 }
 0x4d9   :  { %4433 = vmatmul.msk.f32.gmra.mxu0 %vm411_vm7, %v5693_v24 }
 0x4de   :  { %v592_v26 = vpop.permute.xlu0 %591  ;;  %v650_v27 = vpop.permute.xlu1 %649 }
 0x4df   :  { %v5705_v28 = vsel %vm687_vm10, %v681_v52, %v650_v27  ;;  %v675_v37 = vsel %vm669_vm8, %v5530_v44, %v592_v26 }
 0x4e0   :  { %8246 = vst [vmem:[#allocation22_spill] sm:$0xff] %v5705_v28  ;;  %4418 = vmatmul.msk.f32.gmra.mxu2 %vm411_vm7, %v5705_v28  ;;  %4426 = vmatmul.msk.f32.gmra.mxu3 %vm411_vm7, %v5705_v28 }
 0x4e1   :  { %4434 = vmatmul.msk.f32.gmra.mxu0 %vm411_vm7, %v5705_v28 }
 0x4e6   :  { %v624_v30 = vpop.permute.xlu1 %623  ;;  %v652_v31 = vpop.permute.xlu0 %651 }
 0x4e7   :  { %v5717_v32 = vsel %vm687_vm10, %v682_v49, %v652_v31  ;;  %v684_v46 = vsel %vm678_vm9, %v675_v37, %v624_v30 }
 0x4e8   :  { %8247 = vst [vmem:[#allocation23_spill] sm:$0xff] %v5717_v32  ;;  %4419 = vmatmul.msk.f32.gmra.mxu2 %vm411_vm7, %v5717_v32  ;;  %4427 = vmatmul.msk.f32.gmra.mxu3 %vm411_vm7, %v5717_v32 }
 0x4e9   :  { %4435 = vmatmul.msk.f32.gmra.mxu0 %vm411_vm7, %v5717_v32 }
 0x4ee   :  { %v626_v48 = vpop.permute.xlu0 %625  ;;  %v654_v35 = vpop.permute.xlu1 %653 }
 0x4ef   :  { %v5729_v36 = vsel %vm687_vm10, %v683_v34, %v654_v35 }
 0x4f0   :  { %8248 = vst [vmem:[#allocation24_spill] sm:$0xff] %v5729_v36  ;;  %4420 = vmatmul.msk.f32.gmra.mxu2 %vm411_vm7, %v5729_v36  ;;  %4428 = vmatmul.msk.f32.gmra.mxu3 %vm411_vm7, %v5729_v36 }
 0x4f1   :  { %4436 = vmatmul.msk.f32.gmra.mxu0 %vm411_vm7, %v5729_v36 }
 0x4f6   :  { %v594_v0 = vpop.permute.xlu1 %593  ;;  %v656_v38 = vpop.permute.xlu0 %655 }
 0x4f7   :  { %v5741_v39 = vsel %vm687_vm10, %v684_v46, %v656_v38  ;;  %v676_v40 = vsel %vm669_vm8, %v5526_v43, %v594_v0 }
 0x4f8   :  { %8249 = vst [vmem:[#allocation25_spill] sm:$0xff] %v5741_v39  ;;  %4421 = vmatmul.msk.f32.gmra.mxu2 %vm411_vm7, %v5741_v39  ;;  %4429 = vmatmul.msk.f32.gmra.mxu3 %vm411_vm7, %v5741_v39  ;;  %v685_v41 = vsel %vm678_vm9, %v676_v40, %v626_v48 }
 0x4f9   :  { %4437 = vmatmul.msk.f32.gmra.mxu0 %vm411_vm7, %v5741_v39 }
 0x4fe   :  { %v596_v44 = vpop.permute.xlu0 %595  ;;  %v658_v45 = vpop.permute.xlu1 %657 }
 0x4ff   :  { %v5753_v47 = vsel %vm687_vm10, %v685_v41, %v658_v45  ;;  %v677_v50 = vsel %vm669_vm8, %v5522_v42, %v596_v44 }
 0x500   :  { %8250 = vst [vmem:[#allocation26_spill] sm:$0xff] %v5753_v47  ;;  %4422 = vmatmul.msk.f32.gmra.mxu2 %vm411_vm7, %v5753_v47  ;;  %4430 = vmatmul.msk.f32.gmra.mxu3 %vm411_vm7, %v5753_v47 }
 0x501   :  { %4438 = vmatmul.msk.f32.gmra.mxu0 %vm411_vm7, %v5753_v47 }
 0x506   :  { %v628_v43 = vpop.permute.xlu1 %627  ;;  %v660_v51 = vpop.permute.xlu0 %659 }
 0x507   :  { %v686_v53 = vsel %vm678_vm9, %v677_v50, %v628_v43 }
 0x508   :  { %v5765_v55 = vsel %vm687_vm10, %v686_v53, %v660_v51 }
 0x509   :  { %8251 = vst [vmem:[#allocation27_spill] sm:$0xff] %v5765_v55  ;;  %4423 = vmatmul.msk.f32.gmra.mxu2 %vm411_vm7, %v5765_v55  ;;  %4431 = vmatmul.msk.f32.gmra.mxu3 %vm411_vm7, %v5765_v55 }
 0x50a   :  { %4439 = vmatmul.msk.f32.gmra.mxu0 %vm411_vm7, %v5765_v55 }
 0x553   :  { %v749_v56 = vpop.f32.mrf.mxu2  ;;  %v5773_v57 = vpop.f32.mrf.mxu3 }
 0x554   :  { %v5786_v2 = vadd.f32 %v4870_v63, %v749_v56 }
 0x556   :  { %v781_v8 = vand.u32 2147483647, %v5786_v2 }
 0x558   :  { %v789_v12 = vsub.f32 0.0, %v781_v8 }
 0x55a   :  { %v797_v18 = vmul.f32 1.442695, %v789_v12 }
 0x55b   :  { %v752_v42 = vpop.f32.mrf.mxu2  ;;  %v5775_v58 = vpop.f32.mrf.mxu3 }
 0x55c   :  { %v5784_v1 = vadd.f32 %v4870_v63, %v752_v42 }
 0x55e   :  { %v782_v6 = vand.u32 2147483647, %v5784_v1 }
 0x560   :  { %v790_v10 = vsub.f32 0.0, %v782_v6 }
 0x562   :  { %v799_v16 = vmul.f32 1.442695, %v790_v10 }
 0x563   :  { %v755_v59 = vpop.f32.mrf.mxu2  ;;  %v5777_v60 = vpop.f32.mrf.mxu3 }
 0x564   :  { %v5802_v26 = vadd.f32 %v4870_v63, %v755_v59 }
 0x566   :  { %v783_v48 = vand.u32 2147483647, %v5802_v26 }
 0x568   :  { %v791_v41 = vsub.f32 0.0, %v783_v48 }
 0x56a   :  { %v801_v53 = vmul.f32 1.442695, %v791_v41 }
 0x56b   :  { %v758_v61 = vpop.f32.mrf.mxu2  ;;  %v5779_v62 = vpop.f32.mrf.mxu3 }
 0x56c   :  { %v5798_v25 = vadd.f32 %v4870_v63, %v758_v61 }
 0x56e   :  { %v784_v30 = vand.u32 2147483647, %v5798_v25 }
 0x570   :  { %v792_v0 = vsub.f32 0.0, %v784_v30 }
 0x572   :  { %v803_v51 = vmul.f32 1.442695, %v792_v0 }
 0x573   :  { %v761_v3 = vpop.f32.mrf.mxu2  ;;  %v5788_v4 = vpop.f32.mrf.mxu3 }
 0x574   :  { %v5790_v5 = vadd.f32 %v4870_v63, %v761_v3 }
 0x576   :  { %v785_v7 = vand.u32 2147483647, %v5790_v5  ;;  %v777_v3 = vmax.f32 %v5790_v5, 0.0 }
 0x578   :  { %v793_v9 = vsub.f32 0.0, %v785_v7 }
 0x57a   :  { %v805_v11 = vmul.f32 1.442695, %v793_v9 }
 0x57b   :  { %v764_v13 = vpop.f32.mrf.mxu2  ;;  %v893_v14 = vpop.f32.mrf.mxu3 }
 0x57c   :  { %4878 = vpow2.f32 %v805_v11  ;;  %v5795_v15 = vadd.f32 %v4870_v63, %v764_v13 }
 0x57d   :  { %4880 = vpow2.f32 %v799_v16  ;;  %v773_v16 = vmax.f32 %v5786_v2, 0.0 }
 0x57e   :  { %v786_v17 = vand.u32 2147483647, %v5795_v15  ;;  %4882 = vpow2.f32 %v797_v18  ;;  %v778_v6 = vmax.f32 %v5795_v15, 0.0 }
 0x580   :  { %v794_v19 = vsub.f32 0.0, %v786_v17 }
 0x582   :  { %v4879_v21 = vpop.eup %4878  ;;  %v807_v54 = vmul.f32 1.442695, %v794_v19 }
 0x583   :  { %v767_v22 = vpop.f32.mrf.mxu2  ;;  %v896_v23 = vpop.f32.mrf.mxu3  ;;  %v817_v27 = vadd.f32 1.0, %v4879_v21 }
 0x584   :  { %4884 = vpow2.f32 %v807_v54  ;;  %v5800_v52 = vadd.f32 %v4870_v63, %v767_v22  ;;  %v4881_v49 = vpop.eup %4880 }
 0x585   :  { %v4883_v33 = vpop.eup %4882  ;;  %4886 = vlog2.f32 %v817_v27  ;;  %v814_v37 = vadd.f32 1.0, %v4881_v49 }
 0x586   :  { %v787_v29 = vand.u32 2147483647, %v5800_v52  ;;  %v813_v44 = vadd.f32 1.0, %v4883_v33 }
 0x588   :  { %v795_v31 = vsub.f32 0.0, %v787_v29 }
 0x58a   :  { %v4885_v34 = vpop.eup %4884  ;;  %v809_v35 = vmul.f32 1.442695, %v795_v31 }
 0x58b   :  { %v818_v46 = vadd.f32 1.0, %v4885_v34  ;;  %v4887_v50 = vpop.eup %4886 }
 0x58c   :  { %v770_v38 = vpop.f32.mrf.mxu2  ;;  %v899_v40 = vpop.f32.mrf.mxu3  ;;  %v830_v42 = vmul.f32 0.6931472, %v4887_v50 }
 0x58d   :  { %4888 = vlog2.f32 %v818_v46  ;;  %v5807_v45 = vadd.f32 %v4870_v63, %v770_v38  ;;  %1904 = vmatpush.msrb.mxu1 %v899_v40  ;;  %4713 = vmatpush.msrb.mxu3 %v899_v40  ;;  %v775_v38 = vmax.f32 %v5802_v26, 0.0 }
 0x58e   :  { %4890 = vpow2.f32 %v809_v35  ;;  %v5816_v9 = vadd.f32 %v830_v42, %v777_v3  ;;  %v5888_v42 = vpop.f32.mrf.mxu0  ;;  %v5899_v3 = vld [vmem:[%s8174_s14] sm:$0xff] }
 0x58f   :  { %4892 = vlog2.f32 %v814_v37  ;;  %v788_v43 = vand.u32 2147483647, %v5807_v45  ;;  %1905 = vmatpush.msrb.mxu1 %v896_v23  ;;  %4714 = vmatpush.msrb.mxu3 %v896_v23  ;;  %v779_v23 = vmax.f32 %v5800_v52, 0.0  ;;  %v780_v27 = vmax.f32 %v5807_v45, 0.0  ;;  %8252 = vst [vmem:[#allocation28_spill] sm:$0xff] %v5888_v42 }
 0x590   :  { %4894 = vlog2.f32 %v813_v44  ;;  %v5846_v49 = vmul.f32 %v5816_v9, %v5729_v36  ;;  %v776_v52 = vmax.f32 %v5798_v25, 0.0 }
 0x591   :  { %v796_v56 = vsub.f32 0.0, %v788_v43  ;;  %1906 = vmatpush.msrb.mxu1 %v893_v14  ;;  %4715 = vmatpush.msrb.mxu3 %v893_v14  ;;  %4896 = vpow2.f32 %v803_v51  ;;  %v774_v14 = vmax.f32 %v5784_v1, 0.0 }
 0x592   :  { %4898 = vpow2.f32 %v801_v53 }
 0x593   :  { %v4889_v59 = vpop.eup %4888  ;;  %v811_v61 = vmul.f32 1.442695, %v796_v56  ;;  %1907 = vmatpush.msrb.mxu1 %v5788_v4  ;;  %4716 = vmatpush.msrb.mxu3 %v5788_v4 }
 0x594   :  { %v4891_v63 = vpop.eup %4890  ;;  %v832_v7 = vmul.f32 0.6931472, %v4889_v59 }
 0x595   :  { %v4893_v8 = vpop.eup %4892  ;;  %1908 = vmatpush.msrb.mxu1 %v5779_v62  ;;  %4717 = vmatpush.msrb.mxu3 %v5779_v62  ;;  %4900 = vpow2.f32 %v811_v61  ;;  %v819_v4 = vadd.f32 1.0, %v4891_v63 }
 0x596   :  { %v5818_v10 = vadd.f32 %v832_v7, %v778_v6  ;;  %v4895_v11 = vpop.eup %4894  ;;  %v824_v5 = vmul.f32 0.6931472, %v4893_v8  ;;  %v5890_v59 = vpop.f32.mrf.mxu0  ;;  %v5908_v7 = vld [vmem:[%s8174_s14 + $0x78] sm:$0xff]  ;;  %v5913_v8 = vld [vmem:[%s8174_s14 + $0x8] sm:$0xff] }
 0x597   :  { %1909 = vmatpush.msrb.mxu1 %v5777_v60  ;;  %4718 = vmatpush.msrb.mxu3 %v5777_v60  ;;  %v4897_v62 = vpop.eup %4896  ;;  %v822_v13 = vmul.f32 0.6931472, %v4895_v11  ;;  %4902 = vlog2.f32 %v819_v4 }
 0x598   :  { %v4749_v12 = vpack.i.bf16 %v5816_v9, %v5818_v10  ;;  %v4899_v15 = vpop.eup %4898  ;;  %v5831_v17 = vadd.f32 %v824_v5, %v774_v14  ;;  %v816_v18 = vadd.f32 1.0, %v4897_v62  ;;  %v5840_v2 = vmul.f32 %v5818_v10, %v5741_v39  ;;  %v5924_v5 = vld [vmem:[%s8174_s14 + $0x80] sm:$0xff] }
 0x599   :  { %1910 = vmatpush.msrb.mxu1 %v5775_v58  ;;  %4719 = vmatpush.msrb.mxu3 %v5775_v58  ;;  %v5833_v19 = vadd.f32 %v822_v13, %v773_v16  ;;  %v815_v21 = vadd.f32 1.0, %v4899_v15  ;;  %v6476_v39 = vld [vmem:[%s8174_s14 + $0x160] sm:$0xff] }
 0x59a   :  { %4750 = vrot.lane.b32.xlu0 %v4749_v12, %s5342_s8  ;;  %v4769_v48 = vpack.i.bf16 %v5846_v49, %v5840_v2  ;;  %v5855_v0 = vmul.f32 %v5831_v17, %v5693_v24  ;;  %v5929_v12 = vld [vmem:[%s8174_s14 + $0x10] sm:$0xff]  ;;  %8264 = vst [vmem:[#allocation40_spill] sm:$0xff] %v6476_v39 }
 0x59b   :  { %1911 = vmatpush.msrb.mxu1 %v5773_v57  ;;  %4720 = vmatpush.msrb.mxu3 %v5773_v57  ;;  %v4901_v60 = vpop.eup %4900  ;;  %v4764_v1 = vpack.i.bf16 %v5833_v19, %v5831_v17  ;;  %v5860_v44 = vmul.f32 %v5833_v19, %v5681_v20  ;;  %v6442_v24 = vld [vmem:[%s8174_s14 + $0x150] sm:$0xff] }
 0x59c   :  { %v820_v58 = vadd.f32 1.0, %v4901_v60  ;;  %4504 = vmatmul.msk.f32.vlgmr.msrb.gmra.mxu1 %vm411_vm7, %v5899_v3  ;;  %4519 = vmatmul.msk.f32.vlgmr.msrb.gmra.mxu3 %vm411_vm7, %v5908_v7  ;;  %8260 = vst [vmem:[#allocation36_spill] sm:$0xff] %v6442_v24 }
 0x59d   :  { %v4903_v54 = vpop.eup %4902  ;;  %v4784_v45 = vpack.i.bf16 %v5860_v44, %v5855_v0 }
 0x59e   :  { %4904 = vlog2.f32 %v820_v58  ;;  %v834_v57 = vmul.f32 0.6931472, %v4903_v54  ;;  %v5892_v61 = vpop.f32.mrf.mxu0 }
 0x59f   :  { %4906 = vlog2.f32 %v816_v18  ;;  %v5941_v18 = vld [vmem:[%s8174_s14 + $0x18] sm:$0xff] }
 0x5a0   :  { %4908 = vlog2.f32 %v815_v21  ;;  %v843_v31 = vadd.f32 %v834_v57, %v779_v23  ;;  %v5946_v21 = vld [vmem:[%s8174_s14 + $0x88] sm:$0xff] }
 0x5a2   :  { %4765 = vrot.lane.b32.xlu0 %v4764_v1, %s5342_s8  ;;  %v5873_v26 = vmul.f32 %v843_v31, %v5753_v47 }
 0x5a4   :  { %v4905_v22 = vpop.eup %4904  ;;  %4505 = vmatmul.msk.f32.gmra.mxu1 %vm411_vm7, %v5913_v8  ;;  %4520 = vmatmul.msk.f32.gmra.mxu3 %vm411_vm7, %v5924_v5 }
 0x5a5   :  { %v836_v29 = vmul.f32 0.6931472, %v4905_v22  ;;  %v4907_v30 = vpop.eup %4906 }
 0x5a6   :  { %v4909_v34 = vpop.eup %4908  ;;  %v828_v35 = vmul.f32 0.6931472, %v4907_v30  ;;  %v5894_v63 = vpop.f32.mrf.mxu0 }
 0x5a7   :  { %v844_v33 = vadd.f32 %v836_v29, %v780_v27  ;;  %v826_v46 = vmul.f32 0.6931472, %v4909_v34 }
 0x5a8   :  { %v840_v40 = vadd.f32 %v828_v35, %v776_v52 }
 0x5a9   :  { %v4754_v37 = vpack.i.bf16 %v843_v31, %v844_v33  ;;  %v5862_v41 = vadd.f32 %v826_v46, %v775_v38  ;;  %v5870_v50 = vmul.f32 %v844_v33, %v5765_v55 }
 0x5aa   :  { %4770 = vrot.lane.b32.xlu0 %v4769_v48, %s5342_s8  ;;  %v5879_v51 = vmul.f32 %v840_v40, %v5717_v32  ;;  %v5961_v48 = vld [vmem:[%s8174_s14 + $0x20] sm:$0xff] }
 0x5ab   :  { %4755 = vrot.lane.b32.xlu1 %v4754_v37, %s5342_s8  ;;  %v4759_v25 = vpack.i.bf16 %v5862_v41, %v840_v40  ;;  %v4774_v43 = vpack.i.bf16 %v5873_v26, %v5870_v50  ;;  %v5883_v53 = vmul.f32 %v5862_v41, %v5705_v28  ;;  %v6459_v28 = vld [vmem:[%s8174_s14 + $0x158] sm:$0xff] }
 0x5ac   :  { %4506 = vmatmul.msk.f32.gmra.mxu1 %vm411_vm7, %v5929_v12  ;;  %4521 = vmatmul.msk.f32.gmra.mxu3 %vm411_vm7, %v5946_v21  ;;  %8262 = vst [vmem:[#allocation38_spill] sm:$0xff] %v6459_v28 }
 0x5ad   :  { %v4779_v56 = vpack.i.bf16 %v5883_v53, %v5879_v51 }
 0x5ae   :  { %v5901_v6 = vpop.f32.mrf.mxu0 }
 0x5b2   :  { %4785 = vrot.lane.b32.xlu0 %v4784_v45, %s5342_s8 }
 0x5b3   :  { %4760 = vrot.lane.b32.xlu1 %v4759_v25, %s5342_s8  ;;  %v5987_v25 = vld [vmem:[%s8174_s14 + $0x28] sm:$0xff] }
 0x5b4   :  { %4507 = vmatmul.msk.f32.gmra.mxu1 %vm411_vm7, %v5941_v18 }
 0x5b6   :  { %v5919_v11 = vpop.f32.mrf.mxu0 }
 0x5bb   :  { %4775 = vrot.lane.b32.xlu1 %v4774_v43, %s5342_s8 }
 0x5bc   :  { %4508 = vmatmul.msk.f32.gmra.mxu1 %vm411_vm7, %v5961_v48 }
 0x5be   :  { %v5935_v62 = vpop.f32.mrf.mxu0 }
 0x5c3   :  { %4780 = vrot.lane.b32.xlu1 %v4779_v56, %s5342_s8 }
 0x5c4   :  { %4509 = vmatmul.msk.f32.gmra.mxu1 %vm411_vm7, %v5987_v25 }
 0x5c6   :  { %v945_v23 = vpop.f32.mrf.mxu0 }
 0x60c   :  { %v4751_v4 = vpop.permute.xlu0 %4750 }
 0x60d   :  { %v4752_v60 = vunpack.i.l.bf16 %v4751_v4  ;;  %v4753_v1 = vunpack.i.h.bf16 %v4751_v4 }
 0x60f   :  { %v1132_v57 = vsel %vm411_vm7, %v5818_v10, %v4752_v60  ;;  %v1131_v30 = vsel %vm411_vm7, %v5816_v9, %v4753_v1  ;;  %v5966_v10 = vld [vmem:[%s8174_s14 + $0x90] sm:$0xff]  ;;  %v6102_v1 = vld [vmem:[%s8174_s14 + $0xc0] sm:$0xff] }
 0x610   :  { %4522 = vmatmul.msk.f32.gmra.mxu3 %vm411_vm7, %v5966_v10 }
 0x614   :  { %v4766_v58 = vpop.permute.xlu0 %4765 }
 0x615   :  { %v4768_v34 = vunpack.i.h.bf16 %v4766_v58 }
 0x61c   :  { %v4771_v35 = vpop.permute.xlu0 %4770 }
 0x61d   :  { %v4756_v13 = vpop.permute.xlu1 %4755  ;;  %v4772_v45 = vunpack.i.l.bf16 %v4771_v35  ;;  %v4773_v43 = vunpack.i.h.bf16 %v4771_v35  ;;  %v1089_v35 = vld [vmem:[%s8173_s13 + $0x50] sm:$0xff] }
 0x61e   :  { %v4758_v14 = vunpack.i.h.bf16 %v4756_v13  ;;  %v4757_v15 = vunpack.i.l.bf16 %v4756_v13 }
 0x61f   :  { %v1958_v42 = vpop.f32.mrf.mxu3 }
 0x620   :  { %v1134_v16 = vsel %vm411_vm7, %v844_v33, %v4757_v15  ;;  %v1133_v54 = vsel %vm411_vm7, %v843_v31, %v4758_v14  ;;  %v4767_v31 = vunpack.i.l.bf16 %v4766_v58  ;;  %v6097_v58 = vld [vmem:[%s8174_s14 + $0x50] sm:$0xff] }
 0x621   :  { %1375 = vmatpush.msra.mxu0 %v1134_v16  ;;  %4705 = vmatpush.msrb.mxu2 %v1134_v16 }
 0x622   :  { %v1128_v37 = vsel %vm411_vm7, %v5831_v17, %v4767_v31  ;;  %v1091_v31 = vld [vmem:[%s8173_s13 + $0x60] sm:$0xff] }
 0x623   :  { %1376 = vmatpush.msra.mxu0 %v1133_v54  ;;  %4706 = vmatpush.msrb.mxu2 %v1133_v54  ;;  %v6115_v54 = vld [vmem:[%s8174_s14 + $0x58] sm:$0xff] }
 0x624   :  { %v4786_v4 = vpop.permute.xlu0 %4785 }
 0x625   :  { %v4761_v22 = vpop.permute.xlu1 %4760  ;;  %1377 = vmatpush.msra.mxu0 %v1132_v57  ;;  %4707 = vmatpush.msrb.mxu2 %v1132_v57  ;;  %v4787_v60 = vunpack.i.l.bf16 %v4786_v4  ;;  %v6120_v57 = vld [vmem:[%s8174_s14 + $0xc8] sm:$0xff] }
 0x626   :  { %v4763_v27 = vunpack.i.h.bf16 %v4761_v22  ;;  %v4762_v29 = vunpack.i.l.bf16 %v4761_v22  ;;  %v6133_v22 = vld [vmem:[%s8174_s14 + $0x60] sm:$0xff] }
 0x627   :  { %1378 = vmatpush.msra.mxu0 %v1131_v30  ;;  %4708 = vmatpush.msrb.mxu2 %v1131_v30  ;;  %v1092_v30 = vld [vmem:[%s8173_s13 + $0x68] sm:$0xff]  ;;  %v1961_v20 = vpop.f32.mrf.mxu3 }
 0x628   :  { %v1130_v33 = vsel %vm411_vm7, %v840_v40, %v4762_v29  ;;  %v1129_v9 = vsel %vm411_vm7, %v5862_v41, %v4763_v27  ;;  %v1127_v40 = vsel %vm411_vm7, %v5833_v19, %v4768_v34  ;;  %v948_v41 = vpop.f32.mrf.mxu0  ;;  %v5992_v19 = vld [vmem:[%s8174_s14 + $0x98] sm:$0xff]  ;;  %v6141_v27 = vld [vmem:[%s8174_s14 + $0xd0] sm:$0xff] }
 0x629   :  { %1379 = vmatpush.msra.mxu0 %v1130_v33  ;;  %4709 = vmatpush.msrb.mxu2 %v1130_v33  ;;  %v1093_v29 = vld [vmem:[%s8173_s13 + $0x70] sm:$0xff]  ;;  %v6163_v33 = vld [vmem:[%s8174_s14 + $0x68] sm:$0xff]  ;;  %v1090_v34 = vld [vmem:[%s8173_s13 + $0x58] sm:$0xff] }
 0x62a   :  { %4523 = vmatmul.msk.f32.gmra.mxu3 %vm411_vm7, %v5992_v19 }
 0x62b   :  { %1380 = vmatpush.msra.mxu0 %v1129_v9  ;;  %4710 = vmatpush.msrb.mxu2 %v1129_v9  ;;  %v6171_v9 = vld [vmem:[%s8174_s14 + $0xd8] sm:$0xff] }
 0x62d   :  { %v4776_v46 = vpop.permute.xlu1 %4775  ;;  %1381 = vmatpush.msra.mxu0 %v1128_v37  ;;  %4711 = vmatpush.msrb.mxu2 %v1128_v37  ;;  %v1088_v37 = vld [vmem:[%s8173_s13 + $0x48] sm:$0xff] }
 0x62e   :  { %v4778_v52 = vunpack.i.h.bf16 %v4776_v46  ;;  %v4777_v38 = vunpack.i.l.bf16 %v4776_v46  ;;  %v1087_v46 = vld [vmem:[%s8173_s13 + $0x40] sm:$0xff] }
 0x62f   :  { %1382 = vmatpush.msra.mxu0 %v1127_v40  ;;  %4712 = vmatpush.msrb.mxu2 %v1127_v40  ;;  %v6201_v40 = vld [vmem:[%s8174_s14 + $0xe0] sm:$0xff]  ;;  %v1964_v55 = vpop.f32.mrf.mxu3 }
 0x630   :  { %4440 = vmatmul.msk.f32.vlgmr.msra.gmra.mxu0 %vm411_vm7, %v5899_v3  ;;  %4455 = vmatmul.msk.f32.vlgmr.msrb.gmra.mxu2 %vm411_vm7, %v5908_v7  ;;  %v1174_v17 = vsel %vm411_vm7, %v5870_v50, %v4777_v38  ;;  %v1173_v56 = vsel %vm411_vm7, %v5873_v26, %v4778_v52  ;;  %v1172_v50 = vsel %vm411_vm7, %v5840_v2, %v4772_v45  ;;  %v6193_v52 = vld [vmem:[%s8174_s14 + $0x70] sm:$0xff]  ;;  %v1086_v38 = vld [vmem:[%s8173_s13 + $0x38] sm:$0xff]  ;;  %v1084_v45 = vld [vmem:[%s8173_s13 + $0x28] sm:$0xff] }
 0x631   :  { %2723 = vmatpush.msra.mxu2 %v948_v41  ;;  %2386 = vmatpush.msra.mxu1 %v1174_v17  ;;  %v1171_v26 = vsel %vm411_vm7, %v5846_v49, %v4773_v43  ;;  %v6021_v49 = vld [vmem:[%s8174_s14 + $0xa0] sm:$0xff]  ;;  %v1085_v41 = vld [vmem:[%s8173_s13 + $0x30] sm:$0xff]  ;;  %v1082_v43 = vld [vmem:[%s8173_s13 + $0x18] sm:$0xff] }
 0x632   :  { %4524 = vmatmul.msk.f32.gmra.mxu3 %vm411_vm7, %v6021_v49  ;;  %v1083_v17 = vld [vmem:[%s8173_s13 + $0x20] sm:$0xff] }
 0x633   :  { %2724 = vmatpush.msra.mxu2 %v945_v23  ;;  %2387 = vmatpush.msra.mxu1 %v1173_v56  ;;  %v1094_v23 = vld [vmem:[%s8173_s13 + $0x78] sm:$0xff]  ;;  %v1081_v56 = vld [vmem:[%s8173_s13 + $0x10] sm:$0xff] }
 0x634   :  { %2169 = vmatpush.msrb.mxu0 %v1094_v23  ;;  %2988 = vmatpush.msra.mxu3 %v1094_v23 }
 0x635   :  { %2725 = vmatpush.msra.mxu2 %v5935_v62  ;;  %v4781_v13 = vpop.permute.xlu1 %4780  ;;  %2388 = vmatpush.msra.mxu1 %v1172_v50  ;;  %v6015_v62 = vld [vmem:[%s8174_s14 + $0x30] sm:$0xff]  ;;  %v6229_v50 = vld [vmem:[%s8174_s14 + $0xe8] sm:$0xff] }
 0x636   :  { %v4783_v14 = vunpack.i.h.bf16 %v4781_v13  ;;  %v4782_v15 = vunpack.i.l.bf16 %v4781_v13  ;;  %4510 = vmatmul.msk.f32.gmra.mxu1 %vm411_vm7, %v6015_v62  ;;  %2170 = vmatpush.msrb.mxu0 %v1093_v29  ;;  %v1079_v13 = vld [vmem:[%s8173_s13] sm:$0xff] }
 0x637   :  { %2726 = vmatpush.msra.mxu2 %v5919_v11  ;;  %2389 = vmatpush.msra.mxu1 %v1171_v26  ;;  %v4788_v11 = vunpack.i.h.bf16 %v4786_v4  ;;  %v1080_v4 = vld [vmem:[%s8173_s13 + $0x8] sm:$0xff]  ;;  %v6261_v26 = vld [vmem:[%s8174_s14 + $0xf8] sm:$0xff] }
 0x638   :  { %4441 = vmatmul.msk.f32.gmra.mxu0 %vm411_vm7, %v5913_v8  ;;  %4456 = vmatmul.msk.f32.gmra.mxu2 %vm411_vm7, %v5924_v5  ;;  %v1170_v2 = vsel %vm411_vm7, %v5879_v51, %v4782_v15  ;;  %v1169_v16 = vsel %vm411_vm7, %v5883_v53, %v4783_v14  ;;  %v1168_v51 = vsel %vm411_vm7, %v5855_v0, %v4787_v60  ;;  %v6043_v53 = vld [vmem:[%s8174_s14 + $0x38] sm:$0xff]  ;;  %v6048_v0 = vld [vmem:[%s8174_s14 + $0xa8] sm:$0xff]  ;;  %v1913_v14 = vpop.f32.mrf.mxu1  ;;  %v6274_v60 = vld [vmem:[%s8174_s14 + $0x100] sm:$0xff] }
 0x639   :  { %2727 = vmatpush.msra.mxu2 %v5901_v6  ;;  %2390 = vmatpush.msra.mxu1 %v1170_v2  ;;  %v1167_v6 = vsel %vm411_vm7, %v5860_v44, %v4788_v11  ;;  %v6061_v44 = vld [vmem:[%s8174_s14 + $0x40] sm:$0xff]  ;;  %v1015_v2 = vld [vmem:[#allocation13] sm:$0xff] }
 0x63a   :  { %4525 = vmatmul.msk.f32.gmra.mxu3 %vm411_vm7, %v6048_v0  ;;  %2171 = vmatpush.msrb.mxu0 %v1092_v30  ;;  %v6287_v11 = vld [vmem:[%s8174_s14 + $0x108] sm:$0xff] }
 0x63b   :  { %2728 = vmatpush.msra.mxu2 %v5894_v63  ;;  %2391 = vmatpush.msra.mxu1 %v1169_v16  ;;  %v6084_v63 = vld [vmem:[%s8174_s14 + $0xb8] sm:$0xff] }
 0x63c   :  { %2989 = vmatpush.msra.mxu3 %v1093_v29  ;;  %2172 = vmatpush.msrb.mxu0 %v1091_v31 }
 0x63d   :  { %2729 = vmatpush.msra.mxu2 %v5892_v61  ;;  %2392 = vmatpush.msra.mxu1 %v1168_v51  ;;  %v6079_v61 = vld [vmem:[%s8174_s14 + $0x48] sm:$0xff]  ;;  %v1016_v51 = vld [vmem:[#allocation13 + $0x8] sm:$0xff] }
 0x63e   :  { %4511 = vmatmul.msk.f32.gmra.mxu1 %vm411_vm7, %v6043_v53  ;;  %2990 = vmatpush.msra.mxu3 %v1092_v30  ;;  %v1017_v30 = vld [vmem:[#allocation13 + $0x10] sm:$0xff] }
 0x63f   :  { %2730 = vmatpush.msra.mxu2 %v5890_v59  ;;  %2393 = vmatpush.msra.mxu1 %v1167_v6  ;;  %v6066_v59 = vld [vmem:[%s8174_s14 + $0xb0] sm:$0xff] }
 0x640   :  { %4442 = vmatmul.msk.f32.gmra.mxu0 %vm411_vm7, %v5929_v12  ;;  %4457 = vmatmul.msk.f32.gmra.mxu2 %vm411_vm7, %v5946_v21  ;;  %v1916_v15 = vpop.f32.mrf.mxu1  ;;  %v6298_v6 = vld [vmem:[%s8174_s14 + $0x110] sm:$0xff] }
 0x641   :  { %2991 = vmatpush.msra.mxu3 %v1091_v31  ;;  %2173 = vmatpush.msrb.mxu0 %v1090_v34  ;;  %v6311_v31 = vld [vmem:[%s8174_s14 + $0x118] sm:$0xff] }
 0x642   :  { %4526 = vmatmul.msk.f32.gmra.mxu3 %vm411_vm7, %v6066_v59 }
 0x643   :  { %2992 = vmatpush.msra.mxu3 %v1090_v34  ;;  %2174 = vmatpush.msrb.mxu0 %v1089_v35 }
 0x645   :  { %2993 = vmatpush.msra.mxu3 %v1089_v35  ;;  %2175 = vmatpush.msrb.mxu0 %v1088_v37 }
 0x646   :  { %4512 = vmatmul.msk.f32.gmra.mxu1 %vm411_vm7, %v6061_v44 }
 0x647   :  { %2994 = vmatpush.msra.mxu3 %v1088_v37  ;;  %2176 = vmatpush.msrb.mxu0 %v1087_v46 }
 0x648   :  { %4443 = vmatmul.msk.f32.gmra.mxu0 %vm411_vm7, %v5941_v18  ;;  %4458 = vmatmul.msk.f32.gmra.mxu2 %vm411_vm7, %v5966_v10 }
 0x649   :  { %2995 = vmatpush.msra.mxu3 %v1087_v46  ;;  %2177 = vmatpush.msrb.mxu0 %v1086_v38  ;;  %v1018_v46 = vld [vmem:[#allocation13 + $0x18] sm:$0xff] }
 0x64a   :  { %4527 = vmatmul.msk.f32.gmra.mxu3 %vm411_vm7, %v6084_v63 }
 0x64b   :  { %2996 = vmatpush.msra.mxu3 %v1086_v38  ;;  %2178 = vmatpush.msrb.mxu0 %v1085_v41  ;;  %v6326_v38 = vld [vmem:[%s8174_s14 + $0x120] sm:$0xff] }
 0x64d   :  { %2997 = vmatpush.msra.mxu3 %v1085_v41  ;;  %2179 = vmatpush.msrb.mxu0 %v1084_v45 }
 0x64e   :  { %4513 = vmatmul.msk.f32.gmra.mxu1 %vm411_vm7, %v6079_v61 }
 0x64f   :  { %2998 = vmatpush.msra.mxu3 %v1084_v45  ;;  %2180 = vmatpush.msrb.mxu0 %v1083_v17 }
 0x650   :  { %4444 = vmatmul.msk.f32.gmra.mxu0 %vm411_vm7, %v5961_v48  ;;  %4459 = vmatmul.msk.f32.gmra.mxu2 %vm411_vm7, %v5992_v19 }
 0x651   :  { %2999 = vmatpush.msra.mxu3 %v1083_v17  ;;  %2181 = vmatpush.msrb.mxu0 %v1082_v43 }
 0x652   :  { %4528 = vmatmul.msk.f32.gmra.mxu3 %vm411_vm7, %v6102_v1 }
 0x653   :  { %3000 = vmatpush.msra.mxu3 %v1082_v43  ;;  %2182 = vmatpush.msrb.mxu0 %v1081_v56  ;;  %v1019_v43 = vld [vmem:[#allocation13 + $0x20] sm:$0xff] }
 0x655   :  { %3001 = vmatpush.msra.mxu3 %v1081_v56  ;;  %2183 = vmatpush.msrb.mxu0 %v1080_v4  ;;  %v6341_v56 = vld [vmem:[%s8174_s14 + $0x128] sm:$0xff] }
 0x656   :  { %4514 = vmatmul.msk.f32.gmra.mxu1 %vm411_vm7, %v6097_v58 }
 0x657   :  { %3002 = vmatpush.msra.mxu3 %v1080_v4  ;;  %2184 = vmatpush.msrb.mxu0 %v1079_v13 }
 0x658   :  { %4445 = vmatmul.msk.f32.gmra.mxu0 %vm411_vm7, %v5987_v25  ;;  %4460 = vmatmul.msk.f32.gmra.mxu2 %vm411_vm7, %v6021_v49 }
 0x659   :  { %3003 = vmatpush.msra.mxu3 %v1079_v13 }
 0x65a   :  { %4529 = vmatmul.msk.f32.gmra.mxu3 %vm411_vm7, %v6120_v57 }
 0x65e   :  { %4515 = vmatmul.msk.f32.gmra.mxu1 %vm411_vm7, %v6115_v54 }
 0x660   :  { %4446 = vmatmul.msk.f32.gmra.mxu0 %vm411_vm7, %v6015_v62  ;;  %4461 = vmatmul.msk.f32.gmra.mxu2 %vm411_vm7, %v6048_v0 }
 0x662   :  { %4530 = vmatmul.msk.f32.gmra.mxu3 %vm411_vm7, %v6141_v27 }
 0x666   :  { %4516 = vmatmul.msk.f32.gmra.mxu1 %vm411_vm7, %v6133_v22 }
 0x668   :  { %4447 = vmatmul.msk.f32.gmra.mxu0 %vm411_vm7, %v6043_v53  ;;  %4462 = vmatmul.msk.f32.gmra.mxu2 %vm411_vm7, %v6066_v59 }
 0x66a   :  { %4531 = vmatmul.msk.f32.gmra.mxu3 %vm411_vm7, %v6171_v9 }
 0x66e   :  { %4517 = vmatmul.msk.f32.gmra.mxu1 %vm411_vm7, %v6163_v33 }
 0x670   :  { %4448 = vmatmul.msk.f32.gmra.mxu0 %vm411_vm7, %v6061_v44  ;;  %4463 = vmatmul.msk.f32.gmra.mxu2 %vm411_vm7, %v6084_v63 }
 0x672   :  { %4532 = vmatmul.msk.f32.gmra.mxu3 %vm411_vm7, %v6201_v40 }
 0x676   :  { %4518 = vmatmul.msk.f32.gmra.mxu1 %vm411_vm7, %v6193_v52 }
 0x678   :  { %4449 = vmatmul.msk.f32.gmra.mxu0 %vm411_vm7, %v6079_v61  ;;  %4464 = vmatmul.msk.f32.gmra.mxu2 %vm411_vm7, %v6102_v1 }
 0x67a   :  { %4533 = vmatmul.msk.f32.gmra.mxu3 %vm411_vm7, %v6229_v50 }
 0x67e   :  { %4568 = vmatmul.msk.f32.vlgmr.msra.gmra.mxu1 %vm411_vm7, %v5899_v3  ;;  %v6248_v3 = vld [vmem:[%s8174_s14 + $0xf0] sm:$0xff] }
 0x680   :  { %4450 = vmatmul.msk.f32.gmra.mxu0 %vm411_vm7, %v6097_v58  ;;  %4465 = vmatmul.msk.f32.gmra.mxu2 %vm411_vm7, %v6120_v57 }
 0x682   :  { %4534 = vmatmul.msk.f32.gmra.mxu3 %vm411_vm7, %v6248_v3 }
 0x686   :  { %4569 = vmatmul.msk.f32.gmra.mxu1 %vm411_vm7, %v5913_v8  ;;  %v1919_v8 = vpop.f32.mrf.mxu1 }
 0x687   :  { %v2107_v34 = vmul.f32 %v1919_v8, %v1017_v30  ;;  %v6356_v8 = vld [vmem:[%s8174_s14 + $0x130] sm:$0xff] }
 0x688   :  { %4451 = vmatmul.msk.f32.gmra.mxu0 %vm411_vm7, %v6115_v54  ;;  %4466 = vmatmul.msk.f32.gmra.mxu2 %vm411_vm7, %v6141_v27 }
 0x68a   :  { %4535 = vmatmul.msk.f32.gmra.mxu3 %vm411_vm7, %v6261_v26 }
 0x68e   :  { %4570 = vmatmul.msk.f32.gmra.mxu1 %vm411_vm7, %v5929_v12  ;;  %v1922_v12 = vpop.f32.mrf.mxu1 }
 0x68f   :  { %v2108_v41 = vmul.f32 %v1922_v12, %v1018_v46 }
 0x690   :  { %4452 = vmatmul.msk.f32.gmra.mxu0 %vm411_vm7, %v6133_v22  ;;  %4467 = vmatmul.msk.f32.gmra.mxu2 %vm411_vm7, %v6171_v9 }
 0x692   :  { %4536 = vmatmul.msk.f32.gmra.mxu3 %vm411_vm7, %v6274_v60 }
 0x693   :  { %v1967_v36 = vpop.f32.mrf.mxu3 }
 0x696   :  { %4571 = vmatmul.msk.f32.gmra.mxu1 %vm411_vm7, %v5941_v18  ;;  %v2105_v18 = vmul.f32 %v1913_v14, %v1015_v2  ;;  %v1925_v16 = vpop.f32.mrf.mxu1 }
 0x697   :  { %v2109_v4 = vmul.f32 %v1925_v16, %v1019_v43  ;;  %v1021_v16 = vld [vmem:[#allocation13 + $0x30] sm:$0xff] }
 0x698   :  { %4453 = vmatmul.msk.f32.gmra.mxu0 %vm411_vm7, %v6163_v33  ;;  %4468 = vmatmul.msk.f32.gmra.mxu2 %vm411_vm7, %v6201_v40 }
 0x69a   :  { %4537 = vmatmul.msk.f32.gmra.mxu3 %vm411_vm7, %v6287_v11 }
 0x69e   :  { %4572 = vmatmul.msk.f32.gmra.mxu1 %vm411_vm7, %v5961_v48  ;;  %v2106_v48 = vmul.f32 %v1916_v15, %v1016_v51  ;;  %v1928_v29 = vpop.f32.mrf.mxu1  ;;  %v1020_v15 = vld [vmem:[#allocation13 + $0x28] sm:$0xff] }
 0x69f   :  { %v2110_v12 = vmul.f32 %v1928_v29, %v1020_v15  ;;  %v1022_v29 = vld [vmem:[#allocation13 + $0x38] sm:$0xff] }
 0x6a0   :  { %4454 = vmatmul.msk.f32.gmra.mxu0 %vm411_vm7, %v6193_v52  ;;  %4469 = vmatmul.msk.f32.gmra.mxu2 %vm411_vm7, %v6229_v50 }
 0x6a2   :  { %4538 = vmatmul.msk.f32.gmra.mxu3 %vm411_vm7, %v6298_v6 }
 0x6a6   :  { %4573 = vmatmul.msk.f32.gmra.mxu1 %vm411_vm7, %v5987_v25 }
 0x6a8   :  { %4470 = vmatmul.msk.f32.gmra.mxu2 %vm411_vm7, %v6248_v3  ;;  %2185 = vmatmul.f32.vlgmr.msrb.gmra.mxu0 %v2105_v18 }
 0x6aa   :  { %4539 = vmatmul.msk.f32.gmra.mxu3 %vm411_vm7, %v6311_v31 }
 0x6ad   :  { %v6304_v23 = vpop.f32.mrf.mxu0 }
 0x6ae   :  { %4574 = vmatmul.msk.f32.gmra.mxu1 %vm411_vm7, %v6015_v62 }
 0x6b0   :  { %4471 = vmatmul.msk.f32.gmra.mxu2 %vm411_vm7, %v6261_v26  ;;  %2188 = vmatmul.f32.gmra.mxu0 %v2106_v48 }
 0x6b2   :  { %4540 = vmatmul.msk.f32.gmra.mxu3 %vm411_vm7, %v6326_v38 }
 0x6b3   :  { %v6317_v25 = vpop.f32.mrf.mxu2  ;;  %v1931_v37 = vpop.f32.mrf.mxu1 }
 0x6b5   :  { %v6319_v35 = vpop.f32.mrf.mxu0 }
 0x6b6   :  { %4575 = vmatmul.msk.f32.gmra.mxu1 %vm411_vm7, %v6043_v53 }
 0x6b8   :  { %4472 = vmatmul.msk.f32.gmra.mxu2 %vm411_vm7, %v6274_v60  ;;  %2191 = vmatmul.f32.gmra.mxu0 %v2107_v34 }
 0x6ba   :  { %4541 = vmatmul.msk.f32.gmra.mxu3 %vm411_vm7, %v6341_v56 }
 0x6bb   :  { %v6332_v62 = vpop.f32.mrf.mxu2  ;;  %v1934_v17 = vpop.f32.mrf.mxu1 }
 0x6bc   :  { %v2112_v46 = vmul.f32 %v1934_v17, %v1022_v29 }
 0x6bd   :  { %v6334_v45 = vpop.f32.mrf.mxu0 }
 0x6be   :  { %4576 = vmatmul.msk.f32.gmra.mxu1 %vm411_vm7, %v6061_v44 }
 0x6c0   :  { %4473 = vmatmul.msk.f32.gmra.mxu2 %vm411_vm7, %v6287_v11  ;;  %2194 = vmatmul.f32.gmra.mxu0 %v2108_v41 }
 0x6c2   :  { %4542 = vmatmul.msk.f32.gmra.mxu3 %vm411_vm7, %v6356_v8 }
 0x6c3   :  { %v6347_v53 = vpop.f32.mrf.mxu2  ;;  %v1937_v14 = vpop.f32.mrf.mxu1 }
 0x6c5   :  { %v6349_v13 = vpop.f32.mrf.mxu0 }
 0x6c6   :  { %4577 = vmatmul.msk.f32.gmra.mxu1 %vm411_vm7, %v6079_v61  ;;  %v2111_v61 = vmul.f32 %v1931_v37, %v1021_v16  ;;  %v1023_v37 = vld [vmem:[#allocation13 + $0x40] sm:$0xff] }
 0x6c8   :  { %4474 = vmatmul.msk.f32.gmra.mxu2 %vm411_vm7, %v6298_v6  ;;  %2197 = vmatmul.f32.gmra.mxu0 %v2109_v4  ;;  %v2113_v4 = vmul.f32 %v1937_v14, %v1023_v37  ;;  %v1025_v14 = vld [vmem:[#allocation13 + $0x50] sm:$0xff]  ;;  %v6414_v37 = vld [vmem:[%s8174_s14 + $0x140] sm:$0xff] }
 0x6c9   :  { %8256 = vst [vmem:[#allocation32_spill] sm:$0xff] %v6414_v37 }
 0x6cb   :  { %v6362_v44 = vpop.f32.mrf.mxu2  ;;  %v1940_v18 = vpop.f32.mrf.mxu1 }
 0x6cd   :  { %v6364_v2 = vpop.f32.mrf.mxu0 }
 0x6ce   :  { %4578 = vmatmul.msk.f32.gmra.mxu1 %vm411_vm7, %v6097_v58 }
 0x6d0   :  { %4475 = vmatmul.msk.f32.gmra.mxu2 %vm411_vm7, %v6311_v31  ;;  %2200 = vmatmul.f32.gmra.mxu0 %v2110_v12 }
 0x6d3   :  { %v6370_v51 = vpop.f32.mrf.mxu2  ;;  %v1943_v30 = vpop.f32.mrf.mxu1 }
 0x6d5   :  { %v6372_v48 = vpop.f32.mrf.mxu0 }
 0x6d6   :  { %4579 = vmatmul.msk.f32.gmra.mxu1 %vm411_vm7, %v6115_v54  ;;  %v1024_v54 = vld [vmem:[#allocation13 + $0x48] sm:$0xff] }
 0x6d7   :  { %v2114_v16 = vmul.f32 %v1940_v18, %v1024_v54 }
 0x6d8   :  { %4476 = vmatmul.msk.f32.gmra.mxu2 %vm411_vm7, %v6326_v38  ;;  %2203 = vmatmul.f32.gmra.mxu0 %v2111_v61 }
 0x6db   :  { %v6378_v34 = vpop.f32.mrf.mxu2  ;;  %v1946_v58 = vpop.f32.mrf.mxu1 }
 0x6dd   :  { %v6380_v41 = vpop.f32.mrf.mxu0 }
 0x6de   :  { %4580 = vmatmul.msk.f32.gmra.mxu1 %vm411_vm7, %v6133_v22  ;;  %v6401_v22 = vld [vmem:[%s8174_s14 + $0x138] sm:$0xff] }
 0x6df   :  { %4543 = vmatmul.msk.f32.gmra.mxu3 %vm411_vm7, %v6401_v22 }
 0x6e0   :  { %4477 = vmatmul.msk.f32.gmra.mxu2 %vm411_vm7, %v6341_v56  ;;  %2206 = vmatmul.f32.gmra.mxu0 %v2112_v46 }
 0x6e3   :  { %v6386_v43 = vpop.f32.mrf.mxu2  ;;  %v1949_v17 = vpop.f32.mrf.mxu1 }
 0x6e4   :  { %8253 = vst [vmem:[#allocation29_spill] sm:$0xff] %v6386_v43 }
 0x6e5   :  { %v6388_v15 = vpop.f32.mrf.mxu0 }
 0x6e6   :  { %4581 = vmatmul.msk.f32.gmra.mxu1 %vm411_vm7, %v6163_v33  ;;  %v2115_v33 = vmul.f32 %v1943_v30, %v1025_v14 }
 0x6e7   :  { %4544 = vmatmul.msk.f32.gmra.mxu3 %vm411_vm7, %v6414_v37 }
 0x6e8   :  { %4478 = vmatmul.msk.f32.gmra.mxu2 %vm411_vm7, %v6356_v8  ;;  %2209 = vmatmul.f32.gmra.mxu0 %v2113_v4  ;;  %v1026_v4 = vld [vmem:[#allocation13 + $0x58] sm:$0xff] }
 0x6e9   :  { %v2116_v54 = vmul.f32 %v1946_v58, %v1026_v4 }
 0x6eb   :  { %v6394_v12 = vpop.f32.mrf.mxu2  ;;  %v1952_v46 = vpop.f32.mrf.mxu1 }
 0x6ec   :  { %8254 = vst [vmem:[#allocation30_spill] sm:$0xff] %v6394_v12 }
 0x6ed   :  { %v6396_v61 = vpop.f32.mrf.mxu0 }
 0x6ee   :  { %4582 = vmatmul.msk.f32.gmra.mxu1 %vm411_vm7, %v6193_v52 }
 0x6f0   :  { %4479 = vmatmul.msk.f32.gmra.mxu2 %vm411_vm7, %v6401_v22  ;;  %2212 = vmatmul.f32.gmra.mxu0 %v2114_v16  ;;  %v6427_v16 = vld [vmem:[%s8174_s14 + $0x148] sm:$0xff] }
 0x6f1   :  { %8258 = vst [vmem:[#allocation34_spill] sm:$0xff] %v6427_v16  ;;  %4545 = vmatmul.msk.f32.gmra.mxu3 %vm411_vm7, %v6427_v16 }
 0x6f3   :  { %v6407_v29 = vpop.f32.mrf.mxu2  ;;  %v1955_v14 = vpop.f32.mrf.mxu1 }
 0x6f4   :  { %8255 = vst [vmem:[#allocation31_spill] sm:$0xff] %v6407_v29 }
 0x6f5   :  { %v6409_v18 = vpop.f32.mrf.mxu0 }
 0x6f6   :  { %4583 = vmatmul.msk.f32.gmra.mxu1 %vm411_vm7, %v5908_v7  ;;  %v1027_v7 = vld [vmem:[#allocation13 + $0x60] sm:$0xff] }
 0x6f8   :  { %4480 = vmatmul.msk.f32.gmra.mxu2 %vm411_vm7, %v6414_v37  ;;  %2215 = vmatmul.f32.gmra.mxu0 %v2115_v33  ;;  %v2117_v33 = vmul.f32 %v1949_v17, %v1027_v7 }
 0x6f9   :  { %4546 = vmatmul.msk.f32.gmra.mxu3 %vm411_vm7, %v6442_v24 }
 0x6fb   :  { %v6420_v52 = vpop.f32.mrf.mxu2  ;;  %v6444_v32 = vpop.f32.mrf.mxu1 }
 0x6fc   :  { %8257 = vst [vmem:[#allocation33_spill] sm:$0xff] %v6420_v52 }
 0x6fd   :  { %v6422_v30 = vpop.f32.mrf.mxu0 }
 0x6fe   :  { %4584 = vmatmul.msk.f32.gmra.mxu1 %vm411_vm7, %v5924_v5  ;;  %v1028_v5 = vld [vmem:[#allocation13 + $0x68] sm:$0xff] }
 0x700   :  { %4481 = vmatmul.msk.f32.gmra.mxu2 %vm411_vm7, %v6427_v16  ;;  %2218 = vmatmul.f32.gmra.mxu0 %v2116_v54  ;;  %v2118_v54 = vmul.f32 %v1952_v46, %v1028_v5 }
 0x703   :  { %v6435_v58 = vpop.f32.mrf.mxu2  ;;  %v6461_v47 = vpop.f32.mrf.mxu1 }
 0x704   :  { %8259 = vst [vmem:[#allocation35_spill] sm:$0xff] %v6435_v58  ;;  %v1970_v58 = vpop.f32.mrf.mxu3  ;;  %4547 = vmatmul.msk.f32.gmra.mxu3 %vm411_vm7, %v6459_v28 }
 0x705   :  { %v6437_v4 = vpop.f32.mrf.mxu0 }
 0x706   :  { %4585 = vmatmul.msk.f32.gmra.mxu1 %vm411_vm7, %v5946_v21  ;;  %v1029_v21 = vld [vmem:[#allocation13 + $0x70] sm:$0xff] }
 0x708   :  { %4482 = vmatmul.msk.f32.gmra.mxu2 %vm411_vm7, %v6442_v24  ;;  %2221 = vmatmul.f32.gmra.mxu0 %v2117_v33  ;;  %v2119_v33 = vmul.f32 %v1955_v14, %v1029_v21 }
 0x70b   :  { %v6452_v17 = vpop.f32.mrf.mxu2 }
 0x70c   :  { %8261 = vst [vmem:[#allocation37_spill] sm:$0xff] %v6452_v17  ;;  %v6478_v17 = vpop.f32.mrf.mxu1  ;;  %v6510_v24 = vpop.f32.mrf.mxu3  ;;  %4548 = vmatmul.msk.f32.gmra.mxu3 %vm411_vm7, %v6476_v39 }
 0x70d   :  { %v6454_v7 = vpop.f32.mrf.mxu0 }
 0x70e   :  { %4586 = vmatmul.msk.f32.gmra.mxu1 %vm411_vm7, %v5966_v10  ;;  %v1030_v10 = vld [vmem:[#allocation13 + $0x78] sm:$0xff] }
 0x710   :  { %4483 = vmatmul.msk.f32.gmra.mxu2 %vm411_vm7, %v6459_v28  ;;  %2224 = vmatmul.f32.gmra.mxu0 %v2118_v54  ;;  %v2120_v54 = vmul.f32 %v1958_v42, %v1030_v10 }
 0x713   :  { %v6469_v46 = vpop.f32.mrf.mxu2 }
 0x714   :  { %8263 = vst [vmem:[#allocation39_spill] sm:$0xff] %v6469_v46  ;;  %v6493_v46 = vld [vmem:[%s8174_s14 + $0x168] sm:$0xff]  ;;  %v6495_v52 = vpop.f32.mrf.mxu1 }
 0x715   :  { %v6471_v5 = vpop.f32.mrf.mxu0  ;;  %8266 = vst [vmem:[#allocation42_spill] sm:$0xff] %v6493_v46 }
 0x716   :  { %4587 = vmatmul.msk.f32.gmra.mxu1 %vm411_vm7, %v5992_v19  ;;  %v1031_v19 = vld [vmem:[#allocation13 + $0x80] sm:$0xff] }
 0x718   :  { %4484 = vmatmul.msk.f32.gmra.mxu2 %vm411_vm7, %v6476_v39  ;;  %2227 = vmatmul.f32.gmra.mxu0 %v2119_v33  ;;  %v2121_v33 = vmul.f32 %v1961_v20, %v1031_v19  ;;  %v1576_v20 = vld [vmem:[%s8171_s11] sm:$0xff]  ;;  %v6529_v39 = vld [vmem:[%s8174_s14 + $0x178] sm:$0xff] }
 0x719   :  { %v1640_v19 = vmul.f32 %v1576_v20, %v6304_v23  ;;  %v1578_v20 = vld [vmem:[%s8171_s11 + $0x10] sm:$0xff] }
 0x71b   :  { %v6486_v14 = vpop.f32.mrf.mxu2 }
 0x71c   :  { %8265 = vst [vmem:[#allocation41_spill] sm:$0xff] %v6486_v14  ;;  %v6508_v14 = vld [vmem:[%s8174_s14 + $0x170] sm:$0xff]  ;;  %v6512_v28 = vpop.f32.mrf.mxu1 }
 0x71d   :  { %v6488_v21 = vpop.f32.mrf.mxu0  ;;  %8268 = vst [vmem:[#allocation44_spill] sm:$0xff] %v6508_v14 }
 0x71e   :  { %4588 = vmatmul.msk.f32.gmra.mxu1 %vm411_vm7, %v6021_v49  ;;  %v1032_v49 = vld [vmem:[#allocation13 + $0x88] sm:$0xff] }
 0x720   :  { %4485 = vmatmul.msk.f32.gmra.mxu2 %vm411_vm7, %v6493_v46  ;;  %2230 = vmatmul.f32.gmra.mxu0 %v2120_v54 }
 0x723   :  { %v6503_v42 = vpop.f32.mrf.mxu2 }
 0x724   :  { %8267 = vst [vmem:[#allocation43_spill] sm:$0xff] %v6503_v42  ;;  %v2122_v42 = vmul.f32 %v1964_v55, %v1032_v49  ;;  %v6533_v16 = vpop.f32.mrf.mxu1  ;;  %v1033_v55 = vld [vmem:[#allocation13 + $0x90] sm:$0xff] }
 0x725   :  { %v2186_v10 = vpop.f32.mrf.mxu0 }
 0x726   :  { %4589 = vmatmul.msk.f32.gmra.mxu1 %vm411_vm7, %v6048_v0  ;;  %v1577_v0 = vld [vmem:[%s8171_s11 + $0x8] sm:$0xff]  ;;  %v2587_v43 = vmul.f32 %v6444_v32, %v2186_v10 }
 0x727   :  { %v1641_v23 = vmul.f32 %v1577_v0, %v6319_v35  ;;  %v1642_v35 = vmul.f32 %v1578_v20, %v6334_v45  ;;  %v1580_v20 = vld [vmem:[%s8171_s11 + $0x20] sm:$0xff]  ;;  %v1581_v32 = vld [vmem:[%s8171_s11 + $0x28] sm:$0xff] }
 0x728   :  { %4486 = vmatmul.msk.f32.gmra.mxu2 %vm411_vm7, %v6508_v14  ;;  %2233 = vmatmul.f32.gmra.mxu0 %v2121_v33  ;;  %v6531_v33 = vpop.f32.mrf.mxu3 }
 0x729   :  { %4549 = vmatmul.msk.f32.gmra.mxu3 %vm411_vm7, %v6493_v46  ;;  %v2123_v46 = vmul.f32 %v1967_v36, %v1033_v55  ;;  %v1579_v36 = vld [vmem:[%s8171_s11 + $0x18] sm:$0xff] }
 0x72a   :  { %v1643_v45 = vmul.f32 %v1579_v36, %v6349_v13 }
 0x72b   :  { %v6523_v54 = vpop.f32.mrf.mxu2 }
 0x72c   :  { %8269 = vst [vmem:[#allocation45_spill] sm:$0xff] %v6523_v54  ;;  %v1704_v54 = vmul.f32 1.442695, %v1640_v19  ;;  %v6553_v19 = vld [vmem:[%s8174_s14 + $0x180] sm:$0xff]  ;;  %v1710_v13 = vmul.f32 1.442695, %v1643_v45 }
 0x72d   :  { %v2189_v29 = vpop.f32.mrf.mxu0  ;;  %v1582_v45 = vld [vmem:[%s8171_s11 + $0x30] sm:$0xff] }
 0x72e   :  { %4590 = vmatmul.msk.f32.gmra.mxu1 %vm411_vm7, %v6066_v59  ;;  %4910 = vpow2.f32 %v1704_v54  ;;  %v6558_v59 = vpop.f32.mrf.mxu1  ;;  %v1034_v54 = vld [vmem:[#allocation13 + $0x98] sm:$0xff]  ;;  %v2588_v10 = vmul.f32 %v6461_v47, %v2189_v29 }
 0x730   :  { %4487 = vmatmul.msk.f32.gmra.mxu2 %vm411_vm7, %v6529_v39  ;;  %2236 = vmatmul.f32.gmra.mxu0 %v2122_v42  ;;  %v1706_v42 = vmul.f32 1.442695, %v1641_v23  ;;  %v6556_v0 = vpop.f32.mrf.mxu3  ;;  %v1708_v23 = vmul.f32 1.442695, %v1642_v35 }
 0x731   :  { %4550 = vmatmul.msk.f32.gmra.mxu3 %vm411_vm7, %v6508_v14  ;;  %v2124_v14 = vmul.f32 %v1970_v58, %v1034_v54  ;;  %v1035_v54 = vld [vmem:[#allocation13 + $0xa0] sm:$0xff] }
 0x732   :  { %4912 = vpow2.f32 %v1706_v42  ;;  %v6579_v42 = vld [vmem:[%s8174_s14 + $0x188] sm:$0xff]  ;;  %v2125_v47 = vmul.f32 %v6510_v24, %v1035_v54 }
 0x733   :  { %v6548_v49 = vpop.f32.mrf.mxu2  ;;  %4914 = vpow2.f32 %v1708_v23  ;;  %v1645_v23 = vmul.f32 %v1581_v32, %v6372_v48  ;;  %v6610_v48 = vld [vmem:[%s8174_s14 + $0x190] sm:$0xff] }
 0x734   :  { %8270 = vst [vmem:[#allocation46_spill] sm:$0xff] %v6548_v49  ;;  %v4911_v55 = vpop.eup %4910  ;;  %4916 = vpow2.f32 %v1710_v13  ;;  %v1646_v13 = vmul.f32 %v1582_v45, %v6380_v41 }
 0x735   :  { %v2192_v12 = vpop.f32.mrf.mxu0  ;;  %v3262_v37 = vmul.f32 0.0, %v4911_v55 }
 0x736   :  { %4591 = vmatmul.msk.f32.gmra.mxu1 %vm411_vm7, %v6084_v63  ;;  %v1644_v63 = vmul.f32 %v1580_v20, %v6364_v2  ;;  %v6584_v36 = vpop.f32.mrf.mxu1  ;;  %v1716_v54 = vmul.f32 1.442695, %v1646_v13 }
 0x737   :  { %v6594_v2 = vadd.f32 %v3262_v37, %v2587_v43  ;;  %v2589_v43 = vmul.f32 %v6478_v17, %v2192_v12  ;;  %v1714_v37 = vmul.f32 1.442695, %v1645_v23  ;;  %v1583_v17 = vld [vmem:[%s8171_s11 + $0x38] sm:$0xff] }
 0x738   :  { %4488 = vmatmul.msk.f32.gmra.mxu2 %vm411_vm7, %v6553_v19  ;;  %2239 = vmatmul.f32.gmra.mxu0 %v2123_v46  ;;  %v6582_v35 = vpop.f32.mrf.mxu3  ;;  %v4913_v58 = vpop.eup %4912  ;;  %v1712_v55 = vmul.f32 1.442695, %v1644_v63 }
 0x739   :  { %4551 = vmatmul.msk.f32.gmra.mxu3 %vm411_vm7, %v6529_v39  ;;  %8272 = vst [vmem:[#allocation48_spill] sm:$0xff] %v6594_v2 }
 0x73a   :  { %4918 = vpow2.f32 %v1712_v55 }
 0x73b   :  { %v6573_v49 = vpop.f32.mrf.mxu2  ;;  %4920 = vpow2.f32 %v1714_v37 }
 0x73c   :  { %8271 = vst [vmem:[#allocation47_spill] sm:$0xff] %v6573_v49  ;;  %v4915_v49 = vpop.eup %4914  ;;  %4922 = vpow2.f32 %v1716_v54 }
 0x73d   :  { %v2195_v46 = vpop.f32.mrf.mxu0  ;;  %v4917_v12 = vpop.eup %4916 }
 0x73e   :  { %4592 = vmatmul.msk.f32.gmra.mxu1 %vm411_vm7, %v6102_v1  ;;  %v6617_v32 = vpop.f32.mrf.mxu1  ;;  %v2590_v41 = vmul.f32 %v6495_v52, %v2195_v46  ;;  %v6641_v46 = vld [vmem:[%s8174_s14 + $0x198] sm:$0xff] }
 0x740   :  { %4489 = vmatmul.msk.f32.gmra.mxu2 %vm411_vm7, %v6579_v42  ;;  %2242 = vmatmul.f32.gmra.mxu0 %v2124_v14  ;;  %v3267_v14 = vmul.f32 %v4913_v58, %v6594_v2  ;;  %v6615_v63 = vpop.f32.mrf.mxu3  ;;  %v1036_v58 = vld [vmem:[#allocation13 + $0xa8] sm:$0xff]  ;;  %v4919_v45 = vpop.eup %4918 }
 0x741   :  { %4552 = vmatmul.msk.f32.gmra.mxu3 %vm411_vm7, %v6553_v19 }
 0x742   :  { %v6612_v1 = vadd.f32 %v3267_v14, %v2588_v10  ;;  %v2126_v14 = vmul.f32 %v6531_v33, %v1036_v58 }
 0x743   :  { %v6602_v20 = vpop.f32.mrf.mxu2 }
 0x744   :  { %8273 = vst [vmem:[#allocation49_spill] sm:$0xff] %v6612_v1  ;;  %v3272_v24 = vmul.f32 %v4915_v49, %v6612_v1  ;;  %v1647_v49 = vmul.f32 %v1583_v17, %v6388_v15 }
 0x745   :  { %v2198_v29 = vpop.f32.mrf.mxu0 }
 0x746   :  { %v6628_v10 = vadd.f32 %v3272_v24, %v2589_v43  ;;  %4593 = vmatmul.msk.f32.gmra.mxu1 %vm411_vm7, %v6120_v57  ;;  %v6647_v15 = vpop.f32.mrf.mxu1  ;;  %v1718_v37 = vmul.f32 1.442695, %v1647_v49  ;;  %v1037_v24 = vld [vmem:[#allocation13 + $0xb0] sm:$0xff] }
 0x747   :  { %v2127_v49 = vmul.f32 %v6556_v0, %v1037_v24 }
 0x748   :  { %4490 = vmatmul.msk.f32.gmra.mxu2 %vm411_vm7, %v6610_v48  ;;  %2245 = vmatmul.f32.gmra.mxu0 %v2125_v47  ;;  %8274 = vst [vmem:[#allocation50_spill] sm:$0xff] %v6628_v10  ;;  %v3277_v23 = vmul.f32 %v4917_v12, %v6628_v10  ;;  %v2591_v47 = vmul.f32 %v6512_v28, %v2198_v29  ;;  %v6645_v57 = vpop.f32.mrf.mxu3  ;;  %v4921_v28 = vpop.eup %4920  ;;  %v1584_v29 = vld [vmem:[%s8171_s11 + $0x40] sm:$0xff]  ;;  %4924 = vpow2.f32 %v1718_v37 }
 0x749   :  { %4553 = vmatmul.msk.f32.gmra.mxu3 %vm411_vm7, %v6579_v42  ;;  %v1648_v17 = vmul.f32 %v1584_v29, %v6396_v61  ;;  %v4923_v54 = vpop.eup %4922 }
 0x74a   :  { %v6643_v43 = vadd.f32 %v3277_v23, %v2590_v41 }
 0x74b   :  { %v6633_v55 = vpop.f32.mrf.mxu2 }
 0x74c   :  { %8275 = vst [vmem:[#allocation51_spill] sm:$0xff] %v6643_v43  ;;  %v3282_v33 = vmul.f32 %v4919_v45, %v6643_v43 }
 0x74d   :  { %v2201_v52 = vpop.f32.mrf.mxu0 }
 0x74e   :  { %v2592_v13 = vmul.f32 %v6533_v16, %v2201_v52  ;;  %v6658_v12 = vadd.f32 %v3282_v33, %v2591_v47  ;;  %4594 = vmatmul.msk.f32.gmra.mxu1 %vm411_vm7, %v6141_v27  ;;  %v6670_v16 = vld [vmem:[%s8174_s14 + $0x1a0] sm:$0xff]  ;;  %v6677_v61 = vpop.f32.mrf.mxu1  ;;  %v1720_v47 = vmul.f32 1.442695, %v1648_v17  ;;  %v1585_v52 = vld [vmem:[%s8171_s11 + $0x48] sm:$0xff]  ;;  %v4925_v37 = vpop.eup %4924 }
 0x750   :  { %4491 = vmatmul.msk.f32.gmra.mxu2 %vm411_vm7, %v6641_v46  ;;  %2248 = vmatmul.f32.gmra.mxu0 %v2126_v14  ;;  %8276 = vst [vmem:[#allocation52_spill] sm:$0xff] %v6658_v12  ;;  %v3287_v58 = vmul.f32 %v4921_v28, %v6658_v12  ;;  %v6675_v14 = vpop.f32.mrf.mxu3  ;;  %4926 = vpow2.f32 %v1720_v47  ;;  %v1649_v28 = vmul.f32 %v1585_v52, %v6409_v18 }
 0x751   :  { %4554 = vmatmul.msk.f32.gmra.mxu3 %vm411_vm7, %v6610_v48 }
 0x752   :  { %v6672_v45 = vadd.f32 %v3287_v58, %v2592_v13  ;;  %v6699_v58 = vld [vmem:[%s8174_s14 + $0x1a8] sm:$0xff]  ;;  %v1722_v18 = vmul.f32 1.442695, %v1649_v28  ;;  %v6725_v28 = vld [vmem:[%s8174_s14 + $0x1b0] sm:$0xff] }
 0x753   :  { %v6663_v41 = vpop.f32.mrf.mxu2 }
 0x754   :  { %v3292_v0 = vmul.f32 %v4923_v54, %v6672_v45  ;;  %4928 = vpow2.f32 %v1722_v18 }
 0x755   :  { %v2204_v23 = vpop.f32.mrf.mxu0 }
 0x756   :  { %v2593_v27 = vmul.f32 %v6558_v59, %v2204_v23  ;;  %v1038_v59 = vld [vmem:[#allocation13 + $0xb8] sm:$0xff]  ;;  %4595 = vmatmul.msk.f32.gmra.mxu1 %vm411_vm7, %v6171_v9  ;;  %v6704_v9 = vpop.f32.mrf.mxu1 }
 0x757   :  { %v2128_v13 = vmul.f32 %v6582_v35, %v1038_v59  ;;  %v1586_v35 = vld [vmem:[%s8171_s11 + $0x50] sm:$0xff] }
 0x758   :  { %4492 = vmatmul.msk.f32.gmra.mxu2 %vm411_vm7, %v6670_v16  ;;  %2251 = vmatmul.f32.gmra.mxu0 %v2127_v49  ;;  %v6687_v33 = vadd.f32 %v3292_v0, %v2593_v27  ;;  %v6702_v49 = vpop.f32.mrf.mxu3  ;;  %v4927_v27 = vpop.eup %4926  ;;  %v1650_v47 = vmul.f32 %v1586_v35, %v6422_v30 }
 0x759   :  { %4555 = vmatmul.msk.f32.gmra.mxu3 %vm411_vm7, %v6641_v46 }
 0x75a   :  { %8277 = vst [vmem:[#allocation53_spill] sm:$0xff] %v6687_v33  ;;  %v3297_v24 = vmul.f32 %v4925_v37, %v6687_v33  ;;  %v1724_v30 = vmul.f32 1.442695, %v1650_v47 }
 0x75b   :  { %v6692_v29 = vpop.f32.mrf.mxu2 }
 0x75c   :  { %4930 = vpow2.f32 %v1724_v30 }
 0x75d   :  { %v2207_v17 = vpop.f32.mrf.mxu0 }
 0x75e   :  { %v2594_v54 = vmul.f32 %v6584_v36, %v2207_v17  ;;  %v1039_v36 = vld [vmem:[#allocation13 + $0xc0] sm:$0xff]  ;;  %4596 = vmatmul.msk.f32.gmra.mxu1 %vm411_vm7, %v6201_v40  ;;  %v6730_v40 = vpop.f32.mrf.mxu1 }
 0x75f   :  { %v2129_v52 = vmul.f32 %v6615_v63, %v1039_v36  ;;  %v1587_v63 = vld [vmem:[%s8171_s11 + $0x58] sm:$0xff] }
 0x760   :  { %4493 = vmatmul.msk.f32.gmra.mxu2 %vm411_vm7, %v6699_v58  ;;  %2254 = vmatmul.f32.gmra.mxu0 %v2128_v13  ;;  %v6713_v23 = vadd.f32 %v3297_v24, %v2594_v54  ;;  %v6728_v24 = vpop.f32.mrf.mxu3  ;;  %v4929_v54 = vpop.eup %4928  ;;  %v1651_v18 = vmul.f32 %v1587_v63, %v6437_v4 }
 0x761   :  { %4556 = vmatmul.msk.f32.gmra.mxu3 %vm411_vm7, %v6670_v16 }
 0x762   :  { %8278 = vst [vmem:[#allocation54_spill] sm:$0xff] %v6713_v23  ;;  %v3302_v37 = vmul.f32 %v4927_v27, %v6713_v23  ;;  %v1726_v4 = vmul.f32 1.442695, %v1651_v18  ;;  %v4931_v30 = vpop.eup %4930 }
 0x763   :  { %v6718_v0 = vpop.f32.mrf.mxu2 }
 0x764   :  { %4932 = vpow2.f32 %v1726_v4 }
 0x765   :  { %v2210_v59 = vpop.f32.mrf.mxu0 }
 0x766   :  { %v2595_v13 = vmul.f32 %v6617_v32, %v2210_v59  ;;  %v1040_v32 = vld [vmem:[#allocation13 + $0xc8] sm:$0xff]  ;;  %4597 = vmatmul.msk.f32.gmra.mxu1 %vm411_vm7, %v6229_v50  ;;  %v6756_v50 = vpop.f32.mrf.mxu1 }
 0x767   :  { %v2130_v27 = vmul.f32 %v6645_v57, %v1040_v32  ;;  %v1588_v57 = vld [vmem:[%s8171_s11 + $0x60] sm:$0xff] }
 0x768   :  { %4494 = vmatmul.msk.f32.gmra.mxu2 %vm411_vm7, %v6725_v28  ;;  %2257 = vmatmul.f32.gmra.mxu0 %v2129_v52  ;;  %v6739_v17 = vadd.f32 %v3302_v37, %v2595_v13  ;;  %v6751_v52 = vld [vmem:[%s8174_s14 + $0x1b8] sm:$0xff]  ;;  %v6754_v59 = vpop.f32.mrf.mxu3  ;;  %v1652_v63 = vmul.f32 %v1588_v57, %v6454_v7 }
 0x769   :  { %4557 = vmatmul.msk.f32.gmra.mxu3 %vm411_vm7, %v6699_v58 }
 0x76a   :  { %8279 = vst [vmem:[#allocation55_spill] sm:$0xff] %v6739_v17  ;;  %v3307_v36 = vmul.f32 %v4929_v54, %v6739_v17  ;;  %v1728_v7 = vmul.f32 1.442695, %v1652_v63  ;;  %v4933_v57 = vpop.eup %4932 }
 0x76b   :  { %v6744_v35 = vpop.f32.mrf.mxu2 }
 0x76c   :  { %4934 = vpow2.f32 %v1728_v7 }
 0x76d   :  { %v2213_v47 = vpop.f32.mrf.mxu0 }
 0x76e   :  { %v2596_v37 = vmul.f32 %v6647_v15, %v2213_v47  ;;  %v1041_v15 = vld [vmem:[#allocation13 + $0xd0] sm:$0xff]  ;;  %4598 = vmatmul.msk.f32.gmra.mxu1 %vm411_vm7, %v6248_v3  ;;  %v6782_v3 = vpop.f32.mrf.mxu1 }
 0x76f   :  { %v2131_v32 = vmul.f32 %v6675_v14, %v1041_v15  ;;  %v1589_v14 = vld [vmem:[%s8171_s11 + $0x68] sm:$0xff] }
 0x770   :  { %4495 = vmatmul.msk.f32.gmra.mxu2 %vm411_vm7, %v6751_v52  ;;  %2260 = vmatmul.f32.gmra.mxu0 %v2130_v27  ;;  %v6765_v13 = vadd.f32 %v3307_v36, %v2596_v37  ;;  %v6777_v27 = vld [vmem:[%s8174_s14 + $0x1c0] sm:$0xff]  ;;  %v6780_v37 = vpop.f32.mrf.mxu3 }
 0x771   :  { %4558 = vmatmul.msk.f32.gmra.mxu3 %vm411_vm7, %v6725_v28 }
 0x772   :  { %8280 = vst [vmem:[#allocation56_spill] sm:$0xff] %v6765_v13  ;;  %v3312_v18 = vmul.f32 %v4931_v30, %v6765_v13  ;;  %v1653_v30 = vmul.f32 %v1589_v14, %v6471_v5  ;;  %v4935_v14 = vpop.eup %4934 }
 0x773   :  { %v6770_v54 = vpop.f32.mrf.mxu2 }
 0x774   :  { %v1730_v5 = vmul.f32 1.442695, %v1653_v30 }
 0x775   :  { %v2216_v47 = vpop.f32.mrf.mxu0 }
 0x776   :  { %v2597_v36 = vmul.f32 %v6677_v61, %v2216_v47  ;;  %v1042_v61 = vld [vmem:[#allocation13 + $0xd8] sm:$0xff]  ;;  %4599 = vmatmul.msk.f32.gmra.mxu1 %vm411_vm7, %v6261_v26  ;;  %v6808_v26 = vpop.f32.mrf.mxu1  ;;  %4936 = vpow2.f32 %v1730_v5 }
 0x777   :  { %v2132_v63 = vmul.f32 %v6702_v49, %v1042_v61  ;;  %v1590_v49 = vld [vmem:[%s8171_s11 + $0x70] sm:$0xff] }
 0x778   :  { %4496 = vmatmul.msk.f32.gmra.mxu2 %vm411_vm7, %v6777_v27  ;;  %2263 = vmatmul.f32.gmra.mxu0 %v2131_v32  ;;  %v6791_v4 = vadd.f32 %v3312_v18, %v2597_v36  ;;  %v6803_v32 = vld [vmem:[%s8174_s14 + $0x1c8] sm:$0xff]  ;;  %v6806_v36 = vpop.f32.mrf.mxu3 }
 0x779   :  { %4559 = vmatmul.msk.f32.gmra.mxu3 %vm411_vm7, %v6751_v52 }
 0x77a   :  { %8281 = vst [vmem:[#allocation57_spill] sm:$0xff] %v6791_v4  ;;  %v3317_v47 = vmul.f32 %v4933_v57, %v6791_v4  ;;  %v1049_v4 = vld [vmem:[#allocation13 + $0x110] sm:$0xff] }
 0x77b   :  { %v6796_v15 = vpop.f32.mrf.mxu2 }
 0x77d   :  { %v2219_v2 = vpop.f32.mrf.mxu0 }
 0x77e   :  { %v2598_v18 = vmul.f32 %v6704_v9, %v2219_v2  ;;  %v1043_v2 = vld [vmem:[#allocation13 + $0xe0] sm:$0xff]  ;;  %4600 = vmatmul.msk.f32.gmra.mxu1 %vm411_vm7, %v6274_v60  ;;  %v1654_v9 = vmul.f32 %v1590_v49, %v6488_v21  ;;  %v6834_v60 = vpop.f32.mrf.mxu1  ;;  %v4937_v49 = vpop.eup %4936 }
 0x77f   :  { %v2133_v61 = vmul.f32 %v6728_v24, %v1043_v2  ;;  %v1591_v24 = vld [vmem:[%s8171_s11 + $0x78] sm:$0xff] }
 0x780   :  { %4497 = vmatmul.msk.f32.gmra.mxu2 %vm411_vm7, %v6803_v32  ;;  %2266 = vmatmul.f32.gmra.mxu0 %v2132_v63  ;;  %v6817_v7 = vadd.f32 %v3317_v47, %v2598_v18  ;;  %v6829_v63 = vld [vmem:[%s8174_s14 + $0x1d0] sm:$0xff]  ;;  %v6832_v18 = vpop.f32.mrf.mxu3  ;;  %v1732_v21 = vmul.f32 1.442695, %v1654_v9 }
 0x781   :  { %4560 = vmatmul.msk.f32.gmra.mxu3 %vm411_vm7, %v6777_v27 }
 0x782   :  { %8282 = vst [vmem:[#allocation58_spill] sm:$0xff] %v6817_v7  ;;  %v3322_v30 = vmul.f32 %v4935_v14, %v6817_v7  ;;  %4938 = vpow2.f32 %v1732_v21 }
 0x783   :  { %v6822_v57 = vpop.f32.mrf.mxu2 }
 0x785   :  { %v2222_v1 = vpop.f32.mrf.mxu0 }
 0x786   :  { %v2599_v47 = vmul.f32 %v6730_v40, %v2222_v1  ;;  %v1044_v1 = vld [vmem:[#allocation13 + $0xe8] sm:$0xff]  ;;  %4601 = vmatmul.msk.f32.gmra.mxu1 %vm411_vm7, %v6287_v11  ;;  %v1655_v40 = vmul.f32 %v1591_v24, %v6317_v25  ;;  %v6860_v11 = vpop.f32.mrf.mxu1 }
 0x787   :  { %v2134_v2 = vmul.f32 %v6754_v59, %v1044_v1  ;;  %v1592_v59 = vld [vmem:[%s8171_s11 + $0x80] sm:$0xff] }
 0x788   :  { %4498 = vmatmul.msk.f32.gmra.mxu2 %vm411_vm7, %v6829_v63  ;;  %2269 = vmatmul.f32.gmra.mxu0 %v2133_v61  ;;  %v6843_v5 = vadd.f32 %v3322_v30, %v2599_v47  ;;  %v6855_v61 = vld [vmem:[%s8174_s14 + $0x1d8] sm:$0xff]  ;;  %v6858_v47 = vpop.f32.mrf.mxu3  ;;  %v1734_v25 = vmul.f32 1.442695, %v1655_v40  ;;  %v4939_v24 = vpop.eup %4938 }
 0x789   :  { %4561 = vmatmul.msk.f32.gmra.mxu3 %vm411_vm7, %v6803_v32 }
 0x78a   :  { %8283 = vst [vmem:[#allocation59_spill] sm:$0xff] %v6843_v5  ;;  %v3327_v9 = vmul.f32 %v4937_v49, %v6843_v5  ;;  %4940 = vpow2.f32 %v1734_v25 }
 0x78b   :  { %v6848_v14 = vpop.f32.mrf.mxu2 }
 0x78d   :  { %v2225_v10 = vpop.f32.mrf.mxu0 }
 0x78e   :  { %v2600_v30 = vmul.f32 %v6756_v50, %v2225_v10  ;;  %v1045_v10 = vld [vmem:[#allocation13 + $0xf0] sm:$0xff]  ;;  %4602 = vmatmul.msk.f32.gmra.mxu1 %vm411_vm7, %v6298_v6  ;;  %v1656_v50 = vmul.f32 %v1592_v59, %v6332_v62  ;;  %v6886_v6 = vpop.f32.mrf.mxu1  ;;  %v1046_v59 = vld [vmem:[#allocation13 + $0xf8] sm:$0xff] }
 0x78f   :  { %v2135_v1 = vmul.f32 %v6780_v37, %v1045_v10  ;;  %v2136_v10 = vmul.f32 %v6806_v36, %v1046_v59  ;;  %v1047_v59 = vld [vmem:[#allocation13 + $0x100] sm:$0xff] }
 0x790   :  { %4499 = vmatmul.msk.f32.gmra.mxu2 %vm411_vm7, %v6855_v61  ;;  %2272 = vmatmul.f32.gmra.mxu0 %v2134_v2  ;;  %v6869_v21 = vadd.f32 %v3327_v9, %v2600_v30  ;;  %v6881_v2 = vld [vmem:[%s8174_s14 + $0x1e0] sm:$0xff]  ;;  %v6884_v30 = vpop.f32.mrf.mxu3  ;;  %v1736_v62 = vmul.f32 1.442695, %v1656_v50  ;;  %v4941_v25 = vpop.eup %4940 }
 0x791   :  { %4562 = vmatmul.msk.f32.gmra.mxu3 %vm411_vm7, %v6829_v63 }
 0x792   :  { %8284 = vst [vmem:[#allocation60_spill] sm:$0xff] %v6869_v21  ;;  %v3332_v40 = vmul.f32 %v4939_v24, %v6869_v21  ;;  %4942 = vpow2.f32 %v1736_v62  ;;  %v1593_v24 = vld [vmem:[%s8171_s11 + $0x88] sm:$0xff] }
 0x793   :  { %v6874_v49 = vpop.f32.mrf.mxu2  ;;  %v1657_v62 = vmul.f32 %v1593_v24, %v6347_v53  ;;  %v1594_v53 = vld [vmem:[%s8171_s11 + $0x90] sm:$0xff]  ;;  %v2137_v24 = vmul.f32 %v6832_v18, %v1047_v59  ;;  %v1595_v59 = vld [vmem:[%s8171_s11 + $0x98] sm:$0xff] }
 0x795   :  { %v2228_v43 = vpop.f32.mrf.mxu0 }
 0x796   :  { %v2601_v9 = vmul.f32 %v6782_v3, %v2228_v43  ;;  %4603 = vmatmul.msk.f32.gmra.mxu1 %vm411_vm7, %v6311_v31 }
 0x798   :  { %4500 = vmatmul.msk.f32.gmra.mxu2 %vm411_vm7, %v6881_v2  ;;  %2275 = vmatmul.f32.gmra.mxu0 %v2135_v1  ;;  %v6892_v37 = vadd.f32 %v3332_v40, %v2601_v9  ;;  %v6906_v1 = vld [vmem:[%s8174_s14 + $0x1e8] sm:$0xff]  ;;  %v6909_v31 = vpop.f32.mrf.mxu3  ;;  %v6911_v9 = vpop.f32.mrf.mxu1 }
 0x799   :  { %4563 = vmatmul.msk.f32.gmra.mxu3 %vm411_vm7, %v6855_v61 }
 0x79a   :  { %8285 = vst [vmem:[#allocation61_spill] sm:$0xff] %v6892_v37  ;;  %v3337_v43 = vmul.f32 %v4941_v25, %v6892_v37  ;;  %v4943_v25 = vpop.eup %4942 }
 0x79b   :  { %v6897_v3 = vpop.f32.mrf.mxu2 }
 0x79d   :  { %v2231_v50 = vpop.f32.mrf.mxu0 }
 0x79e   :  { %v2602_v40 = vmul.f32 %v6808_v26, %v2231_v50  ;;  %4604 = vmatmul.msk.f32.gmra.mxu1 %vm411_vm7, %v6326_v38  ;;  %v1738_v50 = vmul.f32 1.442695, %v1657_v62  ;;  %v1658_v62 = vmul.f32 %v1594_v53, %v6362_v44 }
 0x7a0   :  { %4501 = vmatmul.msk.f32.gmra.mxu2 %vm411_vm7, %v6906_v1  ;;  %2278 = vmatmul.f32.gmra.mxu0 %v2136_v10  ;;  %v6918_v36 = vadd.f32 %v3337_v43, %v2602_v40  ;;  %v6932_v43 = vld [vmem:[%s8174_s14 + $0x1f0] sm:$0xff]  ;;  %v6935_v38 = vpop.f32.mrf.mxu3  ;;  %v6937_v40 = vpop.f32.mrf.mxu1  ;;  %4944 = vpow2.f32 %v1738_v50 }
 0x7a1   :  { %4564 = vmatmul.msk.f32.gmra.mxu3 %vm411_vm7, %v6881_v2 }
 0x7a2   :  { %8286 = vst [vmem:[#allocation62_spill] sm:$0xff] %v6918_v36  ;;  %v3342_v26 = vmul.f32 %v4943_v25, %v6918_v36  ;;  %v1048_v25 = vld [vmem:[#allocation13 + $0x108] sm:$0xff] }
 0x7a3   :  { %v6923_v12 = vpop.f32.mrf.mxu2  ;;  %v2138_v50 = vmul.f32 %v6858_v47, %v1048_v25  ;;  %v1659_v47 = vmul.f32 %v1595_v59, %v6370_v51 }
 0x7a5   :  { %v2234_v13 = vpop.f32.mrf.mxu0 }
 0x7a6   :  { %v2603_v10 = vmul.f32 %v6834_v60, %v2234_v13  ;;  %4605 = vmatmul.msk.f32.gmra.mxu1 %vm411_vm7, %v6341_v56  ;;  %v1740_v13 = vmul.f32 1.442695, %v1658_v62  ;;  %v4945_v44 = vpop.eup %4944 }
 0x7a8   :  { %4502 = vmatmul.msk.f32.gmra.mxu2 %vm411_vm7, %v6932_v43  ;;  %2281 = vmatmul.f32.gmra.mxu0 %v2137_v24  ;;  %v6944_v18 = vadd.f32 %v3342_v26, %v2603_v10  ;;  %v6957_v26 = vld [vmem:[%s8174_s14 + $0x1f8] sm:$0xff]  ;;  %v6960_v10 = vpop.f32.mrf.mxu3  ;;  %v6962_v56 = vpop.f32.mrf.mxu1  ;;  %4946 = vpow2.f32 %v1740_v13  ;;  %v2139_v13 = vmul.f32 %v6884_v30, %v1049_v4  ;;  %v5044_v4 = vld [vmem:[%s8174_s14] sm:$0xff] }
 0x7a9   :  { %4565 = vmatmul.msk.f32.gmra.mxu3 %vm411_vm7, %v6906_v1 }
 0x7aa   :  { %8287 = vst [vmem:[#allocation63_spill] sm:$0xff] %v6944_v18  ;;  %v3347_v62 = vmul.f32 %v4945_v44, %v6944_v18  ;;  %v1596_v44 = vld [vmem:[%s8171_s11 + $0xa0] sm:$0xff] }
 0x7ab   :  { %v6948_v60 = vpop.f32.mrf.mxu2 }
 0x7ad   :  { %v2237_v53 = vpop.f32.mrf.mxu0 }
 0x7ae   :  { %v2604_v24 = vmul.f32 %v6860_v11, %v2237_v53  ;;  %4606 = vmatmul.msk.f32.gmra.mxu1 %vm411_vm7, %v6356_v8  ;;  %v1742_v11 = vmul.f32 1.442695, %v1659_v47  ;;  %v4947_v51 = vpop.eup %4946 }
 0x7b0   :  { %4503 = vmatmul.msk.f32.gmra.mxu2 %vm411_vm7, %v6957_v26  ;;  %2284 = vmatmul.f32.gmra.mxu0 %v2138_v50  ;;  %v6970_v25 = vadd.f32 %v3347_v62, %v2604_v24  ;;  %v6981_v50 = vpop.f32.mrf.mxu3  ;;  %v6983_v24 = vpop.f32.mrf.mxu1  ;;  %4948 = vpow2.f32 %v1742_v11  ;;  %v1660_v62 = vmul.f32 %v1596_v44, %v6378_v34  ;;  %v1597_v34 = vld [vmem:[%s8171_s11 + $0xa8] sm:$0xff] }
 0x7b1   :  { %4566 = vmatmul.msk.f32.gmra.mxu3 %vm411_vm7, %v6932_v43 }
 0x7b2   :  { %8288 = vst [vmem:[#allocation64_spill] sm:$0xff] %v6970_v25  ;;  %v3352_v8 = vmul.f32 %v4947_v51, %v6970_v25  ;;  %v1744_v47 = vmul.f32 1.442695, %v1660_v62  ;;  %v8292_v25 = vld [vmem:[#allocation32_spill] sm:$0xff] }
 0x7b3   :  { %v6974_v53 = vpop.f32.mrf.mxu2 }
 0x7b4   :  { %4950 = vpow2.f32 %v1744_v47 }
 0x7b5   :  { %v2240_v59 = vpop.f32.mrf.mxu0 }
 0x7b6   :  { %v2605_v18 = vmul.f32 %v6886_v6, %v2240_v59  ;;  %v1050_v6 = vld [vmem:[#allocation13 + $0x118] sm:$0xff]  ;;  %4607 = vmatmul.msk.f32.gmra.mxu1 %vm411_vm7, %v6401_v22  ;;  %v4949_v44 = vpop.eup %4948 }
 0x7b7   :  { %v2140_v11 = vmul.f32 %v6909_v31, %v1050_v6  ;;  %v1598_v31 = vld [vmem:[%s8171_s11 + $0xb0] sm:$0xff] }
 0x7b8   :  { %2287 = vmatmul.f32.gmra.mxu0 %v2139_v13  ;;  %4632 = vmatmul.msk.f32.vlgmr.msra.gmra.mxu2 %vm411_vm7, %v5044_v4  ;;  %v6993_v30 = vadd.f32 %v3352_v8, %v2605_v18  ;;  %v7004_v4 = vpop.f32.mrf.mxu3  ;;  %v7006_v18 = vpop.f32.mrf.mxu1  ;;  %v8290_v8 = vld [vmem:[#allocation29_spill] sm:$0xff] }
 0x7b9   :  { %4567 = vmatmul.msk.f32.gmra.mxu3 %vm411_vm7, %v6957_v26  ;;  %v1661_v62 = vmul.f32 %v1597_v34, %v8290_v8 }
 0x7ba   :  { %8289 = vst [vmem:[#allocation65_spill] sm:$0xff] %v6993_v30  ;;  %v3357_v22 = vmul.f32 %v4949_v44, %v6993_v30  ;;  %v8293_v44 = vld [vmem:[#allocation30_spill] sm:$0xff] }
 0x7bb   :  { %v6997_v59 = vpop.f32.mrf.mxu2  ;;  %v1746_v47 = vmul.f32 1.442695, %v1661_v62  ;;  %v1662_v34 = vmul.f32 %v1598_v31, %v8293_v44  ;;  %v8295_v62 = vld [vmem:[#allocation34_spill] sm:$0xff]  ;;  %v8296_v31 = vld [vmem:[#allocation31_spill] sm:$0xff] }
 0x7bd   :  { %v2243_v13 = vpop.f32.mrf.mxu0  ;;  %4952 = vpow2.f32 %v1746_v47 }
 0x7be   :  { %v2606_v51 = vmul.f32 %v6911_v9, %v2243_v13  ;;  %v5045_v9 = vld [vmem:[%s8174_s14 + $0x8] sm:$0xff]  ;;  %4608 = vmatmul.msk.f32.gmra.mxu1 %vm411_vm7, %v8292_v25  ;;  %v1599_v25 = vld [vmem:[%s8171_s11 + $0xb8] sm:$0xff] }
 0x7bf   :  { %v1051_v13 = vld [vmem:[#allocation13 + $0x120] sm:$0xff] }
 0x7c0   :  { %2290 = vmatmul.f32.gmra.mxu0 %v2140_v11  ;;  %4633 = vmatmul.msk.f32.gmra.mxu2 %vm411_vm7, %v5045_v9  ;;  %v7019_v6 = vadd.f32 %v3357_v22, %v2606_v51  ;;  %v2141_v30 = vmul.f32 %v6935_v38, %v1051_v13  ;;  %v4951_v11 = vpop.eup %4950  ;;  %v7028_v21 = vpop.f32.mrf.mxu3  ;;  %v1748_v22 = vmul.f32 1.442695, %v1662_v34  ;;  %v5046_v38 = vld [vmem:[%s8174_s14 + $0x10] sm:$0xff]  ;;  %v1663_v13 = vmul.f32 %v1599_v25, %v8296_v31 }
 0x7c1   :  { %v7030_v9 = vpop.f32.mrf.mxu1 }
 0x7c2   :  { %8291 = vst [vmem:[#allocation29_spill] sm:$0xff] %v7019_v6  ;;  %v3362_v51 = vmul.f32 %v4951_v11, %v7019_v6  ;;  %4954 = vpow2.f32 %v1748_v22  ;;  %v1600_v22 = vld [vmem:[%s8171_s11 + $0xc0] sm:$0xff] }
 0x7c3   :  { %v7024_v8 = vpop.f32.mrf.mxu2 }
 0x7c5   :  { %v2246_v7 = vpop.f32.mrf.mxu0 }
 0x7c6   :  { %v2607_v5 = vmul.f32 %v6937_v40, %v2246_v7  ;;  %v1052_v40 = vld [vmem:[#allocation13 + $0x128] sm:$0xff]  ;;  %4609 = vmatmul.msk.f32.gmra.mxu1 %vm411_vm7, %v8295_v62  ;;  %v8298_v62 = vld [vmem:[#allocation36_spill] sm:$0xff] }
 0x7c7   :  { %v2142_v44 = vmul.f32 %v6960_v10, %v1052_v40  ;;  %v5047_v10 = vld [vmem:[%s8174_s14 + $0x18] sm:$0xff] }
 0x7c8   :  { %2293 = vmatmul.f32.gmra.mxu0 %v2141_v30  ;;  %4634 = vmatmul.msk.f32.gmra.mxu2 %vm411_vm7, %v5046_v38  ;;  %v7040_v7 = vadd.f32 %v3362_v51, %v2607_v5  ;;  %v4953_v30 = vpop.eup %4952  ;;  %v7049_v6 = vpop.f32.mrf.mxu3  ;;  %v1750_v51 = vmul.f32 1.442695, %v1663_v13  ;;  %v1053_v40 = vld [vmem:[#allocation13 + $0x130] sm:$0xff]  ;;  %v8299_v13 = vld [vmem:[#allocation33_spill] sm:$0xff] }
 0x7c9   :  { %v7051_v38 = vpop.f32.mrf.mxu1 }
 0x7ca   :  { %8294 = vst [vmem:[#allocation32_spill] sm:$0xff] %v7040_v7  ;;  %v3367_v5 = vmul.f32 %v4953_v30, %v7040_v7  ;;  %4956 = vpow2.f32 %v1750_v51  ;;  %v1664_v30 = vmul.f32 %v1600_v22, %v8299_v13  ;;  %v5048_v51 = vld [vmem:[%s8174_s14 + $0x20] sm:$0xff] }
 0x7cb   :  { %v7045_v47 = vpop.f32.mrf.mxu2 }
 0x7cd   :  { %v2249_v34 = vpop.f32.mrf.mxu0 }
 0x7ce   :  { %v2608_v11 = vmul.f32 %v6962_v56, %v2249_v34  ;;  %v4955_v56 = vpop.eup %4954  ;;  %4610 = vmatmul.msk.f32.gmra.mxu1 %vm411_vm7, %v8298_v62  ;;  %v1601_v62 = vld [vmem:[%s8171_s11 + $0xc8] sm:$0xff] }
 0x7d0   :  { %2296 = vmatmul.f32.gmra.mxu0 %v2142_v44  ;;  %4635 = vmatmul.msk.f32.gmra.mxu2 %vm411_vm7, %v5047_v10  ;;  %v7061_v25 = vadd.f32 %v3367_v5, %v2608_v11  ;;  %v2143_v44 = vmul.f32 %v6981_v50, %v1053_v40  ;;  %v7071_v10 = vpop.f32.mrf.mxu3  ;;  %v1752_v5 = vmul.f32 1.442695, %v1664_v30  ;;  %v4957_v22 = vpop.eup %4956  ;;  %v8302_v40 = vld [vmem:[#allocation35_spill] sm:$0xff] }
 0x7d1   :  { %v7073_v11 = vpop.f32.mrf.mxu1  ;;  %v1665_v13 = vmul.f32 %v1601_v62, %v8302_v40 }
 0x7d2   :  { %8297 = vst [vmem:[#allocation30_spill] sm:$0xff] %v7061_v25  ;;  %v3372_v31 = vmul.f32 %v4955_v56, %v7061_v25  ;;  %4958 = vpow2.f32 %v1752_v5  ;;  %v5049_v5 = vld [vmem:[%s8174_s14 + $0x28] sm:$0xff] }
 0x7d3   :  { %v7067_v34 = vpop.f32.mrf.mxu2 }
 0x7d5   :  { %v2252_v7 = vpop.f32.mrf.mxu0 }
 0x7d6   :  { %v2609_v37 = vmul.f32 %v6983_v24, %v2252_v7  ;;  %v1054_v24 = vld [vmem:[#allocation13 + $0x138] sm:$0xff]  ;;  %v8301_v7 = vld [vmem:[#allocation38_spill] sm:$0xff] }
 0x7d7   :  { %4611 = vmatmul.msk.f32.gmra.mxu1 %vm411_vm7, %v8301_v7  ;;  %v1602_v7 = vld [vmem:[%s8171_s11 + $0xd0] sm:$0xff] }
 0x7d8   :  { %2299 = vmatmul.f32.gmra.mxu0 %v2143_v44  ;;  %4636 = vmatmul.msk.f32.gmra.mxu2 %vm411_vm7, %v5048_v51  ;;  %v7082_v50 = vadd.f32 %v3372_v31, %v2609_v37  ;;  %v2144_v44 = vmul.f32 %v7004_v4, %v1054_v24  ;;  %v7092_v51 = vpop.f32.mrf.mxu3  ;;  %v1754_v31 = vmul.f32 1.442695, %v1665_v13  ;;  %v4959_v62 = vpop.eup %4958  ;;  %v8305_v24 = vld [vmem:[#allocation37_spill] sm:$0xff] }
 0x7d9   :  { %v7094_v37 = vpop.f32.mrf.mxu1  ;;  %v1666_v40 = vmul.f32 %v1602_v7, %v8305_v24 }
 0x7da   :  { %8300 = vst [vmem:[#allocation34_spill] sm:$0xff] %v7082_v50  ;;  %v3377_v56 = vmul.f32 %v4957_v22, %v7082_v50  ;;  %4960 = vpow2.f32 %v1754_v31  ;;  %v5050_v31 = vld [vmem:[%s8174_s14 + $0x30] sm:$0xff] }
 0x7db   :  { %v7088_v30 = vpop.f32.mrf.mxu2 }
 0x7dd   :  { %v2255_v25 = vpop.f32.mrf.mxu0 }
 0x7de   :  { %v2610_v36 = vmul.f32 %v7006_v18, %v2255_v25  ;;  %v1055_v18 = vld [vmem:[#allocation13 + $0x140] sm:$0xff] }
 0x7df   :  { %v8304_v25 = vld [vmem:[#allocation40_spill] sm:$0xff] }
 0x7e0   :  { %2302 = vmatmul.f32.gmra.mxu0 %v2144_v44  ;;  %4637 = vmatmul.msk.f32.gmra.mxu2 %vm411_vm7, %v5049_v5  ;;  %v7103_v4 = vadd.f32 %v3377_v56, %v2610_v36  ;;  %v2145_v44 = vmul.f32 %v7028_v21, %v1055_v18  ;;  %v7113_v5 = vpop.f32.mrf.mxu3  ;;  %v1756_v56 = vmul.f32 1.442695, %v1666_v40  ;;  %v4961_v7 = vpop.eup %4960  ;;  %v8308_v18 = vld [vmem:[#allocation39_spill] sm:$0xff] }
 0x7e1   :  { %4612 = vmatmul.msk.f32.gmra.mxu1 %vm411_vm7, %v8304_v25  ;;  %v7115_v36 = vpop.f32.mrf.mxu1  ;;  %v1603_v25 = vld [vmem:[%s8171_s11 + $0xd8] sm:$0xff] }
 0x7e2   :  { %8303 = vst [vmem:[#allocation31_spill] sm:$0xff] %v7103_v4  ;;  %v3382_v22 = vmul.f32 %v4959_v62, %v7103_v4  ;;  %4962 = vpow2.f32 %v1756_v56  ;;  %v1667_v24 = vmul.f32 %v1603_v25, %v8308_v18  ;;  %v5051_v56 = vld [vmem:[%s8174_s14 + $0x38] sm:$0xff] }
 0x7e3   :  { %v7109_v13 = vpop.f32.mrf.mxu2 }
 0x7e5   :  { %v2258_v50 = vpop.f32.mrf.mxu0 }
 0x7e6   :  { %v2611_v17 = vmul.f32 %v7030_v9, %v2258_v50  ;;  %v1056_v9 = vld [vmem:[#allocation13 + $0x148] sm:$0xff]  ;;  %v8307_v50 = vld [vmem:[#allocation42_spill] sm:$0xff] }
 0x7e8   :  { %2305 = vmatmul.f32.gmra.mxu0 %v2145_v44  ;;  %4638 = vmatmul.msk.f32.gmra.mxu2 %vm411_vm7, %v5050_v31  ;;  %v7124_v21 = vadd.f32 %v3382_v22, %v2611_v17  ;;  %v2146_v44 = vmul.f32 %v7049_v6, %v1056_v9  ;;  %v7134_v31 = vpop.f32.mrf.mxu3  ;;  %v1758_v22 = vmul.f32 1.442695, %v1667_v24  ;;  %v4963_v25 = vpop.eup %4962  ;;  %v8311_v9 = vld [vmem:[#allocation41_spill] sm:$0xff] }
 0x7e9   :  { %4613 = vmatmul.msk.f32.gmra.mxu1 %vm411_vm7, %v8307_v50  ;;  %v7136_v17 = vpop.f32.mrf.mxu1  ;;  %v1604_v50 = vld [vmem:[%s8171_s11 + $0xe0] sm:$0xff] }
 0x7ea   :  { %8306 = vst [vmem:[#allocation36_spill] sm:$0xff] %v7124_v21  ;;  %v3387_v62 = vmul.f32 %v4961_v7, %v7124_v21  ;;  %4964 = vpow2.f32 %v1758_v22  ;;  %v1668_v18 = vmul.f32 %v1604_v50, %v8311_v9  ;;  %v5052_v22 = vld [vmem:[%s8174_s14 + $0x40] sm:$0xff] }
 0x7eb   :  { %v7130_v40 = vpop.f32.mrf.mxu2 }
 0x7ed   :  { %v2261_v4 = vpop.f32.mrf.mxu0 }
 0x7ee   :  { %v2612_v23 = vmul.f32 %v7051_v38, %v2261_v4  ;;  %v1057_v38 = vld [vmem:[#allocation13 + $0x150] sm:$0xff]  ;;  %v8310_v4 = vld [vmem:[#allocation44_spill] sm:$0xff] }
 0x7f0   :  { %2308 = vmatmul.f32.gmra.mxu0 %v2146_v44  ;;  %4639 = vmatmul.msk.f32.gmra.mxu2 %vm411_vm7, %v5051_v56  ;;  %v7145_v6 = vadd.f32 %v3387_v62, %v2612_v23  ;;  %v2147_v44 = vmul.f32 %v7071_v10, %v1057_v38  ;;  %v7155_v56 = vpop.f32.mrf.mxu3  ;;  %v1760_v62 = vmul.f32 1.442695, %v1668_v18  ;;  %v4965_v50 = vpop.eup %4964 }
 0x7f1   :  { %4614 = vmatmul.msk.f32.gmra.mxu1 %vm411_vm7, %v8310_v4  ;;  %v7157_v23 = vpop.f32.mrf.mxu1  ;;  %v1605_v4 = vld [vmem:[%s8171_s11 + $0xe8] sm:$0xff] }
 0x7f2   :  { %8309 = vst [vmem:[#allocation33_spill] sm:$0xff] %v7145_v6  ;;  %v3392_v7 = vmul.f32 %v4963_v25, %v7145_v6  ;;  %4966 = vpow2.f32 %v1760_v62  ;;  %v8313_v25 = vld [vmem:[#allocation43_spill] sm:$0xff]  ;;  %v5053_v62 = vld [vmem:[%s8174_s14 + $0x48] sm:$0xff] }
 0x7f3   :  { %v7151_v24 = vpop.f32.mrf.mxu2  ;;  %v1669_v38 = vmul.f32 %v1605_v4, %v8313_v25 }
 0x7f5   :  { %v2264_v21 = vpop.f32.mrf.mxu0 }
 0x7f6   :  { %v2613_v33 = vmul.f32 %v7073_v11, %v2264_v21  ;;  %v1058_v11 = vld [vmem:[#allocation13 + $0x158] sm:$0xff] }
 0x7f7   :  { %v2148_v18 = vmul.f32 %v7092_v51, %v1058_v11  ;;  %v8315_v11 = vld [vmem:[#allocation45_spill] sm:$0xff] }
 0x7f8   :  { %2311 = vmatmul.f32.gmra.mxu0 %v2147_v44  ;;  %4640 = vmatmul.msk.f32.gmra.mxu2 %vm411_vm7, %v5052_v22  ;;  %v7166_v10 = vadd.f32 %v3392_v7, %v2613_v33  ;;  %v7176_v22 = vpop.f32.mrf.mxu3  ;;  %v1762_v7 = vmul.f32 1.442695, %v1669_v38  ;;  %v4967_v4 = vpop.eup %4966 }
 0x7f9   :  { %4615 = vmatmul.msk.f32.gmra.mxu1 %vm411_vm7, %v6529_v39  ;;  %v7178_v33 = vpop.f32.mrf.mxu1  ;;  %v1606_v39 = vld [vmem:[%s8171_s11 + $0xf0] sm:$0xff] }
 0x7fa   :  { %8312 = vst [vmem:[#allocation38_spill] sm:$0xff] %v7166_v10  ;;  %v3397_v21 = vmul.f32 %v4965_v50, %v7166_v10  ;;  %4968 = vpow2.f32 %v1762_v7  ;;  %v1670_v25 = vmul.f32 %v1606_v39, %v8315_v11  ;;  %v5054_v7 = vld [vmem:[%s8174_s14 + $0x50] sm:$0xff] }
 0x7fb   :  { %v7172_v9 = vpop.f32.mrf.mxu2 }
 0x7fd   :  { %v2267_v44 = vpop.f32.mrf.mxu0 }
 0x7fe   :  { %v2614_v6 = vmul.f32 %v7094_v37, %v2267_v44  ;;  %v1059_v37 = vld [vmem:[#allocation13 + $0x160] sm:$0xff] }
 0x800   :  { %2314 = vmatmul.f32.gmra.mxu0 %v2148_v18  ;;  %4641 = vmatmul.msk.f32.gmra.mxu2 %vm411_vm7, %v5053_v62  ;;  %v7187_v51 = vadd.f32 %v3397_v21, %v2614_v6  ;;  %v2149_v18 = vmul.f32 %v7113_v5, %v1059_v37  ;;  %v7197_v62 = vpop.f32.mrf.mxu3  ;;  %v1764_v21 = vmul.f32 1.442695, %v1670_v25  ;;  %v4969_v39 = vpop.eup %4968  ;;  %v8317_v37 = vld [vmem:[#allocation46_spill] sm:$0xff] }
 0x801   :  { %4616 = vmatmul.msk.f32.gmra.mxu1 %vm411_vm7, %v6553_v19  ;;  %v7199_v6 = vpop.f32.mrf.mxu1  ;;  %v1607_v19 = vld [vmem:[%s8171_s11 + $0xf8] sm:$0xff] }
 0x802   :  { %8314 = vst [vmem:[#allocation35_spill] sm:$0xff] %v7187_v51  ;;  %v3402_v50 = vmul.f32 %v4967_v4, %v7187_v51  ;;  %4970 = vpow2.f32 %v1764_v21  ;;  %v1671_v11 = vmul.f32 %v1607_v19, %v8317_v37  ;;  %v5055_v21 = vld [vmem:[%s8174_s14 + $0x58] sm:$0xff] }
 0x803   :  { %v7193_v38 = vpop.f32.mrf.mxu2 }
 0x805   :  { %v2270_v44 = vpop.f32.mrf.mxu0 }
 0x806   :  { %v2615_v10 = vmul.f32 %v7115_v36, %v2270_v44  ;;  %v1060_v36 = vld [vmem:[#allocation13 + $0x168] sm:$0xff] }
 0x808   :  { %2317 = vmatmul.f32.gmra.mxu0 %v2149_v18  ;;  %4642 = vmatmul.msk.f32.gmra.mxu2 %vm411_vm7, %v5054_v7  ;;  %v7208_v5 = vadd.f32 %v3402_v50, %v2615_v10  ;;  %v2150_v18 = vmul.f32 %v7134_v31, %v1060_v36  ;;  %v7218_v7 = vpop.f32.mrf.mxu3  ;;  %v1766_v50 = vmul.f32 1.442695, %v1671_v11  ;;  %v4971_v19 = vpop.eup %4970  ;;  %v8318_v36 = vld [vmem:[#allocation47_spill] sm:$0xff] }
 0x809   :  { %4617 = vmatmul.msk.f32.gmra.mxu1 %vm411_vm7, %v6579_v42  ;;  %v7220_v10 = vpop.f32.mrf.mxu1  ;;  %v1608_v42 = vld [vmem:[%s8171_s11 + $0x100] sm:$0xff] }
 0x80a   :  { %8316 = vst [vmem:[#allocation40_spill] sm:$0xff] %v7208_v5  ;;  %v3407_v4 = vmul.f32 %v4969_v39, %v7208_v5  ;;  %4972 = vpow2.f32 %v1766_v50  ;;  %v1672_v37 = vmul.f32 %v1608_v42, %v8318_v36 }
 0x80b   :  { %v7214_v25 = vpop.f32.mrf.mxu2 }
 0x80d   :  { %v2273_v44 = vpop.f32.mrf.mxu0 }
 0x80e   :  { %v2616_v51 = vmul.f32 %v7136_v17, %v2273_v44  ;;  %v1061_v17 = vld [vmem:[#allocation13 + $0x170] sm:$0xff] }
 0x810   :  { %2320 = vmatmul.f32.gmra.mxu0 %v2150_v18  ;;  %4643 = vmatmul.msk.f32.gmra.mxu2 %vm411_vm7, %v5055_v21  ;;  %v7229_v31 = vadd.f32 %v3407_v4, %v2616_v51  ;;  %v2151_v18 = vmul.f32 %v7155_v56, %v1061_v17  ;;  %v1768_v51 = vmul.f32 1.442695, %v1672_v37  ;;  %v2063_v4 = vpop.f32.mrf.mxu3  ;;  %v4973_v42 = vpop.eup %4972  ;;  %v1609_v17 = vld [vmem:[%s8171_s11 + $0x108] sm:$0xff] }
 0x811   :  { %4618 = vmatmul.msk.f32.gmra.mxu1 %vm411_vm7, %v6610_v48  ;;  %v7239_v21 = vpop.f32.mrf.mxu1  ;;  %v5056_v48 = vld [vmem:[%s8174_s14 + $0x60] sm:$0xff] }
 0x812   :  { %v3412_v39 = vmul.f32 %v4971_v19, %v7229_v31  ;;  %v1062_v19 = vld [vmem:[#allocation13 + $0x178] sm:$0xff]  ;;  %4974 = vpow2.f32 %v1768_v51 }
 0x813   :  { %v7235_v11 = vpop.f32.mrf.mxu2  ;;  %v2152_v36 = vmul.f32 %v7176_v22, %v1062_v19 }
 0x815   :  { %v2276_v44 = vpop.f32.mrf.mxu0 }
 0x816   :  { %v2617_v5 = vmul.f32 %v7157_v23, %v2276_v44 }
 0x818   :  { %2323 = vmatmul.f32.gmra.mxu0 %v2151_v18  ;;  %4644 = vmatmul.msk.f32.gmra.mxu2 %vm411_vm7, %v5056_v48  ;;  %v7245_v50 = vadd.f32 %v3412_v39, %v2617_v5  ;;  %v1673_v18 = vmul.f32 %v1609_v17, %v6602_v20  ;;  %v4975_v51 = vpop.eup %4974  ;;  %v1063_v48 = vld [vmem:[#allocation13 + $0x180] sm:$0xff]  ;;  %v1610_v20 = vld [vmem:[%s8171_s11 + $0x110] sm:$0xff] }
 0x819   :  { %4619 = vmatmul.msk.f32.gmra.mxu1 %vm411_vm7, %v6641_v46  ;;  %v7257_v39 = vpop.f32.mrf.mxu1  ;;  %v5057_v46 = vld [vmem:[%s8174_s14 + $0x68] sm:$0xff]  ;;  %v2153_v17 = vmul.f32 %v7197_v62, %v1063_v48 }
 0x81a   :  { %v3417_v56 = vmul.f32 %v4973_v42, %v7245_v50  ;;  %v2066_v42 = vpop.f32.mrf.mxu3 }
 0x81b   :  { %v7250_v23 = vpop.f32.mrf.mxu2 }
 0x81d   :  { %v2279_v37 = vpop.f32.mrf.mxu0 }
 0x81e   :  { %v2618_v5 = vmul.f32 %v7178_v33, %v2279_v37  ;;  %v1770_v33 = vmul.f32 1.442695, %v1673_v18 }
 0x820   :  { %2326 = vmatmul.f32.gmra.mxu0 %v2152_v36  ;;  %4645 = vmatmul.msk.f32.gmra.mxu2 %vm411_vm7, %v5057_v46  ;;  %v7264_v44 = vadd.f32 %v3417_v56, %v2618_v5  ;;  %4976 = vpow2.f32 %v1770_v33  ;;  %v1674_v5 = vmul.f32 %v1610_v20, %v6633_v55  ;;  %v1064_v46 = vld [vmem:[#allocation13 + $0x188] sm:$0xff]  ;;  %v1611_v55 = vld [vmem:[%s8171_s11 + $0x118] sm:$0xff] }
 0x821   :  { %4620 = vmatmul.msk.f32.gmra.mxu1 %vm411_vm7, %v6670_v16  ;;  %v7276_v37 = vpop.f32.mrf.mxu1  ;;  %v5058_v16 = vld [vmem:[%s8174_s14 + $0x70] sm:$0xff]  ;;  %v2154_v48 = vmul.f32 %v7218_v7, %v1064_v46  ;;  %v1065_v7 = vld [vmem:[#allocation13 + $0x190] sm:$0xff] }
 0x822   :  { %v3422_v22 = vmul.f32 %v4975_v51, %v7264_v44  ;;  %v1772_v62 = vmul.f32 1.442695, %v1674_v5  ;;  %v2069_v51 = vpop.f32.mrf.mxu3  ;;  %v2155_v46 = vmul.f32 %v2063_v4, %v1065_v7  ;;  %v1613_v7 = vld [vmem:[%s8171_s11 + $0x128] sm:$0xff] }
 0x823   :  { %v7269_v19 = vpop.f32.mrf.mxu2 }
 0x824   :  { %4978 = vpow2.f32 %v1772_v62 }
 0x825   :  { %v2282_v36 = vpop.f32.mrf.mxu0 }
 0x826   :  { %v2619_v56 = vmul.f32 %v7199_v6, %v2282_v36  ;;  %v4977_v33 = vpop.eup %4976 }
 0x828   :  { %2329 = vmatmul.f32.gmra.mxu0 %v2153_v17  ;;  %4646 = vmatmul.msk.f32.gmra.mxu2 %vm411_vm7, %v5058_v16  ;;  %v7283_v18 = vadd.f32 %v3422_v22, %v2619_v56  ;;  %v5059_v56 = vld [vmem:[%s8174_s14 + $0x78] sm:$0xff] }
 0x829   :  { %4621 = vmatmul.msk.f32.gmra.mxu1 %vm411_vm7, %v6699_v58  ;;  %v7294_v22 = vpop.f32.mrf.mxu1  ;;  %v1675_v58 = vmul.f32 %v1611_v55, %v6663_v41  ;;  %v1612_v41 = vld [vmem:[%s8171_s11 + $0x120] sm:$0xff] }
 0x82a   :  { %8319 = vst [vmem:[#allocation37_spill] sm:$0xff] %v7283_v18  ;;  %v3427_v36 = vmul.f32 %v4977_v33, %v7283_v18  ;;  %v4979_v62 = vpop.eup %4978 }
 0x82b   :  { %v7287_v6 = vpop.f32.mrf.mxu2 }
 0x82d   :  { %v2285_v20 = vpop.f32.mrf.mxu0 }
 0x82e   :  { %v2620_v17 = vmul.f32 %v7220_v10, %v2285_v20  ;;  %v1774_v10 = vmul.f32 1.442695, %v1675_v58  ;;  %v1066_v58 = vld [vmem:[#allocation13 + $0x198] sm:$0xff] }
 0x830   :  { %2332 = vmatmul.f32.gmra.mxu0 %v2154_v48  ;;  %4647 = vmatmul.msk.f32.gmra.mxu2 %vm411_vm7, %v5059_v56  ;;  %v7302_v5 = vadd.f32 %v3427_v36, %v2620_v17  ;;  %v2072_v48 = vpop.f32.mrf.mxu3  ;;  %4980 = vpow2.f32 %v1774_v10  ;;  %v5060_v36 = vld [vmem:[%s8174_s14 + $0x80] sm:$0xff] }
 0x831   :  { %4622 = vmatmul.msk.f32.gmra.mxu1 %vm411_vm7, %v6725_v28  ;;  %v7312_v20 = vpop.f32.mrf.mxu1  ;;  %v1676_v28 = vmul.f32 %v1612_v41, %v6692_v29  ;;  %v5061_v29 = vld [vmem:[#allocation13] sm:$0xff]  ;;  %v2156_v41 = vmul.f32 %v2066_v42, %v1066_v58 }
 0x832   :  { %v3432_v17 = vmul.f32 %v4979_v62, %v7302_v5  ;;  %v5062_v42 = vld [vmem:[%s8174_s14 + $0x88] sm:$0xff] }
 0x833   :  { %v7306_v16 = vpop.f32.mrf.mxu2  ;;  %v1067_v58 = vld [vmem:[#allocation13 + $0x1a0] sm:$0xff] }
 0x835   :  { %v2288_v55 = vpop.f32.mrf.mxu0 }
 0x836   :  { %v2621_v33 = vmul.f32 %v7239_v21, %v2288_v55  ;;  %v1776_v21 = vmul.f32 1.442695, %v1676_v28 }
 0x838   :  { %2335 = vmatmul.f32.gmra.mxu0 %v2155_v46  ;;  %4648 = vmatmul.msk.f32.gmra.mxu2 %vm411_vm7, %v5060_v36  ;;  %v7320_v4 = vadd.f32 %v3432_v17, %v2621_v33  ;;  %v4981_v46 = vpop.eup %4980  ;;  %4982 = vpow2.f32 %v1776_v21  ;;  %v2075_v28 = vpop.f32.mrf.mxu3  ;;  %v1614_v36 = vld [vmem:[%s8171_s11 + $0x130] sm:$0xff] }
 0x839   :  { %4623 = vmatmul.msk.f32.gmra.mxu1 %vm411_vm7, %v6751_v52  ;;  %v7328_v33 = vpop.f32.mrf.mxu1  ;;  %v1677_v52 = vmul.f32 %v1613_v7, %v6718_v0  ;;  %v1678_v0 = vmul.f32 %v1614_v36, %v6744_v35  ;;  %v5063_v7 = vld [vmem:[#allocation13 + $0x8] sm:$0xff] }
 0x83a   :  { %v3437_v17 = vmul.f32 %v4981_v46, %v7320_v4  ;;  %v5064_v35 = vld [vmem:[%s8174_s14 + $0x90] sm:$0xff] }
 0x83b   :  { %v2732_v56 = vpop.f32.mrf.mxu2  ;;  %v1778_v21 = vmul.f32 1.442695, %v1677_v52 }
 0x83c   :  { %v2924_v10 = vmul.f32 %v5061_v29, %v2732_v56 }
 0x83d   :  { %v2291_v62 = vpop.f32.mrf.mxu0  ;;  %4984 = vpow2.f32 %v1778_v21 }
 0x83e   :  { %v2622_v55 = vmul.f32 %v7257_v39, %v2291_v62  ;;  %3004 = vmatmul.f32.vlgmr.msra.gmra.mxu3 %v2924_v10  ;;  %v2157_v10 = vmul.f32 %v2069_v51, %v1067_v58  ;;  %v5065_v58 = vld [vmem:[#allocation13 + $0x10] sm:$0xff] }
 0x840   :  { %2338 = vmatmul.f32.gmra.mxu0 %v2156_v41  ;;  %4649 = vmatmul.msk.f32.gmra.mxu2 %vm411_vm7, %v5062_v42  ;;  %v7339_v39 = vadd.f32 %v3437_v17, %v2622_v55  ;;  %v4983_v41 = vpop.eup %4982  ;;  %v1780_v17 = vmul.f32 1.442695, %v1678_v0  ;;  %v2078_v52 = vpop.f32.mrf.mxu3 }
 0x841   :  { %4624 = vmatmul.msk.f32.gmra.mxu1 %vm411_vm7, %v6777_v27  ;;  %v7345_v18 = vpop.f32.mrf.mxu1  ;;  %v1615_v27 = vld [vmem:[%s8171_s11 + $0x138] sm:$0xff] }
 0x842   :  { %v3442_v55 = vmul.f32 %v4983_v41, %v7339_v39  ;;  %4986 = vpow2.f32 %v1780_v17  ;;  %v1679_v36 = vmul.f32 %v1615_v27, %v6770_v54  ;;  %v5066_v54 = vld [vmem:[%s8174_s14 + $0x98] sm:$0xff] }
 0x843   :  { %v2735_v56 = vpop.f32.mrf.mxu2 }
 0x844   :  { %v2925_v29 = vmul.f32 %v5063_v7, %v2735_v56  ;;  %v4985_v56 = vpop.eup %4984 }
 0x845   :  { %v2294_v46 = vpop.f32.mrf.mxu0 }
 0x846   :  { %v2623_v62 = vmul.f32 %v7276_v37, %v2294_v46  ;;  %3007 = vmatmul.f32.gmra.mxu3 %v2925_v29  ;;  %v1068_v37 = vld [vmem:[#allocation13 + $0x1a8] sm:$0xff]  ;;  %v1782_v46 = vmul.f32 1.442695, %v1679_v36 }
 0x847   :  { %v2158_v0 = vmul.f32 %v2072_v48, %v1068_v37  ;;  %v5067_v37 = vld [vmem:[#allocation13 + $0x18] sm:$0xff] }
 0x848   :  { %2341 = vmatmul.f32.gmra.mxu0 %v2157_v10  ;;  %4650 = vmatmul.msk.f32.gmra.mxu2 %vm411_vm7, %v5064_v35  ;;  %v7355_v51 = vadd.f32 %v3442_v55, %v2623_v62  ;;  %v1069_v62 = vld [vmem:[#allocation13 + $0x1b0] sm:$0xff]  ;;  %4988 = vpow2.f32 %v1782_v46  ;;  %v2081_v35 = vpop.f32.mrf.mxu3 }
 0x849   :  { %4625 = vmatmul.msk.f32.gmra.mxu1 %vm411_vm7, %v6803_v32  ;;  %v7361_v10 = vpop.f32.mrf.mxu1  ;;  %v1616_v32 = vld [vmem:[%s8171_s11 + $0x140] sm:$0xff] }
 0x84a   :  { %v3447_v41 = vmul.f32 %v4985_v56, %v7355_v51  ;;  %v1680_v17 = vmul.f32 %v1616_v32, %v6796_v15  ;;  %v5068_v15 = vld [vmem:[%s8174_s14 + $0xa0] sm:$0xff]  ;;  %v5069_v32 = vld [vmem:[#allocation13 + $0x20] sm:$0xff] }
 0x84b   :  { %v2738_v42 = vpop.f32.mrf.mxu2 }
 0x84c   :  { %v2926_v21 = vmul.f32 %v5065_v58, %v2738_v42  ;;  %v2159_v42 = vmul.f32 %v2075_v28, %v1069_v62  ;;  %v1784_v56 = vmul.f32 1.442695, %v1680_v17 }
 0x84d   :  { %v2297_v7 = vpop.f32.mrf.mxu0 }
 0x84e   :  { %v2624_v29 = vmul.f32 %v7294_v22, %v2297_v7  ;;  %3010 = vmatmul.f32.gmra.mxu3 %v2926_v21  ;;  %v4987_v22 = vpop.eup %4986  ;;  %4990 = vpow2.f32 %v1784_v56  ;;  %v5071_v56 = vld [vmem:[#allocation13 + $0x28] sm:$0xff] }
 0x84f   :  { %v4989_v28 = vpop.eup %4988 }
 0x850   :  { %2344 = vmatmul.f32.gmra.mxu0 %v2158_v0  ;;  %4651 = vmatmul.msk.f32.gmra.mxu2 %vm411_vm7, %v5066_v54  ;;  %v7371_v48 = vadd.f32 %v3447_v41, %v2624_v29  ;;  %v1070_v29 = vld [vmem:[#allocation13 + $0x1b8] sm:$0xff]  ;;  %v2084_v17 = vpop.f32.mrf.mxu3 }
 0x851   :  { %4626 = vmatmul.msk.f32.gmra.mxu1 %vm411_vm7, %v6829_v63  ;;  %v7378_v0 = vpop.f32.mrf.mxu1  ;;  %v1617_v63 = vld [vmem:[%s8171_s11 + $0x148] sm:$0xff] }
 0x852   :  { %v3452_v55 = vmul.f32 %v4987_v22, %v7371_v48  ;;  %v1681_v41 = vmul.f32 %v1617_v63, %v6822_v57  ;;  %v2160_v22 = vmul.f32 %v2078_v52, %v1070_v29  ;;  %v5070_v57 = vld [vmem:[%s8174_s14 + $0xa8] sm:$0xff] }
 0x853   :  { %v2741_v27 = vpop.f32.mrf.mxu2 }
 0x854   :  { %v2927_v36 = vmul.f32 %v5067_v37, %v2741_v27  ;;  %v1786_v37 = vmul.f32 1.442695, %v1681_v41 }
 0x855   :  { %v2300_v58 = vpop.f32.mrf.mxu0 }
 0x856   :  { %v2625_v21 = vmul.f32 %v7312_v20, %v2300_v58  ;;  %3013 = vmatmul.f32.gmra.mxu3 %v2927_v36  ;;  %v4991_v36 = vpop.eup %4990  ;;  %4992 = vpow2.f32 %v1786_v37 }
 0x858   :  { %2347 = vmatmul.f32.gmra.mxu0 %v2159_v42  ;;  %4652 = vmatmul.msk.f32.gmra.mxu2 %vm411_vm7, %v5068_v15  ;;  %v7387_v7 = vadd.f32 %v3452_v55, %v2625_v21  ;;  %v1071_v42 = vld [vmem:[#allocation13 + $0x1c0] sm:$0xff] }
 0x859   :  { %4627 = vmatmul.msk.f32.gmra.mxu1 %vm411_vm7, %v6855_v61  ;;  %v7394_v55 = vpop.f32.mrf.mxu1  ;;  %v1618_v61 = vld [vmem:[%s8171_s11 + $0x150] sm:$0xff]  ;;  %v2161_v15 = vmul.f32 %v2081_v35, %v1071_v42 }
 0x85a   :  { %v3457_v20 = vmul.f32 %v4989_v28, %v7387_v7  ;;  %v1682_v58 = vmul.f32 %v1618_v61, %v6848_v14  ;;  %v5072_v14 = vld [vmem:[%s8174_s14 + $0xb0] sm:$0xff] }
 0x85b   :  { %v2744_v46 = vpop.f32.mrf.mxu2 }
 0x85c   :  { %v2928_v54 = vmul.f32 %v5069_v32, %v2744_v46  ;;  %v1788_v41 = vmul.f32 1.442695, %v1682_v58  ;;  %v2087_v46 = vpop.f32.mrf.mxu3  ;;  %v4993_v32 = vpop.eup %4992 }
 0x85d   :  { %v2303_v62 = vpop.f32.mrf.mxu0 }
 0x85e   :  { %v2626_v27 = vmul.f32 %v7328_v33, %v2303_v62  ;;  %3016 = vmatmul.f32.gmra.mxu3 %v2928_v54  ;;  %4994 = vpow2.f32 %v1788_v41 }
 0x860   :  { %2350 = vmatmul.f32.gmra.mxu0 %v2160_v22  ;;  %4653 = vmatmul.msk.f32.gmra.mxu2 %vm411_vm7, %v5070_v57  ;;  %v7403_v52 = vadd.f32 %v3457_v20, %v2626_v27  ;;  %v5073_v27 = vld [vmem:[#allocation13 + $0x30] sm:$0xff] }
 0x861   :  { %4628 = vmatmul.msk.f32.gmra.mxu1 %vm411_vm7, %v6881_v2  ;;  %v7410_v20 = vpop.f32.mrf.mxu1  ;;  %v1619_v2 = vld [vmem:[%s8171_s11 + $0x158] sm:$0xff] }
 0x862   :  { %v3462_v33 = vmul.f32 %v4991_v36, %v7403_v52  ;;  %v1683_v22 = vmul.f32 %v1619_v2, %v6874_v49  ;;  %v5074_v49 = vld [vmem:[%s8174_s14 + $0xb8] sm:$0xff] }
 0x863   :  { %v2747_v21 = vpop.f32.mrf.mxu2 }
 0x864   :  { %v2929_v63 = vmul.f32 %v5071_v56, %v2747_v21  ;;  %v1073_v21 = vld [vmem:[#allocation13 + $0x1d0] sm:$0xff] }
 0x865   :  { %v2306_v28 = vpop.f32.mrf.mxu0  ;;  %v2163_v41 = vmul.f32 %v2087_v46, %v1073_v21 }
 0x866   :  { %v2627_v29 = vmul.f32 %v7345_v18, %v2306_v28  ;;  %3019 = vmatmul.f32.gmra.mxu3 %v2929_v63  ;;  %v1072_v18 = vld [vmem:[#allocation13 + $0x1c8] sm:$0xff]  ;;  %v5075_v28 = vld [vmem:[#allocation13 + $0x38] sm:$0xff] }
 0x867   :  { %v2162_v61 = vmul.f32 %v2084_v17, %v1072_v18  ;;  %v4995_v17 = vpop.eup %4994 }
 0x868   :  { %2353 = vmatmul.f32.gmra.mxu0 %v2161_v15  ;;  %4654 = vmatmul.msk.f32.gmra.mxu2 %vm411_vm7, %v5072_v14  ;;  %v7419_v35 = vadd.f32 %v3462_v33, %v2627_v29  ;;  %v1790_v33 = vmul.f32 1.442695, %v1683_v22  ;;  %v1074_v22 = vld [vmem:[#allocation13 + $0x1d8] sm:$0xff] }
 0x869   :  { %4629 = vmatmul.msk.f32.gmra.mxu1 %vm411_vm7, %v6906_v1  ;;  %v7426_v42 = vpop.f32.mrf.mxu1  ;;  %v1620_v1 = vld [vmem:[%s8171_s11 + $0x160] sm:$0xff] }
 0x86a   :  { %v3467_v54 = vmul.f32 %v4993_v32, %v7419_v35  ;;  %4996 = vpow2.f32 %v1790_v33  ;;  %v1684_v63 = vmul.f32 %v1620_v1, %v6897_v3  ;;  %v5076_v3 = vld [vmem:[%s8174_s14 + $0xc0] sm:$0xff] }
 0x86b   :  { %v2750_v62 = vpop.f32.mrf.mxu2 }
 0x86c   :  { %v2930_v37 = vmul.f32 %v5073_v27, %v2750_v62  ;;  %v1792_v18 = vmul.f32 1.442695, %v1684_v63 }
 0x86d   :  { %v2309_v57 = vpop.f32.mrf.mxu0 }
 0x86e   :  { %v2628_v36 = vmul.f32 %v7361_v10, %v2309_v57  ;;  %3022 = vmatmul.f32.gmra.mxu3 %v2930_v37  ;;  %v2090_v10 = vpop.f32.mrf.mxu3  ;;  %4998 = vpow2.f32 %v1792_v18 }
 0x870   :  { %2356 = vmatmul.f32.gmra.mxu0 %v2162_v61  ;;  %4655 = vmatmul.msk.f32.gmra.mxu2 %vm411_vm7, %v5074_v49  ;;  %v7435_v58 = vadd.f32 %v3467_v54, %v2628_v36  ;;  %v4997_v46 = vpop.eup %4996  ;;  %v5077_v61 = vld [vmem:[#allocation13 + $0x40] sm:$0xff]  ;;  %v2164_v36 = vmul.f32 %v2090_v10, %v1074_v22 }
 0x871   :  { %4630 = vmatmul.msk.f32.gmra.mxu1 %vm411_vm7, %v6932_v43  ;;  %v7442_v32 = vpop.f32.mrf.mxu1  ;;  %v1621_v43 = vld [vmem:[%s8171_s11 + $0x168] sm:$0xff] }
 0x872   :  { %v3472_v56 = vmul.f32 %v4995_v17, %v7435_v58  ;;  %v1685_v62 = vmul.f32 %v1621_v43, %v6923_v12  ;;  %v5078_v12 = vld [vmem:[%s8174_s14 + $0xc8] sm:$0xff] }
 0x873   :  { %v2753_v15 = vpop.f32.mrf.mxu2 }
 0x874   :  { %v2931_v29 = vmul.f32 %v5075_v28, %v2753_v15  ;;  %v1794_v17 = vmul.f32 1.442695, %v1685_v62  ;;  %v4999_v10 = vpop.eup %4998  ;;  %v5079_v28 = vld [vmem:[#allocation13 + $0x48] sm:$0xff] }
 0x875   :  { %v2312_v2 = vpop.f32.mrf.mxu0  ;;  %v7486_v62 = vld [vmem:[#allocation13 + $0x1e8] sm:$0xff] }
 0x876   :  { %v2629_v14 = vmul.f32 %v7378_v0, %v2312_v2  ;;  %3025 = vmatmul.f32.gmra.mxu3 %v2931_v29  ;;  %v2093_v37 = vpop.f32.mrf.mxu3  ;;  %5000 = vpow2.f32 %v1794_v17 }
 0x878   :  { %2359 = vmatmul.f32.gmra.mxu0 %v2163_v41  ;;  %4656 = vmatmul.msk.f32.gmra.mxu2 %vm411_vm7, %v5076_v3  ;;  %v7451_v54 = vadd.f32 %v3472_v56, %v2629_v14  ;;  %v7469_v56 = vld [vmem:[#allocation13 + $0x1e0] sm:$0xff] }
 0x879   :  { %4631 = vmatmul.msk.f32.gmra.mxu1 %vm411_vm7, %v6957_v26  ;;  %v7458_v49 = vpop.f32.mrf.mxu1  ;;  %v1622_v26 = vld [vmem:[%s8171_s11 + $0x170] sm:$0xff]  ;;  %v2165_v41 = vmul.f32 %v2093_v37, %v7469_v56 }
 0x87a   :  { %v3477_v0 = vmul.f32 %v4997_v46, %v7451_v54  ;;  %v1686_v63 = vmul.f32 %v1622_v26, %v6948_v60  ;;  %v1623_v46 = vld [vmem:[%s8171_s11 + $0x178] sm:$0xff]  ;;  %v5080_v60 = vld [vmem:[%s8174_s14 + $0xd0] sm:$0xff] }
 0x87b   :  { %v2756_v27 = vpop.f32.mrf.mxu2 }
 0x87c   :  { %v2932_v57 = vmul.f32 %v5077_v61, %v2756_v27  ;;  %v1796_v43 = vmul.f32 1.442695, %v1686_v63  ;;  %v1687_v27 = vmul.f32 %v1623_v46, %v6974_v53  ;;  %v5081_v61 = vld [vmem:[#allocation13 + $0x50] sm:$0xff] }
 0x87d   :  { %v2315_v33 = vpop.f32.mrf.mxu0  ;;  %v5082_v53 = vld [vmem:[%s8174_s14 + $0xd8] sm:$0xff] }
 0x87e   :  { %v2630_v1 = vmul.f32 %v7394_v55, %v2315_v33  ;;  %3028 = vmatmul.f32.gmra.mxu3 %v2932_v57  ;;  %v2096_v14 = vpop.f32.mrf.mxu3  ;;  %5002 = vpow2.f32 %v1796_v43  ;;  %v1798_v17 = vmul.f32 1.442695, %v1687_v27  ;;  %v7501_v63 = vld [vmem:[#allocation13 + $0x1f0] sm:$0xff] }
 0x880   :  { %2362 = vmatmul.f32.gmra.mxu0 %v2164_v36  ;;  %4657 = vmatmul.msk.f32.gmra.mxu2 %vm411_vm7, %v5078_v12  ;;  %v7467_v21 = vadd.f32 %v3477_v0, %v2630_v1  ;;  %v5001_v0 = vpop.eup %5000  ;;  %v2166_v36 = vmul.f32 %v2096_v14, %v7486_v62  ;;  %v1624_v12 = vld [vmem:[%s8171_s11 + $0x180] sm:$0xff]  ;;  %5004 = vpow2.f32 %v1798_v17 }
 0x881   :  { %v7475_v3 = vpop.f32.mrf.mxu1 }
 0x882   :  { %v3482_v55 = vmul.f32 %v4999_v10, %v7467_v21 }
 0x883   :  { %v2759_v15 = vpop.f32.mrf.mxu2 }
 0x884   :  { %v2933_v29 = vmul.f32 %v5079_v28, %v2759_v15  ;;  %v1688_v28 = vmul.f32 %v1624_v12, %v6997_v59 }
 0x885   :  { %v2318_v2 = vpop.f32.mrf.mxu0 }
 0x886   :  { %v2631_v18 = vmul.f32 %v7410_v20, %v2318_v2  ;;  %3031 = vmatmul.f32.gmra.mxu3 %v2933_v29  ;;  %v2099_v26 = vpop.f32.mrf.mxu3  ;;  %v1800_v46 = vmul.f32 1.442695, %v1688_v28  ;;  %v1625_v28 = vld [vmem:[%s8171_s11 + $0x188] sm:$0xff] }
 0x887   :  { %v2167_v14 = vmul.f32 %v2099_v26, %v7501_v63  ;;  %v5086_v26 = vld [vmem:[%s8174_s14 + $0xe8] sm:$0xff] }
 0x888   :  { %2365 = vmatmul.f32.gmra.mxu0 %v2165_v41  ;;  %4658 = vmatmul.msk.f32.gmra.mxu2 %vm411_vm7, %v5080_v60  ;;  %v7484_v22 = vadd.f32 %v3482_v55, %v2631_v18  ;;  %v5003_v55 = vpop.eup %5002  ;;  %v5083_v41 = vld [vmem:[#allocation13 + $0x58] sm:$0xff]  ;;  %5006 = vpow2.f32 %v1800_v46 }
 0x889   :  { %v5084_v60 = vld [vmem:[%s8174_s14 + $0xe0] sm:$0xff]  ;;  %v5005_v59 = vpop.eup %5004 }
 0x88a   :  { %v3487_v20 = vmul.f32 %v5001_v0, %v7484_v22 }
 0x88b   :  { %v2762_v37 = vpop.f32.mrf.mxu2 }
 0x88c   :  { %v2934_v57 = vmul.f32 %v5081_v61, %v2762_v37 }
 0x88d   :  { %v2321_v33 = vpop.f32.mrf.mxu0 }
 0x88e   :  { %v2632_v1 = vmul.f32 %v7426_v42, %v2321_v33  ;;  %3034 = vmatmul.f32.gmra.mxu3 %v2934_v57  ;;  %v7503_v42 = vpop.f32.mrf.mxu1  ;;  %v2102_v27 = vpop.f32.mrf.mxu3  ;;  %v5085_v57 = vld [vmem:[#allocation13 + $0x60] sm:$0xff] }
 0x890   :  { %2368 = vmatmul.f32.gmra.mxu0 %v2166_v36  ;;  %4659 = vmatmul.msk.f32.gmra.mxu2 %vm411_vm7, %v5082_v53  ;;  %v7499_v10 = vadd.f32 %v3487_v20, %v2632_v1  ;;  %v7515_v20 = vld [vmem:[#allocation13 + $0x1f8] sm:$0xff]  ;;  %v5007_v53 = vpop.eup %5006 }
 0x891   :  { %v2168_v33 = vmul.f32 %v2102_v27, %v7515_v20 }
 0x892   :  { %v3492_v15 = vmul.f32 %v5003_v55, %v7499_v10 }
 0x893   :  { %v2765_v29 = vpop.f32.mrf.mxu2 }
 0x894   :  { %v2935_v2 = vmul.f32 %v5083_v41, %v2765_v29  ;;  %v5087_v29 = vld [vmem:[#allocation13 + $0x68] sm:$0xff] }
 0x895   :  { %v2324_v18 = vpop.f32.mrf.mxu0 }
 0x896   :  { %v2633_v43 = vmul.f32 %v7442_v32, %v2324_v18  ;;  %3037 = vmatmul.f32.gmra.mxu3 %v2935_v2  ;;  %v2545_v32 = vpop.f32.mrf.mxu1  ;;  %v5088_v18 = vld [vmem:[%s8174_s14 + $0xf0] sm:$0xff] }
 0x898   :  { %2371 = vmatmul.f32.gmra.mxu0 %v2167_v14  ;;  %4660 = vmatmul.msk.f32.gmra.mxu2 %vm411_vm7, %v5084_v60  ;;  %v7513_v0 = vadd.f32 %v3492_v15, %v2633_v43  ;;  %v1689_v14 = vmul.f32 %v1625_v28, %v7024_v8  ;;  %v1626_v43 = vld [vmem:[%s8171_s11 + $0x190] sm:$0xff] }
 0x89a   :  { %v3497_v37 = vmul.f32 %v5005_v59, %v7513_v0  ;;  %v1802_v46 = vmul.f32 1.442695, %v1689_v14  ;;  %v5089_v59 = vld [vmem:[#allocation13 + $0x70] sm:$0xff] }
 0x89b   :  { %v2768_v61 = vpop.f32.mrf.mxu2 }
 0x89c   :  { %v2936_v36 = vmul.f32 %v5085_v57, %v2768_v61  ;;  %5008 = vpow2.f32 %v1802_v46 }
 0x89d   :  { %v2327_v1 = vpop.f32.mrf.mxu0 }
 0x89e   :  { %v2634_v17 = vmul.f32 %v7458_v49, %v2327_v1  ;;  %3040 = vmatmul.f32.gmra.mxu3 %v2936_v36  ;;  %v2548_v2 = vpop.f32.mrf.mxu1  ;;  %v1627_v36 = vld [vmem:[%s8171_s11 + $0x198] sm:$0xff] }
 0x8a0   :  { %2374 = vmatmul.f32.gmra.mxu0 %v2168_v33  ;;  %4661 = vmatmul.msk.f32.gmra.mxu2 %vm411_vm7, %v5086_v26  ;;  %v7524_v12 = vadd.f32 %v3497_v37, %v2634_v17  ;;  %v1690_v37 = vmul.f32 %v1626_v43, %v7045_v47  ;;  %v5090_v33 = vld [vmem:[%s8174_s14 + $0xf8] sm:$0xff]  ;;  %v1691_v47 = vmul.f32 %v1627_v36, %v7067_v34  ;;  %v5092_v34 = vld [vmem:[%s8174_s14 + $0x100] sm:$0xff] }
 0x8a2   :  { %v3502_v55 = vmul.f32 %v5007_v53, %v7524_v12  ;;  %v1804_v1 = vmul.f32 1.442695, %v1690_v37  ;;  %v5091_v53 = vld [vmem:[#allocation13 + $0x78] sm:$0xff]  ;;  %v5009_v28 = vpop.eup %5008  ;;  %v1806_v14 = vmul.f32 1.442695, %v1691_v47  ;;  %v5094_v47 = vld [vmem:[%s8174_s14 + $0x108] sm:$0xff] }
 0x8a3   :  { %v2771_v15 = vpop.f32.mrf.mxu2 }
 0x8a4   :  { %v2937_v49 = vmul.f32 %v5087_v29, %v2771_v15  ;;  %5010 = vpow2.f32 %v1804_v1 }
 0x8a5   :  { %v2330_v41 = vpop.f32.mrf.mxu0  ;;  %5012 = vpow2.f32 %v1806_v14 }
 0x8a6   :  { %3043 = vmatmul.f32.gmra.mxu3 %v2937_v49  ;;  %v2635_v57 = vmul.f32 %v7475_v3, %v2330_v41  ;;  %v2551_v8 = vpop.f32.mrf.mxu1  ;;  %v1628_v49 = vld [vmem:[%s8171_s11 + $0x1a0] sm:$0xff] }
 0x8a8   :  { %4662 = vmatmul.msk.f32.gmra.mxu2 %vm411_vm7, %v5088_v18  ;;  %v7547_v17 = vadd.f32 %v3502_v55, %v2635_v57  ;;  %v1692_v55 = vmul.f32 %v1628_v49, %v7088_v30  ;;  %v5095_v49 = vld [vmem:[#allocation13 + $0x88] sm:$0xff] }
 0x8aa   :  { %8320 = vst [vmem:[#allocation42_spill] sm:$0xff] %v7547_v17  ;;  %v3507_v41 = vmul.f32 %v5009_v28, %v7547_v17  ;;  %v5011_v46 = vpop.eup %5010  ;;  %v1808_v57 = vmul.f32 1.442695, %v1692_v55  ;;  %v5125_v17 = vld [vmem:[#allocation13 + $0x100] sm:$0xff] }
 0x8ab   :  { %v2774_v60 = vpop.f32.mrf.mxu2 }
 0x8ac   :  { %v2938_v27 = vmul.f32 %v5089_v59, %v2774_v60  ;;  %v1629_v59 = vld [vmem:[%s8171_s11 + $0x1a8] sm:$0xff]  ;;  %5014 = vpow2.f32 %v1808_v57 }
 0x8ad   :  { %v2333_v61 = vpop.f32.mrf.mxu0  ;;  %v1693_v30 = vmul.f32 %v1629_v59, %v7109_v13 }
 0x8ae   :  { %3046 = vmatmul.f32.gmra.mxu3 %v2938_v27  ;;  %v2636_v3 = vmul.f32 %v7503_v42, %v2333_v61  ;;  %v2554_v18 = vpop.f32.mrf.mxu1  ;;  %v5093_v27 = vld [vmem:[#allocation13 + $0x80] sm:$0xff] }
 0x8b0   :  { %4663 = vmatmul.msk.f32.gmra.mxu2 %vm411_vm7, %v5090_v33  ;;  %v7559_v42 = vadd.f32 %v3507_v41, %v2636_v3 }
 0x8b2   :  { %8321 = vst [vmem:[#allocation39_spill] sm:$0xff] %v7559_v42  ;;  %v3512_v61 = vmul.f32 %v5011_v46, %v7559_v42  ;;  %v1631_v46 = vld [vmem:[%s8171_s11 + $0x1b8] sm:$0xff] }
 0x8b3   :  { %v2777_v26 = vpop.f32.mrf.mxu2 }
 0x8b4   :  { %v2939_v15 = vmul.f32 %v5091_v53, %v2777_v26  ;;  %v5013_v26 = vpop.eup %5012 }
 0x8b5   :  { %v2336_v29 = vpop.f32.mrf.mxu0  ;;  %v5015_v55 = vpop.eup %5014 }
 0x8b6   :  { %3049 = vmatmul.f32.gmra.mxu3 %v2939_v15  ;;  %v2637_v43 = vmul.f32 %v2545_v32, %v2336_v29  ;;  %v1630_v32 = vld [vmem:[%s8171_s11 + $0x1b0] sm:$0xff]  ;;  %v1810_v15 = vmul.f32 1.442695, %v1693_v30  ;;  %v2557_v29 = vpop.f32.mrf.mxu1 }
 0x8b7   :  { %v1694_v13 = vmul.f32 %v1630_v32, %v7130_v40  ;;  %v5096_v40 = vld [vmem:[%s8174_s14 + $0x110] sm:$0xff] }
 0x8b8   :  { %4664 = vmatmul.msk.f32.gmra.mxu2 %vm411_vm7, %v5092_v34  ;;  %v7566_v33 = vadd.f32 %v3512_v61, %v2637_v43  ;;  %5016 = vpow2.f32 %v1810_v15  ;;  %v5097_v61 = vld [vmem:[#allocation13 + $0x90] sm:$0xff] }
 0x8b9   :  { %v1812_v43 = vmul.f32 1.442695, %v1694_v13  ;;  %v5098_v15 = vld [vmem:[%s8174_s14 + $0x118] sm:$0xff] }
 0x8ba   :  { %8322 = vst [vmem:[#allocation44_spill] sm:$0xff] %v7566_v33  ;;  %v3517_v53 = vmul.f32 %v5013_v26, %v7566_v33 }
 0x8bb   :  { %v2780_v60 = vpop.f32.mrf.mxu2  ;;  %5018 = vpow2.f32 %v1812_v43 }
 0x8bc   :  { %v2940_v37 = vmul.f32 %v5093_v27, %v2780_v60 }
 0x8bd   :  { %v2339_v36 = vpop.f32.mrf.mxu0 }
 0x8be   :  { %3052 = vmatmul.f32.gmra.mxu3 %v2940_v37  ;;  %v2638_v1 = vmul.f32 %v2548_v2, %v2339_v36  ;;  %v5017_v36 = vpop.eup %5016  ;;  %v2560_v32 = vpop.f32.mrf.mxu1 }
 0x8c0   :  { %4665 = vmatmul.msk.f32.gmra.mxu2 %vm411_vm7, %v5094_v47  ;;  %v7580_v2 = vadd.f32 %v3517_v53, %v2638_v1  ;;  %v1632_v53 = vld [vmem:[%s8171_s11 + $0x1c0] sm:$0xff] }
 0x8c1   :  { %v7576_v3 = vpop.f32.mrf.mxu3  ;;  %v5019_v13 = vpop.eup %5018 }
 0x8c2   :  { %v3522_v60 = vmul.f32 %v5015_v55, %v7580_v2 }
 0x8c3   :  { %v2783_v28 = vpop.f32.mrf.mxu2 }
 0x8c4   :  { %v2941_v41 = vmul.f32 %v5095_v49, %v2783_v28  ;;  %v1696_v49 = vmul.f32 %v1632_v53, %v7172_v9 }
 0x8c5   :  { %v2342_v14 = vpop.f32.mrf.mxu0 }
 0x8c6   :  { %v2639_v34 = vmul.f32 %v2551_v8, %v2342_v14  ;;  %3055 = vmatmul.f32.gmra.mxu3 %v2941_v41  ;;  %v1695_v8 = vmul.f32 %v1631_v46, %v7151_v24  ;;  %v5099_v14 = vld [vmem:[#allocation13 + $0x98] sm:$0xff]  ;;  %v1816_v46 = vmul.f32 1.442695, %v1696_v49 }
 0x8c8   :  { %4666 = vmatmul.msk.f32.gmra.mxu2 %vm411_vm7, %v5096_v40  ;;  %v7592_v27 = vadd.f32 %v3522_v60, %v2639_v34  ;;  %v1814_v26 = vmul.f32 1.442695, %v1695_v8  ;;  %v2563_v40 = vpop.f32.mrf.mxu1  ;;  %v1633_v60 = vld [vmem:[%s8171_s11 + $0x1c8] sm:$0xff]  ;;  %v5100_v8 = vld [vmem:[%s8174_s14 + $0x120] sm:$0xff] }
 0x8c9   :  { %v7590_v59 = vpop.f32.mrf.mxu3 }
 0x8ca   :  { %v3527_v47 = vmul.f32 %v5017_v36, %v7592_v27  ;;  %5020 = vpow2.f32 %v1814_v26 }
 0x8cb   :  { %v2786_v37 = vpop.f32.mrf.mxu2  ;;  %5022 = vpow2.f32 %v1816_v46 }
 0x8cc   :  { %v2942_v57 = vmul.f32 %v5097_v61, %v2786_v37 }
 0x8cd   :  { %v2345_v30 = vpop.f32.mrf.mxu0 }
 0x8ce   :  { %v2640_v1 = vmul.f32 %v2554_v18, %v2345_v30  ;;  %3058 = vmatmul.f32.gmra.mxu3 %v2942_v57  ;;  %v1697_v57 = vmul.f32 %v1633_v60, %v7193_v38  ;;  %v5101_v30 = vld [vmem:[#allocation13 + $0xa0] sm:$0xff] }
 0x8d0   :  { %4667 = vmatmul.msk.f32.gmra.mxu2 %vm411_vm7, %v5098_v15  ;;  %v7603_v24 = vadd.f32 %v3527_v47, %v2640_v1  ;;  %v5021_v9 = vpop.eup %5020  ;;  %v1818_v53 = vmul.f32 1.442695, %v1697_v57  ;;  %v1634_v15 = vld [vmem:[%s8171_s11 + $0x1d0] sm:$0xff] }
 0x8d1   :  { %v7605_v28 = vpop.f32.mrf.mxu3  ;;  %v5023_v38 = vpop.eup %5022 }
 0x8d2   :  { %v3532_v18 = vmul.f32 %v5019_v13, %v7603_v24  ;;  %v5102_v13 = vld [vmem:[%s8174_s14 + $0x128] sm:$0xff]  ;;  %5024 = vpow2.f32 %v1818_v53  ;;  %v5105_v53 = vld [vmem:[#allocation13 + $0xb0] sm:$0xff] }
 0x8d3   :  { %v2789_v41 = vpop.f32.mrf.mxu2 }
 0x8d4   :  { %v2943_v34 = vmul.f32 %v5099_v14, %v2789_v41  ;;  %v2566_v41 = vpop.f32.mrf.mxu1  ;;  %v1698_v14 = vmul.f32 %v1634_v15, %v7214_v25 }
 0x8d5   :  { %v2348_v55 = vpop.f32.mrf.mxu0 }
 0x8d6   :  { %v2641_v43 = vmul.f32 %v2557_v29, %v2348_v55  ;;  %3061 = vmatmul.f32.gmra.mxu3 %v2943_v34  ;;  %v5103_v55 = vld [vmem:[#allocation13 + $0xa8] sm:$0xff] }
 0x8d8   :  { %4668 = vmatmul.msk.f32.gmra.mxu2 %vm411_vm7, %v5100_v8  ;;  %v7616_v37 = vadd.f32 %v3532_v18, %v2641_v43  ;;  %v1820_v8 = vmul.f32 1.442695, %v1698_v14  ;;  %v5025_v25 = vpop.eup %5024 }
 0x8d9   :  { %v7618_v61 = vpop.f32.mrf.mxu3 }
 0x8da   :  { %v3537_v29 = vmul.f32 %v5021_v9, %v7616_v37  ;;  %v1635_v9 = vld [vmem:[%s8171_s11 + $0x1d8] sm:$0xff]  ;;  %5026 = vpow2.f32 %v1820_v8 }
 0x8db   :  { %v2792_v36 = vpop.f32.mrf.mxu2 }
 0x8dc   :  { %v2944_v1 = vmul.f32 %v5101_v30, %v2792_v36 }
 0x8dd   :  { %v2351_v47 = vpop.f32.mrf.mxu0 }
 0x8de   :  { %v2642_v26 = vmul.f32 %v2560_v32, %v2351_v47  ;;  %3064 = vmatmul.f32.gmra.mxu3 %v2944_v1  ;;  %v1699_v1 = vmul.f32 %v1635_v9, %v7235_v11  ;;  %v5107_v9 = vld [vmem:[#allocation13 + $0xb8] sm:$0xff] }
 0x8e0   :  { %4669 = vmatmul.msk.f32.gmra.mxu2 %vm411_vm7, %v5102_v13  ;;  %v7629_v18 = vadd.f32 %v3537_v29, %v2642_v26  ;;  %v5104_v29 = vld [vmem:[%s8174_s14 + $0x130] sm:$0xff]  ;;  %v2569_v26 = vpop.f32.mrf.mxu1  ;;  %v1822_v14 = vmul.f32 1.442695, %v1699_v1  ;;  %v5027_v11 = vpop.eup %5026 }
 0x8e1   :  { %v7631_v49 = vpop.f32.mrf.mxu3 }
 0x8e2   :  { %v3542_v32 = vmul.f32 %v5023_v38, %v7629_v18  ;;  %5028 = vpow2.f32 %v1822_v14 }
 0x8e3   :  { %v2795_v34 = vpop.f32.mrf.mxu2 }
 0x8e4   :  { %v2945_v43 = vmul.f32 %v5103_v55, %v2795_v34 }
 0x8e5   :  { %v2354_v46 = vpop.f32.mrf.mxu0 }
 0x8e6   :  { %v2643_v60 = vmul.f32 %v2563_v40, %v2354_v46  ;;  %3067 = vmatmul.f32.gmra.mxu3 %v2945_v43  ;;  %v8323_v43 = vld [vmem:[#allocation53_spill] sm:$0xff] }
 0x8e8   :  { %4670 = vmatmul.msk.f32.gmra.mxu2 %vm411_vm7, %v5104_v29  ;;  %v7642_v57 = vadd.f32 %v3542_v32, %v2643_v60  ;;  %v1636_v32 = vld [vmem:[%s8171_s11 + $0x1e0] sm:$0xff] }
 0x8e9   :  { %v3020_v36 = vpop.f32.mrf.mxu3  ;;  %v1700_v60 = vmul.f32 %v1636_v32, %v7250_v23  ;;  %v5029_v23 = vpop.eup %5028 }
 0x8ea   :  { %v7645_v30 = vmul.f32 %v6672_v45, %v3020_v36  ;;  %v3547_v40 = vmul.f32 %v5025_v25, %v7642_v57  ;;  %v5106_v45 = vld [vmem:[%s8174_s14 + $0x138] sm:$0xff]  ;;  %v2572_v36 = vpop.f32.mrf.mxu1 }
 0x8eb   :  { %v2798_v47 = vpop.f32.mrf.mxu2 }
 0x8ec   :  { %v2946_v15 = vmul.f32 %v5105_v53, %v2798_v47  ;;  %v1824_v47 = vmul.f32 1.442695, %v1700_v60  ;;  %v5108_v53 = vld [vmem:[%s8174_s14 + $0x140] sm:$0xff] }
 0x8ed   :  { %v2357_v13 = vpop.f32.mrf.mxu0 }
 0x8ee   :  { %v2644_v38 = vmul.f32 %v2566_v41, %v2357_v13  ;;  %3070 = vmatmul.f32.gmra.mxu3 %v2946_v15  ;;  %5030 = vpow2.f32 %v1824_v47  ;;  %v8325_v47 = vld [vmem:[#allocation55_spill] sm:$0xff] }
 0x8f0   :  { %4671 = vmatmul.msk.f32.gmra.mxu2 %vm411_vm7, %v5106_v45  ;;  %v7656_v34 = vadd.f32 %v3547_v40, %v2644_v38  ;;  %v1637_v40 = vld [vmem:[%s8171_s11 + $0x1e8] sm:$0xff]  ;;  %v8324_v38 = vld [vmem:[#allocation54_spill] sm:$0xff] }
 0x8f1   :  { %v3023_v55 = vpop.f32.mrf.mxu3  ;;  %v1701_v32 = vmul.f32 %v1637_v40, %v7269_v19 }
 0x8f2   :  { %v7659_v46 = vmul.f32 %v8323_v43, %v3023_v55  ;;  %v3552_v41 = vmul.f32 %v5027_v11, %v7656_v34  ;;  %v5109_v11 = vld [vmem:[#allocation13 + $0xc0] sm:$0xff] }
 0x8f3   :  { %v2801_v8 = vpop.f32.mrf.mxu2 }
 0x8f4   :  { %v2947_v29 = vmul.f32 %v5107_v9, %v2801_v8  ;;  %v1826_v8 = vmul.f32 1.442695, %v1701_v32  ;;  %v2575_v9 = vpop.f32.mrf.mxu1  ;;  %v5031_v19 = vpop.eup %5030 }
 0x8f5   :  { %v2360_v25 = vpop.f32.mrf.mxu0 }
 0x8f6   :  { %v2645_v1 = vmul.f32 %v2569_v26, %v2360_v25  ;;  %3073 = vmatmul.f32.gmra.mxu3 %v2947_v29  ;;  %v5110_v29 = vld [vmem:[%s8174_s14 + $0x148] sm:$0xff]  ;;  %5032 = vpow2.f32 %v1826_v8 }
 0x8f8   :  { %4672 = vmatmul.msk.f32.gmra.mxu2 %vm411_vm7, %v5108_v53  ;;  %v7670_v15 = vadd.f32 %v3552_v41, %v2645_v1  ;;  %v1638_v41 = vld [vmem:[%s8171_s11 + $0x1f0] sm:$0xff] }
 0x8f9   :  { %v3026_v13 = vpop.f32.mrf.mxu3  ;;  %v1702_v53 = vmul.f32 %v1638_v41, %v7287_v6 }
 0x8fa   :  { %v7673_v14 = vmul.f32 %v8324_v38, %v3026_v13  ;;  %v3557_v26 = vmul.f32 %v5029_v23, %v7670_v15  ;;  %v5111_v13 = vld [vmem:[#allocation13 + $0xc8] sm:$0xff] }
 0x8fb   :  { %v2804_v45 = vpop.f32.mrf.mxu2 }
 0x8fc   :  { %v2948_v55 = vmul.f32 %v5109_v11, %v2804_v45  ;;  %v1828_v11 = vmul.f32 1.442695, %v1702_v53  ;;  %v5033_v6 = vpop.eup %5032  ;;  %v2578_v8 = vpop.f32.mrf.mxu1 }
 0x8fd   :  { %v2363_v43 = vpop.f32.mrf.mxu0 }
 0x8fe   :  { %v2646_v60 = vmul.f32 %v2572_v36, %v2363_v43  ;;  %3076 = vmatmul.f32.gmra.mxu3 %v2948_v55  ;;  %v5112_v55 = vld [vmem:[%s8174_s14 + $0x150] sm:$0xff]  ;;  %5034 = vpow2.f32 %v1828_v11 }
 0x900   :  { %4673 = vmatmul.msk.f32.gmra.mxu2 %vm411_vm7, %v5110_v29  ;;  %v7684_v25 = vadd.f32 %v3557_v26, %v2646_v60  ;;  %v1639_v26 = vld [vmem:[%s8171_s11 + $0x1f8] sm:$0xff] }
 0x901   :  { %v3029_v1 = vpop.f32.mrf.mxu3  ;;  %v1703_v41 = vmul.f32 %v1639_v26, %v7306_v16  ;;  %v5115_v26 = vld [vmem:[#allocation13 + $0xd8] sm:$0xff] }
 0x902   :  { %v7687_v40 = vmul.f32 %v8325_v47, %v3029_v1  ;;  %v3562_v36 = vmul.f32 %v5031_v19, %v7684_v25  ;;  %v5113_v19 = vld [vmem:[#allocation13 + $0xd0] sm:$0xff] }
 0x903   :  { %v2807_v23 = vpop.f32.mrf.mxu2 }
 0x904   :  { %v2949_v38 = vmul.f32 %v5111_v13, %v2807_v23  ;;  %v1830_v23 = vmul.f32 1.442695, %v1703_v41  ;;  %v2581_v11 = vpop.f32.mrf.mxu1  ;;  %v5116_v41 = vld [vmem:[%s8174_s14 + $0x160] sm:$0xff] }
 0x905   :  { %v2366_v32 = vpop.f32.mrf.mxu0 }
 0x906   :  { %v2647_v45 = vmul.f32 %v2575_v9, %v2366_v32  ;;  %3079 = vmatmul.f32.gmra.mxu3 %v2949_v38  ;;  %v5035_v38 = vpop.eup %5034  ;;  %5036 = vpow2.f32 %v1830_v23 }
 0x908   :  { %4674 = vmatmul.msk.f32.gmra.mxu2 %vm411_vm7, %v5112_v55  ;;  %v7698_v43 = vadd.f32 %v3562_v36, %v2647_v45  ;;  %v5114_v36 = vld [vmem:[%s8174_s14 + $0x158] sm:$0xff] }
 0x909   :  { %v7700_v60 = vpop.f32.mrf.mxu3 }
 0x90a   :  { %v3567_v9 = vmul.f32 %v5033_v6, %v7698_v43 }
 0x90b   :  { %v2810_v29 = vpop.f32.mrf.mxu2 }
 0x90c   :  { %v2950_v1 = vmul.f32 %v5113_v19, %v2810_v29  ;;  %v5037_v29 = vpop.eup %5036 }
 0x90d   :  { %v2369_v47 = vpop.f32.mrf.mxu0 }
 0x90e   :  { %v2648_v53 = vmul.f32 %v2578_v8, %v2369_v47  ;;  %3082 = vmatmul.f32.gmra.mxu3 %v2950_v1 }
 0x910   :  { %4675 = vmatmul.msk.f32.gmra.mxu2 %vm411_vm7, %v5114_v36  ;;  %v7708_v13 = vadd.f32 %v3567_v9, %v2648_v53  ;;  %v5117_v53 = vld [vmem:[#allocation13 + $0xe0] sm:$0xff] }
 0x911   :  { %v3035_v32 = vpop.f32.mrf.mxu3  ;;  %v5118_v36 = vld [vmem:[%s8174_s14 + $0x168] sm:$0xff] }
 0x912   :  { %v3572_v45 = vmul.f32 %v5035_v38, %v7708_v13 }
 0x913   :  { %v2813_v16 = vpop.f32.mrf.mxu2 }
 0x914   :  { %v2951_v55 = vmul.f32 %v5115_v26, %v2813_v16  ;;  %v5120_v26 = vld [vmem:[%s8174_s14 + $0x170] sm:$0xff] }
 0x915   :  { %v2372_v6 = vpop.f32.mrf.mxu0 }
 0x916   :  { %v2649_v8 = vmul.f32 %v2581_v11, %v2372_v6  ;;  %3085 = vmatmul.f32.gmra.mxu3 %v2951_v55  ;;  %v5119_v11 = vld [vmem:[#allocation13 + $0xe8] sm:$0xff] }
 0x918   :  { %4676 = vmatmul.msk.f32.gmra.mxu2 %vm411_vm7, %v5116_v41  ;;  %v7715_v9 = vadd.f32 %v3572_v45, %v2649_v8  ;;  %v5121_v8 = vld [vmem:[#allocation13 + $0xf0] sm:$0xff] }
 0x919   :  { %v3038_v19 = vpop.f32.mrf.mxu3 }
 0x91a   :  { %v7718_v1 = vmul.f32 %v5037_v29, %v7715_v9  ;;  %v5122_v29 = vld [vmem:[%s8174_s14 + $0x178] sm:$0xff] }
 0x91b   :  { %v2816_v47 = vpop.f32.mrf.mxu2 }
 0x91c   :  { %v2952_v23 = vmul.f32 %v5117_v53, %v2816_v47 }
 0x91e   :  { %3088 = vmatmul.f32.gmra.mxu3 %v2952_v23  ;;  %v5123_v23 = vld [vmem:[#allocation13 + $0xf8] sm:$0xff] }
 0x920   :  { %4677 = vmatmul.msk.f32.gmra.mxu2 %vm411_vm7, %v5118_v36 }
 0x921   :  { %v3041_v38 = vpop.f32.mrf.mxu3 }
 0x923   :  { %v2819_v16 = vpop.f32.mrf.mxu2 }
 0x924   :  { %v2953_v45 = vmul.f32 %v5119_v11, %v2819_v16  ;;  %v5124_v16 = vld [vmem:[%s8174_s14 + $0x180] sm:$0xff] }
 0x926   :  { %3091 = vmatmul.f32.gmra.mxu3 %v2953_v45  ;;  %v8326_v45 = vld [vmem:[#allocation62_spill] sm:$0xff] }
 0x928   :  { %4678 = vmatmul.msk.f32.gmra.mxu2 %vm411_vm7, %v5120_v26 }
 0x929   :  { %v3044_v55 = vpop.f32.mrf.mxu3 }
 0x92b   :  { %v2822_v6 = vpop.f32.mrf.mxu2 }
 0x92c   :  { %v2954_v41 = vmul.f32 %v5121_v8, %v2822_v6  ;;  %v8327_v8 = vld [vmem:[#allocation61_spill] sm:$0xff] }
 0x92e   :  { %3094 = vmatmul.f32.gmra.mxu3 %v2954_v41 }
 0x930   :  { %4679 = vmatmul.msk.f32.gmra.mxu2 %vm411_vm7, %v5122_v29  ;;  %v8328_v29 = vld [vmem:[#allocation60_spill] sm:$0xff] }
 0x931   :  { %v3047_v47 = vpop.f32.mrf.mxu3  ;;  %v3722_v33 = vmul.f32 %v8328_v29, %v3044_v55  ;;  %v5127_v55 = vld [vmem:[#allocation13 + $0x108] sm:$0xff] }
 0x932   :  { %v3723_v41 = vmul.f32 %v8327_v8, %v3047_v47  ;;  %v5129_v8 = vld [vmem:[#allocation13 + $0x110] sm:$0xff] }
 0x933   :  { %v2825_v53 = vpop.f32.mrf.mxu2 }
 0x934   :  { %v2955_v36 = vmul.f32 %v5123_v23, %v2825_v53  ;;  %v8329_v53 = vld [vmem:[#allocation59_spill] sm:$0xff] }
 0x935   :  { %v3721_v23 = vmul.f32 %v8329_v53, %v3041_v38  ;;  %v8332_v38 = vld [vmem:[#allocation56_spill] sm:$0xff]  ;;  %v5130_v53 = vld [vmem:[%s8174_s14 + $0x198] sm:$0xff] }
 0x936   :  { %3097 = vmatmul.f32.gmra.mxu3 %v2955_v36  ;;  %v5126_v36 = vld [vmem:[%s8174_s14 + $0x188] sm:$0xff] }
 0x938   :  { %4680 = vmatmul.msk.f32.gmra.mxu2 %vm411_vm7, %v5124_v16 }
 0x939   :  { %v3050_v11 = vpop.f32.mrf.mxu3 }
 0x93a   :  { %v3724_v26 = vmul.f32 %v8326_v45, %v3050_v11  ;;  %v8330_v11 = vld [vmem:[#allocation58_spill] sm:$0xff]  ;;  %v8331_v45 = vld [vmem:[#allocation57_spill] sm:$0xff] }
 0x93b   :  { %v2828_v6 = vpop.f32.mrf.mxu2  ;;  %v3720_v47 = vmul.f32 %v8330_v11, %v3038_v19 }
 0x93c   :  { %v2956_v42 = vmul.f32 %v5125_v17, %v2828_v6  ;;  %3805 = vmatpush.msra.mxu0 %v3724_v26  ;;  %v3719_v26 = vmul.f32 %v8331_v45, %v3035_v32  ;;  %v3718_v6 = vmul.f32 %v8332_v38, %v7700_v60  ;;  %v8333_v60 = vld [vmem:[#allocation52_spill] sm:$0xff] }
 0x93d   :  { %v3713_v29 = vmul.f32 %v8333_v60, %v7631_v49  ;;  %v8338_v60 = vld [vmem:[#allocation30_spill] sm:$0xff] }
 0x93e   :  { %3100 = vmatmul.f32.gmra.mxu3 %v2956_v42  ;;  %3806 = vmatpush.msra.mxu0 %v3723_v41 }
 0x940   :  { %4681 = vmatmul.msk.f32.gmra.mxu2 %vm411_vm7, %v5126_v36  ;;  %3807 = vmatpush.msra.mxu0 %v3722_v33  ;;  %v5128_v33 = vld [vmem:[%s8174_s14 + $0x190] sm:$0xff] }
 0x941   :  { %v7744_v16 = vpop.f32.mrf.mxu3 }
 0x942   :  { %3808 = vmatpush.msra.mxu0 %v3721_v23  ;;  %v8334_v23 = vld [vmem:[#allocation51_spill] sm:$0xff] }
 0x943   :  { %v2831_v17 = vpop.f32.mrf.mxu2  ;;  %v3712_v36 = vmul.f32 %v8334_v23, %v7618_v61  ;;  %v5132_v61 = vld [vmem:[%s8174_s14 + $0x1a0] sm:$0xff]  ;;  %v5137_v23 = vld [vmem:[#allocation13 + $0x130] sm:$0xff] }
 0x944   :  { %v2957_v42 = vmul.f32 %v5127_v55, %v2831_v17  ;;  %3809 = vmatpush.msra.mxu0 %v3720_v47  ;;  %v5131_v47 = vld [vmem:[#allocation13 + $0x118] sm:$0xff]  ;;  %v8336_v17 = vld [vmem:[#allocation49_spill] sm:$0xff] }
 0x945   :  { %v3710_v45 = vmul.f32 %v8336_v17, %v7590_v59  ;;  %v5134_v59 = vld [vmem:[%s8174_s14 + $0x1a8] sm:$0xff]  ;;  %v5139_v17 = vld [vmem:[#allocation13 + $0x138] sm:$0xff] }
 0x946   :  { %3103 = vmatmul.f32.gmra.mxu3 %v2957_v42  ;;  %3810 = vmatpush.msra.mxu0 %v3719_v26  ;;  %v5133_v42 = vld [vmem:[#allocation13 + $0x120] sm:$0xff] }
 0x948   :  { %4682 = vmatmul.msk.f32.gmra.mxu2 %vm411_vm7, %v5128_v33  ;;  %3811 = vmatpush.msra.mxu0 %v3718_v6  ;;  %v5135_v33 = vld [vmem:[#allocation13 + $0x128] sm:$0xff] }
 0x949   :  { %v7754_v19 = vpop.f32.mrf.mxu3 }
 0x94a   :  { %3812 = vmatpush.msra.mxu0 %v7687_v40 }
 0x94b   :  { %v2834_v32 = vpop.f32.mrf.mxu2 }
 0x94c   :  { %v2958_v41 = vmul.f32 %v5129_v8, %v2834_v32  ;;  %3813 = vmatpush.msra.mxu0 %v7673_v14  ;;  %v5136_v8 = vld [vmem:[%s8174_s14 + $0x1b0] sm:$0xff] }
 0x94e   :  { %3106 = vmatmul.f32.gmra.mxu3 %v2958_v41  ;;  %3814 = vmatpush.msra.mxu0 %v7659_v46  ;;  %v8335_v46 = vld [vmem:[#allocation50_spill] sm:$0xff] }
 0x94f   :  { %v3711_v11 = vmul.f32 %v8335_v46, %v7605_v28 }
 0x950   :  { %4683 = vmatmul.msk.f32.gmra.mxu2 %vm411_vm7, %v5130_v53  ;;  %3815 = vmatpush.msra.mxu0 %v7645_v30  ;;  %v8337_v30 = vld [vmem:[#allocation48_spill] sm:$0xff] }
 0x951   :  { %v7766_v40 = vpop.f32.mrf.mxu3  ;;  %v3709_v26 = vmul.f32 %v8337_v30, %v7576_v3  ;;  %v5140_v30 = vld [vmem:[%s8174_s14 + $0x1c0] sm:$0xff] }
 0x952   :  { %3816 = vmatpush.msra.mxu0 %v3713_v29 }
 0x953   :  { %v2837_v14 = vpop.f32.mrf.mxu2 }
 0x954   :  { %v2959_v49 = vmul.f32 %v5131_v47, %v2837_v14  ;;  %3817 = vmatpush.msra.mxu0 %v3712_v36  ;;  %v5138_v14 = vld [vmem:[%s8174_s14 + $0x1b8] sm:$0xff] }
 0x956   :  { %3109 = vmatmul.f32.gmra.mxu3 %v2959_v49  ;;  %3818 = vmatpush.msra.mxu0 %v3711_v11  ;;  %v8339_v11 = vld [vmem:[#allocation34_spill] sm:$0xff] }
 0x958   :  { %4684 = vmatmul.msk.f32.gmra.mxu2 %vm411_vm7, %v5132_v61  ;;  %3819 = vmatpush.msra.mxu0 %v3710_v45  ;;  %v8340_v61 = vld [vmem:[#allocation31_spill] sm:$0xff] }
 0x959   :  { %v7780_v55 = vpop.f32.mrf.mxu3 }
 0x95a   :  { %3820 = vmatpush.msra.mxu0 %v3709_v26 }
 0x95b   :  { %v2840_v28 = vpop.f32.mrf.mxu2 }
 0x95c   :  { %v2960_v38 = vmul.f32 %v5133_v42, %v2840_v28 }
 0x95e   :  { %3112 = vmatmul.f32.gmra.mxu3 %v2960_v38  ;;  %v5141_v38 = vld [vmem:[#allocation13 + $0x140] sm:$0xff] }
 0x960   :  { %4685 = vmatmul.msk.f32.gmra.mxu2 %vm411_vm7, %v5134_v59 }
 0x961   :  { %v7786_v3 = vpop.f32.mrf.mxu3 }
 0x963   :  { %v2843_v6 = vpop.f32.mrf.mxu2 }
 0x964   :  { %v2961_v32 = vmul.f32 %v5135_v33, %v2843_v6  ;;  %v5142_v6 = vld [vmem:[%s8174_s14 + $0x1c8] sm:$0xff] }
 0x966   :  { %3115 = vmatmul.f32.gmra.mxu3 %v2961_v32  ;;  %v8341_v32 = vld [vmem:[#allocation36_spill] sm:$0xff] }
 0x968   :  { %4686 = vmatmul.msk.f32.gmra.mxu2 %vm411_vm7, %v5136_v8 }
 0x969   :  { %v3068_v41 = vpop.f32.mrf.mxu3 }
 0x96a   :  { %v7793_v29 = vmul.f32 %v8338_v60, %v3068_v41  ;;  %v5143_v60 = vld [vmem:[#allocation13 + $0x148] sm:$0xff] }
 0x96b   :  { %v2846_v53 = vpop.f32.mrf.mxu2 }
 0x96c   :  { %v2962_v36 = vmul.f32 %v5137_v23, %v2846_v53  ;;  %v5144_v23 = vld [vmem:[%s8174_s14 + $0x1d0] sm:$0xff] }
 0x96e   :  { %3118 = vmatmul.f32.gmra.mxu3 %v2962_v36 }
 0x970   :  { %4687 = vmatmul.msk.f32.gmra.mxu2 %vm411_vm7, %v5138_v14 }
 0x971   :  { %v3071_v46 = vpop.f32.mrf.mxu3 }
 0x972   :  { %v7800_v47 = vmul.f32 %v8339_v11, %v3071_v46  ;;  %v5145_v46 = vld [vmem:[#allocation13 + $0x150] sm:$0xff] }
 0x973   :  { %v2849_v49 = vpop.f32.mrf.mxu2 }
 0x974   :  { %v2963_v45 = vmul.f32 %v5139_v17, %v2849_v49  ;;  %v5146_v49 = vld [vmem:[%s8174_s14 + $0x1d8] sm:$0xff] }
 0x976   :  { %3121 = vmatmul.f32.gmra.mxu3 %v2963_v45 }
 0x978   :  { %4688 = vmatmul.msk.f32.gmra.mxu2 %vm411_vm7, %v5140_v30  ;;  %v5147_v30 = vld [vmem:[#allocation13 + $0x158] sm:$0xff] }
 0x979   :  { %v3074_v26 = vpop.f32.mrf.mxu3 }
 0x97a   :  { %v7807_v28 = vmul.f32 %v8340_v61, %v3074_v26  ;;  %v5148_v61 = vld [vmem:[%s8174_s14 + $0x1e0] sm:$0xff] }
 0x97b   :  { %v2852_v42 = vpop.f32.mrf.mxu2 }
 0x97c   :  { %v2964_v59 = vmul.f32 %v5141_v38, %v2852_v42 }
 0x97e   :  { %3124 = vmatmul.f32.gmra.mxu3 %v2964_v59  ;;  %v5149_v59 = vld [vmem:[#allocation13 + $0x160] sm:$0xff] }
 0x980   :  { %4689 = vmatmul.msk.f32.gmra.mxu2 %vm411_vm7, %v5142_v6 }
 0x981   :  { %v3077_v33 = vpop.f32.mrf.mxu3 }
 0x982   :  { %v7814_v8 = vmul.f32 %v8341_v32, %v3077_v33  ;;  %v5150_v33 = vld [vmem:[%s8174_s14 + $0x1e8] sm:$0xff] }
 0x983   :  { %v2855_v41 = vpop.f32.mrf.mxu2 }
 0x984   :  { %v2965_v53 = vmul.f32 %v5143_v60, %v2855_v41  ;;  %v5151_v60 = vld [vmem:[#allocation13 + $0x168] sm:$0xff] }
 0x986   :  { %3127 = vmatmul.f32.gmra.mxu3 %v2965_v53 }
 0x988   :  { %4690 = vmatmul.msk.f32.gmra.mxu2 %vm411_vm7, %v5144_v23  ;;  %v5152_v23 = vld [vmem:[%s8174_s14 + $0x1f0] sm:$0xff] }
 0x989   :  { %v3080_v36 = vpop.f32.mrf.mxu3 }
 0x98b   :  { %v2858_v14 = vpop.f32.mrf.mxu2 }
 0x98c   :  { %v2966_v11 = vmul.f32 %v5145_v46, %v2858_v14 }
 0x98e   :  { %3130 = vmatmul.f32.gmra.mxu3 %v2966_v11  ;;  %v5153_v11 = vld [vmem:[#allocation13 + $0x170] sm:$0xff] }
 0x990   :  { %4691 = vmatmul.msk.f32.gmra.mxu2 %vm411_vm7, %v5146_v49 }
 0x991   :  { %v3083_v17 = vpop.f32.mrf.mxu3 }
 0x993   :  { %v2861_v45 = vpop.f32.mrf.mxu2 }
 0x994   :  { %v2967_v26 = vmul.f32 %v5147_v30, %v2861_v45  ;;  %v5154_v45 = vld [vmem:[%s8174_s14 + $0x1f8] sm:$0xff] }
 0x996   :  { %3133 = vmatmul.f32.gmra.mxu3 %v2967_v26 }
 0x998   :  { %4692 = vmatmul.msk.f32.gmra.mxu2 %vm411_vm7, %v5148_v61  ;;  %v5155_v61 = vld [vmem:[#allocation13 + $0x178] sm:$0xff] }
 0x999   :  { %v3086_v42 = vpop.f32.mrf.mxu3 }
 0x99b   :  { %v2864_v38 = vpop.f32.mrf.mxu2 }
 0x99c   :  { %v2968_v6 = vmul.f32 %v5149_v59, %v2864_v38 }
 0x99e   :  { %3136 = vmatmul.f32.gmra.mxu3 %v2968_v6 }
 0x9a0   :  { %4693 = vmatmul.msk.f32.gmra.mxu2 %vm411_vm7, %v5150_v33 }
 0x9a1   :  { %v3089_v32 = vpop.f32.mrf.mxu3 }
 0x9a3   :  { %v2867_v41 = vpop.f32.mrf.mxu2 }
 0x9a4   :  { %v2969_v53 = vmul.f32 %v5151_v60, %v2867_v41  ;;  %v5156_v60 = vld [vmem:[#allocation13 + $0x180] sm:$0xff] }
 0x9a6   :  { %3139 = vmatmul.f32.gmra.mxu3 %v2969_v53 }
 0x9a8   :  { %4694 = vmatmul.msk.f32.gmra.mxu2 %vm411_vm7, %v5152_v23 }
 0x9a9   :  { %v3092_v14 = vpop.f32.mrf.mxu3 }
 0x9aa   :  { %v3738_v23 = vmul.f32 %v7229_v31, %v3092_v14  ;;  %v5158_v14 = vld [vmem:[#allocation13 + $0x190] sm:$0xff] }
 0x9ab   :  { %v2870_v46 = vpop.f32.mrf.mxu2 }
 0x9ac   :  { %v2970_v49 = vmul.f32 %v5153_v11, %v2870_v46  ;;  %v8342_v46 = vld [vmem:[#allocation40_spill] sm:$0xff] }
 0x9ad   :  { %v3737_v11 = vmul.f32 %v8342_v46, %v3089_v32  ;;  %v5159_v46 = vld [vmem:[#allocation13 + $0x198] sm:$0xff] }
 0x9ae   :  { %3142 = vmatmul.f32.gmra.mxu3 %v2970_v49 }
 0x9b0   :  { %4695 = vmatmul.msk.f32.gmra.mxu2 %vm411_vm7, %v5154_v45  ;;  %v8343_v45 = vld [vmem:[#allocation35_spill] sm:$0xff] }
 0x9b1   :  { %v3095_v30 = vpop.f32.mrf.mxu3 }
 0x9b2   :  { %v3739_v41 = vmul.f32 %v7245_v50, %v3095_v30  ;;  %v8345_v30 = vld [vmem:[#allocation33_spill] sm:$0xff] }
 0x9b3   :  { %v2873_v26 = vpop.f32.mrf.mxu2 }
 0x9b4   :  { %v2971_v38 = vmul.f32 %v5155_v61, %v2873_v26  ;;  %v3736_v26 = vmul.f32 %v8343_v45, %v3086_v42 }
 0x9b6   :  { %3145 = vmatmul.f32.gmra.mxu3 %v2971_v38 }
 0x9b9   :  { %v3098_v59 = vpop.f32.mrf.mxu3 }
 0x9ba   :  { %v3740_v6 = vmul.f32 %v7264_v44, %v3098_v59  ;;  %v8344_v44 = vld [vmem:[#allocation38_spill] sm:$0xff]  ;;  %v5157_v59 = vld [vmem:[#allocation13 + $0x188] sm:$0xff] }
 0x9bb   :  { %v2876_v33 = vpop.f32.mrf.mxu2  ;;  %v3735_v38 = vmul.f32 %v8344_v44, %v3083_v17  ;;  %v8346_v17 = vld [vmem:[#allocation32_spill] sm:$0xff] }
 0x9bc   :  { %v2972_v53 = vmul.f32 %v5156_v60, %v2876_v33  ;;  %3846 = vmatpush.msrb.mxu0 %v3740_v6  ;;  %v3734_v6 = vmul.f32 %v8345_v30, %v3080_v36  ;;  %v3729_v42 = vmul.f32 %v8346_v17, %v7786_v3  ;;  %v8350_v3 = vld [vmem:[#allocation63_spill] sm:$0xff] }
 0x9bd   :  { %v5163_v17 = vld [vmem:[#allocation13 + $0x1b8] sm:$0xff] }
 0x9be   :  { %3148 = vmatmul.f32.gmra.mxu3 %v2972_v53  ;;  %3847 = vmatpush.msrb.mxu0 %v3739_v41  ;;  %v8347_v41 = vld [vmem:[#allocation29_spill] sm:$0xff] }
 0x9bf   :  { %v3728_v60 = vmul.f32 %v8347_v41, %v7780_v55  ;;  %v8348_v53 = vld [vmem:[#allocation65_spill] sm:$0xff] }
 0x9c0   :  { %3848 = vmatpush.msrb.mxu0 %v3738_v23  ;;  %v3727_v23 = vmul.f32 %v8348_v53, %v7766_v40  ;;  %v5164_v53 = vld [vmem:[#allocation13 + $0x1c0] sm:$0xff] }
 0x9c1   :  { %v7844_v49 = vpop.f32.mrf.mxu3 }
 0x9c2   :  { %3849 = vmatpush.msrb.mxu0 %v3737_v11 }
 0x9c3   :  { %v2879_v61 = vpop.f32.mrf.mxu2 }
 0x9c4   :  { %v2973_v50 = vmul.f32 %v5157_v59, %v2879_v61  ;;  %3850 = vmatpush.msrb.mxu0 %v3736_v26  ;;  %v5160_v26 = vld [vmem:[#allocation13 + $0x1a0] sm:$0xff] }
 0x9c6   :  { %3151 = vmatmul.f32.gmra.mxu3 %v2973_v50  ;;  %3851 = vmatpush.msrb.mxu0 %v3735_v38  ;;  %v5161_v38 = vld [vmem:[#allocation13 + $0x1a8] sm:$0xff] }
 0x9c8   :  { %3852 = vmatpush.msrb.mxu0 %v3734_v6 }
 0x9c9   :  { %v7849_v31 = vpop.f32.mrf.mxu3 }
 0x9ca   :  { %3853 = vmatpush.msrb.mxu0 %v7814_v8 }
 0x9cb   :  { %v2882_v32 = vpop.f32.mrf.mxu2 }
 0x9cc   :  { %v2974_v33 = vmul.f32 %v5158_v14, %v2882_v32  ;;  %3854 = vmatpush.msrb.mxu0 %v7807_v28 }
 0x9ce   :  { %3154 = vmatmul.f32.gmra.mxu3 %v2974_v33  ;;  %3855 = vmatpush.msrb.mxu0 %v7800_v47  ;;  %v8349_v47 = vld [vmem:[#allocation64_spill] sm:$0xff] }
 0x9cf   :  { %v3726_v11 = vmul.f32 %v8349_v47, %v7754_v19  ;;  %v3777_v47 = vld [vmem:[%s8175_s15 + $0x20] sm:$0xff] }
 0x9d0   :  { %3856 = vmatpush.msrb.mxu0 %v7793_v29  ;;  %v3725_v29 = vmul.f32 %v8350_v3, %v7744_v16  ;;  %v5162_v16 = vld [vmem:[#allocation13 + $0x1b0] sm:$0xff] }
 0x9d1   :  { %v7857_v36 = vpop.f32.mrf.mxu3 }
 0x9d2   :  { %3857 = vmatpush.msrb.mxu0 %v3729_v42 }
 0x9d3   :  { %v2885_v8 = vpop.f32.mrf.mxu2 }
 0x9d4   :  { %v2975_v28 = vmul.f32 %v5159_v46, %v2885_v8  ;;  %3858 = vmatpush.msrb.mxu0 %v3728_v60 }
 0x9d6   :  { %3157 = vmatmul.f32.gmra.mxu3 %v2975_v28  ;;  %3859 = vmatpush.msrb.mxu0 %v3727_v23 }
 0x9d8   :  { %3860 = vmatpush.msrb.mxu0 %v3726_v11 }
 0x9d9   :  { %v7867_v45 = vpop.f32.mrf.mxu3 }
 0x9da   :  { %3861 = vmatpush.msrb.mxu0 %v3725_v29 }
 0x9db   :  { %v2888_v55 = vpop.f32.mrf.mxu2 }
 0x9dc   :  { %v2976_v61 = vmul.f32 %v5160_v26, %v2888_v55  ;;  %v3781_v55 = vld [vmem:[%s8175_s15 + $0x40] sm:$0xff]  ;;  %v5166_v26 = vld [vmem:[#allocation13 + $0x1d0] sm:$0xff] }
 0x9de   :  { %3160 = vmatmul.f32.gmra.mxu3 %v2976_v61 }
 0x9e1   :  { %v7869_v40 = vpop.f32.mrf.mxu3 }
 0x9e3   :  { %v2891_v44 = vpop.f32.mrf.mxu2 }
 0x9e4   :  { %v2977_v59 = vmul.f32 %v5161_v38, %v2891_v44  ;;  %v3785_v38 = vld [vmem:[%s8175_s15 + $0x60] sm:$0xff] }
 0x9e6   :  { %3163 = vmatmul.f32.gmra.mxu3 %v2977_v59  ;;  %v5167_v59 = vld [vmem:[#allocation13 + $0x1d8] sm:$0xff] }
 0x9e9   :  { %v3116_v19 = vpop.f32.mrf.mxu3 }
 0x9ea   :  { %v7872_v50 = vmul.f32 %v7371_v48, %v3116_v19  ;;  %v3773_v48 = vld [vmem:[%s8175_s15] sm:$0xff] }
 0x9eb   :  { %v2894_v30 = vpop.f32.mrf.mxu2  ;;  %3821 = vmatmul.f32.vlgmr.msra.gmra.mxu0 %v3773_v48 }
 0x9ec   :  { %v2978_v6 = vmul.f32 %v5162_v16, %v2894_v30 }
 0x9ee   :  { %3166 = vmatmul.f32.gmra.mxu3 %v2978_v6  ;;  %v3789_v6 = vld [vmem:[%s8175_s15 + $0x80] sm:$0xff] }
 0x9f1   :  { %v3119_v32 = vpop.f32.mrf.mxu3 }
 0x9f2   :  { %v7875_v14 = vmul.f32 %v7387_v7, %v3119_v32 }
 0x9f3   :  { %v2897_v33 = vpop.f32.mrf.mxu2  ;;  %3824 = vmatmul.f32.gmra.mxu0 %v3777_v47 }
 0x9f4   :  { %v2979_v42 = vmul.f32 %v5163_v17, %v2897_v33 }
 0x9f6   :  { %3169 = vmatmul.f32.gmra.mxu3 %v2979_v42  ;;  %v3793_v42 = vld [vmem:[%s8175_s15 + $0xa0] sm:$0xff] }
 0x9f9   :  { %v3122_v41 = vpop.f32.mrf.mxu3 }
 0x9fa   :  { %v7878_v60 = vmul.f32 %v7403_v52, %v3122_v41  ;;  %v5165_v52 = vld [vmem:[#allocation13 + $0x1c8] sm:$0xff] }
 0x9fb   :  { %v2900_v8 = vpop.f32.mrf.mxu2  ;;  %3827 = vmatmul.f32.gmra.mxu0 %v3781_v55 }
 0x9fc   :  { %v2980_v23 = vmul.f32 %v5164_v53, %v2900_v8  ;;  %v3797_v53 = vld [vmem:[%s8175_s15 + $0xc0] sm:$0xff] }
 0x9fe   :  { %3172 = vmatmul.f32.gmra.mxu3 %v2980_v23 }
 0xa01   :  { %v3125_v46 = vpop.f32.mrf.mxu3 }
 0xa02   :  { %v7884_v7 = vmul.f32 %v7419_v35, %v3125_v46 }
 0xa03   :  { %v2903_v28 = vpop.f32.mrf.mxu2  ;;  %3830 = vmatmul.f32.gmra.mxu0 %v3785_v38 }
 0xa04   :  { %v2981_v11 = vmul.f32 %v5165_v52, %v2903_v28  ;;  %v3801_v28 = vld [vmem:[%s8175_s15 + $0xe0] sm:$0xff] }
 0xa06   :  { %3175 = vmatmul.f32.gmra.mxu3 %v2981_v11  ;;  %v3774_v11 = vld [vmem:[%s8175_s15 + $0x8] sm:$0xff] }
 0xa09   :  { %v3128_v3 = vpop.f32.mrf.mxu3 }
 0xa0b   :  { %v2906_v29 = vpop.f32.mrf.mxu2  ;;  %3833 = vmatmul.f32.gmra.mxu0 %v3789_v6 }
 0xa0c   :  { %v2982_v61 = vmul.f32 %v5166_v26, %v2906_v29 }
 0xa0e   :  { %3178 = vmatmul.f32.gmra.mxu3 %v2982_v61 }
 0xa11   :  { %v3131_v35 = vpop.f32.mrf.mxu3 }
 0xa12   :  { %v3751_v61 = vmul.f32 %v7451_v54, %v3131_v35  ;;  %v3745_v54 = vmul.f32 %v7355_v51, %v7869_v40  ;;  %v3742_v51 = vmul.f32 %v7302_v5, %v7849_v31  ;;  %v8351_v40 = vld [vmem:[#allocation37_spill] sm:$0xff]  ;;  %v3798_v35 = vld [vmem:[%s8175_s15 + $0xc8] sm:$0xff] }
 0xa13   :  { %v2909_v44 = vpop.f32.mrf.mxu2  ;;  %3836 = vmatmul.f32.gmra.mxu0 %v3793_v42  ;;  %v3779_v5 = vld [vmem:[%s8175_s15 + $0x30] sm:$0xff] }
 0xa14   :  { %v2983_v19 = vmul.f32 %v5167_v59, %v2909_v44  ;;  %v3787_v44 = vld [vmem:[%s8175_s15 + $0x70] sm:$0xff] }
 0xa15   :  { %v3799_v42 = vld [vmem:[%s8175_s15 + $0xd0] sm:$0xff] }
 0xa16   :  { %3181 = vmatmul.f32.gmra.mxu3 %v2983_v19  ;;  %v3802_v19 = vld [vmem:[%s8175_s15 + $0xe8] sm:$0xff] }
 0xa19   :  { %v3134_v30 = vpop.f32.mrf.mxu3 }
 0xa1a   :  { %v3752_v26 = vmul.f32 %v7467_v21, %v3134_v30  ;;  %v3782_v21 = vld [vmem:[%s8175_s15 + $0x48] sm:$0xff]  ;;  %v3791_v30 = vld [vmem:[%s8175_s15 + $0x90] sm:$0xff] }
 0xa1b   :  { %v2912_v16 = vpop.f32.mrf.mxu2  ;;  %3839 = vmatmul.f32.gmra.mxu0 %v3797_v53 }
 0xa1c   :  { %v2984_v32 = vmul.f32 %v2912_v16, %v7469_v56 }
 0xa1e   :  { %3184 = vmatmul.f32.gmra.mxu3 %v2984_v32 }
 0xa21   :  { %v3137_v33 = vpop.f32.mrf.mxu3 }
 0xa22   :  { %v3753_v55 = vmul.f32 %v7484_v22, %v3137_v33  ;;  %v3744_v22 = vmul.f32 %v7339_v39, %v7867_v45  ;;  %v3775_v39 = vld [vmem:[%s8175_s15 + $0x10] sm:$0xff] }
 0xa23   :  { %v2915_v17 = vpop.f32.mrf.mxu2  ;;  %3842 = vmatmul.f32.gmra.mxu0 %v3801_v28 }
 0xa24   :  { %v2985_v41 = vmul.f32 %v2915_v17, %v7486_v62 }
 0xa26   :  { %3187 = vmatmul.f32.gmra.mxu3 %v2985_v41 }
 0xa29   :  { %v3140_v8 = vpop.f32.mrf.mxu3 }
 0xa2a   :  { %v3754_v29 = vmul.f32 %v7499_v10, %v3140_v8 }
 0xa2b   :  { %v2918_v48 = vpop.f32.mrf.mxu2  ;;  %3862 = vmatmul.f32.vlgmr.msrb.gmra.mxu0 %v3774_v11 }
 0xa2c   :  { %v2986_v56 = vmul.f32 %v2918_v48, %v7501_v63 }
 0xa2e   :  { %3190 = vmatmul.f32.gmra.mxu3 %v2986_v56 }
 0xa31   :  { %v3143_v23 = vpop.f32.mrf.mxu3 }
 0xa32   :  { %v3755_v63 = vmul.f32 %v7513_v0, %v3143_v23  ;;  %v3750_v0 = vmul.f32 %v7435_v58, %v3128_v3 }
 0xa33   :  { %v2921_v46 = vpop.f32.mrf.mxu2 }
 0xa34   :  { %v2987_v62 = vmul.f32 %v2921_v46, %v7515_v20 }
 0xa36   :  { %3193 = vmatmul.f32.gmra.mxu3 %v2987_v62  ;;  %v2584_v62 = vpop.f32.mrf.mxu1 }
 0xa39   :  { %v3146_v47 = vpop.f32.mrf.mxu3 }
 0xa3a   :  { %v3756_v52 = vmul.f32 %v7524_v12, %v3146_v47  ;;  %v3778_v12 = vld [vmem:[%s8175_s15 + $0x28] sm:$0xff] }
 0xa3b   :  { %3865 = vmatmul.f32.gmra.mxu0 %v3778_v12 }
 0xa3c   :  { %3887 = vmatpush.msrb.mxu1 %v3756_v52 }
 0xa3e   :  { %3888 = vmatpush.msrb.mxu1 %v3755_v63 }
 0xa40   :  { %3889 = vmatpush.msrb.mxu1 %v3754_v29 }
 0xa41   :  { %v7918_v20 = vpop.f32.mrf.mxu3 }
 0xa42   :  { %3890 = vmatpush.msrb.mxu1 %v3753_v55 }
 0xa43   :  { %3868 = vmatmul.f32.gmra.mxu0 %v3782_v21 }
 0xa44   :  { %3891 = vmatpush.msrb.mxu1 %v3752_v26 }
 0xa46   :  { %3892 = vmatpush.msrb.mxu1 %v3751_v61 }
 0xa48   :  { %3893 = vmatpush.msrb.mxu1 %v3750_v0 }
 0xa49   :  { %v7926_v10 = vpop.f32.mrf.mxu3 }
 0xa4a   :  { %3894 = vmatpush.msrb.mxu1 %v7884_v7  ;;  %v3786_v7 = vld [vmem:[%s8175_s15 + $0x68] sm:$0xff] }
 0xa4b   :  { %3871 = vmatmul.f32.gmra.mxu0 %v3786_v7  ;;  %v8353_v7 = vld [vmem:[#allocation39_spill] sm:$0xff] }
 0xa4c   :  { %3895 = vmatpush.msrb.mxu1 %v7878_v60  ;;  %v3743_v60 = vmul.f32 %v7320_v4, %v7857_v36  ;;  %v3790_v4 = vld [vmem:[%s8175_s15 + $0x88] sm:$0xff]  ;;  %v3783_v36 = vld [vmem:[%s8175_s15 + $0x50] sm:$0xff] }
 0xa4e   :  { %3896 = vmatpush.msrb.mxu1 %v7875_v14 }
 0xa50   :  { %3897 = vmatpush.msrb.mxu1 %v7872_v50  ;;  %v3741_v50 = vmul.f32 %v8351_v40, %v7844_v49  ;;  %v3794_v49 = vld [vmem:[%s8175_s15 + $0xa8] sm:$0xff] }
 0xa51   :  { %v7937_v58 = vpop.f32.mrf.mxu3 }
 0xa52   :  { %3898 = vmatpush.msrb.mxu1 %v3745_v54 }
 0xa53   :  { %3874 = vmatmul.f32.gmra.mxu0 %v3790_v4 }
 0xa54   :  { %3899 = vmatpush.msrb.mxu1 %v3744_v22 }
 0xa56   :  { %3900 = vmatpush.msrb.mxu1 %v3743_v60  ;;  %v3758_v60 = vmul.f32 %v8353_v7, %v7926_v10  ;;  %v8356_v7 = vld [vmem:[#allocation25_spill] sm:$0xff] }
 0xa58   :  { %3901 = vmatpush.msrb.mxu1 %v3742_v51  ;;  %v8354_v51 = vld [vmem:[#allocation42_spill] sm:$0xff] }
 0xa59   :  { %v7953_v45 = vpop.f32.mrf.mxu3  ;;  %v3757_v40 = vmul.f32 %v8354_v51, %v7918_v20  ;;  %v3784_v20 = vld [vmem:[%s8175_s15 + $0x58] sm:$0xff] }
 0xa5a   :  { %3902 = vmatpush.msrb.mxu1 %v3741_v50 }
 0xa5b   :  { %3903 = vmatmul.f32.vlgmr.msrb.gmra.mxu1 %v3775_v39  ;;  %3877 = vmatmul.f32.gmra.mxu0 %v3794_v49  ;;  %v3796_v49 = vld [vmem:[%s8175_s15 + $0xb8] sm:$0xff] }
 0xa61   :  { %v7961_v31 = vpop.f32.mrf.mxu3 }
 0xa63   :  { %3906 = vmatmul.f32.gmra.mxu1 %v3779_v5  ;;  %3880 = vmatmul.f32.gmra.mxu0 %v3798_v35  ;;  %v3788_v5 = vld [vmem:[%s8175_s15 + $0x78] sm:$0xff] }
 0xa69   :  { %v3164_v14 = vpop.f32.mrf.mxu3 }
 0xa6a   :  { %v3762_v3 = vmul.f32 %v7603_v24, %v3164_v14  ;;  %v2375_v24 = vpop.f32.mrf.mxu0  ;;  %v3804_v14 = vld [vmem:[%s8175_s15 + $0xf8] sm:$0xff] }
 0xa6b   :  { %3909 = vmatmul.f32.gmra.mxu1 %v3783_v36  ;;  %3883 = vmatmul.f32.gmra.mxu0 %v3802_v19  ;;  %v2650_v11 = vmul.f32 %v2584_v62, %v2375_v24  ;;  %v3800_v36 = vld [vmem:[%s8175_s15 + $0xd8] sm:$0xff] }
 0xa6d   :  { %v3579_v63 = vadd.f32 %v7718_v1, %v2650_v11 }
 0xa71   :  { %v3167_v38 = vpop.f32.mrf.mxu3 }
 0xa72   :  { %v3763_v59 = vmul.f32 %v7616_v37, %v3167_v38  ;;  %v3822_v32 = vpop.f32.mrf.mxu0  ;;  %v3795_v37 = vld [vmem:[%s8175_s15 + $0xb0] sm:$0xff] }
 0xa73   :  { %3912 = vmatmul.f32.gmra.mxu1 %v3787_v44 }
 0xa79   :  { %v3170_v16 = vpop.f32.mrf.mxu3 }
 0xa7a   :  { %v3764_v6 = vmul.f32 %v7629_v18, %v3170_v16  ;;  %v3825_v8 = vpop.f32.mrf.mxu0  ;;  %v3803_v18 = vld [vmem:[%s8175_s15 + $0xf0] sm:$0xff] }
 0xa7b   :  { %3915 = vmatmul.f32.gmra.mxu1 %v3791_v30 }
 0xa81   :  { %v3173_v33 = vpop.f32.mrf.mxu3 }
 0xa82   :  { %v3765_v17 = vmul.f32 %v7642_v57, %v3173_v33  ;;  %v7994_v53 = vpop.f32.mrf.mxu0 }
 0xa83   :  { %3918 = vmatmul.f32.gmra.mxu1 %v3795_v37 }
 0xa89   :  { %v3176_v41 = vpop.f32.mrf.mxu3 }
 0xa8a   :  { %v7996_v23 = vpop.f32.mrf.mxu0  ;;  %v3766_v1 = vmul.f32 %v7656_v34, %v3176_v41 }
 0xa8b   :  { %3921 = vmatmul.f32.gmra.mxu1 %v3799_v42 }
 0xa91   :  { %v3179_v48 = vpop.f32.mrf.mxu3 }
 0xa92   :  { %v7998_v46 = vpop.f32.mrf.mxu0  ;;  %v3767_v54 = vmul.f32 %v7670_v15, %v3179_v48  ;;  %v8352_v15 = vld [vmem:[#allocation44_spill] sm:$0xff] }
 0xa93   :  { %3924 = vmatmul.f32.gmra.mxu1 %v3803_v18 }
 0xa99   :  { %v3182_v56 = vpop.f32.mrf.mxu3 }
 0xa9a   :  { %v8000_v52 = vpop.f32.mrf.mxu0  ;;  %v3768_v21 = vmul.f32 %v7684_v25, %v3182_v56  ;;  %v3760_v25 = vmul.f32 %v7580_v2, %v7953_v45  ;;  %v3780_v45 = vld [vmem:[%s8175_s15 + $0x38] sm:$0xff] }
 0xaa1   :  { %v3185_v57 = vpop.f32.mrf.mxu3 }
 0xaa2   :  { %v8004_v12 = vpop.f32.mrf.mxu0  ;;  %v3769_v0 = vmul.f32 %v7698_v43, %v3185_v57 }
 0xaa9   :  { %v3188_v28 = vpop.f32.mrf.mxu3 }
 0xaaa   :  { %v3770_v61 = vmul.f32 %v7708_v13, %v3188_v28  ;;  %v8011_v22 = vpop.f32.mrf.mxu0  ;;  %v3761_v13 = vmul.f32 %v7592_v27, %v7961_v31  ;;  %v3776_v27 = vld [vmem:[%s8175_s15 + $0x18] sm:$0xff] }
 0xaab   :  { %v3792_v31 = vld [vmem:[%s8175_s15 + $0x98] sm:$0xff] }
 0xab1   :  { %v3191_v47 = vpop.f32.mrf.mxu3 }
 0xab2   :  { %v3771_v26 = vmul.f32 %v7715_v9, %v3191_v47  ;;  %v3863_v43 = vpop.f32.mrf.mxu0  ;;  %v3759_v9 = vmul.f32 %v8352_v15, %v7937_v58 }
 0xab3   :  { %v3864_v34 = vadd.f32 %v3863_v43, %v3822_v32 }
 0xab9   :  { %v3194_v29 = vpop.f32.mrf.mxu3 }
 0xaba   :  { %v3772_v55 = vmul.f32 %v3579_v63, %v3194_v29  ;;  %v3866_v39 = vpop.f32.mrf.mxu0 }
 0xabb   :  { %v3867_v58 = vadd.f32 %v3866_v39, %v3825_v8 }
 0xabc   :  { %3928 = vmatpush.msra.mxu0 %v3772_v55 }
 0xabe   :  { %3929 = vmatpush.msra.mxu0 %v3771_v26 }
 0xac0   :  { %3930 = vmatpush.msra.mxu0 %v3770_v61 }
 0xac2   :  { %3931 = vmatpush.msra.mxu0 %v3769_v0 }
 0xac4   :  { %3932 = vmatpush.msra.mxu0 %v3768_v21 }
 0xac6   :  { %3933 = vmatpush.msra.mxu0 %v3767_v54 }
 0xac8   :  { %3934 = vmatpush.msra.mxu0 %v3766_v1 }
 0xaca   :  { %3935 = vmatpush.msra.mxu0 %v3765_v17 }
 0xacc   :  { %3936 = vmatpush.msra.mxu0 %v3764_v6 }
 0xace   :  { %3937 = vmatpush.msra.mxu0 %v3763_v59 }
 0xad0   :  { %3938 = vmatpush.msra.mxu0 %v3762_v3  ;;  %v3869_v3 = vpop.f32.mrf.mxu0 }
 0xad2   :  { %3939 = vmatpush.msra.mxu0 %v3761_v13 }
 0xad4   :  { %3940 = vmatpush.msra.mxu0 %v3760_v25 }
 0xad6   :  { %3941 = vmatpush.msra.mxu0 %v3759_v9  ;;  %v8355_v9 = vld [vmem:[#allocation24_spill] sm:$0xff] }
 0xad8   :  { %3942 = vmatpush.msra.mxu0 %v3758_v60  ;;  %v3904_v50 = vpop.f32.mrf.mxu1  ;;  %v3872_v35 = vpop.f32.mrf.mxu0 }
 0xad9   :  { %v3905_v2 = vadd.f32 %v3904_v50, %v3864_v34  ;;  %v3873_v43 = vadd.f32 %v3872_v35, %v7996_v23 }
 0xada   :  { %3943 = vmatpush.msra.mxu0 %v3757_v40 }
 0xadb   :  { %3944 = vmatmul.f32.vlgmr.msra.gmra.mxu0 %v3776_v27 }
 0xae0   :  { %v3907_v10 = vpop.f32.mrf.mxu1  ;;  %v3875_v44 = vpop.f32.mrf.mxu0 }
 0xae1   :  { %v3908_v4 = vadd.f32 %v3907_v10, %v3867_v58  ;;  %v3876_v41 = vadd.f32 %v3875_v44, %v7998_v46  ;;  %v3870_v46 = vadd.f32 %v3869_v3, %v7994_v53  ;;  %v8359_v44 = vld [vmem:[#allocation22_spill] sm:$0xff] }
 0xae3   :  { %3947 = vmatmul.f32.gmra.mxu0 %v3780_v45  ;;  %v8357_v45 = vld [vmem:[#allocation26_spill] sm:$0xff] }
 0xae8   :  { %v3878_v38 = vpop.f32.mrf.mxu0  ;;  %v3910_v16 = vpop.f32.mrf.mxu1 }
 0xae9   :  { %v3879_v57 = vadd.f32 %v3878_v38, %v8000_v52  ;;  %v3911_v0 = vadd.f32 %v3910_v16, %v3870_v46 }
 0xaeb   :  { %3950 = vmatmul.f32.gmra.mxu0 %v3784_v20 }
 0xaf0   :  { %v3881_v59 = vpop.f32.mrf.mxu0  ;;  %v3913_v37 = vpop.f32.mrf.mxu1 }
 0xaf1   :  { %v3882_v63 = vadd.f32 %v3881_v59, %v8004_v12  ;;  %v3914_v12 = vadd.f32 %v3913_v37, %v3873_v43  ;;  %v8360_v59 = vld [vmem:[#allocation23_spill] sm:$0xff] }
 0xaf2   :  { %v4335_v43 = vld [vmem:[%s8178_s18] sm:$0xff] }
 0xaf3   :  { %3953 = vmatmul.f32.gmra.mxu0 %v3788_v5 }
 0xaf8   :  { %v3884_v19 = vpop.f32.mrf.mxu0  ;;  %v3916_v17 = vpop.f32.mrf.mxu1 }
 0xaf9   :  { %v3917_v8 = vadd.f32 %v3916_v17, %v3876_v41  ;;  %v3885_v61 = vadd.f32 %v3884_v19, %v8011_v22  ;;  %v4871_v22 = vld [vmem:[%s8176_s16] ss:$0 sm:$0xff]  ;;  %v8361_v41 = vld [vmem:[#allocation20_spill] sm:$0xff]  ;;  %s5344_s16 = smov 96  }
 0xafa   :  { %v4017_v34 = vmul.f32 %v4871_v22, %v8355_v9  ;;  %v4018_v60 = vmul.f32 %v4871_v22, %v8356_v7  ;;  %v4019_v10 = vmul.f32 %v4871_v22, %v8357_v45  ;;  %v4015_v38 = vmul.f32 %v4871_v22, %v8359_v44  ;;  %v4069_v44 = vld [vmem:[#allocation14] sm:$0xff] }
 0xafb   :  { %3956 = vmatmul.f32.gmra.mxu0 %v3792_v31  ;;  %v4016_v19 = vmul.f32 %v4871_v22, %v8360_v59  ;;  %v4071_v59 = vld [vmem:[#allocation14 + $0x10] sm:$0xff] }
 0xb00   :  { %v3919_v48 = vpop.f32.mrf.mxu1 }
 0xb01   :  { %v3920_v28 = vadd.f32 %v3919_v48, %v3879_v57 }
 0xb03   :  { %3959 = vmatmul.f32.gmra.mxu0 %v3796_v49 }
 0xb08   :  { %v3922_v11 = vpop.f32.mrf.mxu1 }
 0xb09   :  { %v3923_v29 = vadd.f32 %v3922_v11, %v3882_v63 }
 0xb0b   :  { %3962 = vmatmul.f32.gmra.mxu0 %v3800_v36 }
 0xb10   :  { %v3925_v52 = vpop.f32.mrf.mxu1 }
 0xb11   :  { %v3926_v21 = vadd.f32 %v3925_v52, %v3885_v61 }
 0xb13   :  { %3965 = vmatmul.f32.gmra.mxu0 %v3804_v14 }
 0xb58   :  { %v3945_v24 = vpop.f32.mrf.mxu0 }
 0xb59   :  { %v8047_v30 = vadd.f32 %v3945_v24, %v3905_v2 }
 0xb60   :  { %v3948_v6 = vpop.f32.mrf.mxu0 }
 0xb61   :  { %v8049_v32 = vadd.f32 %v3948_v6, %v3908_v4  ;;  %v8358_v4 = vld [vmem:[#allocation27_spill] sm:$0xff] }
 0xb62   :  { %v4020_v20 = vmul.f32 %v4871_v22, %v8358_v4 }
 0xb68   :  { %v3951_v33 = vpop.f32.mrf.mxu0 }
 0xb69   :  { %v3952_v1 = vadd.f32 %v3951_v33, %v3911_v0 }
 0xb70   :  { %v3954_v42 = vpop.f32.mrf.mxu0 }
 0xb71   :  { %v3955_v25 = vadd.f32 %v3954_v42, %v3914_v12 }
 0xb78   :  { %v3957_v18 = vpop.f32.mrf.mxu0 }
 0xb79   :  { %v3958_v56 = vadd.f32 %v3957_v18, %v3917_v8  ;;  %v4013_v8 = vmul.f32 %v4871_v22, %v8361_v41  ;;  %v8362_v18 = vld [vmem:[#allocation21_spill] sm:$0xff] }
 0xb7a   :  { %v4014_v48 = vmul.f32 %v4871_v22, %v8362_v18  ;;  %v4078_v41 = vld [vmem:[#allocation14 + $0x48] sm:$0xff]  ;;  %v4080_v18 = vld [vmem:[#allocation14 + $0x58] sm:$0xff] }
 0xb7b   :  { %3985 = vrot.lane.b32.xlu0 %v3958_v56, %s5342_s8 }
 0xb80   :  { %v3960_v62 = vpop.f32.mrf.mxu0 }
 0xb81   :  { %v3961_v47 = vadd.f32 %v3960_v62, %v3920_v28 }
 0xb83   :  { %3987 = vrot.lane.b32.xlu1 %v3961_v47, %s5342_s8 }
 0xb88   :  { %v3963_v55 = vpop.f32.mrf.mxu0 }
 0xb89   :  { %v3964_v26 = vadd.f32 %v3963_v55, %v3923_v29 }
 0xb8b   :  { %3989 = vrot.lane.b32.xlu0 %v3964_v26, %s5342_s8 }
 0xb90   :  { %v3966_v54 = vpop.f32.mrf.mxu0 }
 0xb91   :  { %v3967_v13 = vadd.f32 %v3966_v54, %v3926_v21 }
 0xb93   :  { %3991 = vrot.lane.b32.xlu1 %v3967_v13, %s5342_s8  ;;  %3981 = vrot.lane.b32.xlu0 %v3952_v1, %s5342_s8 }
 0xb9b   :  { %3983 = vrot.lane.b32.xlu1 %v3955_v25, %s5342_s8  ;;  %3977 = vrot.lane.b32.xlu0 %v8047_v30, %s5342_s8 }
 0xba3   :  { %3979 = vrot.lane.b32.xlu1 %v8049_v32, %s5342_s8 }
 0xbed   :  { %v3986_v53 = vpop.permute.xlu0 %3985 }
 0xbee   :  { %v4005_v23 = vadd.f32 %v3986_v53, %v3958_v56 }
 0xbf0   :  { %v8072_v40 = vadd.f32 %v4017_v34, %v4005_v23 }
 0xbf5   :  { %v3988_v15 = vpop.permute.xlu1 %3987 }
 0xbf6   :  { %v4006_v51 = vadd.f32 %v3988_v15, %v3961_v47 }
 0xbf8   :  { %v8074_v27 = vadd.f32 %v4018_v60, %v4006_v51 }
 0xbfa   :  { %v4789_v50 = vpack.i.bf16 %v8072_v40, %v8074_v27 }
 0xbfc   :  { %4790 = vrot.lane.b32.xlu0 %v4789_v50, %s5343_s4 }
 0xbfd   :  { %v3990_v2 = vpop.permute.xlu0 %3989 }
 0xbfe   :  { %v4007_v39 = vadd.f32 %v3990_v2, %v3964_v26 }
 0xc00   :  { %v8081_v49 = vadd.f32 %v4019_v10, %v4007_v39 }
 0xc05   :  { %v3992_v58 = vpop.permute.xlu1 %3991  ;;  %v3982_v31 = vpop.permute.xlu0 %3981 }
 0xc06   :  { %v4008_v5 = vadd.f32 %v3992_v58, %v3967_v13  ;;  %v4003_v3 = vadd.f32 %v3982_v31, %v3952_v1 }
 0xc08   :  { %v8083_v36 = vadd.f32 %v4020_v20, %v4008_v5  ;;  %v8090_v16 = vadd.f32 %v4015_v38, %v4003_v3  ;;  %v4070_v38 = vld [vmem:[#allocation14 + $0x8] sm:$0xff] }
 0xc0a   :  { %v4794_v14 = vpack.i.bf16 %v8081_v49, %v8083_v36 }
 0xc0c   :  { %4795 = vrot.lane.b32.xlu1 %v4794_v14, %s5343_s4 }
 0xc0d   :  { %v3984_v35 = vpop.permute.xlu1 %3983  ;;  %v3978_v37 = vpop.permute.xlu0 %3977 }
 0xc0e   :  { %v4004_v24 = vadd.f32 %v3984_v35, %v3955_v25  ;;  %v4001_v17 = vadd.f32 %v3978_v37, %v8047_v30  ;;  %v4074_v37 = vld [vmem:[#allocation14 + $0x28] sm:$0xff] }
 0xc10   :  { %v8092_v6 = vadd.f32 %v4016_v19, %v4004_v24  ;;  %v8101_v57 = vadd.f32 %v4013_v8, %v4001_v17  ;;  %v4072_v19 = vld [vmem:[#allocation14 + $0x18] sm:$0xff]  ;;  %v4073_v24 = vld [vmem:[#allocation14 + $0x20] sm:$0xff]  ;;  %v4079_v8 = vld [vmem:[#allocation14 + $0x50] sm:$0xff] }
 0xc11   :  { %v4076_v17 = vld [vmem:[#allocation14 + $0x38] sm:$0xff] }
 0xc12   :  { %v4799_v33 = vpack.i.bf16 %v8090_v16, %v8092_v6 }
 0xc14   :  { %4800 = vrot.lane.b32.xlu1 %v4799_v33, %s5343_s4 }
 0xc15   :  { %v3980_v42 = vpop.permute.xlu1 %3979 }
 0xc16   :  { %v4002_v56 = vadd.f32 %v3980_v42, %v8049_v32  ;;  %v4077_v42 = vld [vmem:[#allocation14 + $0x40] sm:$0xff] }
 0xc18   :  { %v8103_v28 = vadd.f32 %v4014_v48, %v4002_v56  ;;  %v4081_v48 = vld [vmem:[#allocation14 + $0x60] sm:$0xff]  ;;  %v4082_v56 = vld [vmem:[#allocation14 + $0x68] sm:$0xff] }
 0xc1a   :  { %v4804_v62 = vpack.i.bf16 %v8101_v57, %v8103_v28 }
 0xc1c   :  { %4815 = vrot.lane.b32.xlu1 %v4794_v14, %s5344_s16  ;;  %4805 = vrot.lane.b32.xlu0 %v4804_v62, %s5343_s4 }
 0xc24   :  { %4820 = vrot.lane.b32.xlu1 %v4799_v33, %s5344_s16  ;;  %4810 = vrot.lane.b32.xlu0 %v4789_v50, %s5344_s16  ;;  %v4075_v33 = vld [vmem:[#allocation14 + $0x30] sm:$0xff] }
 0xc2c   :  { %4825 = vrot.lane.b32.xlu0 %v4804_v62, %s5344_s16  ;;  %v4083_v62 = vld [vmem:[#allocation14 + $0x70] sm:$0xff] }
 0xc6e   :  { %v4791_v30 = vpop.permute.xlu0 %4790 }
 0xc6f   :  { %v4793_v47 = vunpack.i.h.bf16 %v4791_v30  ;;  %v4792_v11 = vunpack.i.l.bf16 %v4791_v30  ;;  %4830 = vrot.lane.b32.xlu0 %v4791_v30, %s5343_s4  ;;  %v4084_v30 = vld [vmem:[#allocation14 + $0x78] sm:$0xff] }
 0xc7e   :  { %v4796_v32 = vpop.permute.xlu1 %4795 }
 0xc7f   :  { %v4798_v63 = vunpack.i.h.bf16 %v4796_v32  ;;  %v4797_v29 = vunpack.i.l.bf16 %v4796_v32  ;;  %4835 = vrot.lane.b32.xlu1 %v4796_v32, %s5343_s4 }
 0xc86   :  { %v4801_v55 = vpop.permute.xlu1 %4800 }
 0xc87   :  { %v4803_v26 = vunpack.i.h.bf16 %v4801_v55  ;;  %v4802_v46 = vunpack.i.l.bf16 %v4801_v55  ;;  %4840 = vrot.lane.b32.xlu1 %v4801_v55, %s5343_s4 }
 0xc8e   :  { %v4816_v61 = vpop.permute.xlu1 %4815  ;;  %v4806_v52 = vpop.permute.xlu0 %4805 }
 0xc8f   :  { %v4808_v0 = vunpack.i.h.bf16 %v4806_v52  ;;  %v4807_v21 = vunpack.i.l.bf16 %v4806_v52  ;;  %4855 = vrot.lane.b32.xlu1 %v4816_v61, %s5343_s4  ;;  %4845 = vrot.lane.b32.xlu0 %v4806_v52, %s5343_s4 }
 0xc96   :  { %v4821_v54 = vpop.permute.xlu1 %4820  ;;  %v4811_v1 = vpop.permute.xlu0 %4810 }
 0xc97   :  { %4860 = vrot.lane.b32.xlu1 %v4821_v54, %s5343_s4  ;;  %4850 = vrot.lane.b32.xlu0 %v4811_v1, %s5343_s4 }
 0xc9e   :  { %v4826_v13 = vpop.permute.xlu0 %4825 }
 0xc9f   :  { %4865 = vrot.lane.b32.xlu0 %v4826_v13, %s5343_s4 }
 0xca7   :  { %4338 = vperm.xlu0 %4747, %v4335_v43  }
 0xce1   :  { %v4831_v53 = vpop.permute.xlu0 %4830 }
 0xce2   :  { %v4832_v23 = vunpack.i.l.bf16 %v4831_v53  ;;  %v4833_v15 = vunpack.i.h.bf16 %v4831_v53 }
 0xcf1   :  { %v4836_v12 = vpop.permute.xlu1 %4835 }
 0xcf2   :  { %v4837_v25 = vunpack.i.l.bf16 %v4836_v12  ;;  %v4838_v22 = vunpack.i.h.bf16 %v4836_v12 }
 0xcf4   :  { %4165 = vmatpush.msra.mxu1 %v4837_v25 }
 0xcf6   :  { %4166 = vmatpush.msra.mxu1 %v4838_v22 }
 0xcf8   :  { %4167 = vmatpush.msra.mxu1 %v4832_v23 }
 0xcf9   :  { %v4841_v9 = vpop.permute.xlu1 %4840 }
 0xcfa   :  { %v4842_v34 = vunpack.i.l.bf16 %v4841_v9  ;;  %4168 = vmatpush.msra.mxu1 %v4833_v15  ;;  %v4843_v7 = vunpack.i.h.bf16 %v4841_v9 }
 0xcfc   :  { %4169 = vmatpush.msra.mxu1 %v4842_v34 }
 0xcfe   :  { %4170 = vmatpush.msra.mxu1 %v4843_v7 }
 0xd01   :  { %v4856_v60 = vpop.permute.xlu1 %4855  ;;  %v4846_v51 = vpop.permute.xlu0 %4845 }
 0xd02   :  { %v4857_v50 = vunpack.i.l.bf16 %v4856_v60  ;;  %v4847_v2 = vunpack.i.l.bf16 %v4846_v51  ;;  %v4858_v39 = vunpack.i.h.bf16 %v4856_v60  ;;  %v4848_v58 = vunpack.i.h.bf16 %v4846_v51 }
 0xd04   :  { %4171 = vmatpush.msra.mxu1 %v4847_v2  ;;  %4214 = vmatpush.msrb.mxu0 %v4857_v50 }
 0xd06   :  { %4172 = vmatpush.msra.mxu1 %v4848_v58  ;;  %4215 = vmatpush.msrb.mxu0 %v4858_v39 }
 0xd08   :  { %4173 = vmatpush.msra.mxu1 %v4797_v29 }
 0xd09   :  { %v4851_v45 = vpop.permute.xlu0 %4850  ;;  %v4861_v4 = vpop.permute.xlu1 %4860 }
 0xd0a   :  { %v4852_v10 = vunpack.i.l.bf16 %v4851_v45  ;;  %4174 = vmatpush.msra.mxu1 %v4798_v63  ;;  %v4853_v20 = vunpack.i.h.bf16 %v4851_v45  ;;  %v4862_v5 = vunpack.i.l.bf16 %v4861_v4  ;;  %v4863_v31 = vunpack.i.h.bf16 %v4861_v4 }
 0xd0c   :  { %4175 = vmatpush.msra.mxu1 %v4792_v11  ;;  %4216 = vmatpush.msrb.mxu0 %v4852_v10 }
 0xd0e   :  { %4176 = vmatpush.msra.mxu1 %v4793_v47  ;;  %4217 = vmatpush.msrb.mxu0 %v4853_v20 }
 0xd10   :  { %4177 = vmatpush.msra.mxu1 %v4802_v46  ;;  %4218 = vmatpush.msrb.mxu0 %v4862_v5 }
 0xd11   :  { %v4866_v14 = vpop.permute.xlu0 %4865 }
 0xd12   :  { %v4867_v3 = vunpack.i.l.bf16 %v4866_v14  ;;  %4178 = vmatpush.msra.mxu1 %v4803_v26  ;;  %4219 = vmatpush.msrb.mxu0 %v4863_v31  ;;  %v4868_v35 = vunpack.i.h.bf16 %v4866_v14  ;;  %v4342_v31 = vld [vmem:[%s8179_s19] sm:$0xff] }
 0xd14   :  { %4179 = vmatpush.msra.mxu1 %v4807_v21  ;;  %4220 = vmatpush.msrb.mxu0 %v4867_v3 }
 0xd16   :  { %4180 = vmatpush.msra.mxu1 %v4808_v0  ;;  %4221 = vmatpush.msrb.mxu0 %v4868_v35 }
 0xd17   :  { %4181 = vmatmul.f32.vlgmr.msra.gmra.mxu1 %v4069_v44  ;;  %4696 = vmatmul.msk.f32.vlgmr.msrb.gmra.mxu0 %vm411_vm7, %v4070_v38 }
 0xd1f   :  { %4184 = vmatmul.f32.gmra.mxu1 %v4071_v59  ;;  %4697 = vmatmul.msk.f32.gmra.mxu0 %vm411_vm7, %v4072_v19 }
 0xd27   :  { %4187 = vmatmul.f32.gmra.mxu1 %v4073_v24  ;;  %4698 = vmatmul.msk.f32.gmra.mxu0 %vm411_vm7, %v4074_v37 }
 0xd2f   :  { %4190 = vmatmul.f32.gmra.mxu1 %v4075_v33  ;;  %4699 = vmatmul.msk.f32.gmra.mxu0 %vm411_vm7, %v4076_v17 }
 0xd37   :  { %4193 = vmatmul.f32.gmra.mxu1 %v4077_v42  ;;  %4700 = vmatmul.msk.f32.gmra.mxu0 %vm411_vm7, %v4078_v41 }
 0xd3f   :  { %4196 = vmatmul.f32.gmra.mxu1 %v4079_v8  ;;  %4701 = vmatmul.msk.f32.gmra.mxu0 %vm411_vm7, %v4080_v18 }
 0xd47   :  { %4199 = vmatmul.f32.gmra.mxu1 %v4081_v48  ;;  %4702 = vmatmul.msk.f32.gmra.mxu0 %vm411_vm7, %v4082_v56 }
 0xd4f   :  { %4202 = vmatmul.f32.gmra.mxu1 %v4083_v62  ;;  %4703 = vmatmul.msk.f32.gmra.mxu0 %vm411_vm7, %v4084_v30 }
 0xd94   :  { %v4182_v47 = vpop.f32.mrf.mxu1  ;;  %v4223_v11 = vpop.f32.mrf.mxu0 }
 0xd95   :  { %v4224_v32 = vadd.f32 %v4223_v11, %v4182_v47 }
 0xd97   :  { %v4247_v63 = vadd.f32 %v4224_v32, %v8101_v57 }
 0xd99   :  { %v4255_v29 = vsel %vm669_vm8, %v4247_v63, 0.0 }
 0xd9a   :  { %4263 = vxpose.xlu1.b32.start [1/8] (short) (narrow) %v4255_v29, 16 }
 0xd9c   :  { %v4185_v55 = vpop.f32.mrf.mxu1  ;;  %v4226_v26 = vpop.f32.mrf.mxu0 }
 0xd9d   :  { %v4227_v46 = vadd.f32 %v4226_v26, %v4185_v55  ;;  %v8363_v55 = vld [vmem:[#allocation28_spill] sm:$0xff] }
 0xd9e   :  { %v4349_v26 = vmul.f32 0.5, %v8363_v55 }
 0xd9f   :  { %v4248_v61 = vadd.f32 %v4227_v46, %v8103_v28 }
 0xda1   :  { %v4256_v52 = vsel %vm669_vm8, %v4248_v61, 0.0 }
 0xda2   :  { %4264 = vxpose.xlu1.b32.cont [2/8] (short) (narrow) %v4256_v52, 16 }
 0xda4   :  { %v4188_v0 = vpop.f32.mrf.mxu1  ;;  %v4229_v21 = vpop.f32.mrf.mxu0 }
 0xda5   :  { %v4230_v54 = vadd.f32 %v4229_v21, %v4188_v0 }
 0xda7   :  { %v4249_v1 = vadd.f32 %v4230_v54, %v8090_v16 }
 0xda9   :  { %v4257_v13 = vsel %vm669_vm8, %v4249_v1, 0.0 }
 0xdaa   :  { %4265 = vxpose.xlu1.b32.cont [3/8] (short) (narrow) %v4257_v13, 16 }
 0xdac   :  { %v4191_v57 = vpop.f32.mrf.mxu1  ;;  %v4232_v43 = vpop.f32.mrf.mxu0 }
 0xdad   :  { %v4233_v12 = vadd.f32 %v4232_v43, %v4191_v57 }
 0xdaf   :  { %v4250_v25 = vadd.f32 %v4233_v12, %v8092_v6 }
 0xdb1   :  { %v4258_v53 = vsel %vm669_vm8, %v4250_v25, 0.0  ;;  %v4339_v25 = vpop.permute.xlu0 %4338 }
 0xdb2   :  { %4266 = vxpose.xlu1.b32.cont [4/8] (short) (narrow) %v4258_v53, 16 }
 0xdb4   :  { %v4194_v28 = vpop.f32.mrf.mxu1  ;;  %v4235_v22 = vpop.f32.mrf.mxu0 }
 0xdb5   :  { %v4236_v23 = vadd.f32 %v4235_v22, %v4194_v28 }
 0xdb7   :  { %v4251_v15 = vadd.f32 %v4236_v23, %v8072_v40 }
 0xdb9   :  { %v4259_v9 = vsel %vm669_vm8, %v4251_v15, 0.0 }
 0xdba   :  { %4267 = vxpose.xlu1.b32.cont [5/8] (short) (narrow) %v4259_v9, 16  ;;  %v4355_v9 = vld [vmem:[%s8180_s20] sm:$0xf] }
 0xdbc   :  { %v4197_v16 = vpop.f32.mrf.mxu1  ;;  %v4238_v34 = vpop.f32.mrf.mxu0 }
 0xdbd   :  { %v4239_v7 = vadd.f32 %v4238_v34, %v4197_v16  ;;  %v5168_v34 = vld [vmem:[%s8241_s5] sm:$0xf] }
 0xdbf   :  { %v4252_v60 = vadd.f32 %v4239_v7, %v8074_v27 }
 0xdc1   :  { %v4260_v51 = vsel %vm669_vm8, %v4252_v60, 0.0 }
 0xdc2   :  { %4268 = vxpose.xlu1.b32.cont [6/8] (short) (narrow) %v4260_v51, 16 }
 0xdc4   :  { %v4200_v6 = vpop.f32.mrf.mxu1  ;;  %v4241_v50 = vpop.f32.mrf.mxu0 }
 0xdc5   :  { %v4242_v2 = vadd.f32 %v4241_v50, %v4200_v6 }
 0xdc7   :  { %v4253_v39 = vadd.f32 %v4242_v2, %v8081_v49  ;;  %v5345_v49 = vmov 8.0  }
 0xdc8   :  { %5038 = vrcp.f32 %v5345_v49 }
 0xdc9   :  { %v4261_v58 = vsel %vm669_vm8, %v4253_v39, 0.0 }
 0xdca   :  { %4269 = vxpose.xlu1.b32.cont [7/8] (short) (narrow) %v4261_v58, 16 }
 0xdcc   :  { %v4203_v40 = vpop.f32.mrf.mxu1  ;;  %v4244_v45 = vpop.f32.mrf.mxu0 }
 0xdcd   :  { %v4245_v10 = vadd.f32 %v4244_v45, %v4203_v40 }
 0xdce   :  { %v5039_v14 = vpop.eup %5038 }
 0xdcf   :  { %v4254_v4 = vadd.f32 %v4245_v10, %v8083_v36  ;;  %v4307_v3 = vmul.f32 8.0, %v5039_v14  ;;  %vm4311_vm11 = vweird.f32 %v5039_v14 }
 0xdd1   :  { %v4262_v20 = vsel %vm669_vm8, %v4254_v4, 0.0  ;;  %v4308_v35 = vsub.f32 1.0, %v4307_v3 }
 0xdd2   :  { %4270 = vxpose.xlu1.b32.end [8/8] (short) (narrow) %v4262_v20, 16 }
 0xdd3   :  { %v4309_v59 = vmul.f32 %v5039_v14, %v4308_v35 }
 0xdd5   :  { %v4310_v37 = vadd.f32 %v5039_v14, %v4309_v59 }
 0xdd7   :  { %v4312_v42 = vsel %vm4311_vm11, %v5039_v14, %v4310_v37 }
 0xe3e   :  { %v4279_v27 = vpop.trf.xlu1 }
 0xe46   :  { %v4280_v5 = vpop.trf.xlu1 }
 0xe47   :  { %4296 = vrot.lane.b32.xlu2 %v4280_v5, %s5342_s8 }
 0xe4f   :  { %4345 = vperm.xlu2 %4869, %v4342_v31  }
 0xea1   :  { %v4297_v44 = vpop.permute.xlu2 %4296 }
 0xea2   :  { %v4299_v36 = vsel %vm411_vm7, %v4279_v27, %v4297_v44 }
 0xea3   :  { %v4300_v38 = vrot.slane %v4299_v36, 4 }
 0xea5   :  { %v4301_v19 = vadd.f32 %v4300_v38, %v4299_v36 }
 0xea7   :  { %v4302_v24 = vrot.slane %v4301_v19, 2 }
 0xea9   :  { %v4303_v33 = vadd.f32 %v4302_v24, %v4301_v19  ;;  %v4346_v53 = vpop.permute.xlu2 %4345 }
 0xeab   :  { %v4304_v17 = vrot.slane %v4303_v33, 1 }
 0xead   :  { %v4305_v41 = vadd.f32 %v4304_v17, %v4303_v33 }
 0xeaf   :  { %v4313_v8 = vmul.f32 %v4312_v42, %v4305_v41 }
 0xeb1   :  { %v4314_v18 = vsub.f32 %v4299_v36, %v4313_v8 }
 0xeb3   :  { %v4315_v48 = vmul.f32 %v4314_v18, %v4314_v18 }
 0xeb5   :  { %v4316_v56 = vrot.slane %v4315_v48, 4 }
 0xeb7   :  { %v4317_v62 = vadd.f32 %v4316_v56, %v4315_v48 }
 0xeb9   :  { %v4318_v30 = vrot.slane %v4317_v62, 2 }
 0xebb   :  { %v4319_v47 = vadd.f32 %v4318_v30, %v4317_v62 }
 0xebd   :  { %v4320_v11 = vrot.slane %v4319_v47, 1 }
 0xebf   :  { %v4321_v32 = vadd.f32 %v4320_v11, %v4319_v47 }
 0xec1   :  { %v4322_v63 = vmul.f32 %v4321_v32, %v4312_v42 }
 0xec3   :  { %v4323_v29 = vadd.f32 1e-05, %v4322_v63 }
 0xec5   :  { %5040 = vrsqrt.f32 %v4323_v29  ;;  %vm4330_vm13 = vweird.f32 %v4323_v29 }
 0xec6   :  { %5042 = vtanh.f32 %v4349_v26 }
 0xecb   :  { %v5041_v46 = vpop.eup %5040 }
 0xecc   :  { %v4325_v61 = vmul.f32 %v5041_v46, %v4323_v29  ;;  %v5043_v0 = vpop.eup %5042  ;;  %vm4331_vm12 = vweird.f32 %v5041_v46 }
 0xecd   :  { %v4351_v1 = vadd.f32 1.0, %v5043_v0  ;;  %vm4332_vm14 = vmor %vm4330_vm13, %vm4331_vm12 }
 0xece   :  { %v4326_v52 = vmul.f32 %v5041_v46, %v4325_v61 }
 0xecf   :  { %v4352_v43 = vmul.f32 0.5, %v4351_v1 }
 0xed0   :  { %v4327_v21 = vmul.f32 0.5, %v4326_v52 }
 0xed1   :  { %v4353_v22 = vmul.f32 %v4352_v43, %v8363_v55 }
 0xed2   :  { %v4328_v54 = vsub.f32 1.5, %v4327_v21 }
 0xed4   :  { %v4329_v13 = vmul.f32 %v5041_v46, %v4328_v54 }
 0xed6   :  { %v4333_v57 = vsel %vm4332_vm14, %v5041_v46, %v4329_v13 }
 0xed7   :  { %v4334_v12 = vmul.f32 %v4333_v57, %v4314_v18 }
 0xed9   :  { %v4341_v28 = vmul.f32 %v4339_v25, %v4334_v12 }
 0xedb   :  { %v4348_v23 = vadd.f32 %v4346_v53, %v4341_v28 }
 0xedd   :  { %v4354_v15 = vmul.f32 %v4353_v22, %v4348_v23 }
 0xedf   :  { %4374 = vmatpush.msrb.mxu1 %v4354_v15 }
 0xee0   :  { %4704 = vmatmul.msk.f32.vlgmr.msrb.gmra.mxu1 %vm260_vm6, %v4355_v9 }
 0xf5d   :  { %v4376_v16 = vpop.f32.mrf.mxu1 }
 0xf5e   :  { %v4379_v7 = vadd.f32 %v5168_v34, %v4376_v16 }
 0xf60   :  { %4380 = vst [vmem:[%s8181_s21] sm:$0xf] %v4379_v7 }
 0xf61   :  { %4385 = vsyncpa [#allocation7], 1 }
 0xf62   :  { %4386 = vsyncpa [#allocation9], 1 }
 0xf63   :  { %4387 = vsyncpa [#allocation12], 1 }
 0xf64   :  { %4388 = vsyncpa [#allocation15], 1 }

</bundles_post_ra>
